<compile_context>
chip_gen: v7x
topology: tpu7x:2x2x1
jax: 0.10.0
libtpu: 0.0.40
codegen_flags: <defaults>
</compile_context>

<pallas_src>
import math
import functools

import jax
import jax.numpy as jnp
from jax.experimental import pallas as pl
from jax.experimental.pallas import tpu as pltpu


# ----------------------------------------------------------------------------
# Fused kernel: fc reduce + positional encoding + TransformerEncoder
#               (post-norm, gelu) + classifier + sigmoid.  One batch element
#               per grid step.
# ----------------------------------------------------------------------------
def phago_kernel(
    x_ref, pe_ref, fcw_ref, fcb_ref,
    wq_ref, wk_ref, wv_ref, bq_ref, bk_ref, bv_ref,
    wo_ref, bo_ref,
    ln1w_ref, ln1b_ref, ln2w_ref, ln2b_ref,
    ff1w_ref, ff1b_ref, ff2w_ref, ff2b_ref,
    clsw_ref, clsb_ref,
    o_ref,
    *, num_layers, nhead, d_model,
):
    hd = d_model // nhead
    scale = 1.0 / math.sqrt(hd)
    eps = 1e-5
    inv_sqrt2 = 1.0 / math.sqrt(2.0)

    def layer_norm(v, w, b):
        mu = jnp.mean(v, axis=-1, keepdims=True)
        c = v - mu
        var = jnp.mean(c * c, axis=-1, keepdims=True)
        return c * jax.lax.rsqrt(var + eps) * w + b

    def gelu(v):  # exact (erf) gelu, matching torch activation='gelu'
        return 0.5 * v * (1.0 + jax.lax.erf(v * inv_sqrt2))

    # ---- fused fc: (S, d_model, 1024) -> (S, d_model) -----------------------
    # VPU multiply + XLU lane-reduce over the 1024 feature axis; accumulate f32.
    x3 = x_ref[0].astype(jnp.float32)                        # (S, D, 1024)
    h = jnp.sum(x3 * fcw_ref[...], axis=-1) + fcb_ref[...]   # (S, D)

    # ---- positional encoding (dropout = identity in eval mode) --------------
    h = h + pe_ref[...]                                      # (S, D)

    # ---- transformer encoder layers (post-norm) ------------------------------
    for l in range(num_layers):
        # Head-batched Q/K/V projections: (H, S, D) @ (H, D, hd) -> (H, S, hd)
        hb = jnp.broadcast_to(h, (nhead,) + h.shape)         # (H, S, D)
        q4 = jnp.einsum('hsd,hdf->hsf', hb, wq_ref[l],
                        preferred_element_type=jnp.float32) + bq_ref[l]
        k4 = jnp.einsum('hsd,hdf->hsf', hb, wk_ref[l],
                        preferred_element_type=jnp.float32) + bk_ref[l]
        v4 = jnp.einsum('hsd,hdf->hsf', hb, wv_ref[l],
                        preferred_element_type=jnp.float32) + bv_ref[l]

        # Head-batched scaled-dot-product attention.
        s = jnp.einsum('hqd,hkd->hqk', q4, k4,
                       preferred_element_type=jnp.float32) * scale  # (H, S, S)
        s = s - jnp.max(s, axis=-1, keepdims=True)
        p = jnp.exp(s)
        p = p * pl.reciprocal(jnp.sum(p, axis=-1, keepdims=True), approx=True)
        o4 = jnp.einsum('hqk,hkd->hqd', p, v4,
                        preferred_element_type=jnp.float32)          # (H, S, hd)

        # Output projection, per-head weights summed over heads (== concat @ Wo).
        attn = jnp.sum(
            jnp.einsum('hqd,hdf->hqf', o4, wo_ref[l],
                       preferred_element_type=jnp.float32),
            axis=0) + bo_ref[l]                                      # (S, D)

        h = layer_norm(h + attn, ln1w_ref[l], ln1b_ref[l])

        # Feed-forward block.
        f = jnp.dot(h, ff1w_ref[l], preferred_element_type=jnp.float32) + ff1b_ref[l]
        f = gelu(f)
        f = jnp.dot(f, ff2w_ref[l], preferred_element_type=jnp.float32) + ff2b_ref[l]
        h = layer_norm(h + f, ln2w_ref[l], ln2b_ref[l])

    # ---- classifier + sigmoid (lane-dense padded output) ---------------------
    logits = jnp.dot(h, clsw_ref[...], preferred_element_type=jnp.float32) + clsb_ref[...]
    o_ref[0] = jax.nn.sigmoid(logits)                        # (S, LPAD)


@functools.partial(jax.jit, static_argnames=("nhead", "num_layers", "num_labels"))
def phago_forward(x, params, *, nhead, num_layers, num_labels):
    # x: (B, S, d_model, 1024), matching the PyTorch module's expected input.
    B, S, D, F = x.shape
    assert D % nhead == 0

    pe = make_pe(S, D)

    # Pad classifier to a lane-dense (multiple-of-128) output; slice outside.
    lpad = ((num_labels + 127) // 128) * 128
    cls_w = jnp.pad(params["cls_w"], ((0, 0), (0, lpad - num_labels)))
    cls_b = jnp.pad(params["cls_b"], ((0, 0), (0, lpad - num_labels)))

    kernel = functools.partial(
        phago_kernel, num_layers=num_layers, nhead=nhead, d_model=D
    )

    def full(arr):
        idx = (0,) * arr.ndim
        return pl.BlockSpec(arr.shape, lambda b, _idx=idx: _idx)

    operands = (
        x, pe, params["fc_w"], params["fc_b"],
        params["wq"], params["wk"], params["wv"],
        params["bq"], params["bk"], params["bv"],
        params["wo"], params["bo"],
        params["ln1_w"], params["ln1_b"], params["ln2_w"], params["ln2_b"],
        params["ff1_w"], params["ff1_b"], params["ff2_w"], params["ff2_b"],
        cls_w, cls_b,
    )
    in_specs = [pl.BlockSpec((1, S, D, F), lambda b: (b, 0, 0, 0))]
    in_specs += [full(a) for a in operands[1:]]

    out = pl.pallas_call(
        kernel,
        out_shape=jax.ShapeDtypeStruct((B, S, lpad), jnp.float32),
        grid_spec=pltpu.PrefetchScalarGridSpec(
            num_scalar_prefetch=0,
            grid=(B,),
            in_specs=in_specs,
            out_specs=pl.BlockSpec((1, S, lpad), lambda b: (b, 0, 0)),
        ),
        compiler_params=pltpu.CompilerParams(dimension_semantics=("parallel",)),
    )(*operands)

    return out[:, :, :num_labels]


# ----------------------------------------------------------------------------
# Parameter setup & positional-encoding table.
# ----------------------------------------------------------------------------
def make_pe(S, d_model):
    position = jnp.arange(S, dtype=jnp.float32)[:, None]
    div_term = jnp.exp(
        jnp.arange(0, d_model, 2, dtype=jnp.float32) * (-math.log(10000.0) / d_model)
    )
    pe = jnp.zeros((S, d_model), jnp.float32)
    pe = pe.at[:, 0::2].set(jnp.sin(position * div_term))
    pe = pe.at[:, 1::2].set(jnp.cos(position * div_term))
    return pe


def init_params(key, *, d_model, nhead, dff, num_layers, num_labels, in_features=1024):
    # NOTE on conventions: weights are stored PRE-TRANSPOSED to (in, out) so the
    # kernel computes h @ W, and the MHA in_proj / out_proj weights are pre-split
    # per head:  wq[l, h] == in_proj_weight[:d].T[:, h*hd:(h+1)*hd], and
    # wo[l, h] == out_proj.weight.T[h*hd:(h+1)*hd, :].  Any converter from a
    # trained PyTorch checkpoint must apply those transposes/splits.
    L = num_layers
    hd = d_model // nhead
    keys = jax.random.split(key, 12)

    def w(k, shape, scale=0.02):
        return (scale * jax.random.normal(k, shape)).astype(jnp.float32)

    return {
        "fc_w": w(keys[0], (1, in_features)),               # lane-major row
        "fc_b": jnp.zeros((1, 1), jnp.float32),
        "wq": w(keys[1], (L, nhead, d_model, hd)),
        "wk": w(keys[2], (L, nhead, d_model, hd)),
        "wv": w(keys[3], (L, nhead, d_model, hd)),
        "bq": w(keys[4], (L, nhead, 1, hd)),
        "bk": w(keys[5], (L, nhead, 1, hd)),
        "bv": w(keys[6], (L, nhead, 1, hd)),
        "wo": w(keys[7], (L, nhead, hd, d_model)),
        "bo": jnp.zeros((L, 1, d_model), jnp.float32),
        "ln1_w": jnp.ones((L, 1, d_model), jnp.float32),
        "ln1_b": jnp.zeros((L, 1, d_model), jnp.float32),
        "ln2_w": jnp.ones((L, 1, d_model), jnp.float32),
        "ln2_b": jnp.zeros((L, 1, d_model), jnp.float32),
        "ff1_w": w(keys[8], (L, d_model, dff)),
        "ff1_b": w(keys[9], (L, 1, dff)),
        "ff2_w": w(keys[10], (L, dff, d_model)),
        "ff2_b": jnp.zeros((L, 1, d_model), jnp.float32),
        "cls_w": w(keys[11], (d_model, num_labels)),
        "cls_b": jnp.zeros((1, num_labels), jnp.float32),
    }


if __name__ == "__main__":
    # Hyperparameters (small, consistent with the module's __init__ / forward).
    nhead = 4
    dim_feedforward = 64
    num_layers = 2
    num_labels = 16
    d_model = 32
    B, S = 2, 8  # vocab_size only bounds the PE table; S <= vocab_size

    key = jax.random.PRNGKey(0)
    kx, kp = jax.random.split(key)
    x = jax.random.normal(kx, (B, S, d_model, 1024), dtype=jnp.float32)
    params = init_params(
        kp, d_model=d_model, nhead=nhead, dff=dim_feedforward,
        num_layers=num_layers, num_labels=num_labels,
    )

    out = phago_forward(
        x, params, nhead=nhead, num_layers=num_layers, num_labels=num_labels
    )
    out = jax.block_until_ready(out)
    assert out.shape == (B, S, num_labels)
    assert bool(jnp.all(jnp.isfinite(out)))
    # TODO(synk): all dropout layers (pos-enc, encoder, the unused p=0.5 one)
    # are treated as inference-mode identities.
    print("KERNEL_OK")
</pallas_src>

<mosaic_0001>
module attributes {stable_mosaic.version = 11 : i64} {
  func.func @phago_kernel(%arg0: i32, %arg1: memref<1x8x32x1024xf32, #tpu.memory_space<vmem>>, %arg2: memref<8x32xf32, #tpu.memory_space<vmem>>, %arg3: memref<1x1024xf32, #tpu.memory_space<vmem>>, %arg4: memref<1x1xf32, #tpu.memory_space<vmem>>, %arg5: memref<2x4x32x8xf32, #tpu.memory_space<vmem>>, %arg6: memref<2x4x32x8xf32, #tpu.memory_space<vmem>>, %arg7: memref<2x4x32x8xf32, #tpu.memory_space<vmem>>, %arg8: memref<2x4x1x8xf32, #tpu.memory_space<vmem>>, %arg9: memref<2x4x1x8xf32, #tpu.memory_space<vmem>>, %arg10: memref<2x4x1x8xf32, #tpu.memory_space<vmem>>, %arg11: memref<2x4x8x32xf32, #tpu.memory_space<vmem>>, %arg12: memref<2x1x32xf32, #tpu.memory_space<vmem>>, %arg13: memref<2x1x32xf32, #tpu.memory_space<vmem>>, %arg14: memref<2x1x32xf32, #tpu.memory_space<vmem>>, %arg15: memref<2x1x32xf32, #tpu.memory_space<vmem>>, %arg16: memref<2x1x32xf32, #tpu.memory_space<vmem>>, %arg17: memref<2x32x64xf32, #tpu.memory_space<vmem>>, %arg18: memref<2x1x64xf32, #tpu.memory_space<vmem>>, %arg19: memref<2x64x32xf32, #tpu.memory_space<vmem>>, %arg20: memref<2x1x32xf32, #tpu.memory_space<vmem>>, %arg21: memref<32x128xf32, #tpu.memory_space<vmem>>, %arg22: memref<1x128xf32, #tpu.memory_space<vmem>>, %arg23: memref<1x8x128xf32, #tpu.memory_space<vmem>>) attributes {dimension_semantics = [#tpu.dimension_semantics<parallel>], iteration_bounds = array<i64: 2>, scalar_prefetch = 0 : i64, scratch_operands = 0 : i64, tpu.core_type = #tpu.core_type<tc>, window_params = [{transform_indices = @transform_0, window_bounds = array<i64: 1, 8, 32, 1024>}, {pipeline_mode = #tpu.pipeline_mode<synchronous>, transform_indices = @transform_1, window_bounds = array<i64: 8, 32>}, {pipeline_mode = #tpu.pipeline_mode<synchronous>, transform_indices = @transform_2, window_bounds = array<i64: 1, 1024>}, {pipeline_mode = #tpu.pipeline_mode<synchronous>, transform_indices = @transform_3, window_bounds = array<i64: 1, 1>}, {pipeline_mode = #tpu.pipeline_mode<synchronous>, transform_indices = @transform_4, window_bounds = array<i64: 2, 4, 32, 8>}, {pipeline_mode = #tpu.pipeline_mode<synchronous>, transform_indices = @transform_5, window_bounds = array<i64: 2, 4, 32, 8>}, {pipeline_mode = #tpu.pipeline_mode<synchronous>, transform_indices = @transform_6, window_bounds = array<i64: 2, 4, 32, 8>}, {pipeline_mode = #tpu.pipeline_mode<synchronous>, transform_indices = @transform_7, window_bounds = array<i64: 2, 4, 1, 8>}, {pipeline_mode = #tpu.pipeline_mode<synchronous>, transform_indices = @transform_8, window_bounds = array<i64: 2, 4, 1, 8>}, {pipeline_mode = #tpu.pipeline_mode<synchronous>, transform_indices = @transform_9, window_bounds = array<i64: 2, 4, 1, 8>}, {pipeline_mode = #tpu.pipeline_mode<synchronous>, transform_indices = @transform_10, window_bounds = array<i64: 2, 4, 8, 32>}, {pipeline_mode = #tpu.pipeline_mode<synchronous>, transform_indices = @transform_11, window_bounds = array<i64: 2, 1, 32>}, {pipeline_mode = #tpu.pipeline_mode<synchronous>, transform_indices = @transform_12, window_bounds = array<i64: 2, 1, 32>}, {pipeline_mode = #tpu.pipeline_mode<synchronous>, transform_indices = @transform_13, window_bounds = array<i64: 2, 1, 32>}, {pipeline_mode = #tpu.pipeline_mode<synchronous>, transform_indices = @transform_14, window_bounds = array<i64: 2, 1, 32>}, {pipeline_mode = #tpu.pipeline_mode<synchronous>, transform_indices = @transform_15, window_bounds = array<i64: 2, 1, 32>}, {pipeline_mode = #tpu.pipeline_mode<synchronous>, transform_indices = @transform_16, window_bounds = array<i64: 2, 32, 64>}, {pipeline_mode = #tpu.pipeline_mode<synchronous>, transform_indices = @transform_17, window_bounds = array<i64: 2, 1, 64>}, {pipeline_mode = #tpu.pipeline_mode<synchronous>, transform_indices = @transform_18, window_bounds = array<i64: 2, 64, 32>}, {pipeline_mode = #tpu.pipeline_mode<synchronous>, transform_indices = @transform_19, window_bounds = array<i64: 2, 1, 32>}, {pipeline_mode = #tpu.pipeline_mode<synchronous>, transform_indices = @transform_20, window_bounds = array<i64: 32, 128>}, {pipeline_mode = #tpu.pipeline_mode<synchronous>, transform_indices = @transform_21, window_bounds = array<i64: 1, 128>}, {transform_indices = @transform_22, window_bounds = array<i64: 1, 8, 128>}]} {
    %c0 = arith.constant 0 : index
    %c0_0 = arith.constant 0 : index
    %c0_1 = arith.constant 0 : index
    %c0_2 = arith.constant 0 : index
    %0 = vector.load %arg1[%c0, %c0_0, %c0_1, %c0_2] : memref<1x8x32x1024xf32, #tpu.memory_space<vmem>>, vector<1x8x32x1024xf32>
    %1 = vector.shape_cast %0 : vector<1x8x32x1024xf32> to vector<8x32x1024xf32>
    %c0_3 = arith.constant 0 : index
    %c0_4 = arith.constant 0 : index
    %2 = vector.load %arg3[%c0_3, %c0_4] : memref<1x1024xf32, #tpu.memory_space<vmem>>, vector<1x1024xf32>
    %3 = vector.shape_cast %2 : vector<1x1024xf32> to vector<1x1x1024xf32>
    %4 = vector.broadcast %3 : vector<1x1x1024xf32> to vector<8x32x1024xf32>
    %5 = arith.mulf %1, %4 : vector<8x32x1024xf32>
    %cst = arith.constant dense<0.000000e+00> : vector<8x32xf32>
    %6 = vector.multi_reduction <add>, %5, %cst [2] : vector<8x32x1024xf32> to vector<8x32xf32>
    %c0_5 = arith.constant 0 : index
    %c0_6 = arith.constant 0 : index
    %7 = vector.load %arg4[%c0_5, %c0_6] : memref<1x1xf32, #tpu.memory_space<vmem>>, vector<1x1xf32>
    %8 = vector.broadcast %7 : vector<1x1xf32> to vector<8x32xf32>
    %9 = arith.addf %6, %8 : vector<8x32xf32>
    %c0_7 = arith.constant 0 : index
    %c0_8 = arith.constant 0 : index
    %10 = vector.load %arg2[%c0_7, %c0_8] : memref<8x32xf32, #tpu.memory_space<vmem>>, vector<8x32xf32>
    %11 = arith.addf %9, %10 : vector<8x32xf32>
    %12 = vector.shape_cast %11 : vector<8x32xf32> to vector<1x8x32xf32>
    %13 = vector.broadcast %12 : vector<1x8x32xf32> to vector<4x8x32xf32>
    %c0_9 = arith.constant 0 : index
    %c0_10 = arith.constant 0 : index
    %c0_11 = arith.constant 0 : index
    %c0_12 = arith.constant 0 : index
    %14 = vector.load %arg5[%c0_9, %c0_10, %c0_11, %c0_12] : memref<2x4x32x8xf32, #tpu.memory_space<vmem>>, vector<1x4x32x8xf32>
    %15 = vector.shape_cast %14 : vector<1x4x32x8xf32> to vector<4x32x8xf32>
    "tpu.trace_start"() <{level = 10 : i32, message = "hsd,hdf->hsf"}> : () -> ()
    %cst_13 = arith.constant dense<0.000000e+00> : vector<4x8x8xf32>
    %16 = tpu.matmul %13, %15, %cst_13 {dimension_numbers = #tpu.dot_dimension_numbers<[2], [1], [1], [2], [0, 0, 0, 1, 1, 2], [0], [0]>} : vector<4x8x32xf32>, vector<4x32x8xf32>, vector<4x8x8xf32> -> vector<4x8x8xf32>
    "tpu.trace_stop"() : () -> ()
    %c0_14 = arith.constant 0 : index
    %c0_15 = arith.constant 0 : index
    %c0_16 = arith.constant 0 : index
    %c0_17 = arith.constant 0 : index
    %17 = vector.load %arg8[%c0_14, %c0_15, %c0_16, %c0_17] : memref<2x4x1x8xf32, #tpu.memory_space<vmem>>, vector<1x4x1x8xf32>
    %18 = vector.shape_cast %17 : vector<1x4x1x8xf32> to vector<4x1x8xf32>
    %19 = vector.broadcast %18 : vector<4x1x8xf32> to vector<4x8x8xf32>
    %20 = arith.addf %16, %19 : vector<4x8x8xf32>
    %c0_18 = arith.constant 0 : index
    %c0_19 = arith.constant 0 : index
    %c0_20 = arith.constant 0 : index
    %c0_21 = arith.constant 0 : index
    %21 = vector.load %arg6[%c0_18, %c0_19, %c0_20, %c0_21] : memref<2x4x32x8xf32, #tpu.memory_space<vmem>>, vector<1x4x32x8xf32>
    %22 = vector.shape_cast %21 : vector<1x4x32x8xf32> to vector<4x32x8xf32>
    "tpu.trace_start"() <{level = 10 : i32, message = "hsd,hdf->hsf"}> : () -> ()
    %cst_22 = arith.constant dense<0.000000e+00> : vector<4x8x8xf32>
    %23 = tpu.matmul %13, %22, %cst_22 {dimension_numbers = #tpu.dot_dimension_numbers<[2], [1], [1], [2], [0, 0, 0, 1, 1, 2], [0], [0]>} : vector<4x8x32xf32>, vector<4x32x8xf32>, vector<4x8x8xf32> -> vector<4x8x8xf32>
    "tpu.trace_stop"() : () -> ()
    %c0_23 = arith.constant 0 : index
    %c0_24 = arith.constant 0 : index
    %c0_25 = arith.constant 0 : index
    %c0_26 = arith.constant 0 : index
    %24 = vector.load %arg9[%c0_23, %c0_24, %c0_25, %c0_26] : memref<2x4x1x8xf32, #tpu.memory_space<vmem>>, vector<1x4x1x8xf32>
    %25 = vector.shape_cast %24 : vector<1x4x1x8xf32> to vector<4x1x8xf32>
    %26 = vector.broadcast %25 : vector<4x1x8xf32> to vector<4x8x8xf32>
    %27 = arith.addf %23, %26 : vector<4x8x8xf32>
    %c0_27 = arith.constant 0 : index
    %c0_28 = arith.constant 0 : index
    %c0_29 = arith.constant 0 : index
    %c0_30 = arith.constant 0 : index
    %28 = vector.load %arg7[%c0_27, %c0_28, %c0_29, %c0_30] : memref<2x4x32x8xf32, #tpu.memory_space<vmem>>, vector<1x4x32x8xf32>
    %29 = vector.shape_cast %28 : vector<1x4x32x8xf32> to vector<4x32x8xf32>
    "tpu.trace_start"() <{level = 10 : i32, message = "hsd,hdf->hsf"}> : () -> ()
    %cst_31 = arith.constant dense<0.000000e+00> : vector<4x8x8xf32>
    %30 = tpu.matmul %13, %29, %cst_31 {dimension_numbers = #tpu.dot_dimension_numbers<[2], [1], [1], [2], [0, 0, 0, 1, 1, 2], [0], [0]>} : vector<4x8x32xf32>, vector<4x32x8xf32>, vector<4x8x8xf32> -> vector<4x8x8xf32>
    "tpu.trace_stop"() : () -> ()
    %c0_32 = arith.constant 0 : index
    %c0_33 = arith.constant 0 : index
    %c0_34 = arith.constant 0 : index
    %c0_35 = arith.constant 0 : index
    %31 = vector.load %arg10[%c0_32, %c0_33, %c0_34, %c0_35] : memref<2x4x1x8xf32, #tpu.memory_space<vmem>>, vector<1x4x1x8xf32>
    %32 = vector.shape_cast %31 : vector<1x4x1x8xf32> to vector<4x1x8xf32>
    %33 = vector.broadcast %32 : vector<4x1x8xf32> to vector<4x8x8xf32>
    %34 = arith.addf %30, %33 : vector<4x8x8xf32>
    "tpu.trace_start"() <{level = 10 : i32, message = "hqd,hkd->hqk"}> : () -> ()
    %cst_36 = arith.constant dense<0.000000e+00> : vector<4x8x8xf32>
    %35 = tpu.matmul %20, %27, %cst_36 {dimension_numbers = #tpu.dot_dimension_numbers<[2], [2], [1], [1], [0, 0, 0, 1, 1, 1], [0], [0]>} : vector<4x8x8xf32>, vector<4x8x8xf32>, vector<4x8x8xf32> -> vector<4x8x8xf32>
    "tpu.trace_stop"() : () -> ()
    %cst_37 = arith.constant 0.353553385 : f32
    %36 = vector.broadcast %cst_37 : f32 to vector<4x8x8xf32>
    %37 = arith.mulf %35, %36 : vector<4x8x8xf32>
    %cst_38 = arith.constant dense<0xFF800000> : vector<4x8xf32>
    %38 = vector.multi_reduction <maximumf>, %37, %cst_38 [2] : vector<4x8x8xf32> to vector<4x8xf32>
    %39 = vector.shape_cast %38 : vector<4x8xf32> to vector<4x8x1xf32>
    %40 = vector.broadcast %39 : vector<4x8x1xf32> to vector<4x8x8xf32>
    %41 = arith.subf %37, %40 : vector<4x8x8xf32>
    %42 = math.exp %41 : vector<4x8x8xf32>
    %cst_39 = arith.constant dense<0.000000e+00> : vector<4x8xf32>
    %43 = vector.multi_reduction <add>, %42, %cst_39 [2] : vector<4x8x8xf32> to vector<4x8xf32>
    %44 = vector.shape_cast %43 : vector<4x8xf32> to vector<4x8x1xf32>
    %45 = tpu.reciprocal %44 {approx = true} : vector<4x8x1xf32> -> vector<4x8x1xf32>
    %46 = vector.broadcast %45 : vector<4x8x1xf32> to vector<4x8x8xf32>
    %47 = arith.mulf %42, %46 : vector<4x8x8xf32>
    "tpu.trace_start"() <{level = 10 : i32, message = "hqk,hkd->hqd"}> : () -> ()
    %cst_40 = arith.constant dense<0.000000e+00> : vector<4x8x8xf32>
    %48 = tpu.matmul %47, %34, %cst_40 {dimension_numbers = #tpu.dot_dimension_numbers<[2], [1], [1], [2], [0, 0, 0, 1, 1, 2], [0], [0]>} : vector<4x8x8xf32>, vector<4x8x8xf32>, vector<4x8x8xf32> -> vector<4x8x8xf32>
    "tpu.trace_stop"() : () -> ()
    %c0_41 = arith.constant 0 : index
    %c0_42 = arith.constant 0 : index
    %c0_43 = arith.constant 0 : index
    %c0_44 = arith.constant 0 : index
    %49 = vector.load %arg11[%c0_41, %c0_42, %c0_43, %c0_44] : memref<2x4x8x32xf32, #tpu.memory_space<vmem>>, vector<1x4x8x32xf32>
    %50 = vector.shape_cast %49 : vector<1x4x8x32xf32> to vector<4x8x32xf32>
    "tpu.trace_start"() <{level = 10 : i32, message = "hqd,hdf->hqf"}> : () -> ()
    %cst_45 = arith.constant dense<0.000000e+00> : vector<4x8x32xf32>
    %51 = tpu.matmul %48, %50, %cst_45 {dimension_numbers = #tpu.dot_dimension_numbers<[2], [1], [1], [2], [0, 0, 0, 1, 1, 2], [0], [0]>} : vector<4x8x8xf32>, vector<4x8x32xf32>, vector<4x8x32xf32> -> vector<4x8x32xf32>
    "tpu.trace_stop"() : () -> ()
    %cst_46 = arith.constant dense<0.000000e+00> : vector<8x32xf32>
    %52 = vector.multi_reduction <add>, %51, %cst_46 [0] : vector<4x8x32xf32> to vector<8x32xf32>
    %c0_47 = arith.constant 0 : index
    %c0_48 = arith.constant 0 : index
    %c0_49 = arith.constant 0 : index
    %53 = vector.load %arg12[%c0_47, %c0_48, %c0_49] : memref<2x1x32xf32, #tpu.memory_space<vmem>>, vector<1x1x32xf32>
    %54 = vector.shape_cast %53 : vector<1x1x32xf32> to vector<1x32xf32>
    %55 = vector.broadcast %54 : vector<1x32xf32> to vector<8x32xf32>
    %56 = arith.addf %52, %55 : vector<8x32xf32>
    %57 = arith.addf %11, %56 : vector<8x32xf32>
    %c0_50 = arith.constant 0 : index
    %c0_51 = arith.constant 0 : index
    %c0_52 = arith.constant 0 : index
    %58 = vector.load %arg13[%c0_50, %c0_51, %c0_52] : memref<2x1x32xf32, #tpu.memory_space<vmem>>, vector<1x1x32xf32>
    %59 = vector.shape_cast %58 : vector<1x1x32xf32> to vector<1x32xf32>
    %c0_53 = arith.constant 0 : index
    %c0_54 = arith.constant 0 : index
    %c0_55 = arith.constant 0 : index
    %60 = vector.load %arg14[%c0_53, %c0_54, %c0_55] : memref<2x1x32xf32, #tpu.memory_space<vmem>>, vector<1x1x32xf32>
    %61 = vector.shape_cast %60 : vector<1x1x32xf32> to vector<1x32xf32>
    %cst_56 = arith.constant dense<0.000000e+00> : vector<8xf32>
    %62 = vector.multi_reduction <add>, %57, %cst_56 [1] : vector<8x32xf32> to vector<8xf32>
    %63 = vector.shape_cast %62 : vector<8xf32> to vector<8x1xf32>
    %cst_57 = arith.constant 3.200000e+01 : f32
    %64 = vector.broadcast %cst_57 : f32 to vector<8x1xf32>
    %65 = arith.divf %63, %64 : vector<8x1xf32>
    %66 = vector.broadcast %65 : vector<8x1xf32> to vector<8x32xf32>
    %67 = arith.subf %57, %66 : vector<8x32xf32>
    %68 = arith.mulf %67, %67 : vector<8x32xf32>
    %cst_58 = arith.constant dense<0.000000e+00> : vector<8xf32>
    %69 = vector.multi_reduction <add>, %68, %cst_58 [1] : vector<8x32xf32> to vector<8xf32>
    %70 = vector.shape_cast %69 : vector<8xf32> to vector<8x1xf32>
    %cst_59 = arith.constant 3.200000e+01 : f32
    %71 = vector.broadcast %cst_59 : f32 to vector<8x1xf32>
    %72 = arith.divf %70, %71 : vector<8x1xf32>
    %cst_60 = arith.constant 9.99999974E-6 : f32
    %73 = vector.broadcast %cst_60 : f32 to vector<8x1xf32>
    %74 = arith.addf %72, %73 : vector<8x1xf32>
    %75 = math.rsqrt %74 : vector<8x1xf32>
    %76 = vector.broadcast %75 : vector<8x1xf32> to vector<8x32xf32>
    %77 = arith.mulf %67, %76 : vector<8x32xf32>
    %78 = vector.broadcast %59 : vector<1x32xf32> to vector<8x32xf32>
    %79 = arith.mulf %77, %78 : vector<8x32xf32>
    %80 = vector.broadcast %61 : vector<1x32xf32> to vector<8x32xf32>
    %81 = arith.addf %79, %80 : vector<8x32xf32>
    %c0_61 = arith.constant 0 : index
    %c0_62 = arith.constant 0 : index
    %c0_63 = arith.constant 0 : index
    %82 = vector.load %arg17[%c0_61, %c0_62, %c0_63] : memref<2x32x64xf32, #tpu.memory_space<vmem>>, vector<1x32x64xf32>
    %83 = vector.shape_cast %82 : vector<1x32x64xf32> to vector<32x64xf32>
    %cst_64 = arith.constant dense<0.000000e+00> : vector<8x64xf32>
    %84 = tpu.matmul %81, %83, %cst_64 {dimension_numbers = #tpu.dot_dimension_numbers<[1], [0], [0], [1], [0, 0, 1, 1], [], []>} : vector<8x32xf32>, vector<32x64xf32>, vector<8x64xf32> -> vector<8x64xf32>
    %c0_65 = arith.constant 0 : index
    %c0_66 = arith.constant 0 : index
    %c0_67 = arith.constant 0 : index
    %85 = vector.load %arg18[%c0_65, %c0_66, %c0_67] : memref<2x1x64xf32, #tpu.memory_space<vmem>>, vector<1x1x64xf32>
    %86 = vector.shape_cast %85 : vector<1x1x64xf32> to vector<1x64xf32>
    %87 = vector.broadcast %86 : vector<1x64xf32> to vector<8x64xf32>
    %88 = arith.addf %84, %87 : vector<8x64xf32>
    %cst_68 = arith.constant 5.000000e-01 : f32
    %89 = vector.broadcast %cst_68 : f32 to vector<8x64xf32>
    %90 = arith.mulf %89, %88 : vector<8x64xf32>
    %cst_69 = arith.constant 0.707106769 : f32
    %91 = vector.broadcast %cst_69 : f32 to vector<8x64xf32>
    %92 = arith.mulf %88, %91 : vector<8x64xf32>
    %93 = math.erf %92 : vector<8x64xf32>
    %cst_70 = arith.constant 1.000000e+00 : f32
    %94 = vector.broadcast %cst_70 : f32 to vector<8x64xf32>
    %95 = arith.addf %94, %93 : vector<8x64xf32>
    %96 = arith.mulf %90, %95 : vector<8x64xf32>
    %c0_71 = arith.constant 0 : index
    %c0_72 = arith.constant 0 : index
    %c0_73 = arith.constant 0 : index
    %97 = vector.load %arg19[%c0_71, %c0_72, %c0_73] : memref<2x64x32xf32, #tpu.memory_space<vmem>>, vector<1x64x32xf32>
    %98 = vector.shape_cast %97 : vector<1x64x32xf32> to vector<64x32xf32>
    %cst_74 = arith.constant dense<0.000000e+00> : vector<8x32xf32>
    %99 = tpu.matmul %96, %98, %cst_74 {dimension_numbers = #tpu.dot_dimension_numbers<[1], [0], [0], [1], [0, 0, 1, 1], [], []>} : vector<8x64xf32>, vector<64x32xf32>, vector<8x32xf32> -> vector<8x32xf32>
    %c0_75 = arith.constant 0 : index
    %c0_76 = arith.constant 0 : index
    %c0_77 = arith.constant 0 : index
    %100 = vector.load %arg20[%c0_75, %c0_76, %c0_77] : memref<2x1x32xf32, #tpu.memory_space<vmem>>, vector<1x1x32xf32>
    %101 = vector.shape_cast %100 : vector<1x1x32xf32> to vector<1x32xf32>
    %102 = vector.broadcast %101 : vector<1x32xf32> to vector<8x32xf32>
    %103 = arith.addf %99, %102 : vector<8x32xf32>
    %104 = arith.addf %81, %103 : vector<8x32xf32>
    %c0_78 = arith.constant 0 : index
    %c0_79 = arith.constant 0 : index
    %c0_80 = arith.constant 0 : index
    %105 = vector.load %arg15[%c0_78, %c0_79, %c0_80] : memref<2x1x32xf32, #tpu.memory_space<vmem>>, vector<1x1x32xf32>
    %106 = vector.shape_cast %105 : vector<1x1x32xf32> to vector<1x32xf32>
    %c0_81 = arith.constant 0 : index
    %c0_82 = arith.constant 0 : index
    %c0_83 = arith.constant 0 : index
    %107 = vector.load %arg16[%c0_81, %c0_82, %c0_83] : memref<2x1x32xf32, #tpu.memory_space<vmem>>, vector<1x1x32xf32>
    %108 = vector.shape_cast %107 : vector<1x1x32xf32> to vector<1x32xf32>
    %cst_84 = arith.constant dense<0.000000e+00> : vector<8xf32>
    %109 = vector.multi_reduction <add>, %104, %cst_84 [1] : vector<8x32xf32> to vector<8xf32>
    %110 = vector.shape_cast %109 : vector<8xf32> to vector<8x1xf32>
    %cst_85 = arith.constant 3.200000e+01 : f32
    %111 = vector.broadcast %cst_85 : f32 to vector<8x1xf32>
    %112 = arith.divf %110, %111 : vector<8x1xf32>
    %113 = vector.broadcast %112 : vector<8x1xf32> to vector<8x32xf32>
    %114 = arith.subf %104, %113 : vector<8x32xf32>
    %115 = arith.mulf %114, %114 : vector<8x32xf32>
    %cst_86 = arith.constant dense<0.000000e+00> : vector<8xf32>
    %116 = vector.multi_reduction <add>, %115, %cst_86 [1] : vector<8x32xf32> to vector<8xf32>
    %117 = vector.shape_cast %116 : vector<8xf32> to vector<8x1xf32>
    %cst_87 = arith.constant 3.200000e+01 : f32
    %118 = vector.broadcast %cst_87 : f32 to vector<8x1xf32>
    %119 = arith.divf %117, %118 : vector<8x1xf32>
    %cst_88 = arith.constant 9.99999974E-6 : f32
    %120 = vector.broadcast %cst_88 : f32 to vector<8x1xf32>
    %121 = arith.addf %119, %120 : vector<8x1xf32>
    %122 = math.rsqrt %121 : vector<8x1xf32>
    %123 = vector.broadcast %122 : vector<8x1xf32> to vector<8x32xf32>
    %124 = arith.mulf %114, %123 : vector<8x32xf32>
    %125 = vector.broadcast %106 : vector<1x32xf32> to vector<8x32xf32>
    %126 = arith.mulf %124, %125 : vector<8x32xf32>
    %127 = vector.broadcast %108 : vector<1x32xf32> to vector<8x32xf32>
    %128 = arith.addf %126, %127 : vector<8x32xf32>
    %129 = vector.shape_cast %128 : vector<8x32xf32> to vector<1x8x32xf32>
    %130 = vector.broadcast %129 : vector<1x8x32xf32> to vector<4x8x32xf32>
    %c1 = arith.constant 1 : index
    %c0_89 = arith.constant 0 : index
    %c0_90 = arith.constant 0 : index
    %c0_91 = arith.constant 0 : index
    %131 = vector.load %arg5[%c1, %c0_89, %c0_90, %c0_91] : memref<2x4x32x8xf32, #tpu.memory_space<vmem>>, vector<1x4x32x8xf32>
    %132 = vector.shape_cast %131 : vector<1x4x32x8xf32> to vector<4x32x8xf32>
    "tpu.trace_start"() <{level = 10 : i32, message = "hsd,hdf->hsf"}> : () -> ()
    %cst_92 = arith.constant dense<0.000000e+00> : vector<4x8x8xf32>
    %133 = tpu.matmul %130, %132, %cst_92 {dimension_numbers = #tpu.dot_dimension_numbers<[2], [1], [1], [2], [0, 0, 0, 1, 1, 2], [0], [0]>} : vector<4x8x32xf32>, vector<4x32x8xf32>, vector<4x8x8xf32> -> vector<4x8x8xf32>
    "tpu.trace_stop"() : () -> ()
    %c1_93 = arith.constant 1 : index
    %c0_94 = arith.constant 0 : index
    %c0_95 = arith.constant 0 : index
    %c0_96 = arith.constant 0 : index
    %134 = vector.load %arg8[%c1_93, %c0_94, %c0_95, %c0_96] : memref<2x4x1x8xf32, #tpu.memory_space<vmem>>, vector<1x4x1x8xf32>
    %135 = vector.shape_cast %134 : vector<1x4x1x8xf32> to vector<4x1x8xf32>
    %136 = vector.broadcast %135 : vector<4x1x8xf32> to vector<4x8x8xf32>
    %137 = arith.addf %133, %136 : vector<4x8x8xf32>
    %c1_97 = arith.constant 1 : index
    %c0_98 = arith.constant 0 : index
    %c0_99 = arith.constant 0 : index
    %c0_100 = arith.constant 0 : index
    %138 = vector.load %arg6[%c1_97, %c0_98, %c0_99, %c0_100] : memref<2x4x32x8xf32, #tpu.memory_space<vmem>>, vector<1x4x32x8xf32>
    %139 = vector.shape_cast %138 : vector<1x4x32x8xf32> to vector<4x32x8xf32>
    "tpu.trace_start"() <{level = 10 : i32, message = "hsd,hdf->hsf"}> : () -> ()
    %cst_101 = arith.constant dense<0.000000e+00> : vector<4x8x8xf32>
    %140 = tpu.matmul %130, %139, %cst_101 {dimension_numbers = #tpu.dot_dimension_numbers<[2], [1], [1], [2], [0, 0, 0, 1, 1, 2], [0], [0]>} : vector<4x8x32xf32>, vector<4x32x8xf32>, vector<4x8x8xf32> -> vector<4x8x8xf32>
    "tpu.trace_stop"() : () -> ()
    %c1_102 = arith.constant 1 : index
    %c0_103 = arith.constant 0 : index
    %c0_104 = arith.constant 0 : index
    %c0_105 = arith.constant 0 : index
    %141 = vector.load %arg9[%c1_102, %c0_103, %c0_104, %c0_105] : memref<2x4x1x8xf32, #tpu.memory_space<vmem>>, vector<1x4x1x8xf32>
    %142 = vector.shape_cast %141 : vector<1x4x1x8xf32> to vector<4x1x8xf32>
    %143 = vector.broadcast %142 : vector<4x1x8xf32> to vector<4x8x8xf32>
    %144 = arith.addf %140, %143 : vector<4x8x8xf32>
    %c1_106 = arith.constant 1 : index
    %c0_107 = arith.constant 0 : index
    %c0_108 = arith.constant 0 : index
    %c0_109 = arith.constant 0 : index
    %145 = vector.load %arg7[%c1_106, %c0_107, %c0_108, %c0_109] : memref<2x4x32x8xf32, #tpu.memory_space<vmem>>, vector<1x4x32x8xf32>
    %146 = vector.shape_cast %145 : vector<1x4x32x8xf32> to vector<4x32x8xf32>
    "tpu.trace_start"() <{level = 10 : i32, message = "hsd,hdf->hsf"}> : () -> ()
    %cst_110 = arith.constant dense<0.000000e+00> : vector<4x8x8xf32>
    %147 = tpu.matmul %130, %146, %cst_110 {dimension_numbers = #tpu.dot_dimension_numbers<[2], [1], [1], [2], [0, 0, 0, 1, 1, 2], [0], [0]>} : vector<4x8x32xf32>, vector<4x32x8xf32>, vector<4x8x8xf32> -> vector<4x8x8xf32>
    "tpu.trace_stop"() : () -> ()
    %c1_111 = arith.constant 1 : index
    %c0_112 = arith.constant 0 : index
    %c0_113 = arith.constant 0 : index
    %c0_114 = arith.constant 0 : index
    %148 = vector.load %arg10[%c1_111, %c0_112, %c0_113, %c0_114] : memref<2x4x1x8xf32, #tpu.memory_space<vmem>>, vector<1x4x1x8xf32>
    %149 = vector.shape_cast %148 : vector<1x4x1x8xf32> to vector<4x1x8xf32>
    %150 = vector.broadcast %149 : vector<4x1x8xf32> to vector<4x8x8xf32>
    %151 = arith.addf %147, %150 : vector<4x8x8xf32>
    "tpu.trace_start"() <{level = 10 : i32, message = "hqd,hkd->hqk"}> : () -> ()
    %cst_115 = arith.constant dense<0.000000e+00> : vector<4x8x8xf32>
    %152 = tpu.matmul %137, %144, %cst_115 {dimension_numbers = #tpu.dot_dimension_numbers<[2], [2], [1], [1], [0, 0, 0, 1, 1, 1], [0], [0]>} : vector<4x8x8xf32>, vector<4x8x8xf32>, vector<4x8x8xf32> -> vector<4x8x8xf32>
    "tpu.trace_stop"() : () -> ()
    %cst_116 = arith.constant 0.353553385 : f32
    %153 = vector.broadcast %cst_116 : f32 to vector<4x8x8xf32>
    %154 = arith.mulf %152, %153 : vector<4x8x8xf32>
    %cst_117 = arith.constant dense<0xFF800000> : vector<4x8xf32>
    %155 = vector.multi_reduction <maximumf>, %154, %cst_117 [2] : vector<4x8x8xf32> to vector<4x8xf32>
    %156 = vector.shape_cast %155 : vector<4x8xf32> to vector<4x8x1xf32>
    %157 = vector.broadcast %156 : vector<4x8x1xf32> to vector<4x8x8xf32>
    %158 = arith.subf %154, %157 : vector<4x8x8xf32>
    %159 = math.exp %158 : vector<4x8x8xf32>
    %cst_118 = arith.constant dense<0.000000e+00> : vector<4x8xf32>
    %160 = vector.multi_reduction <add>, %159, %cst_118 [2] : vector<4x8x8xf32> to vector<4x8xf32>
    %161 = vector.shape_cast %160 : vector<4x8xf32> to vector<4x8x1xf32>
    %162 = tpu.reciprocal %161 {approx = true} : vector<4x8x1xf32> -> vector<4x8x1xf32>
    %163 = vector.broadcast %162 : vector<4x8x1xf32> to vector<4x8x8xf32>
    %164 = arith.mulf %159, %163 : vector<4x8x8xf32>
    "tpu.trace_start"() <{level = 10 : i32, message = "hqk,hkd->hqd"}> : () -> ()
    %cst_119 = arith.constant dense<0.000000e+00> : vector<4x8x8xf32>
    %165 = tpu.matmul %164, %151, %cst_119 {dimension_numbers = #tpu.dot_dimension_numbers<[2], [1], [1], [2], [0, 0, 0, 1, 1, 2], [0], [0]>} : vector<4x8x8xf32>, vector<4x8x8xf32>, vector<4x8x8xf32> -> vector<4x8x8xf32>
    "tpu.trace_stop"() : () -> ()
    %c1_120 = arith.constant 1 : index
    %c0_121 = arith.constant 0 : index
    %c0_122 = arith.constant 0 : index
    %c0_123 = arith.constant 0 : index
    %166 = vector.load %arg11[%c1_120, %c0_121, %c0_122, %c0_123] : memref<2x4x8x32xf32, #tpu.memory_space<vmem>>, vector<1x4x8x32xf32>
    %167 = vector.shape_cast %166 : vector<1x4x8x32xf32> to vector<4x8x32xf32>
    "tpu.trace_start"() <{level = 10 : i32, message = "hqd,hdf->hqf"}> : () -> ()
    %cst_124 = arith.constant dense<0.000000e+00> : vector<4x8x32xf32>
    %168 = tpu.matmul %165, %167, %cst_124 {dimension_numbers = #tpu.dot_dimension_numbers<[2], [1], [1], [2], [0, 0, 0, 1, 1, 2], [0], [0]>} : vector<4x8x8xf32>, vector<4x8x32xf32>, vector<4x8x32xf32> -> vector<4x8x32xf32>
    "tpu.trace_stop"() : () -> ()
    %cst_125 = arith.constant dense<0.000000e+00> : vector<8x32xf32>
    %169 = vector.multi_reduction <add>, %168, %cst_125 [0] : vector<4x8x32xf32> to vector<8x32xf32>
    %c1_126 = arith.constant 1 : index
    %c0_127 = arith.constant 0 : index
    %c0_128 = arith.constant 0 : index
    %170 = vector.load %arg12[%c1_126, %c0_127, %c0_128] : memref<2x1x32xf32, #tpu.memory_space<vmem>>, vector<1x1x32xf32>
    %171 = vector.shape_cast %170 : vector<1x1x32xf32> to vector<1x32xf32>
    %172 = vector.broadcast %171 : vector<1x32xf32> to vector<8x32xf32>
    %173 = arith.addf %169, %172 : vector<8x32xf32>
    %174 = arith.addf %128, %173 : vector<8x32xf32>
    %c1_129 = arith.constant 1 : index
    %c0_130 = arith.constant 0 : index
    %c0_131 = arith.constant 0 : index
    %175 = vector.load %arg13[%c1_129, %c0_130, %c0_131] : memref<2x1x32xf32, #tpu.memory_space<vmem>>, vector<1x1x32xf32>
    %176 = vector.shape_cast %175 : vector<1x1x32xf32> to vector<1x32xf32>
    %c1_132 = arith.constant 1 : index
    %c0_133 = arith.constant 0 : index
    %c0_134 = arith.constant 0 : index
    %177 = vector.load %arg14[%c1_132, %c0_133, %c0_134] : memref<2x1x32xf32, #tpu.memory_space<vmem>>, vector<1x1x32xf32>
    %178 = vector.shape_cast %177 : vector<1x1x32xf32> to vector<1x32xf32>
    %cst_135 = arith.constant dense<0.000000e+00> : vector<8xf32>
    %179 = vector.multi_reduction <add>, %174, %cst_135 [1] : vector<8x32xf32> to vector<8xf32>
    %180 = vector.shape_cast %179 : vector<8xf32> to vector<8x1xf32>
    %cst_136 = arith.constant 3.200000e+01 : f32
    %181 = vector.broadcast %cst_136 : f32 to vector<8x1xf32>
    %182 = arith.divf %180, %181 : vector<8x1xf32>
    %183 = vector.broadcast %182 : vector<8x1xf32> to vector<8x32xf32>
    %184 = arith.subf %174, %183 : vector<8x32xf32>
    %185 = arith.mulf %184, %184 : vector<8x32xf32>
    %cst_137 = arith.constant dense<0.000000e+00> : vector<8xf32>
    %186 = vector.multi_reduction <add>, %185, %cst_137 [1] : vector<8x32xf32> to vector<8xf32>
    %187 = vector.shape_cast %186 : vector<8xf32> to vector<8x1xf32>
    %cst_138 = arith.constant 3.200000e+01 : f32
    %188 = vector.broadcast %cst_138 : f32 to vector<8x1xf32>
    %189 = arith.divf %187, %188 : vector<8x1xf32>
    %cst_139 = arith.constant 9.99999974E-6 : f32
    %190 = vector.broadcast %cst_139 : f32 to vector<8x1xf32>
    %191 = arith.addf %189, %190 : vector<8x1xf32>
    %192 = math.rsqrt %191 : vector<8x1xf32>
    %193 = vector.broadcast %192 : vector<8x1xf32> to vector<8x32xf32>
    %194 = arith.mulf %184, %193 : vector<8x32xf32>
    %195 = vector.broadcast %176 : vector<1x32xf32> to vector<8x32xf32>
    %196 = arith.mulf %194, %195 : vector<8x32xf32>
    %197 = vector.broadcast %178 : vector<1x32xf32> to vector<8x32xf32>
    %198 = arith.addf %196, %197 : vector<8x32xf32>
    %c1_140 = arith.constant 1 : index
    %c0_141 = arith.constant 0 : index
    %c0_142 = arith.constant 0 : index
    %199 = vector.load %arg17[%c1_140, %c0_141, %c0_142] : memref<2x32x64xf32, #tpu.memory_space<vmem>>, vector<1x32x64xf32>
    %200 = vector.shape_cast %199 : vector<1x32x64xf32> to vector<32x64xf32>
    %cst_143 = arith.constant dense<0.000000e+00> : vector<8x64xf32>
    %201 = tpu.matmul %198, %200, %cst_143 {dimension_numbers = #tpu.dot_dimension_numbers<[1], [0], [0], [1], [0, 0, 1, 1], [], []>} : vector<8x32xf32>, vector<32x64xf32>, vector<8x64xf32> -> vector<8x64xf32>
    %c1_144 = arith.constant 1 : index
    %c0_145 = arith.constant 0 : index
    %c0_146 = arith.constant 0 : index
    %202 = vector.load %arg18[%c1_144, %c0_145, %c0_146] : memref<2x1x64xf32, #tpu.memory_space<vmem>>, vector<1x1x64xf32>
    %203 = vector.shape_cast %202 : vector<1x1x64xf32> to vector<1x64xf32>
    %204 = vector.broadcast %203 : vector<1x64xf32> to vector<8x64xf32>
    %205 = arith.addf %201, %204 : vector<8x64xf32>
    %cst_147 = arith.constant 5.000000e-01 : f32
    %206 = vector.broadcast %cst_147 : f32 to vector<8x64xf32>
    %207 = arith.mulf %206, %205 : vector<8x64xf32>
    %cst_148 = arith.constant 0.707106769 : f32
    %208 = vector.broadcast %cst_148 : f32 to vector<8x64xf32>
    %209 = arith.mulf %205, %208 : vector<8x64xf32>
    %210 = math.erf %209 : vector<8x64xf32>
    %cst_149 = arith.constant 1.000000e+00 : f32
    %211 = vector.broadcast %cst_149 : f32 to vector<8x64xf32>
    %212 = arith.addf %211, %210 : vector<8x64xf32>
    %213 = arith.mulf %207, %212 : vector<8x64xf32>
    %c1_150 = arith.constant 1 : index
    %c0_151 = arith.constant 0 : index
    %c0_152 = arith.constant 0 : index
    %214 = vector.load %arg19[%c1_150, %c0_151, %c0_152] : memref<2x64x32xf32, #tpu.memory_space<vmem>>, vector<1x64x32xf32>
    %215 = vector.shape_cast %214 : vector<1x64x32xf32> to vector<64x32xf32>
    %cst_153 = arith.constant dense<0.000000e+00> : vector<8x32xf32>
    %216 = tpu.matmul %213, %215, %cst_153 {dimension_numbers = #tpu.dot_dimension_numbers<[1], [0], [0], [1], [0, 0, 1, 1], [], []>} : vector<8x64xf32>, vector<64x32xf32>, vector<8x32xf32> -> vector<8x32xf32>
    %c1_154 = arith.constant 1 : index
    %c0_155 = arith.constant 0 : index
    %c0_156 = arith.constant 0 : index
    %217 = vector.load %arg20[%c1_154, %c0_155, %c0_156] : memref<2x1x32xf32, #tpu.memory_space<vmem>>, vector<1x1x32xf32>
    %218 = vector.shape_cast %217 : vector<1x1x32xf32> to vector<1x32xf32>
    %219 = vector.broadcast %218 : vector<1x32xf32> to vector<8x32xf32>
    %220 = arith.addf %216, %219 : vector<8x32xf32>
    %221 = arith.addf %198, %220 : vector<8x32xf32>
    %c1_157 = arith.constant 1 : index
    %c0_158 = arith.constant 0 : index
    %c0_159 = arith.constant 0 : index
    %222 = vector.load %arg15[%c1_157, %c0_158, %c0_159] : memref<2x1x32xf32, #tpu.memory_space<vmem>>, vector<1x1x32xf32>
    %223 = vector.shape_cast %222 : vector<1x1x32xf32> to vector<1x32xf32>
    %c1_160 = arith.constant 1 : index
    %c0_161 = arith.constant 0 : index
    %c0_162 = arith.constant 0 : index
    %224 = vector.load %arg16[%c1_160, %c0_161, %c0_162] : memref<2x1x32xf32, #tpu.memory_space<vmem>>, vector<1x1x32xf32>
    %225 = vector.shape_cast %224 : vector<1x1x32xf32> to vector<1x32xf32>
    %cst_163 = arith.constant dense<0.000000e+00> : vector<8xf32>
    %226 = vector.multi_reduction <add>, %221, %cst_163 [1] : vector<8x32xf32> to vector<8xf32>
    %227 = vector.shape_cast %226 : vector<8xf32> to vector<8x1xf32>
    %cst_164 = arith.constant 3.200000e+01 : f32
    %228 = vector.broadcast %cst_164 : f32 to vector<8x1xf32>
    %229 = arith.divf %227, %228 : vector<8x1xf32>
    %230 = vector.broadcast %229 : vector<8x1xf32> to vector<8x32xf32>
    %231 = arith.subf %221, %230 : vector<8x32xf32>
    %232 = arith.mulf %231, %231 : vector<8x32xf32>
    %cst_165 = arith.constant dense<0.000000e+00> : vector<8xf32>
    %233 = vector.multi_reduction <add>, %232, %cst_165 [1] : vector<8x32xf32> to vector<8xf32>
    %234 = vector.shape_cast %233 : vector<8xf32> to vector<8x1xf32>
    %cst_166 = arith.constant 3.200000e+01 : f32
    %235 = vector.broadcast %cst_166 : f32 to vector<8x1xf32>
    %236 = arith.divf %234, %235 : vector<8x1xf32>
    %cst_167 = arith.constant 9.99999974E-6 : f32
    %237 = vector.broadcast %cst_167 : f32 to vector<8x1xf32>
    %238 = arith.addf %236, %237 : vector<8x1xf32>
    %239 = math.rsqrt %238 : vector<8x1xf32>
    %240 = vector.broadcast %239 : vector<8x1xf32> to vector<8x32xf32>
    %241 = arith.mulf %231, %240 : vector<8x32xf32>
    %242 = vector.broadcast %223 : vector<1x32xf32> to vector<8x32xf32>
    %243 = arith.mulf %241, %242 : vector<8x32xf32>
    %244 = vector.broadcast %225 : vector<1x32xf32> to vector<8x32xf32>
    %245 = arith.addf %243, %244 : vector<8x32xf32>
    %c0_168 = arith.constant 0 : index
    %c0_169 = arith.constant 0 : index
    %246 = vector.load %arg21[%c0_168, %c0_169] : memref<32x128xf32, #tpu.memory_space<vmem>>, vector<32x128xf32>
    %cst_170 = arith.constant dense<0.000000e+00> : vector<8x128xf32>
    %247 = tpu.matmul %245, %246, %cst_170 {dimension_numbers = #tpu.dot_dimension_numbers<[1], [0], [0], [1], [0, 0, 1, 1], [], []>} : vector<8x32xf32>, vector<32x128xf32>, vector<8x128xf32> -> vector<8x128xf32>
    %c0_171 = arith.constant 0 : index
    %c0_172 = arith.constant 0 : index
    %248 = vector.load %arg22[%c0_171, %c0_172] : memref<1x128xf32, #tpu.memory_space<vmem>>, vector<1x128xf32>
    %249 = vector.broadcast %248 : vector<1x128xf32> to vector<8x128xf32>
    %250 = arith.addf %247, %249 : vector<8x128xf32>
    %251 = arith.negf %250 : vector<8x128xf32>
    %252 = math.exp %251 : vector<8x128xf32>
    %cst_173 = arith.constant 1.000000e+00 : f32
    %253 = vector.broadcast %cst_173 : f32 to vector<8x128xf32>
    %254 = arith.addf %253, %252 : vector<8x128xf32>
    %255 = arith.divf %253, %254 : vector<8x128xf32>
    %c0_174 = arith.constant 0 : index
    %c0_175 = arith.constant 0 : index
    %c0_176 = arith.constant 0 : index
    %256 = vector.load %arg23[%c0_174, %c0_175, %c0_176] : memref<1x8x128xf32, #tpu.memory_space<vmem>>, vector<1x8x128xf32>
    %257 = vector.shape_cast %256 : vector<1x8x128xf32> to vector<8x128xf32>
    %258 = vector.shape_cast %255 : vector<8x128xf32> to vector<1x8x128xf32>
    tpu.vector_store %arg23[%c0_174, %c0_175, %c0_176], %258 {strides = array<i32>} : memref<1x8x128xf32, #tpu.memory_space<vmem>>, vector<1x8x128xf32>,
    return
  }
  func.func @transform_0(%arg0: i32) -> (i32, i32, i32, i32) {
    %c0_i32 = arith.constant 0 : i32
    %c0_i32_0 = arith.constant 0 : i32
    %c0_i32_1 = arith.constant 0 : i32
    %c0_i32_2 = arith.constant 0 : i32
    return %arg0, %c0_i32, %c0_i32_0, %c0_i32_1 : i32, i32, i32, i32
  }
  func.func @transform_1(%arg0: i32) -> (i32, i32) {
    %c0_i32 = arith.constant 0 : i32
    %c0_i32_0 = arith.constant 0 : i32
    %c0_i32_1 = arith.constant 0 : i32
    return %c0_i32, %c0_i32_0 : i32, i32
  }
  func.func @transform_2(%arg0: i32) -> (i32, i32) {
    %c0_i32 = arith.constant 0 : i32
    %c0_i32_0 = arith.constant 0 : i32
    %c0_i32_1 = arith.constant 0 : i32
    return %c0_i32, %c0_i32_0 : i32, i32
  }
  func.func @transform_3(%arg0: i32) -> (i32, i32) {
    %c0_i32 = arith.constant 0 : i32
    %c0_i32_0 = arith.constant 0 : i32
    %c0_i32_1 = arith.constant 0 : i32
    return %c0_i32, %c0_i32_0 : i32, i32
  }
  func.func @transform_4(%arg0: i32) -> (i32, i32, i32, i32) {
    %c0_i32 = arith.constant 0 : i32
    %c0_i32_0 = arith.constant 0 : i32
    %c0_i32_1 = arith.constant 0 : i32
    %c0_i32_2 = arith.constant 0 : i32
    %c0_i32_3 = arith.constant 0 : i32
    return %c0_i32, %c0_i32_0, %c0_i32_1, %c0_i32_2 : i32, i32, i32, i32
  }
  func.func @transform_5(%arg0: i32) -> (i32, i32, i32, i32) {
    %c0_i32 = arith.constant 0 : i32
    %c0_i32_0 = arith.constant 0 : i32
    %c0_i32_1 = arith.constant 0 : i32
    %c0_i32_2 = arith.constant 0 : i32
    %c0_i32_3 = arith.constant 0 : i32
    return %c0_i32, %c0_i32_0, %c0_i32_1, %c0_i32_2 : i32, i32, i32, i32
  }
  func.func @transform_6(%arg0: i32) -> (i32, i32, i32, i32) {
    %c0_i32 = arith.constant 0 : i32
    %c0_i32_0 = arith.constant 0 : i32
    %c0_i32_1 = arith.constant 0 : i32
    %c0_i32_2 = arith.constant 0 : i32
    %c0_i32_3 = arith.constant 0 : i32
    return %c0_i32, %c0_i32_0, %c0_i32_1, %c0_i32_2 : i32, i32, i32, i32
  }
  func.func @transform_7(%arg0: i32) -> (i32, i32, i32, i32) {
    %c0_i32 = arith.constant 0 : i32
    %c0_i32_0 = arith.constant 0 : i32
    %c0_i32_1 = arith.constant 0 : i32
    %c0_i32_2 = arith.constant 0 : i32
    %c0_i32_3 = arith.constant 0 : i32
    return %c0_i32, %c0_i32_0, %c0_i32_1, %c0_i32_2 : i32, i32, i32, i32
  }
  func.func @transform_8(%arg0: i32) -> (i32, i32, i32, i32) {
    %c0_i32 = arith.constant 0 : i32
    %c0_i32_0 = arith.constant 0 : i32
    %c0_i32_1 = arith.constant 0 : i32
    %c0_i32_2 = arith.constant 0 : i32
    %c0_i32_3 = arith.constant 0 : i32
    return %c0_i32, %c0_i32_0, %c0_i32_1, %c0_i32_2 : i32, i32, i32, i32
  }
  func.func @transform_9(%arg0: i32) -> (i32, i32, i32, i32) {
    %c0_i32 = arith.constant 0 : i32
    %c0_i32_0 = arith.constant 0 : i32
    %c0_i32_1 = arith.constant 0 : i32
    %c0_i32_2 = arith.constant 0 : i32
    %c0_i32_3 = arith.constant 0 : i32
    return %c0_i32, %c0_i32_0, %c0_i32_1, %c0_i32_2 : i32, i32, i32, i32
  }
  func.func @transform_10(%arg0: i32) -> (i32, i32, i32, i32) {
    %c0_i32 = arith.constant 0 : i32
    %c0_i32_0 = arith.constant 0 : i32
    %c0_i32_1 = arith.constant 0 : i32
    %c0_i32_2 = arith.constant 0 : i32
    %c0_i32_3 = arith.constant 0 : i32
    return %c0_i32, %c0_i32_0, %c0_i32_1, %c0_i32_2 : i32, i32, i32, i32
  }
  func.func @transform_11(%arg0: i32) -> (i32, i32, i32) {
    %c0_i32 = arith.constant 0 : i32
    %c0_i32_0 = arith.constant 0 : i32
    %c0_i32_1 = arith.constant 0 : i32
    %c0_i32_2 = arith.constant 0 : i32
    return %c0_i32, %c0_i32_0, %c0_i32_1 : i32, i32, i32
  }
  func.func @transform_12(%arg0: i32) -> (i32, i32, i32) {
    %c0_i32 = arith.constant 0 : i32
    %c0_i32_0 = arith.constant 0 : i32
    %c0_i32_1 = arith.constant 0 : i32
    %c0_i32_2 = arith.constant 0 : i32
    return %c0_i32, %c0_i32_0, %c0_i32_1 : i32, i32, i32
  }
  func.func @transform_13(%arg0: i32) -> (i32, i32, i32) {
    %c0_i32 = arith.constant 0 : i32
    %c0_i32_0 = arith.constant 0 : i32
    %c0_i32_1 = arith.constant 0 : i32
    %c0_i32_2 = arith.constant 0 : i32
    return %c0_i32, %c0_i32_0, %c0_i32_1 : i32, i32, i32
  }
  func.func @transform_14(%arg0: i32) -> (i32, i32, i32) {
    %c0_i32 = arith.constant 0 : i32
    %c0_i32_0 = arith.constant 0 : i32
    %c0_i32_1 = arith.constant 0 : i32
    %c0_i32_2 = arith.constant 0 : i32
    return %c0_i32, %c0_i32_0, %c0_i32_1 : i32, i32, i32
  }
  func.func @transform_15(%arg0: i32) -> (i32, i32, i32) {
    %c0_i32 = arith.constant 0 : i32
    %c0_i32_0 = arith.constant 0 : i32
    %c0_i32_1 = arith.constant 0 : i32
    %c0_i32_2 = arith.constant 0 : i32
    return %c0_i32, %c0_i32_0, %c0_i32_1 : i32, i32, i32
  }
  func.func @transform_16(%arg0: i32) -> (i32, i32, i32) {
    %c0_i32 = arith.constant 0 : i32
    %c0_i32_0 = arith.constant 0 : i32
    %c0_i32_1 = arith.constant 0 : i32
    %c0_i32_2 = arith.constant 0 : i32
    return %c0_i32, %c0_i32_0, %c0_i32_1 : i32, i32, i32
  }
  func.func @transform_17(%arg0: i32) -> (i32, i32, i32) {
    %c0_i32 = arith.constant 0 : i32
    %c0_i32_0 = arith.constant 0 : i32
    %c0_i32_1 = arith.constant 0 : i32
    %c0_i32_2 = arith.constant 0 : i32
    return %c0_i32, %c0_i32_0, %c0_i32_1 : i32, i32, i32
  }
  func.func @transform_18(%arg0: i32) -> (i32, i32, i32) {
    %c0_i32 = arith.constant 0 : i32
    %c0_i32_0 = arith.constant 0 : i32
    %c0_i32_1 = arith.constant 0 : i32
    %c0_i32_2 = arith.constant 0 : i32
    return %c0_i32, %c0_i32_0, %c0_i32_1 : i32, i32, i32
  }
  func.func @transform_19(%arg0: i32) -> (i32, i32, i32) {
    %c0_i32 = arith.constant 0 : i32
    %c0_i32_0 = arith.constant 0 : i32
    %c0_i32_1 = arith.constant 0 : i32
    %c0_i32_2 = arith.constant 0 : i32
    return %c0_i32, %c0_i32_0, %c0_i32_1 : i32, i32, i32
  }
  func.func @transform_20(%arg0: i32) -> (i32, i32) {
    %c0_i32 = arith.constant 0 : i32
    %c0_i32_0 = arith.constant 0 : i32
    %c0_i32_1 = arith.constant 0 : i32
    return %c0_i32, %c0_i32_0 : i32, i32
  }
  func.func @transform_21(%arg0: i32) -> (i32, i32) {
    %c0_i32 = arith.constant 0 : i32
    %c0_i32_0 = arith.constant 0 : i32
    %c0_i32_1 = arith.constant 0 : i32
    return %c0_i32, %c0_i32_0 : i32, i32
  }
  func.func @transform_22(%arg0: i32) -> (i32, i32, i32) {
    %c0_i32 = arith.constant 0 : i32
    %c0_i32_0 = arith.constant 0 : i32
    %c0_i32_1 = arith.constant 0 : i32
    return %arg0, %c0_i32, %c0_i32_0 : i32, i32, i32
  }
}

</mosaic_0001>

<bundles_post_ra>
// kernel: phago_forward.1
= control target key start
LH: loop header
LB: loop body
LE: loop exit
PB: predicated region body
PF: predicated region fallthrough
CT: control target
= control target key end

     0   :  { %s19191_s0 = inlined_call_operand.hbm [shape: f32[2,8,32,1024], index: 0, kind: input, shape index: {}]   ;;  %s19192_s1 = inlined_call_operand.vmem [shape: f32[8,32], index: 1, kind: input, shape index: {}]   ;;  %s19193_s2 = inlined_call_operand.hbm [shape: f32[1,1024], index: 2, kind: input, shape index: {}]   ;;  %s19194_s3 = inlined_call_operand.<no memory space> [shape: f32[1,1], index: 3, kind: input, shape index: {}]   ;;  %s19195_s4 = inlined_call_operand.vmem [shape: f32[2,4,32,8], index: 4, kind: input, shape index: {}]   ;;  %s19196_s5 = inlined_call_operand.vmem [shape: f32[2,4,32,8], index: 5, kind: input, shape index: {}]   ;;  %s19197_s6 = inlined_call_operand.vmem [shape: f32[2,4,32,8], index: 6, kind: input, shape index: {}]   ;;  %s19198_s7 = inlined_call_operand.hbm [shape: f32[2,4,1,8], index: 7, kind: input, shape index: {}]   ;;  %s19199_s8 = inlined_call_operand.hbm [shape: f32[2,4,1,8], index: 8, kind: input, shape index: {}]   ;;  %s19200_s9 = inlined_call_operand.hbm [shape: f32[2,4,1,8], index: 9, kind: input, shape index: {}]   ;;  %s19201_s10 = inlined_call_operand.hbm [shape: f32[2,4,8,32], index: 10, kind: input, shape index: {}]   ;;  %s19202_s11 = inlined_call_operand.hbm [shape: f32[2,1,32], index: 11, kind: input, shape index: {}]   ;;  %s19203_s12 = inlined_call_operand.hbm [shape: f32[2,1,32], index: 12, kind: input, shape index: {}]   ;;  %s19204_s13 = inlined_call_operand.hbm [shape: f32[2,1,32], index: 13, kind: input, shape index: {}]   ;;  %s19205_s14 = inlined_call_operand.hbm [shape: f32[2,1,32], index: 14, kind: input, shape index: {}]   ;;  %s19206_s15 = inlined_call_operand.hbm [shape: f32[2,1,32], index: 15, kind: input, shape index: {}]   ;;  %s19207_s16 = inlined_call_operand.hbm [shape: f32[2,32,64], index: 16, kind: input, shape index: {}]   ;;  %s19208_s17 = inlined_call_operand.hbm [shape: f32[2,1,64], index: 17, kind: input, shape index: {}]   ;;  %s19209_s18 = inlined_call_operand.vmem [shape: f32[2,64,32], index: 18, kind: input, shape index: {}]   ;;  %s19210_s19 = inlined_call_operand.hbm [shape: f32[2,1,32], index: 19, kind: input, shape index: {}]   ;;  %s19211_s20 = inlined_call_operand.vmem [shape: f32[32,128], index: 20, kind: input, shape index: {}]   ;;  %s19212_s21 = inlined_call_operand.vmem [shape: f32[1,128], index: 21, kind: input, shape index: {}]   ;;  %s19213_s22 = inlined_call_operand.hbm [shape: f32[2,8,128], index: 22, kind: output, shape index: {}]  }
   0x1   :  { %19451 = sst [smem:[#allocation65_spill]] %s19191_s0 }
   0x2   :  { %19452 = sst [smem:[#allocation66_spill]] %s19192_s1 }
   0x3   :  { %19453 = sst [smem:[#allocation67_spill]] %s19193_s2 }
   0x4   :  { %19454 = sst [smem:[#allocation68_spill]] %s19194_s3 }
   0x5   :  { %19455 = sst [smem:[#allocation69_spill]] %s19195_s4  ;;  %s19467_s29 = sld [smem:[#allocation68_spill]] }
   0x6   :  { %19456 = sst [smem:[#allocation70_spill]] %s19196_s5 }
   0x7   :  { %19457 = sst [smem:[#allocation71_spill]] %s19197_s6 }
   0x8   :  { %19458 = sst [smem:[#allocation72_spill]] %s19198_s7 }
   0x9   :  { %19459 = sst [smem:[#allocation73_spill]] %s19199_s8 }
   0xa   :  { %19460 = sst [smem:[#allocation74_spill]] %s19200_s9 }
   0xb   :  { %19461 = sst [smem:[#allocation75_spill]] %s19201_s10  ;;  %v27_v0 = vstv %s19467_s29 }
   0xc   :  { %19462 = sst [smem:[#allocation76_spill]] %s19202_s11  ;;  %28 = vst [vmem:[#allocation2] sm:$0x1] %v27_v0 }
   0xd   :  { %19463 = sst [smem:[#allocation77_spill]] %s19209_s18 }
   0xe   :  { %19464 = sst [smem:[#allocation78_spill]] %s19211_s20 }
   0xf   :  { %19465 = sst [smem:[#allocation79_spill]] %s19212_s21 }
  0x10   :  { %19466 = sst [smem:[#allocation80_spill]] %s19213_s22 }
  0x11   :  { %29 = vsyncpa [#allocation4], 0 }
  0x12   :  { %31 = vsyncpa [#allocation4 + $0x1], 0 }
  0x13   :  { %32 = vsyncpa [#allocation7], 0 }
  0x14   :  { %33 = vsyncpa [#allocation10], 0 }
  0x15   :  { %34 = vsyncpa [#allocation13], 0 }
  0x16   :  { %35 = vsyncpa [#allocation16], 0 }
  0x17   :  { %36 = vsyncpa [#allocation19], 0 }
  0x18   :  { %37 = vsyncpa [#allocation22], 0 }
  0x19   :  { %38 = vsyncpa [#allocation25], 0 }
  0x1a   :  { %39 = vsyncpa [#allocation5], 0 }
  0x1b   :  { %41 = vsyncpa [#allocation5 + $0x1], 0  ;;  %s14261_s30 = smov 0   ;;  %s14263_s4 = smov 0  }
  0x1c   :  { %s14265_s0 = smov 0   ;;  %s14267_s23 = smov 0  }
  0x1d LB: > { %19468 = sst [smem:[#allocation36_spill]] %s14104_s30  ;;  %s14118_s1 = smov [#allocation6]   ;;  %s14116_s23 = sphi %s14267_s23, %s19934_s23   ;;  %s14112_s0 = sphi %s14265_s0, %s19933_s0   ;;  %s14108_s4 = sphi %s14263_s4, %s19932_s4   ;;  %s14104_s30 = sphi %s14261_s30, %s19931_s30  }
  0x1e   : > { %19469 = sst [smem:[#allocation37_spill]] %s14108_s4  ;;  %s561_s5 = sshll.u32 %s14118_s1, 4  ;;  %s562_s5 = int_to_ptr.vmem [resolvable:$true] %s561_s5 }
  0x1f   : > { %s14282_s24 = sadd.s32 4294967295, %s14116_s23   ;;  %p12352_p0 = scmp.ge.s32.totalorder %s14116_s23, 1 }
  0x20   : > { %19470 = sst [smem:[#allocation38_spill]] %s14282_s24  ;;  %p19222_p1 = scmp.eq.s32.totalorder %s14282_s24, 0 }
  0x21   : > { %p545_p2 = scmp.lt.s32.totalorder %s14116_s23, 3  ;;  %s14119_s25 = smov [#allocation9]  }
  0x22   : > { %s596_s26 = sshll.u32 %s14119_s25, 4  ;;  %s14120_s27 = smov [#allocation12]   ;;  %s14300_s26 = int_to_ptr.vmem [resolvable:$true] %s596_s26 }
  0x23   : > { %p14287_p3 = pnand %p12352_p0, %p545_p2  ;;  %s622_s3 = sshll.u32 %s14120_s27, 4  ;;  %s14302_s3 = int_to_ptr.vmem [resolvable:$true] %s622_s3 }
  0x24   : > { %s19474_s1 = sld [smem:[#allocation67_spill]] }
  0x25   : > { %s19471_s6 = scalar_select %p14287_p3, 1, 0 }
  0x26   : > { %p13447_p5 = pneg %p14287_p3 }
  0x27   : > { %19472 = sst [smem:[#allocation39_spill]] %s19471_s6 }
  0x28   : > { %p14296_p6 = pnand %p13447_p5, %p19222_p1 }
  0x2a   : > { %s13628_s22 = scalar_lea.hbm %s19474_s1, 128  ;;  %p14312_p8 = pneg %p14296_p6 }
  0x2b   : > { %p13629_p7 = scmp.ne.s32.totalorder %s19474_s1, %s13628_s22  ;;  %p13635_p11 = scmp.lt.u32.totalorder %s13628_s22, %s19474_s1 }
  0x2d   : > { %p13631_p9 = pnand %p14312_p8, %p13629_p7 }
  0x2f   : > { %p13632_p10 = pneg %p13631_p9 }
  0x31   : > { %p13637_p12 = pnand %p13635_p11, %p13632_p10 }
  0x33   : > { %13640 = shalt.err (!%p13637_p12)
}
  0x34   : > { %s13641_s28 = scalar_lea.vmem %s562_s5, 128  ;;  %p13649_p5 = scmp.lt.s32.totalorder %s562_s5, %s562_s5 }
  0x35   : > { %p13642_p13 = scmp.ne.s32.totalorder %s562_s5, %s13641_s28  ;;  %p13650_p4 = scmp.lt.s32.totalorder %s13641_s28, %s13641_s28 }
  0x37   : > { %p13644_p0 = pnand %p13642_p13, %p14312_p8  ;;  %p13651_p1 = por %p13650_p4, %p13649_p5 }
  0x39   : > { %p13645_p2 = pneg %p13644_p0 }
  0x3b   : > { %p13652_p3 = pnand %p13651_p1, %p13645_p2 }
  0x3d   : > { %13655 = shalt.err (!%p13652_p3)
}
  0x3e   : > { %13450 = dma.hbm_to_vmem [thread:$0]  (!%p14296_p6), %s19474_s1, 128, %s562_s5, [#allocation7]  }
  0x3f   : > { %s19476_s8 = sld [smem:[#allocation73_spill]] }
  0x45   : > { %s13656_s29 = scalar_lea.hbm %s19476_s8, 128 }
  0x46   : > { %p13657_p7 = scmp.ne.s32.totalorder %s19476_s8, %s13656_s29  ;;  %p13663_p1 = scmp.lt.u32.totalorder %s13656_s29, %s19476_s8 }
  0x48   : > { %p13659_p9 = pnand %p13657_p7, %p14312_p8 }
  0x4a   : > { %p13660_p4 = pneg %p13659_p9 }
  0x4c   : > { %p13665_p3 = pnand %p13663_p1, %p13660_p4 }
  0x4e   : > { %13668 = shalt.err (!%p13665_p3)
}
  0x4f   : > { %s13669_s5 = scalar_lea.vmem %s14300_s26, 128  ;;  %p13677_p13 = scmp.lt.s32.totalorder %s14300_s26, %s14300_s26 }
  0x50   : > { %p13670_p10 = scmp.ne.s32.totalorder %s14300_s26, %s13669_s5  ;;  %p13678_p0 = scmp.lt.s32.totalorder %s13669_s5, %s13669_s5 }
  0x52   : > { %p13672_p11 = pnand %p13670_p10, %p14312_p8  ;;  %p13679_p2 = por %p13678_p0, %p13677_p13 }
  0x54   : > { %p13673_p12 = pneg %p13672_p11 }
  0x56   : > { %p13680_p5 = pnand %p13679_p2, %p13673_p12 }
  0x58   : > { %13683 = shalt.err (!%p13680_p5)
}
  0x59   : > { %s19229_s6 = smov 16   ;;  %s19231_s24 = smov 1  }
  0x5a   : > { %13456 = dma.hbm_to_vmem [thread:$0]  (!%p14296_p6), %s19476_s8, 128, %s14300_s26, [#allocation10], %s19229_s6, %s19229_s6, %s19231_s24  }
  0x5b   : > { %s19477_s10 = sld [smem:[#allocation75_spill]] }
  0x61   : > { %s13684_s29 = scalar_lea.hbm %s19477_s10, 1024 }
  0x62   : > { %p13685_p7 = scmp.ne.s32.totalorder %s19477_s10, %s13684_s29  ;;  %p13691_p1 = scmp.lt.u32.totalorder %s13684_s29, %s19477_s10 }
  0x64   : > { %p13687_p9 = pnand %p13685_p7, %p14312_p8 }
  0x66   : > { %p13688_p4 = pneg %p13687_p9 }
  0x68   : > { %p13693_p3 = pnand %p13691_p1, %p13688_p4 }
  0x6a   : > { %13696 = shalt.err (!%p13693_p3)
}
  0x6b   : > { %s13697_s26 = scalar_lea.vmem %s14302_s3, 1024  ;;  %p13705_p13 = scmp.lt.s32.totalorder %s14302_s3, %s14302_s3 }
  0x6c   : > { %p13698_p10 = scmp.ne.s32.totalorder %s14302_s3, %s13697_s26  ;;  %p13706_p0 = scmp.lt.s32.totalorder %s13697_s26, %s13697_s26 }
  0x6e   : > { %p13700_p11 = pnand %p13698_p10, %p14312_p8  ;;  %p13707_p2 = por %p13706_p0, %p13705_p13 }
  0x70   : > { %p13701_p12 = pneg %p13700_p11 }
  0x72   : > { %p13708_p5 = pnand %p13707_p2, %p13701_p12 }
  0x74   : > { %13711 = shalt.err (!%p13708_p5)
}
  0x75   : > { %s19234_s20 = smov 128   ;;  %s14124_s1 = smov 8  }
  0x76   : > { %13462 = dma.hbm_to_vmem [thread:$0]  (!%p14296_p6), %s19477_s10, 1024, %s14302_s3, [#allocation13], %s19234_s20, %s19234_s20, %s14124_s1  }
  0x77   : > { %s14125_s22 = smov [#allocation15]   ;;  %s14126_s27 = smov [#allocation18]  }
  0x78   : > { %s648_s29 = sshll.u32 %s14125_s22, 4  ;;  %s674_s28 = sshll.u32 %s14126_s27, 4  ;;  %s649_s29 = int_to_ptr.vmem [resolvable:$true] %s648_s29  ;;  %s675_s28 = int_to_ptr.vmem [resolvable:$true] %s674_s28 }
  0x79   : > { %s13712_s6 = scalar_lea.hbm %s19203_s12, 32 }
  0x7a   : > { %p13713_p7 = scmp.ne.s32.totalorder %s19203_s12, %s13712_s6  ;;  %p13719_p1 = scmp.lt.u32.totalorder %s13712_s6, %s19203_s12 }
  0x7c   : > { %p13715_p9 = pnand %p13713_p7, %p14312_p8 }
  0x7e   : > { %p13716_p4 = pneg %p13715_p9 }
  0x80   : > { %p13721_p3 = pnand %p13719_p1, %p13716_p4 }
  0x82   : > { %13724 = shalt.err (!%p13721_p3)
}
  0x83   : > { %s13725_s3 = scalar_lea.vmem %s649_s29, 32  ;;  %p13733_p13 = scmp.lt.s32.totalorder %s649_s29, %s649_s29 }
  0x84   : > { %p13726_p10 = scmp.ne.s32.totalorder %s649_s29, %s13725_s3  ;;  %p13734_p0 = scmp.lt.s32.totalorder %s13725_s3, %s13725_s3 }
  0x86   : > { %p13728_p11 = pnand %p13726_p10, %p14312_p8  ;;  %p13735_p2 = por %p13734_p0, %p13733_p13 }
  0x88   : > { %p13729_p12 = pneg %p13728_p11 }
  0x8a   : > { %p13736_p5 = pnand %p13735_p2, %p13729_p12 }
  0x8c   : > { %13739 = shalt.err (!%p13736_p5)
}
  0x8d   : > { %s19478_s8 = smov 1   ;;  %s19479_s24 = smov 16  }
  0x8e   : > { %13468 = dma.hbm_to_vmem [thread:$0]  (!%p14296_p6), %s19203_s12, 32, %s649_s29, [#allocation16], %s19479_s24, %s19479_s24, %s19478_s8  }
  0x8f   : > { %s13740_s18 = scalar_lea.hbm %s19205_s14, 32 }
  0x90   : > { %p13741_p7 = scmp.ne.s32.totalorder %s19205_s14, %s13740_s18  ;;  %p13747_p1 = scmp.lt.u32.totalorder %s13740_s18, %s19205_s14 }
  0x92   : > { %p13743_p9 = pnand %p13741_p7, %p14312_p8 }
  0x94   : > { %p13744_p4 = pneg %p13743_p9 }
  0x96   : > { %p13749_p3 = pnand %p13747_p1, %p13744_p4 }
  0x98   : > { %13752 = shalt.err (!%p13749_p3)
}
  0x99   : > { %s13753_s3 = scalar_lea.vmem %s675_s28, 32  ;;  %p13761_p13 = scmp.lt.s32.totalorder %s675_s28, %s675_s28 }
  0x9a   : > { %p13754_p10 = scmp.ne.s32.totalorder %s675_s28, %s13753_s3  ;;  %p13762_p0 = scmp.lt.s32.totalorder %s13753_s3, %s13753_s3 }
  0x9c   : > { %p13756_p11 = pnand %p13754_p10, %p14312_p8  ;;  %p13763_p2 = por %p13762_p0, %p13761_p13 }
  0x9e   : > { %p13757_p12 = pneg %p13756_p11 }
  0xa0   : > { %p13764_p5 = pnand %p13763_p2, %p13757_p12 }
  0xa2   : > { %13767 = shalt.err (!%p13764_p5)
}
  0xa3   : > { %13474 = dma.hbm_to_vmem [thread:$0]  (!%p14296_p6), %s19205_s14, 32, %s675_s28, [#allocation19], %s19479_s24, %s19479_s24, %s19478_s8  }
  0xa4   : > { %s14127_s4 = smov [#allocation21]   ;;  %s14128_s21 = smov [#allocation8]  }
  0xa5   : > { %s700_s6 = sshll.u32 %s14127_s4, 4  ;;  %s583_s18 = sshll.u32 %s14128_s21, 4  ;;  %s701_s6 = int_to_ptr.vmem [resolvable:$true] %s700_s6  ;;  %s584_s18 = int_to_ptr.vmem [resolvable:$true] %s583_s18 }
  0xa6   : > { %s13768_s5 = scalar_lea.hbm %s19207_s16, 1024 }
  0xa7   : > { %p13769_p7 = scmp.ne.s32.totalorder %s19207_s16, %s13768_s5  ;;  %p13775_p1 = scmp.lt.u32.totalorder %s13768_s5, %s19207_s16 }
  0xa9   : > { %p13771_p9 = pnand %p13769_p7, %p14312_p8 }
  0xab   : > { %p13772_p4 = pneg %p13771_p9 }
  0xad   : > { %p13777_p3 = pnand %p13775_p1, %p13772_p4 }
  0xaf   : > { %13780 = shalt.err (!%p13777_p3)
}
  0xb0   : > { %s13781_s28 = scalar_lea.vmem %s701_s6, 1024  ;;  %p13789_p13 = scmp.lt.s32.totalorder %s701_s6, %s701_s6 }
  0xb1   : > { %p13782_p10 = scmp.ne.s32.totalorder %s701_s6, %s13781_s28  ;;  %p13790_p0 = scmp.lt.s32.totalorder %s13781_s28, %s13781_s28 }
  0xb3   : > { %p13784_p11 = pnand %p13782_p10, %p14312_p8  ;;  %p13791_p2 = por %p13790_p0, %p13789_p13 }
  0xb5   : > { %p13785_p12 = pneg %p13784_p11 }
  0xb7   : > { %p13792_p5 = pnand %p13791_p2, %p13785_p12 }
  0xb9   : > { %13795 = shalt.err (!%p13792_p5)
}
  0xba   : > { %s19480_s30 = smov 128   ;;  %s19481_s7 = sld [smem:[#allocation72_spill]] }
  0xbb   : > { %13480 = dma.hbm_to_vmem [thread:$0]  (!%p14296_p6), %s19207_s16, 1024, %s701_s6, [#allocation22], %s19480_s30, %s19480_s30, %s14124_s1  }
  0xc0   : > { %s13796_s27 = scalar_lea.hbm %s19481_s7, 128 }
  0xc1   : > { %p13797_p7 = scmp.ne.s32.totalorder %s19481_s7, %s13796_s27  ;;  %p13803_p1 = scmp.lt.u32.totalorder %s13796_s27, %s19481_s7 }
  0xc3   : > { %p13799_p9 = pnand %p13797_p7, %p14312_p8 }
  0xc5   : > { %p13800_p4 = pneg %p13799_p9 }
  0xc7   : > { %p13805_p3 = pnand %p13803_p1, %p13800_p4 }
  0xc9   : > { %13808 = shalt.err (!%p13805_p3)
}
  0xca   : > { %s13809_s28 = scalar_lea.vmem %s584_s18, 128  ;;  %p13817_p13 = scmp.lt.s32.totalorder %s584_s18, %s584_s18 }
  0xcb   : > { %p13810_p10 = scmp.ne.s32.totalorder %s584_s18, %s13809_s28  ;;  %p13818_p0 = scmp.lt.s32.totalorder %s13809_s28, %s13809_s28 }
  0xcd   : > { %p13812_p11 = pnand %p13810_p10, %p14312_p8  ;;  %p13819_p2 = por %p13818_p0, %p13817_p13 }
  0xcf   : > { %p13813_p12 = pneg %p13812_p11 }
  0xd1   : > { %p13820_p5 = pnand %p13819_p2, %p13813_p12 }
  0xd3   : > { %13823 = shalt.err (!%p13820_p5)
}
  0xd4   : > { %13453 = dma.hbm_to_vmem [thread:$0]  (!%p14296_p6), %s19481_s7, 128, %s584_s18, [#allocation7], %s19479_s24, %s19479_s24, %s19478_s8  }
  0xd5   : > { %s14129_s30 = smov [#allocation11]   ;;  %s14130_s4 = smov [#allocation14]  }
  0xd6   : > { %s609_s20 = sshll.u32 %s14129_s30, 4  ;;  %s635_s21 = sshll.u32 %s14130_s4, 4  ;;  %s610_s20 = int_to_ptr.vmem [resolvable:$true] %s609_s20  ;;  %s636_s21 = int_to_ptr.vmem [resolvable:$true] %s635_s21 }
  0xd7   : > { %s19482_s9 = sld [smem:[#allocation74_spill]] }
  0xdd   : > { %s13824_s5 = scalar_lea.hbm %s19482_s9, 128 }
  0xde   : > { %p13825_p7 = scmp.ne.s32.totalorder %s19482_s9, %s13824_s5  ;;  %p13831_p1 = scmp.lt.u32.totalorder %s13824_s5, %s19482_s9 }
  0xe0   : > { %p13827_p9 = pnand %p13825_p7, %p14312_p8 }
  0xe2   : > { %p13828_p4 = pneg %p13827_p9 }
  0xe4   : > { %p13833_p3 = pnand %p13831_p1, %p13828_p4 }
  0xe6   : > { %13836 = shalt.err (!%p13833_p3)
}
  0xe7   : > { %s13837_s18 = scalar_lea.vmem %s610_s20, 128  ;;  %p13845_p13 = scmp.lt.s32.totalorder %s610_s20, %s610_s20 }
  0xe8   : > { %p13838_p10 = scmp.ne.s32.totalorder %s610_s20, %s13837_s18  ;;  %p13846_p0 = scmp.lt.s32.totalorder %s13837_s18, %s13837_s18 }
  0xea   : > { %p13840_p11 = pnand %p13838_p10, %p14312_p8  ;;  %p13847_p2 = por %p13846_p0, %p13845_p13 }
  0xec   : > { %p13841_p12 = pneg %p13840_p11 }
  0xee   : > { %p13848_p5 = pnand %p13847_p2, %p13841_p12 }
  0xf0   : > { %13851 = shalt.err (!%p13848_p5)
}
  0xf1   : > { %13459 = dma.hbm_to_vmem [thread:$0]  (!%p14296_p6), %s19482_s9, 128, %s610_s20, [#allocation10], %s19479_s24, %s19479_s24, %s19478_s8  }
  0xf2   : > { %s19483_s11 = sld [smem:[#allocation76_spill]] }
  0xf8   : > { %s13852_s22 = scalar_lea.hbm %s19483_s11, 32 }
  0xf9   : > { %p13853_p7 = scmp.ne.s32.totalorder %s19483_s11, %s13852_s22  ;;  %p13859_p1 = scmp.lt.u32.totalorder %s13852_s22, %s19483_s11 }
  0xfb   : > { %p13855_p9 = pnand %p13853_p7, %p14312_p8 }
  0xfd   : > { %p13856_p4 = pneg %p13855_p9 }
  0xff   : > { %p13861_p3 = pnand %p13859_p1, %p13856_p4 }
 0x101   : > { %13864 = shalt.err (!%p13861_p3)
}
 0x102   : > { %s13865_s29 = scalar_lea.vmem %s636_s21, 32  ;;  %p13873_p13 = scmp.lt.s32.totalorder %s636_s21, %s636_s21 }
 0x103   : > { %p13866_p10 = scmp.ne.s32.totalorder %s636_s21, %s13865_s29  ;;  %p13874_p0 = scmp.lt.s32.totalorder %s13865_s29, %s13865_s29 }
 0x105   : > { %p13868_p11 = pnand %p13866_p10, %p14312_p8  ;;  %p13875_p2 = por %p13874_p0, %p13873_p13 }
 0x107   : > { %p13869_p12 = pneg %p13868_p11 }
 0x109   : > { %p13876_p5 = pnand %p13875_p2, %p13869_p12 }
 0x10b   : > { %13879 = shalt.err (!%p13876_p5)
}
 0x10c   : > { %13465 = dma.hbm_to_vmem [thread:$0]  (!%p14296_p6), %s19483_s11, 32, %s636_s21, [#allocation13], %s19479_s24, %s19479_s24, %s19478_s8  }
 0x10d   : > { %s14131_s18 = smov [#allocation17]   ;;  %s14132_s6 = smov [#allocation20]  }
 0x10e   : > { %s661_s1 = sshll.u32 %s14131_s18, 4  ;;  %s687_s30 = sshll.u32 %s14132_s6, 4  ;;  %s662_s1 = int_to_ptr.vmem [resolvable:$true] %s661_s1  ;;  %s688_s30 = int_to_ptr.vmem [resolvable:$true] %s687_s30 }
 0x10f   : > { %s13880_s27 = scalar_lea.hbm %s19204_s13, 32 }
 0x110   : > { %p13881_p7 = scmp.ne.s32.totalorder %s19204_s13, %s13880_s27  ;;  %p13887_p1 = scmp.lt.u32.totalorder %s13880_s27, %s19204_s13 }
 0x112   : > { %p13883_p9 = pnand %p13881_p7, %p14312_p8 }
 0x114   : > { %p13884_p4 = pneg %p13883_p9 }
 0x116   : > { %p13889_p3 = pnand %p13887_p1, %p13884_p4 }
 0x118   : > { %13892 = shalt.err (!%p13889_p3)
}
 0x119   : > { %s13893_s21 = scalar_lea.vmem %s662_s1, 32  ;;  %p13901_p13 = scmp.lt.s32.totalorder %s662_s1, %s662_s1 }
 0x11a   : > { %p13894_p10 = scmp.ne.s32.totalorder %s662_s1, %s13893_s21  ;;  %p13902_p0 = scmp.lt.s32.totalorder %s13893_s21, %s13893_s21 }
 0x11c   : > { %p13896_p11 = pnand %p13894_p10, %p14312_p8  ;;  %p13903_p2 = por %p13902_p0, %p13901_p13 }
 0x11e   : > { %p13897_p12 = pneg %p13896_p11 }
 0x120   : > { %p13904_p5 = pnand %p13903_p2, %p13897_p12 }
 0x122   : > { %13907 = shalt.err (!%p13904_p5)
}
 0x123   : > { %13471 = dma.hbm_to_vmem [thread:$0]  (!%p14296_p6), %s19204_s13, 32, %s662_s1, [#allocation16], %s19479_s24, %s19479_s24, %s19478_s8  }
 0x124   : > { %s13908_s4 = scalar_lea.hbm %s19206_s15, 32 }
 0x125   : > { %p13909_p7 = scmp.ne.s32.totalorder %s19206_s15, %s13908_s4  ;;  %p13915_p1 = scmp.lt.u32.totalorder %s13908_s4, %s19206_s15 }
 0x127   : > { %p13911_p9 = pnand %p13909_p7, %p14312_p8 }
 0x129   : > { %p13912_p4 = pneg %p13911_p9 }
 0x12b   : > { %p13917_p3 = pnand %p13915_p1, %p13912_p4 }
 0x12d   : > { %13920 = shalt.err (!%p13917_p3)
}
 0x12e   : > { %s13921_s3 = scalar_lea.vmem %s688_s30, 32  ;;  %p13929_p13 = scmp.lt.s32.totalorder %s688_s30, %s688_s30 }
 0x12f   : > { %p13922_p10 = scmp.ne.s32.totalorder %s688_s30, %s13921_s3  ;;  %p13930_p0 = scmp.lt.s32.totalorder %s13921_s3, %s13921_s3 }
 0x131   : > { %p13924_p11 = pnand %p13922_p10, %p14312_p8  ;;  %p13931_p2 = por %p13930_p0, %p13929_p13 }
 0x133   : > { %p13925_p12 = pneg %p13924_p11 }
 0x135   : > { %p13932_p5 = pnand %p13931_p2, %p13925_p12 }
 0x137   : > { %13935 = shalt.err (!%p13932_p5)
}
 0x138   : > { %13477 = dma.hbm_to_vmem [thread:$0]  (!%p14296_p6), %s19206_s15, 32, %s688_s30, [#allocation19], %s19479_s24, %s19479_s24, %s19478_s8  }
 0x139   : > { %s14133_s21 = smov [#allocation23]   ;;  %s14134_s28 = smov [#allocation24]  }
 0x13a   : > { %s713_s20 = sshll.u32 %s14133_s21, 4  ;;  %s729_s18 = sshll.u32 %s14134_s28, 4  ;;  %s714_s20 = int_to_ptr.vmem [resolvable:$true] %s713_s20  ;;  %s730_s18 = int_to_ptr.vmem [resolvable:$true] %s729_s18 }
 0x13b   : > { %s13936_s22 = scalar_lea.hbm %s19208_s17, 32 }
 0x13c   : > { %p13937_p7 = scmp.ne.s32.totalorder %s19208_s17, %s13936_s22  ;;  %p13943_p1 = scmp.lt.u32.totalorder %s13936_s22, %s19208_s17 }
 0x13e   : > { %p13939_p9 = pnand %p13937_p7, %p14312_p8 }
 0x140   : > { %p13940_p4 = pneg %p13939_p9 }
 0x142   : > { %p13945_p3 = pnand %p13943_p1, %p13940_p4 }
 0x144   : > { %13948 = shalt.err (!%p13945_p3)
}
 0x145   : > { %s13949_s30 = scalar_lea.vmem %s714_s20, 32  ;;  %p13957_p13 = scmp.lt.s32.totalorder %s714_s20, %s714_s20 }
 0x146   : > { %p13950_p10 = scmp.ne.s32.totalorder %s714_s20, %s13949_s30  ;;  %p13958_p0 = scmp.lt.s32.totalorder %s13949_s30, %s13949_s30 }
 0x148   : > { %p13952_p11 = pnand %p13950_p10, %p14312_p8  ;;  %p13959_p2 = por %p13958_p0, %p13957_p13 }
 0x14a   : > { %p13953_p12 = pneg %p13952_p11 }
 0x14c   : > { %p13960_p5 = pnand %p13959_p2, %p13953_p12 }
 0x14e   : > { %13963 = shalt.err (!%p13960_p5)
}
 0x14f   : > { %13483 = dma.hbm_to_vmem [thread:$0]  (!%p14296_p6), %s19208_s17, 32, %s714_s20, [#allocation22], %s19479_s24, %s19479_s24, %s19478_s8  }
 0x150   : > { %s13964_s6 = scalar_lea.hbm %s19210_s19, 32 }
 0x151   : > { %p13965_p7 = scmp.ne.s32.totalorder %s19210_s19, %s13964_s6  ;;  %p13971_p1 = scmp.lt.u32.totalorder %s13964_s6, %s19210_s19 }
 0x153   : > { %p13967_p9 = pnand %p13965_p7, %p14312_p8 }
 0x155   : > { %p13968_p4 = pneg %p13967_p9 }
 0x157   : > { %p13973_p3 = pnand %p13971_p1, %p13968_p4 }
 0x159   : > { %13976 = shalt.err (!%p13973_p3)
}
 0x15a   : > { %s13977_s26 = scalar_lea.vmem %s730_s18, 32  ;;  %p13985_p13 = scmp.lt.s32.totalorder %s730_s18, %s730_s18 }
 0x15b   : > { %p13978_p10 = scmp.ne.s32.totalorder %s730_s18, %s13977_s26  ;;  %p13986_p0 = scmp.lt.s32.totalorder %s13977_s26, %s13977_s26 }
 0x15d   : > { %p13980_p11 = pnand %p13978_p10, %p14312_p8  ;;  %p13987_p2 = por %p13986_p0, %p13985_p13 }
 0x15f   : > { %p13981_p12 = pneg %p13980_p11 }
 0x161   : > { %p13988_p5 = pnand %p13987_p2, %p13981_p12 }
 0x163   : > { %13991 = shalt.err (!%p13988_p5)
}
 0x164   : > { %s19484_s25 = sld [smem:[#allocation37_spill]]  ;;  %s19485_s30 = sld [smem:[#allocation36_spill]] }
 0x165   : > { %s19486_s1 = sld [smem:[#allocation38_spill]]  ;;  %s12351_s2 = sadd.s32 4294967294, %s14116_s23  }
 0x166   : > { %13486 = dma.hbm_to_vmem [thread:$0]  (!%p14296_p6), %s19210_s19, 32, %s730_s18, [#allocation25], %s19479_s24, %s19479_s24, %s19478_s8  }
 0x167   : > { %s14592_s29 = sadd.s32 1, %s14116_s23   ;;  %s54_s21 = sadd.s32 1, %s14112_s0 }
 0x168   : > { %s51_s28 = ssub.s32 %s14116_s23, %s14592_s29  ;;  %p62_p9 = scmp.eq.s32.totalorder %s14116_s23, 0 }
 0x169   : > { %p52_p7 = scmp.eq.s32.totalorder %s51_s28, 0  ;;  %p538_p12 = scmp.eq.s32.totalorder %s12351_s2, 1 }
 0x16a   : > { %p61_p8 = scmp.ne.s32.totalorder %s14112_s0, %s19484_s25  ;;  %p67_p4 = scmp.ne.s32.totalorder %s19484_s25, %s19485_s30 }
 0x16b   : > { %p532_p1 = scmp.eq.s32.totalorder %s19486_s1, 1  ;;  %p19487_p10 = scmp.eq.s32.totalorder %s19486_s1, 0 }
 0x16c   : > { %s14604_s6 = scalar_select %p52_p7, %s14112_s0, %s54_s21  }
 0x16d   : > { %p63_p3 = por %p62_p9, %p61_p8  ;;  %p14608_p11 = por %p19487_p10, %p67_p4 }
 0x16e   : > { %p14612_p6 = por %p532_p1, %p61_p8  ;;  %p13508_p13 = scmp.lt.s32.totalorder %s14116_s23, 2 }
 0x16f   : > { %s749_s24 = sand.u32 1, %s14112_s0   ;;  %p14618_p0 = por %p538_p12, %p67_p4 }
 0x170   : > { %s19489_s8 = scalar_select %p14612_p6, 1, 0 }
 0x171   : > { %s19490_s18 = scalar_select %p14618_p0, 1, 0 }
 0x172   : > { %s12367_s22 = sshll.u32 %s749_s24, 11  ;;  %s12548_s27 = sshll.u32 %s14116_s23, 15 }
 0x173   : > { %s19491_s20 = sld [smem:[#allocation65_spill]]  ;;  %s753_s25 = scalar_lea.vmem [#allocation3], %s12367_s22 }
 0x174   : > { %s760_s30 = sshll.u32 %s753_s25, 4  ;;  %p14628_p2 = pnand %p13508_p13, %p63_p3  ;;  %s14632_s30 = int_to_ptr.vmem [resolvable:$true] %s760_s30 }
 0x175   : > { %s14634_s2 = scalar_lea.sflag [#allocation4], %s749_s24 }
 0x176   : > { %p13994_p8 = pneg %p14628_p2 }
 0x179   : > { %s14626_s3 = scalar_lea.hbm %s19491_s20, %s12548_s27  ;;  %s13997_s27 = scalar_lea.hbm %s19491_s20, 65536 }
 0x17a   : > { %s13992_s21 = scalar_lea.hbm %s14626_s3, 32768  ;;  %p13998_p4 = scmp.lt.u32.totalorder %s14626_s3, %s19491_s20 }
 0x17b   : > { %p13993_p5 = scmp.ne.s32.totalorder %s14626_s3, %s13992_s21  ;;  %p13999_p1 = scmp.lt.u32.totalorder %s13997_s27, %s13992_s21 }
 0x17c   : > { %p14001_p10 = scmp.lt.u32.totalorder %s13992_s21, %s14626_s3 }
 0x17d   : > { %p13995_p7 = pnand %p13994_p8, %p13993_p5  ;;  %p14000_p3 = por %p13999_p1, %p13998_p4 }
 0x17f   : > { %p13996_p9 = pneg %p13995_p7  ;;  %p14002_p12 = por %p14001_p10, %p14000_p3 }
 0x181   : > { %p14003_p13 = pnand %p14002_p12, %p13996_p9 }
 0x183   : > { %14006 = shalt.err (!%p14003_p13)
}
 0x184   : > { %s14007_s24 = scalar_lea.vmem %s14632_s30, 32768  ;;  %s14135_s25 = smov [#allocation3]  }
 0x185   : > { %p14008_p5 = scmp.ne.s32.totalorder %s14632_s30, %s14007_s24  ;;  %s14012_s28 = sshll.u32 %s14135_s25, 4  ;;  %s14013_s28 = int_to_ptr.vmem [resolvable:$false] %s14012_s28 }
 0x186   : > { %s14014_s22 = scalar_lea.vmem %s14013_s28, 65536  ;;  %p14015_p6 = scmp.lt.s32.totalorder %s14632_s30, %s14013_s28 }
 0x187   : > { %p14010_p7 = pnand %p14008_p5, %p13994_p8  ;;  %p14016_p4 = scmp.lt.s32.totalorder %s14014_s22, %s14007_s24 }
 0x189   : > { %p14011_p0 = pneg %p14010_p7  ;;  %p14017_p1 = por %p14016_p4, %p14015_p6 }
 0x18b   : > { %p14018_p3 = pnand %p14017_p1, %p14011_p0 }
 0x18d   : > { %14021 = shalt.err (!%p14018_p3)
}
 0x18e   : > { %s14136_s21 = smov 1024   ;;  %s14137_s27 = smov 64  }
 0x18f   : > { %13490 = dma.hbm_to_vmem [thread:$0]  (!%p14628_p2), %s14626_s3, 32768, %s14632_s30, %s14634_s2, %s14136_s21, %s14136_s21, %s14137_s27  }
 0x190   : > { %s19493_s5 = sld [smem:[#allocation39_spill]] }
 0x196   : > { %p19494_p8 = scmp.ne.s32.totalorder %s19493_s5, 0 }
 0x198   : > { %772 = sbr.rel (%p19494_p8) target bundleno = 8680 (0x21e8), region = 108 }
 0x19f   : > { %s19495_s26 = sld [smem:[#allocation37_spill]] }
 0x1a5   : > { %s14665_s25 = sand.u32 1, %s19495_s26  }
 0x1a6   : > { %s12371_s24 = sshll.u32 %s14665_s25, 11  ;;  %s775_s28 = scalar_lea.sflag [#allocation4], %s14665_s25 }
 0x1a7   : > { %s14669_s22 = scalar_lea.vmem [#allocation3], %s12371_s24 }
 0x1a8   : > { %14067 = dma.done.wait (%p14608_p11), %s775_s28, 32768  }
 0x1a9   : > { %14069 = vsyncadd (%p14608_p11), %s775_s28, 4294934528  ;;  %s19496_s1 = sld [smem:[#allocation38_spill]] }
 0x1af   : > { %p19497_p6 = scmp.eq.s32.totalorder %s19496_s1, 0 }
 0x1b1   : > { %14071 = dma.done.wait (%p19497_p6), [#allocation7], 256   ;;  %p19498_p0 = pmov %p19497_p6 }
 0x1b3   : > { %14073 = vsyncadd (%p19498_p0), [#allocation7], 4294967040  ;;  %p19499_p2 = pmov %p19498_p0 }
 0x1b4   : > { %p19500_p9 = pmov %p19498_p0 }
 0x1b5   : > { %14075 = dma.done.wait (%p19499_p2), [#allocation10], 256  }
 0x1b6   : > { %14077 = vsyncadd (%p19500_p9), [#allocation10], 4294967040  ;;  %p19501_p10 = pmov %p19498_p0 }
 0x1b7   : > { %p19502_p12 = pmov %p19498_p0 }
 0x1b8   : > { %14079 = dma.done.wait (%p19501_p10), [#allocation13], 1056  }
 0x1b9   : > { %14081 = vsyncadd (%p19502_p12), [#allocation13], 4294966240  ;;  %p19503_p11 = pmov %p19498_p0 }
 0x1ba   : > { %p19504_p13 = pmov %p19498_p0 }
 0x1bb   : > { %14083 = dma.done.wait (%p19503_p11), [#allocation16], 64  }
 0x1bc   : > { %14085 = vsyncadd (%p19504_p13), [#allocation16], 4294967232  ;;  %p19505_p5 = pmov %p19498_p0 }
 0x1bd   : > { %p19506_p7 = pmov %p19498_p0 }
 0x1be   : > { %14087 = dma.done.wait (%p19505_p5), [#allocation19], 64  }
 0x1bf   : > { %14089 = vsyncadd (%p19506_p7), [#allocation19], 4294967232  ;;  %p19507_p4 = pmov %p19498_p0 }
 0x1c0   : > { %p19508_p1 = pmov %p19498_p0 }
 0x1c1   : > { %14091 = dma.done.wait (%p19507_p4), [#allocation22], 1056  }
 0x1c2   : > { %14093 = vsyncadd (%p19508_p1), [#allocation22], 4294966240  ;;  %p19509_p3 = pmov %p19498_p0 }
 0x1c3   : > { %p19510_p8 = pmov %p19498_p0 }
 0x1c4   : > { %14095 = dma.done.wait (%p19509_p3), [#allocation25], 32  }
 0x1c5   : > { %14097 = vsyncadd (%p19510_p8), [#allocation25], 4294967264  ;;  %v1149_v1 = vlaneseq  ;;  %v923_v15 = vld [vmem:[%s14669_s22 + $0x100] sm:$0xff]  ;;  %v924_v19 = vld [vmem:[%s14669_s22 + $0x108] sm:$0xff]  ;;  %s19513_s30 = sld [smem:[#allocation66_spill]]  ;;  %s19529_s27 = sld [smem:[#allocation69_spill]] }
 0x1c6   : > { %v925_v20 = vld [vmem:[%s14669_s22 + $0x110] sm:$0xff]  ;;  %v1147_v21 = vld [vmem:[#allocation6] sm:$0xff]  ;;  %v926_v23 = vld [vmem:[%s14669_s22 + $0x118] sm:$0xff]  ;;  %vm14140_vm0 = vmmov 0   ;;  %vm2176_vm1 = vcmask 130112   ;;  %vm2183_vm2 = vcmask 195712  }
 0x1c7   : > { %v1150_v2 = vshrl.u32 %v1149_v1, 7  ;;  %v2166_v3 = vand.u32 127, %v1149_v1  ;;  %v891_v31 = vld [vmem:[%s14669_s22] sm:$0xff]  ;;  %v892_v32 = vld [vmem:[%s14669_s22 + $0x8] sm:$0xff]  ;;  %v893_v33 = vld [vmem:[%s14669_s22 + $0x10] sm:$0xff]  ;;  %vm2190_vm3 = vcmask 261312  }
 0x1c8   : > { %v927_v34 = vld [vmem:[%s14669_s22 + $0x120] sm:$0xff]  ;;  %v928_v35 = vld [vmem:[%s14669_s22 + $0x128] sm:$0xff]  ;;  %v929_v36 = vld [vmem:[%s14669_s22 + $0x130] sm:$0xff]  ;;  %vm2325_vm4 = vcmask 1041409   ;;  %vm2327_vm5 = vcmask 1042434   ;;  %vm2329_vm6 = vcmask 1043459  }
 0x1c9   : > { %v14703_v4 = vsub.s32 0, %v1150_v2  ;;  %v14705_v5 = vsub.s32 1, %v1150_v2  ;;  %v14707_v6 = vsub.s32 2, %v1150_v2  ;;  %v14709_v7 = vsub.s32 3, %v1150_v2  ;;  %v930_v40 = vld [vmem:[%s14669_s22 + $0x138] sm:$0xff]  ;;  %v931_v44 = vld [vmem:[%s14669_s22 + $0x140] sm:$0xff] }
 0x1ca   : > { %v14711_v8 = vsub.s32 %v2166_v3, %v1150_v2  ;;  %v2171_v9 = vadd.s32 4294967288, %v2166_v3  ;;  %v2178_v10 = vadd.s32 4294967280, %v2166_v3  ;;  %v2185_v11 = vadd.s32 4294967272, %v2166_v3  ;;  %v894_v43 = vld [vmem:[%s14669_s22 + $0x18] sm:$0xff]  ;;  %v895_v46 = vld [vmem:[%s14669_s22 + $0x20] sm:$0xff]  ;;  %v932_v50 = vld [vmem:[%s14669_s22 + $0x148] sm:$0xff] }
 0x1cb   : > { %v14713_v12 = vsub.s32 4, %v1150_v2  ;;  %v14715_v13 = vsub.s32 5, %v1150_v2  ;;  %v14717_v14 = vsub.s32 6, %v1150_v2  ;;  %v14728_v22 = vsub.s32 7, %v1150_v2  ;;  %v933_v51 = vld [vmem:[%s14669_s22 + $0x150] sm:$0xff]  ;;  %v896_v55 = vld [vmem:[%s14669_s22 + $0x28] sm:$0xff] }
 0x1cc   : > { %v14720_v16 = vsub.s32 %v2171_v9, %v1150_v2  ;;  %v14722_v17 = vsub.s32 %v2178_v10, %v1150_v2  ;;  %v14724_v18 = vsub.s32 %v2185_v11, %v1150_v2  ;;  %v14732_v24 = vrot.slane %v1147_v21, %v14703_v4  ;;  %v897_v56 = vld [vmem:[%s14669_s22 + $0x30] sm:$0xff]  ;;  %v934_v60 = vld [vmem:[%s14669_s22 + $0x158] sm:$0xff]  ;;  %v899_v62 = vld [vmem:[%s14669_s22 + $0x40] sm:$0xff]  ;;  %s19531_s24 = sld [smem:[#allocation70_spill]]  ;;  %s19534_s2 = sld [smem:[#allocation71_spill]] }
 0x1cd   : > { %19511 = vst [vmem:[#allocation40_spill] sm:$0xff] %v14717_v14  ;;  %19512 = vst [vmem:[#allocation41_spill] sm:$0xff] %v14728_v22  ;;  %v14735_v25 = vrot.slane %v1147_v21, %v14705_v5  ;;  %v14738_v26 = vrot.slane %v1147_v21, %v14707_v6  ;;  %v14741_v27 = vrot.slane %v1147_v21, %v14709_v7  ;;  %v900_v63 = vld [vmem:[%s14669_s22 + $0x48] sm:$0xff]  ;;  %v898_v1 = vld [vmem:[%s14669_s22 + $0x38] sm:$0xff]  ;;  %vm2331_vm7 = vcmask 1044484   ;;  %s19635_s21 = sld [smem:[#allocation77_spill]] }
 0x1ce   : > { %v14744_v28 = vrot.slane %v1147_v21, %v14713_v12  ;;  %v14747_v29 = vrot.slane %v1147_v21, %v14715_v13  ;;  %v14750_v30 = vrot.slane %v1147_v21, %v14717_v14  ;;  %v1221_v37 = vmul.f32 %v14732_v24, %v923_v15  ;;  %v901_v10 = vld [vmem:[%s14669_s22 + $0x50] sm:$0xff]  ;;  %s19923_s28 = sld [smem:[#allocation78_spill]]  ;;  %s19925_s7 = sld [smem:[#allocation79_spill]] }
 0x1cf   : > { %v1222_v38 = vmul.f32 %v14735_v25, %v924_v19  ;;  %v1223_v39 = vmul.f32 %v14738_v26, %v925_v20  ;;  %v14763_v41 = vrot.slane %v1147_v21, %v14728_v22  ;;  %v1224_v42 = vmul.f32 %v14741_v27, %v926_v23  ;;  %v935_v21 = vld [vmem:[%s14669_s22 + $0x160] sm:$0xff]  ;;  %v936_v23 = vld [vmem:[%s14669_s22 + $0x168] sm:$0xff]  ;;  %s12545_s9 = sshll.u32 %s19496_s1, 7  ;;  %s19926_s10 = sld [smem:[#allocation80_spill]] }
 0x1d0   : > { %v1189_v47 = vmul.f32 %v14732_v24, %v891_v31  ;;  %v1190_v48 = vmul.f32 %v14735_v25, %v892_v32  ;;  %v1191_v49 = vmul.f32 %v14738_v26, %v893_v33  ;;  %v1225_v52 = vmul.f32 %v14744_v28, %v927_v34  ;;  %v937_v31 = vld [vmem:[%s14669_s22 + $0x170] sm:$0xff]  ;;  %v902_v34 = vld [vmem:[%s14669_s22 + $0x58] sm:$0xff]  ;;  %s12144_s5 = scalar_lea.sflag [#allocation5], %s14665_s25  ;;  %p19927_p0 = scmp.ne.s32.totalorder %s19489_s8, 0 }
 0x1d1   : > { %v1481_v45 = vadd.f32 %v1222_v38, %v1221_v37  ;;  %v1226_v53 = vmul.f32 %v14747_v29, %v928_v35  ;;  %v1227_v54 = vmul.f32 %v14750_v30, %v929_v36  ;;  %v1192_v58 = vmul.f32 %v14741_v27, %v894_v43  ;;  %v939_v43 = vld [vmem:[%s14669_s22 + $0x180] sm:$0xff]  ;;  %s14142_s1 = smov [#allocation26]  }
 0x1d2   : > { %v1445_v59 = vadd.f32 %v1190_v48, %v1189_v47  ;;  %v1229_v61 = vmul.f32 %v14732_v24, %v931_v44  ;;  %v1228_v0 = vmul.f32 %v14763_v41, %v930_v40  ;;  %v1193_v2 = vmul.f32 %v14744_v28, %v895_v46  ;;  %v938_v40 = vld [vmem:[%s14669_s22 + $0x178] sm:$0xff]  ;;  %v940_v44 = vld [vmem:[%s14669_s22 + $0x188] sm:$0xff] }
 0x1d3   : > { %v1482_v57 = vadd.f32 %v1481_v45, %v1223_v39  ;;  %v1230_v3 = vmul.f32 %v14735_v25, %v932_v50  ;;  %v1231_v9 = vmul.f32 %v14738_v26, %v933_v51  ;;  %v1194_v15 = vmul.f32 %v14747_v29, %v896_v55  ;;  %v905_v55 = vld [vmem:[%s14669_s22 + $0x70] sm:$0xff] }
 0x1d4   : > { %v1195_v19 = vmul.f32 %v14750_v30, %v897_v56  ;;  %v1446_v20 = vadd.f32 %v1445_v59, %v1191_v49  ;;  %v1232_v32 = vmul.f32 %v14741_v27, %v934_v60  ;;  %v1197_v35 = vmul.f32 %v14732_v24, %v899_v62  ;;  %v903_v49 = vld [vmem:[%s14669_s22 + $0x60] sm:$0xff] }
 0x1d5   : > { %v1483_v11 = vadd.f32 %v1482_v57, %v1224_v42  ;;  %v1490_v33 = vadd.f32 %v1230_v3, %v1229_v61  ;;  %v1198_v36 = vmul.f32 %v14735_v25, %v900_v63  ;;  %v1196_v38 = vmul.f32 %v14763_v41, %v898_v1  ;;  %v942_v61 = vld [vmem:[%s14669_s22 + $0x198] sm:$0xff]  ;;  %s19147_s11 = scalar_lea.hbm %s19926_s10, %s12545_s9 }
 0x1d6   : > { %v1447_v39 = vadd.f32 %v1446_v20, %v1192_v58  ;;  %v1199_v42 = vmul.f32 %v14738_v26, %v901_v10  ;;  %v1233_v45 = vmul.f32 %v14744_v28, %v935_v21  ;;  %v1234_v46 = vmul.f32 %v14747_v29, %v936_v23  ;;  %v941_v58 = vld [vmem:[%s14669_s22 + $0x190] sm:$0xff]  ;;  %v908_v10 = vld [vmem:[%s14669_s22 + $0x88] sm:$0xff]  ;;  %v906_v20 = vld [vmem:[%s14669_s22 + $0x78] sm:$0xff] }
 0x1d7   : > { %v1484_v37 = vadd.f32 %v1483_v11, %v1225_v52  ;;  %v1235_v47 = vmul.f32 %v14750_v30, %v937_v31  ;;  %v1491_v48 = vadd.f32 %v1490_v33, %v1231_v9  ;;  %v904_v52 = vld [vmem:[%s14669_s22 + $0x68] sm:$0xff]  ;;  %v1200_v56 = vmul.f32 %v14741_v27, %v902_v34  ;;  %v907_v9 = vld [vmem:[%s14669_s22 + $0x80] sm:$0xff] }
 0x1d8   : > { %v1448_v51 = vadd.f32 %v1447_v39, %v1193_v2  ;;  %v1454_v57 = vadd.f32 %v1198_v36, %v1197_v35  ;;  %v1236_v59 = vmul.f32 %v14763_v41, %v938_v40  ;;  %v1237_v62 = vmul.f32 %v14732_v24, %v939_v43  ;;  %v943_v34 = vld [vmem:[%s14669_s22 + $0x1a0] sm:$0xff]  ;;  %v944_v35 = vld [vmem:[%s14669_s22 + $0x1a8] sm:$0xff]  ;;  %v945_v39 = vld [vmem:[%s14669_s22 + $0x1b0] sm:$0xff] }
 0x1d9   : > { %v1485_v50 = vadd.f32 %v1484_v37, %v1226_v53  ;;  %v1492_v60 = vadd.f32 %v1491_v48, %v1232_v32  ;;  %v1238_v63 = vmul.f32 %v14735_v25, %v940_v44  ;;  %v1201_v2 = vmul.f32 %v14744_v28, %v903_v49  ;;  %v909_v32 = vld [vmem:[%s14669_s22 + $0x90] sm:$0xff]  ;;  %v964_v49 = vld [vmem:[%s14669_s22 + $0x248] sm:$0xff] }
 0x1da   : > { %v1449_v1 = vadd.f32 %v1448_v51, %v1194_v15  ;;  %v1455_v3 = vadd.f32 %v1454_v57, %v1199_v42  ;;  %v1202_v21 = vmul.f32 %v14747_v29, %v904_v52  ;;  %v1203_v23 = vmul.f32 %v14750_v30, %v905_v55  ;;  %v910_v42 = vld [vmem:[%s14669_s22 + $0x98] sm:$0xff]  ;;  %v965_v57 = vld [vmem:[%s14669_s22 + $0x250] sm:$0xff] }
 0x1db   : > { %v1486_v53 = vadd.f32 %v1485_v50, %v1227_v54  ;;  %v1493_v11 = vadd.f32 %v1492_v60, %v1233_v45  ;;  %v1239_v31 = vmul.f32 %v14738_v26, %v941_v58  ;;  %v1240_v36 = vmul.f32 %v14741_v27, %v942_v61  ;;  %v946_v58 = vld [vmem:[%s14669_s22 + $0x1b8] sm:$0xff]  ;;  %v912_v61 = vld [vmem:[%s14669_s22 + $0xa8] sm:$0xff] }
 0x1dc   : > { %v1450_v54 = vadd.f32 %v1449_v1, %v1195_v19  ;;  %v1456_v15 = vadd.f32 %v1455_v3, %v1200_v56  ;;  %v1499_v40 = vadd.f32 %v1238_v63, %v1237_v62  ;;  %v1205_v43 = vmul.f32 %v14732_v24, %v907_v9  ;;  %v911_v56 = vld [vmem:[%s14669_s22 + $0xa0] sm:$0xff]  ;;  %v913_v62 = vld [vmem:[%s14669_s22 + $0xb0] sm:$0xff] }
 0x1dd   : > { %v1487_v33 = vadd.f32 %v1486_v53, %v1228_v0  ;;  %v1494_v37 = vadd.f32 %v1493_v11, %v1234_v46  ;;  %v1206_v44 = vmul.f32 %v14735_v25, %v908_v10  ;;  %v1204_v19 = vmul.f32 %v14763_v41, %v906_v20  ;;  %v963_v46 = vld [vmem:[%s14669_s22 + $0x240] sm:$0xff]  ;;  %v914_v11 = vld [vmem:[%s14669_s22 + $0xb8] sm:$0xff] }
 0x1de   : > { %v1451_v0 = vadd.f32 %v1450_v54, %v1196_v38  ;;  %v1457_v45 = vadd.f32 %v1456_v15, %v1201_v2  ;;  %v1207_v48 = vmul.f32 %v14738_v26, %v909_v32  ;;  %v1241_v51 = vmul.f32 %v14744_v28, %v943_v34  ;;  %v966_v2 = vld [vmem:[%s14669_s22 + $0x258] sm:$0xff]  ;;  %v955_v32 = vld [vmem:[%s14669_s22 + $0x200] sm:$0xff] }
 0x1df   : > { %1488 = vadd.xlane.f32.xlu1 %v1487_v33  ;;  %v1495_v50 = vadd.f32 %v1494_v37, %v1235_v47  ;;  %v1242_v52 = vmul.f32 %v14747_v29, %v944_v35  ;;  %v1500_v55 = vadd.f32 %v1499_v40, %v1239_v31  ;;  %v1243_v60 = vmul.f32 %v14750_v30, %v945_v39  ;;  %v967_v34 = vld [vmem:[%s14669_s22 + $0x260] sm:$0xff]  ;;  %v957_v35 = vld [vmem:[%s14669_s22 + $0x210] sm:$0xff]  ;;  %v968_v39 = vld [vmem:[%s14669_s22 + $0x268] sm:$0xff] }
 0x1e0   : > { %1452 = vadd.xlane.f32.xlu0 %v1451_v0  ;;  %v1458_v38 = vadd.f32 %v1457_v45, %v1202_v21  ;;  %v1208_v47 = vmul.f32 %v14741_v27, %v910_v42  ;;  %v1463_v63 = vadd.f32 %v1206_v44, %v1205_v43  ;;  %v1261_v3 = vmul.f32 %v14732_v24, %v963_v46  ;;  %v969_v40 = vld [vmem:[%s14669_s22 + $0x270] sm:$0xff]  ;;  %v958_v44 = vld [vmem:[%s14669_s22 + $0x218] sm:$0xff] }
 0x1e1   : > { %v1496_v53 = vadd.f32 %v1495_v50, %v1236_v59  ;;  %v1501_v1 = vadd.f32 %v1500_v55, %v1240_v36  ;;  %v1262_v9 = vmul.f32 %v14735_v25, %v964_v49  ;;  %v1209_v20 = vmul.f32 %v14744_v28, %v911_v56  ;;  %v956_v59 = vld [vmem:[%s14669_s22 + $0x208] sm:$0xff]  ;;  %v947_v49 = vld [vmem:[%s14669_s22 + $0x1c0] sm:$0xff]  ;;  %v970_v50 = vld [vmem:[%s14669_s22 + $0x278] sm:$0xff] }
 0x1e2   : > { %v1459_v10 = vadd.f32 %v1458_v38, %v1203_v23  ;;  %v1464_v21 = vadd.f32 %v1463_v63, %v1207_v48  ;;  %v1263_v31 = vmul.f32 %v14738_v26, %v965_v57  ;;  %v1244_v33 = vmul.f32 %v14763_v41, %v946_v58  ;;  %v949_v57 = vld [vmem:[%s14669_s22 + $0x1d0] sm:$0xff] }
 0x1e3   : > { %1497 = vadd.xlane.f32.xlu1 %v1496_v53  ;;  %v1502_v54 = vadd.f32 %v1501_v1, %v1241_v51  ;;  %v1210_v15 = vmul.f32 %v14747_v29, %v912_v61  ;;  %v1211_v23 = vmul.f32 %v14750_v30, %v913_v62  ;;  %v1264_v42 = vmul.f32 %v14741_v27, %v966_v2  ;;  %v959_v62 = vld [vmem:[%s14669_s22 + $0x220] sm:$0xff]  ;;  %v960_v1 = vld [vmem:[%s14669_s22 + $0x228] sm:$0xff]  ;;  %v961_v2 = vld [vmem:[%s14669_s22 + $0x230] sm:$0xff] }
 0x1e4   : > { %v1460_v36 = vadd.f32 %v1459_v10, %v1204_v19  ;;  %v1465_v37 = vadd.f32 %v1464_v21, %v1208_v47  ;;  %v1526_v43 = vadd.f32 %v1262_v9, %v1261_v3  ;;  %v1212_v45 = vmul.f32 %v14763_v41, %v914_v11  ;;  %v950_v9 = vld [vmem:[%s14669_s22 + $0x1d8] sm:$0xff] }
 0x1e5   : > { %v1503_v0 = vadd.f32 %v1502_v54, %v1242_v52  ;;  %v1253_v48 = vmul.f32 %v14732_v24, %v955_v32  ;;  %v1254_v46 = vmul.f32 %v14735_v25, %v956_v59  ;;  %v1265_v51 = vmul.f32 %v14744_v28, %v967_v34  ;;  %v948_v52 = vld [vmem:[%s14669_s22 + $0x1c8] sm:$0xff]  ;;  %v951_v34 = vld [vmem:[%s14669_s22 + $0x1e0] sm:$0xff] }
 0x1e6   : > { %1461 = vadd.xlane.f32.xlu0 %v1460_v36  ;;  %v1466_v19 = vadd.f32 %v1465_v37, %v1209_v20  ;;  %v1527_v55 = vadd.f32 %v1526_v43, %v1263_v31  ;;  %v1255_v56 = vmul.f32 %v14738_v26, %v957_v35  ;;  %v1266_v58 = vmul.f32 %v14747_v29, %v968_v39  ;;  %v915_v31 = vld [vmem:[%s14669_s22 + $0xc0] sm:$0xff]  ;;  %v916_v35 = vld [vmem:[%s14669_s22 + $0xc8] sm:$0xff]  ;;  %v917_v36 = vld [vmem:[%s14669_s22 + $0xd0] sm:$0xff] }
 0x1e7   : > { %v1504_v38 = vadd.f32 %v1503_v0, %v1243_v60  ;;  %v1267_v61 = vmul.f32 %v14750_v30, %v969_v40  ;;  %v1256_v47 = vmul.f32 %v14741_v27, %v958_v44  ;;  %v1517_v3 = vadd.f32 %v1254_v46, %v1253_v48  ;;  %v952_v40 = vld [vmem:[%s14669_s22 + $0x1e8] sm:$0xff]  ;;  %v953_v48 = vld [vmem:[%s14669_s22 + $0x1f0] sm:$0xff]  ;;  %v918_v46 = vld [vmem:[%s14669_s22 + $0xd8] sm:$0xff] }
 0x1e8   : > { %v1467_v63 = vadd.f32 %v1466_v19, %v1210_v15  ;;  %v1528_v53 = vadd.f32 %v1527_v55, %v1264_v42  ;;  %v1245_v60 = vmul.f32 %v14732_v24, %v947_v49  ;;  %v1268_v11 = vmul.f32 %v14763_v41, %v970_v50 }
 0x1e9   : > { %v1505_v10 = vadd.f32 %v1504_v38, %v1244_v33  ;;  %v1246_v20 = vmul.f32 %v14735_v25, %v948_v52  ;;  %v1247_v21 = vmul.f32 %v14738_v26, %v949_v57  ;;  %v1257_v54 = vmul.f32 %v14744_v28, %v959_v62  ;;  %v962_v33 = vld [vmem:[%s14669_s22 + $0x238] sm:$0xff]  ;;  %v919_v62 = vld [vmem:[%s14669_s22 + $0xe0] sm:$0xff] }
 0x1ea   : > { %v1468_v32 = vadd.f32 %v1467_v63, %v1211_v23  ;;  %v1529_v59 = vadd.f32 %v1528_v53, %v1265_v51  ;;  %v1518_v15 = vadd.f32 %v1517_v3, %v1255_v56  ;;  %v1258_v37 = vmul.f32 %v14747_v29, %v960_v1  ;;  %v987_v56 = vld [vmem:[%s14669_s22 + $0x300] sm:$0xff]  ;;  %v954_v63 = vld [vmem:[%s14669_s22 + $0x1f8] sm:$0xff]  ;;  %v921_v3 = vld [vmem:[%s14669_s22 + $0xf0] sm:$0xff] }
 0x1eb   : > { %1506 = vadd.xlane.f32.xlu1 %v1505_v10  ;;  %v1259_v39 = vmul.f32 %v14750_v30, %v961_v2  ;;  %v1248_v23 = vmul.f32 %v14741_v27, %v950_v9  ;;  %v1508_v42 = vadd.f32 %v1246_v20, %v1245_v60  ;;  %v1213_v49 = vmul.f32 %v14732_v24, %v915_v31  ;;  %v920_v2 = vld [vmem:[%s14669_s22 + $0xe8] sm:$0xff]  ;;  %v990_v20 = vld [vmem:[%s14669_s22 + $0x318] sm:$0xff] }
 0x1ec   : > { %v1469_v43 = vadd.f32 %v1468_v32, %v1212_v45  ;;  %v1530_v44 = vadd.f32 %v1529_v59, %v1266_v58  ;;  %v1519_v0 = vadd.f32 %v1518_v15, %v1256_v47  ;;  %v1249_v19 = vmul.f32 %v14744_v28, %v951_v34  ;;  %v988_v45 = vld [vmem:[%s14669_s22 + $0x308] sm:$0xff]  ;;  %v989_v47 = vld [vmem:[%s14669_s22 + $0x310] sm:$0xff]  ;;  %v991_v15 = vld [vmem:[%s14669_s22 + $0x320] sm:$0xff] }
 0x1ed   : > { %v1509_v50 = vadd.f32 %v1508_v42, %v1247_v21  ;;  %v1214_v51 = vmul.f32 %v14735_v25, %v916_v35  ;;  %v1215_v55 = vmul.f32 %v14738_v26, %v917_v36  ;;  %v1260_v57 = vmul.f32 %v14763_v41, %v962_v33  ;;  %v971_v35 = vld [vmem:[%s14669_s22 + $0x280] sm:$0xff]  ;;  %v972_v36 = vld [vmem:[%s14669_s22 + $0x288] sm:$0xff]  ;;  %v973_v42 = vld [vmem:[%s14669_s22 + $0x290] sm:$0xff] }
 0x1ee   : > { %1470 = vadd.xlane.f32.xlu0 %v1469_v43  ;;  %v1531_v52 = vadd.f32 %v1530_v44, %v1267_v61  ;;  %v1520_v38 = vadd.f32 %v1519_v0, %v1257_v54  ;;  %v1250_v58 = vmul.f32 %v14747_v29, %v952_v40  ;;  %v1251_v53 = vmul.f32 %v14750_v30, %v953_v48  ;;  %v992_v0 = vld [vmem:[%s14669_s22 + $0x328] sm:$0xff]  ;;  %v993_v48 = vld [vmem:[%s14669_s22 + $0x330] sm:$0xff] }
 0x1ef   : > { %v1510_v1 = vadd.f32 %v1509_v50, %v1248_v23  ;;  %v1216_v9 = vmul.f32 %v14741_v27, %v918_v46  ;;  %v1472_v60 = vadd.f32 %v1214_v51, %v1213_v49  ;;  %v1285_v21 = vmul.f32 %v14732_v24, %v987_v56  ;;  %v994_v50 = vld [vmem:[%s14669_s22 + $0x338] sm:$0xff] }
 0x1f0   : > { %v1532_v61 = vadd.f32 %v1531_v52, %v1268_v11  ;;  %v1521_v10 = vadd.f32 %v1520_v38, %v1258_v37  ;;  %v1286_v31 = vmul.f32 %v14735_v25, %v988_v45  ;;  %v1217_v59 = vmul.f32 %v14744_v28, %v919_v62  ;;  %v922_v37 = vld [vmem:[%s14669_s22 + $0xf8] sm:$0xff]  ;;  %v979_v62 = vld [vmem:[%s14669_s22 + $0x2c0] sm:$0xff] }
 0x1f1   : > { %v1511_v32 = vadd.f32 %v1510_v1, %v1249_v19  ;;  %v1473_v54 = vadd.f32 %v1472_v60, %v1215_v55  ;;  %v1287_v34 = vmul.f32 %v14738_v26, %v989_v47  ;;  %v1252_v33 = vmul.f32 %v14763_v41, %v954_v63  ;;  %v974_v19 = vld [vmem:[%s14669_s22 + $0x298] sm:$0xff]  ;;  %v980_v47 = vld [vmem:[%s14669_s22 + $0x2c8] sm:$0xff]  ;;  %v981_v63 = vld [vmem:[%s14669_s22 + $0x2d0] sm:$0xff] }
 0x1f2   : > { %1533 = vadd.xlane.f32.xlu1 %v1532_v61  ;;  %v1522_v11 = vadd.f32 %v1521_v10, %v1259_v39  ;;  %v1218_v40 = vmul.f32 %v14747_v29, %v920_v2  ;;  %v1219_v23 = vmul.f32 %v14750_v30, %v921_v3  ;;  %v1288_v46 = vmul.f32 %v14741_v27, %v990_v20  ;;  %v975_v3 = vld [vmem:[%s14669_s22 + $0x2a0] sm:$0xff]  ;;  %v976_v10 = vld [vmem:[%s14669_s22 + $0x2a8] sm:$0xff]  ;;  %v977_v20 = vld [vmem:[%s14669_s22 + $0x2b0] sm:$0xff] }
 0x1f3   : > { %v1512_v43 = vadd.f32 %v1511_v32, %v1250_v58  ;;  %v1474_v44 = vadd.f32 %v1473_v54, %v1216_v9  ;;  %v1553_v49 = vadd.f32 %v1286_v31, %v1285_v21  ;;  %v1289_v51 = vmul.f32 %v14744_v28, %v991_v15  ;;  %v982_v31 = vld [vmem:[%s14669_s22 + $0x2d8] sm:$0xff] }
 0x1f4   : > { %v1523_v39 = vadd.f32 %v1522_v11, %v1260_v57  ;;  %v1269_v55 = vmul.f32 %v14732_v24, %v971_v35  ;;  %v1270_v56 = vmul.f32 %v14735_v25, %v972_v36  ;;  %v1271_v58 = vmul.f32 %v14738_v26, %v973_v42  ;;  %v997_v42 = vld [vmem:[%s14669_s22 + $0x350] sm:$0xff] }
 0x1f5   : > { %v1513_v45 = vadd.f32 %v1512_v43, %v1251_v53  ;;  %v1475_v52 = vadd.f32 %v1474_v44, %v1217_v59  ;;  %v1554_v38 = vadd.f32 %v1553_v49, %v1287_v34  ;;  %v1220_v57 = vmul.f32 %v14763_v41, %v922_v37  ;;  %v995_v34 = vld [vmem:[%s14669_s22 + $0x340] sm:$0xff]  ;;  %v978_v43 = vld [vmem:[%s14669_s22 + $0x2b8] sm:$0xff] }
 0x1f6   : > { %1524 = vadd.xlane.f32.xlu0 %v1523_v39  ;;  %v1290_v1 = vmul.f32 %v14747_v29, %v992_v0  ;;  %v1291_v2 = vmul.f32 %v14750_v30, %v993_v48  ;;  %v1272_v53 = vmul.f32 %v14741_v27, %v974_v19  ;;  %v1535_v21 = vadd.f32 %v1270_v56, %v1269_v55  ;;  %v983_v37 = vld [vmem:[%s14669_s22 + $0x2e0] sm:$0xff]  ;;  %v984_v48 = vld [vmem:[%s14669_s22 + $0x2e8] sm:$0xff] }
 0x1f7   : > { %v1514_v9 = vadd.f32 %v1513_v45, %v1252_v33  ;;  %v1476_v60 = vadd.f32 %v1475_v52, %v1218_v40  ;;  %v1555_v61 = vadd.f32 %v1554_v38, %v1288_v46  ;;  %v1292_v32 = vmul.f32 %v14763_v41, %v994_v50  ;;  %v996_v40 = vld [vmem:[%s14669_s22 + $0x348] sm:$0xff]  ;;  %v985_v50 = vld [vmem:[%s14669_s22 + $0x2f0] sm:$0xff] }
 0x1f8   : > { %v1277_v59 = vmul.f32 %v14732_v24, %v979_v62  ;;  %v1278_v54 = vmul.f32 %v14735_v25, %v980_v47  ;;  %v1279_v15 = vmul.f32 %v14738_v26, %v981_v63  ;;  %v1273_v11 = vmul.f32 %v14744_v28, %v975_v3  ;;  %v1020_v62 = vld [vmem:[%s14669_s22 + $0x408] sm:$0xff]  ;;  %v999_v3 = vld [vmem:[%s14669_s22 + $0x360] sm:$0xff] }
 0x1f9   : > { %1515 = vadd.xlane.f32.xlu1 %v1514_v9  ;;  %v1477_v35 = vadd.f32 %v1476_v60, %v1219_v23  ;;  %v1556_v36 = vadd.f32 %v1555_v61, %v1289_v51  ;;  %v1536_v33 = vadd.f32 %v1535_v21, %v1271_v58  ;;  %v1274_v44 = vmul.f32 %v14747_v29, %v976_v10  ;;  %v998_v51 = vld [vmem:[%s14669_s22 + $0x358] sm:$0xff]  ;;  %v1019_v58 = vld [vmem:[%s14669_s22 + $0x400] sm:$0xff]  ;;  %v1000_v10 = vld [vmem:[%s14669_s22 + $0x368] sm:$0xff] }
 0x1fa   : > { %v1275_v0 = vmul.f32 %v14750_v30, %v977_v20  ;;  %v1280_v46 = vmul.f32 %v14741_v27, %v982_v31  ;;  %v1544_v23 = vadd.f32 %v1278_v54, %v1277_v59  ;;  %v1293_v55 = vmul.f32 %v14732_v24, %v995_v34  ;;  %v986_v9 = vld [vmem:[%s14669_s22 + $0x2f8] sm:$0xff]  ;;  %v1001_v20 = vld [vmem:[%s14669_s22 + $0x370] sm:$0xff] }
 0x1fb   : > { %v1478_v49 = vadd.f32 %v1477_v35, %v1220_v57  ;;  %v1557_v19 = vadd.f32 %v1556_v36, %v1290_v1  ;;  %v1537_v39 = vadd.f32 %v1536_v33, %v1272_v53  ;;  %v1281_v56 = vmul.f32 %v14744_v28, %v983_v37  ;;  %v1021_v53 = vld [vmem:[%s14669_s22 + $0x410] sm:$0xff]  ;;  %v1022_v54 = vld [vmem:[%s14669_s22 + $0x418] sm:$0xff]  ;;  %v1023_v33 = vld [vmem:[%s14669_s22 + $0x420] sm:$0xff] }
 0x1fc   : > { %v1545_v45 = vadd.f32 %v1544_v23, %v1279_v15  ;;  %v1294_v52 = vmul.f32 %v14735_v25, %v996_v40  ;;  %v1295_v38 = vmul.f32 %v14738_v26, %v997_v42  ;;  %v1276_v63 = vmul.f32 %v14763_v41, %v978_v43  ;;  %v1003_v40 = vld [vmem:[%s14669_s22 + $0x380] sm:$0xff]  ;;  %v1004_v42 = vld [vmem:[%s14669_s22 + $0x388] sm:$0xff]  ;;  %v1005_v23 = vld [vmem:[%s14669_s22 + $0x390] sm:$0xff] }
 0x1fd   : > { %1479 = vadd.xlane.f32.xlu0 %v1478_v49  ;;  %v1558_v47 = vadd.f32 %v1557_v19, %v1291_v2  ;;  %v1538_v57 = vadd.f32 %v1537_v39, %v1273_v11  ;;  %v1282_v1 = vmul.f32 %v14747_v29, %v984_v48  ;;  %v1283_v60 = vmul.f32 %v14750_v30, %v985_v50  ;;  %v1024_v39 = vld [vmem:[%s14669_s22 + $0x428] sm:$0xff]  ;;  %v1025_v50 = vld [vmem:[%s14669_s22 + $0x430] sm:$0xff] }
 0x1fe   : > { %v1546_v61 = vadd.f32 %v1545_v45, %v1280_v46  ;;  %v1296_v21 = vmul.f32 %v14741_v27, %v998_v51  ;;  %v1562_v31 = vadd.f32 %v1294_v52, %v1293_v55  ;;  %v1317_v15 = vmul.f32 %v14732_v24, %v1019_v58  ;;  %v1026_v45 = vld [vmem:[%s14669_s22 + $0x438] sm:$0xff] }
 0x1ff   : > { %v1559_v2 = vadd.f32 %v1558_v47, %v1292_v32  ;;  %v1539_v59 = vadd.f32 %v1538_v57, %v1274_v44  ;;  %v1318_v34 = vmul.f32 %v14735_v25, %v1020_v62  ;;  %v1297_v36 = vmul.f32 %v14744_v28, %v999_v3  ;;  %v1002_v44 = vld [vmem:[%s14669_s22 + $0x378] sm:$0xff]  ;;  %v1011_v3 = vld [vmem:[%s14669_s22 + $0x3c0] sm:$0xff] }
 0x200   : > { %v1547_v35 = vadd.f32 %v1546_v61, %v1281_v56  ;;  %v1563_v11 = vadd.f32 %v1562_v31, %v1295_v38  ;;  %v1319_v37 = vmul.f32 %v14738_v26, %v1021_v53  ;;  %v1284_v43 = vmul.f32 %v14763_v41, %v986_v9  ;;  %v1006_v56 = vld [vmem:[%s14669_s22 + $0x398] sm:$0xff]  ;;  %v1012_v53 = vld [vmem:[%s14669_s22 + $0x3c8] sm:$0xff]  ;;  %v1013_v9 = vld [vmem:[%s14669_s22 + $0x3d0] sm:$0xff] }
 0x201   : > { %1560 = vadd.xlane.f32.xlu1 %v1559_v2  ;;  %v1540_v32 = vadd.f32 %v1539_v59, %v1275_v0  ;;  %v1298_v48 = vmul.f32 %v14747_v29, %v1000_v10  ;;  %v1299_v46 = vmul.f32 %v14750_v30, %v1001_v20  ;;  %v1320_v51 = vmul.f32 %v14741_v27, %v1022_v54  ;;  %v1007_v20 = vld [vmem:[%s14669_s22 + $0x3a0] sm:$0xff]  ;;  %v1008_v59 = vld [vmem:[%s14669_s22 + $0x3a8] sm:$0xff]  ;;  %v1009_v54 = vld [vmem:[%s14669_s22 + $0x3b0] sm:$0xff] }
 0x202   : > { %v1548_v49 = vadd.f32 %v1547_v35, %v1282_v1  ;;  %v1564_v19 = vadd.f32 %v1563_v11, %v1296_v21  ;;  %v1589_v55 = vadd.f32 %v1318_v34, %v1317_v15  ;;  %v1321_v52 = vmul.f32 %v14744_v28, %v1023_v33  ;;  %v1014_v34 = vld [vmem:[%s14669_s22 + $0x3d8] sm:$0xff] }
 0x203   : > { %v1541_v0 = vadd.f32 %v1540_v32, %v1276_v63  ;;  %v1301_v38 = vmul.f32 %v14732_v24, %v1003_v40  ;;  %v1302_v58 = vmul.f32 %v14735_v25, %v1004_v42  ;;  %v1303_v1 = vmul.f32 %v14738_v26, %v1005_v23  ;;  %v1029_v23 = vld [vmem:[%s14669_s22 + $0x450] sm:$0xff] }
 0x204   : > { %v1549_v62 = vadd.f32 %v1548_v49, %v1283_v60  ;;  %v1565_v47 = vadd.f32 %v1564_v19, %v1297_v36  ;;  %v1590_v57 = vadd.f32 %v1589_v55, %v1319_v37  ;;  %v1300_v63 = vmul.f32 %v14763_v41, %v1002_v44  ;;  %v1027_v37 = vld [vmem:[%s14669_s22 + $0x440] sm:$0xff]  ;;  %v1010_v49 = vld [vmem:[%s14669_s22 + $0x3b8] sm:$0xff] }
 0x205   : > { %1542 = vadd.xlane.f32.xlu0 %v1541_v0  ;;  %v1322_v61 = vmul.f32 %v14747_v29, %v1024_v39  ;;  %v1323_v10 = vmul.f32 %v14750_v30, %v1025_v50  ;;  %v1304_v60 = vmul.f32 %v14741_v27, %v1006_v56  ;;  %v1571_v15 = vadd.f32 %v1302_v58, %v1301_v38  ;;  %v1015_v44 = vld [vmem:[%s14669_s22 + $0x3e0] sm:$0xff]  ;;  %v1016_v50 = vld [vmem:[%s14669_s22 + $0x3e8] sm:$0xff] }
 0x206   : > { %v1550_v21 = vadd.f32 %v1549_v62, %v1284_v43  ;;  %v1566_v31 = vadd.f32 %v1565_v47, %v1298_v48  ;;  %v1591_v2 = vadd.f32 %v1590_v57, %v1320_v51  ;;  %v1324_v35 = vmul.f32 %v14763_v41, %v1026_v45  ;;  %v1028_v48 = vld [vmem:[%s14669_s22 + $0x448] sm:$0xff]  ;;  %v1017_v45 = vld [vmem:[%s14669_s22 + $0x3f0] sm:$0xff] }
 0x207   : > { %v1309_v36 = vmul.f32 %v14732_v24, %v1011_v3  ;;  %v1310_v11 = vmul.f32 %v14735_v25, %v1012_v53  ;;  %v1311_v33 = vmul.f32 %v14738_v26, %v1013_v9  ;;  %v1305_v32 = vmul.f32 %v14744_v28, %v1007_v20  ;;  %v1052_v3 = vld [vmem:[%s14669_s22 + $0x508] sm:$0xff]  ;;  %v1031_v20 = vld [vmem:[%s14669_s22 + $0x460] sm:$0xff] }
 0x208   : > { %1551 = vadd.xlane.f32.xlu1 %v1550_v21  ;;  %v1567_v40 = vadd.f32 %v1566_v31, %v1299_v46  ;;  %v1592_v42 = vadd.f32 %v1591_v2, %v1321_v52  ;;  %v1572_v43 = vadd.f32 %v1571_v15, %v1303_v1  ;;  %v1306_v19 = vmul.f32 %v14747_v29, %v1008_v59  ;;  %v1030_v52 = vld [vmem:[%s14669_s22 + $0x458] sm:$0xff]  ;;  %v1051_v1 = vld [vmem:[%s14669_s22 + $0x500] sm:$0xff]  ;;  %v1032_v59 = vld [vmem:[%s14669_s22 + $0x468] sm:$0xff] }
 0x209   : > { %v1307_v39 = vmul.f32 %v14750_v30, %v1009_v54  ;;  %v1312_v51 = vmul.f32 %v14741_v27, %v1014_v34  ;;  %v1580_v46 = vadd.f32 %v1310_v11, %v1309_v36  ;;  %v1325_v38 = vmul.f32 %v14732_v24, %v1027_v37  ;;  %v1018_v21 = vld [vmem:[%s14669_s22 + $0x3f8] sm:$0xff]  ;;  %v1033_v54 = vld [vmem:[%s14669_s22 + $0x470] sm:$0xff] }
 0x20a   : > { %v1568_v55 = vadd.f32 %v1567_v40, %v1300_v63  ;;  %v1593_v56 = vadd.f32 %v1592_v42, %v1322_v61  ;;  %v1573_v0 = vadd.f32 %v1572_v43, %v1304_v60  ;;  %v1313_v58 = vmul.f32 %v14744_v28, %v1015_v44  ;;  %v1053_v60 = vld [vmem:[%s14669_s22 + $0x510] sm:$0xff]  ;;  %v1054_v11 = vld [vmem:[%s14669_s22 + $0x518] sm:$0xff]  ;;  %v1055_v43 = vld [vmem:[%s14669_s22 + $0x520] sm:$0xff] }
 0x20b   : > { %v1581_v62 = vadd.f32 %v1580_v46, %v1311_v33  ;;  %v1326_v47 = vmul.f32 %v14735_v25, %v1028_v48  ;;  %v1327_v57 = vmul.f32 %v14738_v26, %v1029_v23  ;;  %v1308_v9 = vmul.f32 %v14763_v41, %v1010_v49  ;;  %v1035_v48 = vld [vmem:[%s14669_s22 + $0x480] sm:$0xff]  ;;  %v1036_v23 = vld [vmem:[%s14669_s22 + $0x488] sm:$0xff]  ;;  %v1037_v46 = vld [vmem:[%s14669_s22 + $0x490] sm:$0xff] }
 0x20c   : > { %1569 = vadd.xlane.f32.xlu0 %v1568_v55  ;;  %v1594_v53 = vadd.f32 %v1593_v56, %v1323_v10  ;;  %v1574_v63 = vadd.f32 %v1573_v0, %v1305_v32  ;;  %v1314_v61 = vmul.f32 %v14747_v29, %v1016_v50  ;;  %v1315_v31 = vmul.f32 %v14750_v30, %v1017_v45  ;;  %v1056_v0 = vld [vmem:[%s14669_s22 + $0x528] sm:$0xff]  ;;  %v1057_v45 = vld [vmem:[%s14669_s22 + $0x530] sm:$0xff] }
 0x20d   : > { %v1582_v2 = vadd.f32 %v1581_v62, %v1312_v51  ;;  %v1328_v15 = vmul.f32 %v14741_v27, %v1030_v52  ;;  %v1598_v34 = vadd.f32 %v1326_v47, %v1325_v38  ;;  %v1349_v33 = vmul.f32 %v14732_v24, %v1051_v1  ;;  %v1058_v62 = vld [vmem:[%s14669_s22 + $0x538] sm:$0xff] }
 0x20e   : > { %v1595_v10 = vadd.f32 %v1594_v53, %v1324_v35  ;;  %v1575_v36 = vadd.f32 %v1574_v63, %v1306_v19  ;;  %v1350_v37 = vmul.f32 %v14735_v25, %v1052_v3  ;;  %v1329_v42 = vmul.f32 %v14744_v28, %v1031_v20  ;;  %v1034_v19 = vld [vmem:[%s14669_s22 + $0x478] sm:$0xff]  ;;  %v1043_v20 = vld [vmem:[%s14669_s22 + $0x4c0] sm:$0xff] }
 0x20f   : > { %v1583_v40 = vadd.f32 %v1582_v2, %v1313_v58  ;;  %v1599_v32 = vadd.f32 %v1598_v34, %v1327_v57  ;;  %v1351_v44 = vmul.f32 %v14738_v26, %v1053_v60  ;;  %v1316_v49 = vmul.f32 %v14763_v41, %v1018_v21  ;;  %v1038_v58 = vld [vmem:[%s14669_s22 + $0x498] sm:$0xff]  ;;  %v1044_v60 = vld [vmem:[%s14669_s22 + $0x4c8] sm:$0xff]  ;;  %v1045_v21 = vld [vmem:[%s14669_s22 + $0x4d0] sm:$0xff] }
 0x210   : > { %1596 = vadd.xlane.f32.xlu1 %v1595_v10  ;;  %v1576_v35 = vadd.f32 %v1575_v36, %v1307_v39  ;;  %v1330_v50 = vmul.f32 %v14747_v29, %v1032_v59  ;;  %v1331_v51 = vmul.f32 %v14750_v30, %v1033_v54  ;;  %v1352_v52 = vmul.f32 %v14741_v27, %v1054_v11  ;;  %v1039_v54 = vld [vmem:[%s14669_s22 + $0x4a0] sm:$0xff]  ;;  %v1040_v36 = vld [vmem:[%s14669_s22 + $0x4a8] sm:$0xff]  ;;  %v1041_v11 = vld [vmem:[%s14669_s22 + $0x4b0] sm:$0xff] }
 0x211   : > { %v1584_v55 = vadd.f32 %v1583_v40, %v1314_v61  ;;  %v1600_v56 = vadd.f32 %v1599_v32, %v1328_v15  ;;  %v1625_v38 = vadd.f32 %v1350_v37, %v1349_v33  ;;  %v1353_v47 = vmul.f32 %v14744_v28, %v1055_v43  ;;  %v1046_v37 = vld [vmem:[%s14669_s22 + $0x4d8] sm:$0xff] }
 0x212   : > { %v1577_v39 = vadd.f32 %v1576_v35, %v1308_v9  ;;  %v1333_v57 = vmul.f32 %v14732_v24, %v1035_v48  ;;  %v1334_v1 = vmul.f32 %v14735_v25, %v1036_v23  ;;  %v1335_v61 = vmul.f32 %v14738_v26, %v1037_v46  ;;  %v1061_v46 = vld [vmem:[%s14669_s22 + $0x550] sm:$0xff] }
 0x213   : > { %v1585_v3 = vadd.f32 %v1584_v55, %v1315_v31  ;;  %v1601_v53 = vadd.f32 %v1600_v56, %v1329_v42  ;;  %v1626_v63 = vadd.f32 %v1625_v38, %v1351_v44  ;;  %v1332_v9 = vmul.f32 %v14763_v41, %v1034_v19  ;;  %v1059_v44 = vld [vmem:[%s14669_s22 + $0x540] sm:$0xff]  ;;  %v1042_v55 = vld [vmem:[%s14669_s22 + $0x4b8] sm:$0xff] }
 0x214   : > { %1578 = vadd.xlane.f32.xlu0 %v1577_v39  ;;  %v1354_v2 = vmul.f32 %v14747_v29, %v1056_v0  ;;  %v1355_v59 = vmul.f32 %v14750_v30, %v1057_v45  ;;  %v1336_v31 = vmul.f32 %v14741_v27, %v1038_v58  ;;  %v1607_v33 = vadd.f32 %v1334_v1, %v1333_v57  ;;  %v1047_v19 = vld [vmem:[%s14669_s22 + $0x4e0] sm:$0xff]  ;;  %v1048_v45 = vld [vmem:[%s14669_s22 + $0x4e8] sm:$0xff] }
 0x215   : > { %v1586_v15 = vadd.f32 %v1585_v3, %v1316_v49  ;;  %v1602_v34 = vadd.f32 %v1601_v53, %v1330_v50  ;;  %v1627_v10 = vadd.f32 %v1626_v63, %v1352_v52  ;;  %v1356_v40 = vmul.f32 %v14763_v41, %v1058_v62  ;;  %v1060_v50 = vld [vmem:[%s14669_s22 + $0x548] sm:$0xff]  ;;  %v1049_v62 = vld [vmem:[%s14669_s22 + $0x4f0] sm:$0xff] }
 0x216   : > { %v1341_v42 = vmul.f32 %v14732_v24, %v1043_v20  ;;  %v1342_v32 = vmul.f32 %v14735_v25, %v1044_v60  ;;  %v1343_v43 = vmul.f32 %v14738_v26, %v1045_v21  ;;  %v1337_v35 = vmul.f32 %v14744_v28, %v1039_v54  ;;  %v1084_v20 = vld [vmem:[%s14669_s22 + $0x608] sm:$0xff]  ;;  %v1063_v54 = vld [vmem:[%s14669_s22 + $0x560] sm:$0xff] }
 0x217   : > { %1587 = vadd.xlane.f32.xlu1 %v1586_v15  ;;  %v1603_v48 = vadd.f32 %v1602_v34, %v1331_v51  ;;  %v1628_v23 = vadd.f32 %v1627_v10, %v1353_v47  ;;  %v1608_v49 = vadd.f32 %v1607_v33, %v1335_v61  ;;  %v1338_v56 = vmul.f32 %v14747_v29, %v1040_v36  ;;  %v1062_v47 = vld [vmem:[%s14669_s22 + $0x558] sm:$0xff]  ;;  %v1083_v61 = vld [vmem:[%s14669_s22 + $0x600] sm:$0xff]  ;;  %v1064_v36 = vld [vmem:[%s14669_s22 + $0x568] sm:$0xff] }
 0x218   : > { %v1339_v0 = vmul.f32 %v14750_v30, %v1041_v11  ;;  %v1344_v52 = vmul.f32 %v14741_v27, %v1046_v37  ;;  %v1616_v51 = vadd.f32 %v1342_v32, %v1341_v42  ;;  %v1357_v57 = vmul.f32 %v14732_v24, %v1059_v44  ;;  %v1050_v15 = vld [vmem:[%s14669_s22 + $0x4f8] sm:$0xff]  ;;  %v1065_v11 = vld [vmem:[%s14669_s22 + $0x570] sm:$0xff] }
 0x219   : > { %v1604_v38 = vadd.f32 %v1603_v48, %v1332_v9  ;;  %v1629_v58 = vadd.f32 %v1628_v23, %v1354_v2  ;;  %v1609_v39 = vadd.f32 %v1608_v49, %v1336_v31  ;;  %v1345_v1 = vmul.f32 %v14744_v28, %v1047_v19  ;;  %v1085_v31 = vld [vmem:[%s14669_s22 + $0x610] sm:$0xff]  ;;  %v1086_v32 = vld [vmem:[%s14669_s22 + $0x618] sm:$0xff]  ;;  %v1087_v49 = vld [vmem:[%s14669_s22 + $0x620] sm:$0xff] }
 0x21a   : > { %v1617_v3 = vadd.f32 %v1616_v51, %v1343_v43  ;;  %v1358_v53 = vmul.f32 %v14735_v25, %v1060_v50  ;;  %v1359_v63 = vmul.f32 %v14738_v26, %v1061_v46  ;;  %v1340_v21 = vmul.f32 %v14763_v41, %v1042_v55  ;;  %v1067_v50 = vld [vmem:[%s14669_s22 + $0x580] sm:$0xff]  ;;  %v1068_v46 = vld [vmem:[%s14669_s22 + $0x588] sm:$0xff]  ;;  %v1069_v51 = vld [vmem:[%s14669_s22 + $0x590] sm:$0xff] }
 0x21b   : > { %1605 = vadd.xlane.f32.xlu0 %v1604_v38  ;;  %v1630_v60 = vadd.f32 %v1629_v58, %v1355_v59  ;;  %v1610_v9 = vadd.f32 %v1609_v39, %v1337_v35  ;;  %v1346_v2 = vmul.f32 %v14747_v29, %v1048_v45  ;;  %v1347_v34 = vmul.f32 %v14750_v30, %v1049_v62  ;;  %v1088_v39 = vld [vmem:[%s14669_s22 + $0x628] sm:$0xff]  ;;  %v1089_v62 = vld [vmem:[%s14669_s22 + $0x630] sm:$0xff] }
 0x21c   : > { %v1618_v10 = vadd.f32 %v1617_v3, %v1344_v52  ;;  %v1360_v33 = vmul.f32 %v14741_v27, %v1062_v47  ;;  %v1634_v37 = vadd.f32 %v1358_v53, %v1357_v57  ;;  %v1381_v43 = vmul.f32 %v14732_v24, %v1083_v61  ;;  %v1090_v3 = vld [vmem:[%s14669_s22 + $0x638] sm:$0xff] }
 0x21d   : > { %v1631_v59 = vadd.f32 %v1630_v60, %v1356_v40  ;;  %v1611_v42 = vadd.f32 %v1610_v9, %v1338_v56  ;;  %v1382_v44 = vmul.f32 %v14735_v25, %v1084_v20  ;;  %v1361_v23 = vmul.f32 %v14744_v28, %v1063_v54  ;;  %v1066_v56 = vld [vmem:[%s14669_s22 + $0x578] sm:$0xff]  ;;  %v1075_v54 = vld [vmem:[%s14669_s22 + $0x5c0] sm:$0xff] }
 0x21e   : > { %v1619_v48 = vadd.f32 %v1618_v10, %v1345_v1  ;;  %v1635_v35 = vadd.f32 %v1634_v37, %v1359_v63  ;;  %v1383_v19 = vmul.f32 %v14738_v26, %v1085_v31  ;;  %v1348_v55 = vmul.f32 %v14763_v41, %v1050_v15  ;;  %v1070_v1 = vld [vmem:[%s14669_s22 + $0x598] sm:$0xff]  ;;  %v1076_v31 = vld [vmem:[%s14669_s22 + $0x5c8] sm:$0xff]  ;;  %v1077_v15 = vld [vmem:[%s14669_s22 + $0x5d0] sm:$0xff] }
 0x21f   : > { %1632 = vadd.xlane.f32.xlu1 %v1631_v59  ;;  %v1612_v40 = vadd.f32 %v1611_v42, %v1339_v0  ;;  %v1362_v45 = vmul.f32 %v14747_v29, %v1064_v36  ;;  %v1363_v52 = vmul.f32 %v14750_v30, %v1065_v11  ;;  %v1384_v47 = vmul.f32 %v14741_v27, %v1086_v32  ;;  %v1071_v11 = vld [vmem:[%s14669_s22 + $0x5a0] sm:$0xff]  ;;  %v1072_v42 = vld [vmem:[%s14669_s22 + $0x5a8] sm:$0xff]  ;;  %v1073_v32 = vld [vmem:[%s14669_s22 + $0x5b0] sm:$0xff] }
 0x220   : > { %v1620_v38 = vadd.f32 %v1619_v48, %v1346_v2  ;;  %v1636_v58 = vadd.f32 %v1635_v35, %v1360_v33  ;;  %v1661_v57 = vadd.f32 %v1382_v44, %v1381_v43  ;;  %v1385_v53 = vmul.f32 %v14744_v28, %v1087_v49  ;;  %v1078_v44 = vld [vmem:[%s14669_s22 + $0x5d8] sm:$0xff] }
 0x221   : > { %v1613_v0 = vadd.f32 %v1612_v40, %v1340_v21  ;;  %v1365_v63 = vmul.f32 %v14732_v24, %v1067_v50  ;;  %v1366_v61 = vmul.f32 %v14735_v25, %v1068_v46  ;;  %v1367_v2 = vmul.f32 %v14738_v26, %v1069_v51  ;;  %v1093_v51 = vld [vmem:[%s14669_s22 + $0x650] sm:$0xff] }
 0x222   : > { %v1621_v20 = vadd.f32 %v1620_v38, %v1347_v34  ;;  %v1637_v60 = vadd.f32 %v1636_v58, %v1361_v23  ;;  %v1662_v9 = vadd.f32 %v1661_v57, %v1383_v19  ;;  %v1364_v21 = vmul.f32 %v14763_v41, %v1066_v56  ;;  %v1091_v19 = vld [vmem:[%s14669_s22 + $0x640] sm:$0xff]  ;;  %v1074_v38 = vld [vmem:[%s14669_s22 + $0x5b8] sm:$0xff] }
 0x223   : > { %1614 = vadd.xlane.f32.xlu0 %v1613_v0  ;;  %v1386_v10 = vmul.f32 %v14747_v29, %v1088_v39  ;;  %v1387_v36 = vmul.f32 %v14750_v30, %v1089_v62  ;;  %v1368_v34 = vmul.f32 %v14741_v27, %v1070_v1  ;;  %v1643_v43 = vadd.f32 %v1366_v61, %v1365_v63  ;;  %v1079_v56 = vld [vmem:[%s14669_s22 + $0x5e0] sm:$0xff]  ;;  %v1080_v62 = vld [vmem:[%s14669_s22 + $0x5e8] sm:$0xff] }
 0x224   : > { %v1622_v33 = vadd.f32 %v1621_v20, %v1348_v55  ;;  %v1638_v37 = vadd.f32 %v1637_v60, %v1362_v45  ;;  %v1663_v59 = vadd.f32 %v1662_v9, %v1384_v47  ;;  %v1388_v48 = vmul.f32 %v14763_v41, %v1090_v3  ;;  %v1092_v45 = vld [vmem:[%s14669_s22 + $0x648] sm:$0xff]  ;;  %v1081_v3 = vld [vmem:[%s14669_s22 + $0x5f0] sm:$0xff] }
 0x225   : > { %v1373_v23 = vmul.f32 %v14732_v24, %v1075_v54  ;;  %v1374_v35 = vmul.f32 %v14735_v25, %v1076_v31  ;;  %v1375_v49 = vmul.f32 %v14738_v26, %v1077_v15  ;;  %v1369_v40 = vmul.f32 %v14744_v28, %v1071_v11  ;;  %v1116_v54 = vld [vmem:[%s14669_s22 + $0x708] sm:$0xff]  ;;  %v1095_v11 = vld [vmem:[%s14669_s22 + $0x660] sm:$0xff] }
 0x226   : > { %1623 = vadd.xlane.f32.xlu1 %v1622_v33  ;;  %v1639_v50 = vadd.f32 %v1638_v37, %v1363_v52  ;;  %v1664_v46 = vadd.f32 %v1663_v59, %v1385_v53  ;;  %v1644_v55 = vadd.f32 %v1643_v43, %v1367_v2  ;;  %v1370_v58 = vmul.f32 %v14747_v29, %v1072_v42  ;;  %v1094_v53 = vld [vmem:[%s14669_s22 + $0x658] sm:$0xff]  ;;  %v1115_v2 = vld [vmem:[%s14669_s22 + $0x700] sm:$0xff]  ;;  %v1096_v42 = vld [vmem:[%s14669_s22 + $0x668] sm:$0xff] }
 0x227   : > { %v1371_v39 = vmul.f32 %v14750_v30, %v1073_v32  ;;  %v1376_v47 = vmul.f32 %v14741_v27, %v1078_v44  ;;  %v1652_v52 = vadd.f32 %v1374_v35, %v1373_v23  ;;  %v1389_v63 = vmul.f32 %v14732_v24, %v1091_v19  ;;  %v1082_v33 = vld [vmem:[%s14669_s22 + $0x5f8] sm:$0xff]  ;;  %v1097_v32 = vld [vmem:[%s14669_s22 + $0x670] sm:$0xff] }
 0x228   : > { %v1640_v57 = vadd.f32 %v1639_v50, %v1364_v21  ;;  %v1665_v1 = vadd.f32 %v1664_v46, %v1386_v10  ;;  %v1645_v0 = vadd.f32 %v1644_v55, %v1368_v34  ;;  %v1377_v61 = vmul.f32 %v14744_v28, %v1079_v56  ;;  %v1117_v34 = vld [vmem:[%s14669_s22 + $0x710] sm:$0xff]  ;;  %v1118_v35 = vld [vmem:[%s14669_s22 + $0x718] sm:$0xff]  ;;  %v1119_v55 = vld [vmem:[%s14669_s22 + $0x720] sm:$0xff] }
 0x229   : > { %v1653_v20 = vadd.f32 %v1652_v52, %v1375_v49  ;;  %v1390_v60 = vmul.f32 %v14735_v25, %v1092_v45  ;;  %v1391_v9 = vmul.f32 %v14738_v26, %v1093_v51  ;;  %v1372_v15 = vmul.f32 %v14763_v41, %v1074_v38  ;;  %v1099_v45 = vld [vmem:[%s14669_s22 + $0x680] sm:$0xff]  ;;  %v1100_v51 = vld [vmem:[%s14669_s22 + $0x688] sm:$0xff]  ;;  %v1101_v52 = vld [vmem:[%s14669_s22 + $0x690] sm:$0xff] }
 0x22a   : > { %1641 = vadd.xlane.f32.xlu0 %v1640_v57  ;;  %v1666_v31 = vadd.f32 %v1665_v1, %v1387_v36  ;;  %v1646_v21 = vadd.f32 %v1645_v0, %v1369_v40  ;;  %v1378_v10 = vmul.f32 %v14747_v29, %v1080_v62  ;;  %v1379_v37 = vmul.f32 %v14750_v30, %v1081_v3  ;;  %v1120_v0 = vld [vmem:[%s14669_s22 + $0x728] sm:$0xff]  ;;  %v1121_v3 = vld [vmem:[%s14669_s22 + $0x730] sm:$0xff] }
 0x22b   : > { %v1654_v59 = vadd.f32 %v1653_v20, %v1376_v47  ;;  %v1392_v43 = vmul.f32 %v14741_v27, %v1094_v53  ;;  %v1670_v44 = vadd.f32 %v1390_v60, %v1389_v63  ;;  %v1413_v49 = vmul.f32 %v14732_v24, %v1115_v2  ;;  %v1122_v20 = vld [vmem:[%s14669_s22 + $0x738] sm:$0xff] }
 0x22c   : > { %v1667_v36 = vadd.f32 %v1666_v31, %v1388_v48  ;;  %v1647_v23 = vadd.f32 %v1646_v21, %v1370_v58  ;;  %v1414_v19 = vmul.f32 %v14735_v25, %v1116_v54  ;;  %v1393_v46 = vmul.f32 %v14744_v28, %v1095_v11  ;;  %v1098_v58 = vld [vmem:[%s14669_s22 + $0x678] sm:$0xff]  ;;  %v1107_v11 = vld [vmem:[%s14669_s22 + $0x6c0] sm:$0xff] }
 0x22d   : > { %v1655_v50 = vadd.f32 %v1654_v59, %v1377_v61  ;;  %v1671_v40 = vadd.f32 %v1670_v44, %v1391_v9  ;;  %v1415_v56 = vmul.f32 %v14738_v26, %v1117_v34  ;;  %v1380_v38 = vmul.f32 %v14763_v41, %v1082_v33  ;;  %v1102_v61 = vld [vmem:[%s14669_s22 + $0x698] sm:$0xff]  ;;  %v1108_v34 = vld [vmem:[%s14669_s22 + $0x6c8] sm:$0xff]  ;;  %v1109_v33 = vld [vmem:[%s14669_s22 + $0x6d0] sm:$0xff] }
 0x22e   : > { %1668 = vadd.xlane.f32.xlu1 %v1667_v36  ;;  %v1648_v48 = vadd.f32 %v1647_v23, %v1371_v39  ;;  %v1394_v62 = vmul.f32 %v14747_v29, %v1096_v42  ;;  %v1395_v47 = vmul.f32 %v14750_v30, %v1097_v32  ;;  %v1416_v53 = vmul.f32 %v14741_v27, %v1118_v35  ;;  %v1103_v32 = vld [vmem:[%s14669_s22 + $0x6a0] sm:$0xff]  ;;  %v1104_v23 = vld [vmem:[%s14669_s22 + $0x6a8] sm:$0xff]  ;;  %v1105_v35 = vld [vmem:[%s14669_s22 + $0x6b0] sm:$0xff] }
 0x22f   : > { %v1656_v57 = vadd.f32 %v1655_v50, %v1378_v10  ;;  %v1672_v1 = vadd.f32 %v1671_v40, %v1392_v43  ;;  %v1697_v63 = vadd.f32 %v1414_v19, %v1413_v49  ;;  %v1417_v60 = vmul.f32 %v14744_v28, %v1119_v55  ;;  %v1110_v19 = vld [vmem:[%s14669_s22 + $0x6d8] sm:$0xff] }
 0x230   : > { %v1649_v39 = vadd.f32 %v1648_v48, %v1372_v15  ;;  %v1397_v9 = vmul.f32 %v14732_v24, %v1099_v45  ;;  %v1398_v2 = vmul.f32 %v14735_v25, %v1100_v51  ;;  %v1399_v10 = vmul.f32 %v14738_v26, %v1101_v52  ;;  %v1125_v52 = vld [vmem:[%s14669_s22 + $0x750] sm:$0xff] }
 0x231   : > { %v1657_v54 = vadd.f32 %v1656_v57, %v1379_v37  ;;  %v1673_v31 = vadd.f32 %v1672_v1, %v1393_v46  ;;  %v1698_v21 = vadd.f32 %v1697_v63, %v1415_v56  ;;  %v1396_v15 = vmul.f32 %v14763_v41, %v1098_v58  ;;  %v1123_v56 = vld [vmem:[%s14669_s22 + $0x740] sm:$0xff]  ;;  %v1106_v57 = vld [vmem:[%s14669_s22 + $0x6b8] sm:$0xff] }
 0x232   : > { %1650 = vadd.xlane.f32.xlu0 %v1649_v39  ;;  %v1418_v59 = vmul.f32 %v14747_v29, %v1120_v0  ;;  %v1419_v42 = vmul.f32 %v14750_v30, %v1121_v3  ;;  %v1400_v37 = vmul.f32 %v14741_v27, %v1102_v61  ;;  %v1679_v49 = vadd.f32 %v1398_v2, %v1397_v9  ;;  %v1111_v58 = vld [vmem:[%s14669_s22 + $0x6e0] sm:$0xff]  ;;  %v1112_v3 = vld [vmem:[%s14669_s22 + $0x6e8] sm:$0xff] }
 0x233   : > { %v1658_v43 = vadd.f32 %v1657_v54, %v1380_v38  ;;  %v1674_v44 = vadd.f32 %v1673_v31, %v1394_v62  ;;  %v1699_v36 = vadd.f32 %v1698_v21, %v1416_v53  ;;  %v1420_v50 = vmul.f32 %v14763_v41, %v1122_v20  ;;  %v1124_v62 = vld [vmem:[%s14669_s22 + $0x748] sm:$0xff]  ;;  %v1113_v20 = vld [vmem:[%s14669_s22 + $0x6f0] sm:$0xff] }
 0x234   : > { %v1405_v46 = vmul.f32 %v14732_v24, %v1107_v11  ;;  %v1406_v40 = vmul.f32 %v14735_v25, %v1108_v34  ;;  %v1407_v55 = vmul.f32 %v14738_v26, %v1109_v33  ;;  %v1401_v48 = vmul.f32 %v14744_v28, %v1103_v32  ;;  %v1132_v11 = vld [vmem:[%s14669_s22 + $0x788] sm:$0xff]  ;;  %v1127_v32 = vld [vmem:[%s14669_s22 + $0x760] sm:$0xff] }
 0x235   : > { %1659 = vadd.xlane.f32.xlu1 %v1658_v43  ;;  %v1675_v45 = vadd.f32 %v1674_v44, %v1395_v47  ;;  %v1700_v51 = vadd.f32 %v1699_v36, %v1417_v60  ;;  %v1680_v38 = vadd.f32 %v1679_v49, %v1399_v10  ;;  %v1402_v1 = vmul.f32 %v14747_v29, %v1104_v23  ;;  %v1126_v60 = vld [vmem:[%s14669_s22 + $0x758] sm:$0xff]  ;;  %v1131_v10 = vld [vmem:[%s14669_s22 + $0x780] sm:$0xff]  ;;  %v1128_v23 = vld [vmem:[%s14669_s22 + $0x768] sm:$0xff] }
 0x236   : > { %v1403_v0 = vmul.f32 %v14750_v30, %v1105_v35  ;;  %v1408_v53 = vmul.f32 %v14741_v27, %v1110_v19  ;;  %v1688_v47 = vadd.f32 %v1406_v40, %v1405_v46  ;;  %v1421_v9 = vmul.f32 %v14732_v24, %v1123_v56  ;;  %v1114_v43 = vld [vmem:[%s14669_s22 + $0x6f8] sm:$0xff]  ;;  %v1129_v35 = vld [vmem:[%s14669_s22 + $0x770] sm:$0xff] }
 0x237   : > { %v1676_v63 = vadd.f32 %v1675_v45, %v1396_v15  ;;  %v1701_v61 = vadd.f32 %v1700_v51, %v1418_v59  ;;  %v1681_v39 = vadd.f32 %v1680_v38, %v1400_v37  ;;  %v1409_v2 = vmul.f32 %v14744_v28, %v1111_v58  ;;  %v1133_v37 = vld [vmem:[%s14669_s22 + $0x790] sm:$0xff]  ;;  %v1134_v40 = vld [vmem:[%s14669_s22 + $0x798] sm:$0xff]  ;;  %v1135_v38 = vld [vmem:[%s14669_s22 + $0x7a0] sm:$0xff] }
 0x238   : > { %v1689_v54 = vadd.f32 %v1688_v47, %v1407_v55  ;;  %v1422_v31 = vmul.f32 %v14735_v25, %v1124_v62  ;;  %v1423_v21 = vmul.f32 %v14738_v26, %v1125_v52  ;;  %v1404_v33 = vmul.f32 %v14763_v41, %v1106_v57  ;;  %v1139_v62 = vld [vmem:[%s14669_s22 + $0x7c0] sm:$0xff]  ;;  %v1140_v52 = vld [vmem:[%s14669_s22 + $0x7c8] sm:$0xff] }
 0x239   : > { %1677 = vadd.xlane.f32.xlu0 %v1676_v63  ;;  %v1702_v34 = vadd.f32 %v1701_v61, %v1419_v42  ;;  %v1682_v15 = vadd.f32 %v1681_v39, %v1401_v48  ;;  %v1410_v59 = vmul.f32 %v14747_v29, %v1112_v3  ;;  %v1411_v44 = vmul.f32 %v14750_v30, %v1113_v20  ;;  %v1130_v63 = vld [vmem:[%s14669_s22 + $0x778] sm:$0xff]  ;;  %v1136_v39 = vld [vmem:[%s14669_s22 + $0x7a8] sm:$0xff] }
 0x23a   : > { %v1690_v36 = vadd.f32 %v1689_v54, %v1408_v53  ;;  %v1424_v49 = vmul.f32 %v14741_v27, %v1126_v60  ;;  %v1706_v19 = vadd.f32 %v1422_v31, %v1421_v9  ;;  %v1429_v55 = vmul.f32 %v14732_v24, %v1131_v10  ;;  %v1141_v53 = vld [vmem:[%s14669_s22 + $0x7d0] sm:$0xff]  ;;  %v1142_v9 = vld [vmem:[%s14669_s22 + $0x7d8] sm:$0xff] }
 0x23b   : > { %v1703_v42 = vadd.f32 %v1702_v34, %v1420_v50  ;;  %v1683_v46 = vadd.f32 %v1682_v15, %v1402_v1  ;;  %v1430_v56 = vmul.f32 %v14735_v25, %v1132_v11  ;;  %v1425_v51 = vmul.f32 %v14744_v28, %v1127_v32  ;;  %v1137_v11 = vld [vmem:[%s14669_s22 + $0x7b0] sm:$0xff] }
 0x23c   : > { %v1691_v45 = vadd.f32 %v1690_v36, %v1409_v2  ;;  %v1707_v48 = vadd.f32 %v1706_v19, %v1423_v21  ;;  %v1431_v58 = vmul.f32 %v14738_v26, %v1133_v37  ;;  %v1412_v57 = vmul.f32 %v14763_v41, %v1114_v43  ;;  %v1138_v36 = vld [vmem:[%s14669_s22 + $0x7b8] sm:$0xff] }
 0x23d   : > { %1704 = vadd.xlane.f32.xlu1 %v1703_v42  ;;  %v1684_v50 = vadd.f32 %v1683_v46, %v1403_v0  ;;  %v1426_v1 = vmul.f32 %v14747_v29, %v1128_v23  ;;  %v1427_v3 = vmul.f32 %v14750_v30, %v1129_v35  ;;  %v1432_v20 = vmul.f32 %v14741_v27, %v1134_v40  ;;  %v1144_v35 = vld [vmem:[%s14669_s22 + $0x7e8] sm:$0xff]  ;;  %v1145_v40 = vld [vmem:[%s14669_s22 + $0x7f0] sm:$0xff] }
 0x23e   : > { %v1692_v47 = vadd.f32 %v1691_v45, %v1410_v59  ;;  %v1708_v61 = vadd.f32 %v1707_v48, %v1424_v49  ;;  %v1715_v60 = vadd.f32 %v1430_v56, %v1429_v55  ;;  %v1433_v0 = vmul.f32 %v14744_v28, %v1135_v38  ;;  %v1146_v48 = vld [vmem:[%s14669_s22 + $0x7f8] sm:$0xff] }
 0x23f   : > { %v1685_v2 = vadd.f32 %v1684_v50, %v1404_v33  ;;  %v1437_v54 = vmul.f32 %v14732_v24, %v1139_v62  ;;  %v1438_v31 = vmul.f32 %v14735_v25, %v1140_v52  ;;  %v1439_v15 = vmul.f32 %v14738_v26, %v1141_v53  ;;  %v1143_v33 = vld [vmem:[%s14669_s22 + $0x7e0] sm:$0xff]  ;;  %s12385_s22 = sshll.u32 %s14665_s25, 3 }
 0x240   : > { %v1693_v21 = vadd.f32 %v1692_v47, %v1411_v44  ;;  %v1709_v10 = vadd.f32 %v1708_v61, %v1425_v51  ;;  %v1716_v34 = vadd.f32 %v1715_v60, %v1431_v58  ;;  %v1428_v59 = vmul.f32 %v14763_v41, %v1130_v63  ;;  %s890_s4 = scalar_lea.vmem [#allocation26], %s12385_s22 }
 0x241   : > { %1686 = vadd.xlane.f32.xlu0 %v1685_v2  ;;  %v1434_v32 = vmul.f32 %v14747_v29, %v1136_v39  ;;  %v1440_v37 = vmul.f32 %v14741_v27, %v1142_v9  ;;  %v1724_v44 = vadd.f32 %v1438_v31, %v1437_v54  ;;  %v1435_v23 = vmul.f32 %v14750_v30, %v1137_v11  ;;  %s12157_s3 = sshll.u32 %s890_s4, 4  ;;  %s19149_s3 = int_to_ptr.vmem [resolvable:$true] %s12157_s3 }
 0x242   : > { %v1694_v43 = vadd.f32 %v1693_v21, %v1412_v57  ;;  %v1710_v24 = vadd.f32 %v1709_v10, %v1426_v1  ;;  %v1717_v25 = vadd.f32 %v1716_v34, %v1432_v20  ;;  %v1441_v19 = vmul.f32 %v14744_v28, %v1143_v33  ;;  %s14022_s26 = scalar_lea.vmem %s19149_s3, 128 }
 0x243   : > { %v1725_v42 = vadd.f32 %v1724_v44, %v1439_v15  ;;  %v1436_v46 = vmul.f32 %v14763_v41, %v1138_v36  ;;  %v14138_v55 = vmov 0   ;;  %v1442_v45 = vmul.f32 %v14747_v29, %v1144_v35  ;;  %v1775_v29 = vld [vmem:[%s19513_s30] sm:$0xff]  ;;  %p14023_p6 = scmp.ne.s32.totalorder %s19149_s3, %s14022_s26 }
 0x244   : > { %1695 = vadd.xlane.f32.xlu1 %v1694_v43  ;;  %v1711_v26 = vadd.f32 %v1710_v24, %v1427_v3  ;;  %v1718_v49 = vadd.f32 %v1717_v25, %v1433_v0  ;;  %13579 = vset.pattern.permute.xlu0 %v14138_v55  ;;  %v1443_v58 = vmul.f32 %v14750_v30, %v1145_v40  ;;  %v12386_v3 = vld [vmem:[#allocation2] ss:$0 sm:$0xff]  ;;  %vm2333_vm8 = vcmask 1045509  }
 0x245   : > { %13578 = vset.pattern.permute.xlu1 %v14138_v55  ;;  %v1726_v51 = vadd.f32 %v1725_v42, %v1440_v37  ;;  %v1444_v28 = vmul.f32 %v14763_v41, %v1146_v48  ;;  %v1780_v53 = vrot.slane %v1775_v29, %v14703_v4  ;;  %v1799_v30 = vrot.slane %v1775_v29, %v14705_v5  ;;  %p14024_p2 = pnand %p14023_p6, %p19927_p0 }
 0x246   : > { %v1712_v27 = vadd.f32 %v1711_v26, %v1428_v59  ;;  %v1719_v56 = vadd.f32 %v1718_v49, %v1434_v32  ;;  %v1818_v41 = vrot.slane %v1775_v29, %v14707_v6  ;;  %v1837_v47 = vrot.slane %v1775_v29, %v14709_v7 }
 0x247   : > { %v1727_v62 = vadd.f32 %v1726_v51, %v1441_v19  ;;  %v1856_v63 = vrot.slane %v1775_v29, %v14713_v12  ;;  %v1875_v20 = vrot.slane %v1775_v29, %v14715_v13  ;;  %v1894_v0 = vrot.slane %v1775_v29, %v14717_v14  ;;  %p14025_p9 = pneg %p14024_p2 }
 0x248   : > { %1713 = vadd.xlane.f32.xlu0 %v1712_v27  ;;  %v1720_v38 = vadd.f32 %v1719_v56, %v1435_v23  ;;  %v1913_v21 = vrot.slane %v1775_v29, %v14728_v22  ;;  %vm2335_vm9 = vcmask 1046534   ;;  %vm2337_vm10 = vcmask 1047559  }
 0x249   : > { %v1728_v50 = vadd.f32 %v1727_v62, %v1442_v45  ;;  %vm2339_vm11 = vcmask 261120   ;;  %vm3270_vm12 = vcmask 64512   ;;  %vm5712_vm13 = vcmask 523264  }
 0x24a   : > { %v1721_v52 = vadd.f32 %v1720_v38, %v1436_v46 }
 0x24b   : > { %v1729_v57 = vadd.f32 %v1728_v50, %v1443_v58 }
 0x24c   : > { %1722 = vadd.xlane.f32.xlu0 %v1721_v52 }
 0x24d   : > { %v1730_v1 = vadd.f32 %v1729_v57, %v1444_v28 }
 0x250   : > { %1731 = vadd.xlane.f32.xlu0 %v1730_v1 }
 0x255   : > { %1740 = vperm.xlu1 %13578, %v12386_v3  }
 0x259   : > { %1786 = vbcast.lane.b32.xlu1 %v1780_v53, 264 }
 0x25d   : > { %1801 = vbcast.lane.b32.xlu1 %v1799_v30, 256 }
 0x261   : > { %1805 = vbcast.lane.b32.xlu1 %v1799_v30, 264 }
 0x265   : > { %1790 = vbcast.lane.b32.xlu1 %v1780_v53, 272 }
 0x266   : > { %1782 = vbcast.lane.b32.xlu0 %v1780_v53, 256 }
 0x269   : > { %1820 = vbcast.lane.b32.xlu1 %v1818_v41, 256 }
 0x26a   : > { %1809 = vbcast.lane.b32.xlu0 %v1799_v30, 272 }
 0x26c   : > { %v1489_v61 = vpop.xlane.xlu1 %1488 }
 0x26d   : > { %1794 = vbcast.lane.b32.xlu1 %v1780_v53, 280  ;;  %v1453_v39 = vpop.xlane.xlu0 %1452 }
 0x26e   : > { %1824 = vbcast.lane.b32.xlu0 %v1818_v41, 264 }
 0x270   : > { %v1498_v60 = vpop.xlane.xlu1 %1497 }
 0x271   : > { %1828 = vbcast.lane.b32.xlu1 %v1818_v41, 272 }
 0x272   : > { %1813 = vbcast.lane.b32.xlu0 %v1799_v30, 280 }
 0x273   : > { %v1462_v9 = vpop.xlane.xlu0 %1461 }
 0x275   : > { %1843 = vbcast.lane.b32.xlu1 %v1837_v47, 264 }
 0x276   : > { %1839 = vbcast.lane.b32.xlu0 %v1837_v47, 256 }
 0x278   : > { %v15272_v2 = vpop.xlane.xlu1 %1506 }
 0x279   : > { %1847 = vbcast.lane.b32.xlu1 %v1837_v47, 272 }
 0x27a   : > { %1832 = vbcast.lane.b32.xlu0 %v1818_v41, 280 }
 0x27b   : > { %v1471_v54 = vpop.xlane.xlu0 %1470 }
 0x27d   : > { %1862 = vbcast.lane.b32.xlu1 %v1856_v63, 264 }
 0x27e   : > { %1858 = vbcast.lane.b32.xlu0 %v1856_v63, 256 }
 0x27f   : > { %v15275_v31 = vpop.xlane.xlu1 %1533 }
 0x281   : > { %1866 = vbcast.lane.b32.xlu1 %v1856_v63, 272 }
 0x282   : > { %1851 = vbcast.lane.b32.xlu0 %v1837_v47, 280 }
 0x283   : > { %v1525_v10 = vpop.xlane.xlu0 %1524 }
 0x285   : > { %1881 = vbcast.lane.b32.xlu1 %v1875_v20, 264 }
 0x286   : > { %1877 = vbcast.lane.b32.xlu0 %v1875_v20, 256  ;;  %v15278_v11 = vpop.xlane.xlu1 %1515 }
 0x289   : > { %1885 = vbcast.lane.b32.xlu1 %v1875_v20, 272 }
 0x28a   : > { %1870 = vbcast.lane.b32.xlu0 %v1856_v63, 280  ;;  %v1480_v34 = vpop.xlane.xlu0 %1479 }
 0x28d   : > { %1900 = vbcast.lane.b32.xlu1 %v1894_v0, 264 }
 0x28e   : > { %1896 = vbcast.lane.b32.xlu0 %v1894_v0, 256  ;;  %v15280_v15 = vpop.xlane.xlu1 %1560 }
 0x291   : > { %1904 = vbcast.lane.b32.xlu1 %v1894_v0, 272 }
 0x292   : > { %1889 = vbcast.lane.b32.xlu0 %v1875_v20, 280  ;;  %v1543_v59 = vpop.xlane.xlu0 %1542 }
 0x295   : > { %1919 = vbcast.lane.b32.xlu1 %v1913_v21, 264  ;;  %v15282_v32 = vpop.xlane.xlu1 %1551 }
 0x296   : > { %1915 = vbcast.lane.b32.xlu0 %v1913_v21, 256 }
 0x299   : > { %1923 = vbcast.lane.b32.xlu1 %v1913_v21, 272  ;;  %v15284_v33 = vpop.xlane.xlu0 %1569 }
 0x29a   : > { %1908 = vbcast.lane.b32.xlu0 %v1894_v0, 280 }
 0x29d   : > { %v15286_v37 = vpop.xlane.xlu1 %1596 }
 0x29e   : > { %1927 = vbcast.lane.b32.xlu0 %v1913_v21, 280 }
 0x2a1   : > { %v15288_v43 = vpop.xlane.xlu0 %1578 }
 0x2a4   : > { %v15290_v24 = vpop.xlane.xlu1 %1587 }
 0x2a8   : > { %v15292_v36 = vpop.xlane.xlu0 %1605 }
 0x2ac   : > { %v15294_v25 = vpop.xlane.xlu1 %1632 }
 0x2b0   : > { %v15296_v44 = vpop.xlane.xlu0 %1614 }
 0x2b3   : > { %v15298_v23 = vpop.xlane.xlu1 %1623 }
 0x2b7   : > { %v15300_v35 = vpop.xlane.xlu0 %1641 }
 0x2bb   : > { %v15302_v26 = vpop.xlane.xlu1 %1668 }
 0x2bf   : > { %v15304_v49 = vpop.xlane.xlu0 %1650 }
 0x2c2   : > { %v15306_v19 = vpop.xlane.xlu1 %1659 }
 0x2c6   : > { %v15308_v42 = vpop.xlane.xlu0 %1677 }
 0x2ca   : > { %v15310_v46 = vpop.xlane.xlu1 %1704 }
 0x2ce   : > { %v15312_v40 = vpop.xlane.xlu0 %1686 }
 0x2d1   : > { %v15314_v55 = vpop.xlane.xlu1 %1695 }
 0x2d5   : > { %v15316_v27 = vpop.xlane.xlu0 %1713  ;;  %v15318_v56 = vpop.permute.xlu1 %1740 }
 0x2d6   : > { %v1744_v45 = vadd.f32 %v15318_v56, %v1462_v9  ;;  %v1743_v52 = vadd.f32 %v15318_v56, %v1453_v39  ;;  %v1747_v1 = vadd.f32 %v15318_v56, %v1489_v61  ;;  %v1745_v3 = vadd.f32 %v15318_v56, %v1471_v54 }
 0x2d7   : > { %v1748_v47 = vadd.f32 %v15318_v56, %v1498_v60  ;;  %v1751_v63 = vadd.f32 %v15318_v56, %v1525_v10  ;;  %v1749_v0 = vadd.f32 %v15318_v56, %v15272_v2  ;;  %v1746_v60 = vadd.f32 %v15318_v56, %v1480_v34 }
 0x2d8   : > { %v1753_v2 = vadd.f32 %v15318_v56, %v1543_v59 }
 0x2d9   : > { %v15321_v51 = vpop.xlane.xlu0 %1722  ;;  %v1787_v48 = vpop.permute.xlu1 %1786 }
 0x2da   : > { %v15323_v38 = vadd.f32 %v1787_v48, %v1744_v45  ;;  %v1752_v48 = vadd.f32 %v15318_v56, %v15275_v31  ;;  %v1756_v31 = vadd.f32 %v15318_v56, %v15284_v33 }
 0x2dc   : > { %2073 = vperm.xlu0 %13579, %v15323_v38  }
 0x2dd   : > { %v15326_v58 = vpop.xlane.xlu0 %1731  ;;  %v1802_v62 = vpop.permute.xlu1 %1801 }
 0x2de   : > { %v15334_v30 = vadd.f32 %v1802_v62, %v1747_v1 }
 0x2e1   : > { %v1783_v28 = vpop.permute.xlu0 %1782  ;;  %v1806_v50 = vpop.permute.xlu1 %1805 }
 0x2e2   : > { %v15329_v57 = vadd.f32 %v1783_v28, %v1743_v52  ;;  %v15342_v20 = vadd.f32 %v1806_v50, %v1748_v47  ;;  %v1750_v50 = vadd.f32 %v15318_v56, %v15278_v11  ;;  %v1757_v11 = vadd.f32 %v15318_v56, %v15288_v43 }
 0x2e4   : > { %2070 = vperm.xlu1 %13578, %v15329_v57  }
 0x2e5   : > { %v1810_v29 = vpop.permute.xlu0 %1809  ;;  %v1791_v53 = vpop.permute.xlu1 %1790 }
 0x2e6   : > { %v15336_v41 = vadd.f32 %v1791_v53, %v1745_v3  ;;  %v15351_v45 = vadd.f32 %v1810_v29, %v1749_v0  ;;  %v1755_v53 = vadd.f32 %v15318_v56, %v15280_v15  ;;  %v1760_v15 = vadd.f32 %v15318_v56, %v15292_v36 }
 0x2e8   : > { %2082 = vperm.xlu1 %13578, %v15334_v30   ;;  %2076 = vperm.xlu0 %13579, %v15336_v41  }
 0x2e9   : > { %v1825_v39 = vpop.permute.xlu0 %1824  ;;  %v1821_v61 = vpop.permute.xlu1 %1820 }
 0x2ea   : > { %v15344_v9 = vadd.f32 %v1821_v61, %v1751_v63  ;;  %v15360_v28 = vadd.f32 %v1825_v39, %v1752_v48  ;;  %v1754_v61 = vadd.f32 %v15318_v56, %v15282_v32  ;;  %v1761_v32 = vadd.f32 %v15318_v56, %v15296_v44 }
 0x2ec   : > { %2085 = vperm.xlu1 %13578, %v15342_v20   ;;  %2094 = vperm.xlu0 %13579, %v15344_v9  }
 0x2ed   : > { %v1814_v54 = vpop.permute.xlu0 %1813  ;;  %v1795_v21 = vpop.permute.xlu1 %1794 }
 0x2ee   : > { %v15353_v10 = vadd.f32 %v1795_v21, %v1746_v60  ;;  %v15370_v29 = vadd.f32 %v1814_v54, %v1750_v50  ;;  %v1759_v21 = vadd.f32 %v15318_v56, %v15286_v37  ;;  %v1764_v37 = vadd.f32 %v15318_v56, %v15300_v35 }
 0x2f0   : > { %2088 = vperm.xlu1 %13578, %v15351_v45   ;;  %2079 = vperm.xlu0 %13579, %v15353_v10  }
 0x2f1   : > { %v1840_v62 = vpop.permute.xlu0 %1839  ;;  %v1829_v52 = vpop.permute.xlu1 %1828 }
 0x2f2   : > { %v15362_v34 = vadd.f32 %v1829_v52, %v1753_v2  ;;  %v15380_v39 = vadd.f32 %v1840_v62, %v1755_v53  ;;  %v1758_v52 = vadd.f32 %v15318_v56, %v15290_v24  ;;  %v1765_v24 = vadd.f32 %v15318_v56, %v15304_v49 }
 0x2f4   : > { %2097 = vperm.xlu1 %13578, %v15360_v28   ;;  %2100 = vperm.xlu0 %13579, %v15362_v34  }
 0x2f5   : > { %v1833_v1 = vpop.permute.xlu0 %1832  ;;  %v1844_v3 = vpop.permute.xlu1 %1843 }
 0x2f6   : > { %v15372_v59 = vadd.f32 %v1844_v3, %v1756_v31  ;;  %v15390_v54 = vadd.f32 %v1833_v1, %v1754_v61  ;;  %v1763_v3 = vadd.f32 %v15318_v56, %v15294_v25  ;;  %v1768_v25 = vadd.f32 %v15318_v56, %v15308_v42 }
 0x2f8   : > { %2091 = vperm.xlu1 %13578, %v15370_v29   ;;  %2109 = vperm.xlu0 %13579, %v15372_v59  }
 0x2f9   : > { %v1859_v47 = vpop.permute.xlu0 %1858  ;;  %v1848_v63 = vpop.permute.xlu1 %1847 }
 0x2fa   : > { %v15382_v33 = vadd.f32 %v1848_v63, %v1757_v11  ;;  %v15400_v62 = vadd.f32 %v1859_v47, %v1759_v21  ;;  %v1762_v63 = vadd.f32 %v15318_v56, %v15298_v23  ;;  %v1769_v23 = vadd.f32 %v15318_v56, %v15312_v40 }
 0x2fc   : > { %2106 = vperm.xlu1 %13578, %v15380_v39   ;;  %2112 = vperm.xlu0 %13579, %v15382_v33   ;;  %19514 = vst [vmem:[#allocation42_spill] sm:$0xff] %v15400_v62 }
 0x2fd   : > { %v1852_v0 = vpop.permute.xlu0 %1851  ;;  %v1863_v60 = vpop.permute.xlu1 %1862 }
 0x2fe   : > { %v15392_v43 = vadd.f32 %v1863_v60, %v1760_v15  ;;  %v15410_v1 = vadd.f32 %v1852_v0, %v1758_v52  ;;  %v1767_v60 = vadd.f32 %v15318_v56, %v15302_v26  ;;  %v1772_v26 = vadd.f32 %v15318_v56, %v15316_v27 }
 0x300   : > { %2103 = vperm.xlu1 %13578, %v15390_v54   ;;  %2121 = vperm.xlu0 %13579, %v15392_v43   ;;  %19516 = vst [vmem:[#allocation44_spill] sm:$0xff] %v15410_v1 }
 0x301   : > { %v1878_v48 = vpop.permute.xlu0 %1877  ;;  %v1867_v2 = vpop.permute.xlu1 %1866 }
 0x302   : > { %v15402_v36 = vadd.f32 %v1867_v2, %v1761_v32  ;;  %v15420_v47 = vadd.f32 %v1878_v48, %v1763_v3  ;;  %v1766_v2 = vadd.f32 %v15318_v56, %v15306_v19 }
 0x304   : > { %19515 = vst [vmem:[#allocation43_spill] sm:$0xff] %v15402_v36  ;;  %2118 = vperm.xlu1 %13578, %v15400_v62   ;;  %2124 = vperm.xlu0 %13579, %v15402_v36   ;;  %19518 = vst [vmem:[#allocation46_spill] sm:$0xff] %v15420_v47 }
 0x305   : > { %v1871_v50 = vpop.permute.xlu0 %1870  ;;  %v1882_v31 = vpop.permute.xlu1 %1881 }
 0x306   : > { %v15412_v44 = vadd.f32 %v1882_v31, %v1764_v37  ;;  %v15430_v0 = vadd.f32 %v1871_v50, %v1762_v63  ;;  %v1773_v50 = vadd.f32 %v15318_v56, %v15321_v51  ;;  %v1771_v31 = vadd.f32 %v15318_v56, %v15310_v46 }
 0x307   : > { %v1774_v63 = vadd.f32 %v15318_v56, %v15326_v58 }
 0x308   : > { %19517 = vst [vmem:[#allocation45_spill] sm:$0xff] %v15412_v44  ;;  %2115 = vperm.xlu1 %13578, %v15410_v1   ;;  %2133 = vperm.xlu0 %13579, %v15412_v44   ;;  %19520 = vst [vmem:[#allocation48_spill] sm:$0xff] %v15430_v0 }
 0x309   : > { %v1897_v53 = vpop.permute.xlu0 %1896  ;;  %v1886_v11 = vpop.permute.xlu1 %1885 }
 0x30a   : > { %v15422_v35 = vadd.f32 %v1886_v11, %v1765_v24  ;;  %v15440_v32 = vadd.f32 %v1897_v53, %v1767_v60  ;;  %v1770_v53 = vadd.f32 %v15318_v56, %v15314_v55  ;;  %v19238_v11 = vmov 0.0|0.0   ;;  %v1993_v55 = vld [vmem:[%s19529_s27] sm:$0xff]  ;;  %v1998_v60 = vld [vmem:[%s19529_s27 + $0x28] sm:$0xff] }
 0x30b   : > { %13205 = vmatprep.subr.bf16.mxu0 %v19238_v11  ;;  %13211 = vmatprep.subr.bf16.mxu1 %v19238_v11 }
 0x30c   : > { %19519 = vst [vmem:[#allocation47_spill] sm:$0xff] %v15422_v35  ;;  %2130 = vperm.xlu1 %13578, %v15420_v47   ;;  %2136 = vperm.xlu0 %13579, %v15422_v35   ;;  %19522 = vst [vmem:[#allocation50_spill] sm:$0xff] %v15440_v32 }
 0x30d   : > { %v1890_v61 = vpop.permute.xlu0 %1889  ;;  %v1901_v15 = vpop.permute.xlu1 %1900 }
 0x30e   : > { %v15432_v49 = vadd.f32 %v1901_v15, %v1768_v25  ;;  %v15450_v37 = vadd.f32 %v1890_v61, %v1766_v2  ;;  %v1994_v25 = vld [vmem:[%s19529_s27 + $0x8] sm:$0xff]  ;;  %v1997_v61 = vld [vmem:[%s19529_s27 + $0x20] sm:$0xff] }
 0x30f   : > { %v13206_v15 = vpack.c.bf16 %v1994_v25, %v1993_v55  ;;  %v13212_v58 = vpack.c.bf16 %v1998_v60, %v1997_v61 }
 0x310   : > { %19521 = vst [vmem:[#allocation49_spill] sm:$0xff] %v15432_v49  ;;  %2127 = vperm.xlu1 %13578, %v15430_v0   ;;  %2145 = vperm.xlu0 %13579, %v15432_v49   ;;  %19524 = vst [vmem:[#allocation52_spill] sm:$0xff] %v15450_v37 }
 0x311   : > { %v1905_v21 = vpop.permute.xlu1 %1904  ;;  %v1916_v48 = vpop.permute.xlu0 %1915  ;;  %13207 = vmatpush3.bf16.msra.mxu0 %v13206_v15  ;;  %13213 = vmatpush3.bf16.msra.mxu1 %v13212_v58 }
 0x312   : > { %v15442_v42 = vadd.f32 %v1905_v21, %v1769_v23  ;;  %v15460_v24 = vadd.f32 %v1916_v48, %v1771_v31  ;;  %v1995_v23 = vld [vmem:[%s19529_s27 + $0x10] sm:$0xff]  ;;  %v1996_v21 = vld [vmem:[%s19529_s27 + $0x18] sm:$0xff]  ;;  %13208 = vmatprep.subr.bf16.mxu0 %v19238_v11  ;;  %13214 = vmatprep.subr.bf16.mxu1 %v19238_v11 }
 0x313   : > { %v1999_v48 = vld [vmem:[%s19529_s27 + $0x30] sm:$0xff]  ;;  %v13209_v2 = vpack.c.bf16 %v1996_v21, %v1995_v23 }
 0x314   : > { %19523 = vst [vmem:[#allocation51_spill] sm:$0xff] %v15442_v42  ;;  %2142 = vperm.xlu1 %13578, %v15440_v32   ;;  %2148 = vperm.xlu0 %13579, %v15442_v42   ;;  %19526 = vst [vmem:[#allocation54_spill] sm:$0xff] %v15460_v24 }
 0x315   : > { %v1920_v52 = vpop.permute.xlu1 %1919  ;;  %v1909_v19 = vpop.permute.xlu0 %1908  ;;  %13210 = vmatpush3.bf16.msra.mxu0 %v13209_v2 }
 0x316   : > { %v15452_v40 = vadd.f32 %v1920_v52, %v1772_v26  ;;  %v15468_v51 = vadd.f32 %v1909_v19, %v1770_v53  ;;  %v2000_v26 = vld [vmem:[%s19529_s27 + $0x38] sm:$0xff]  ;;  %13217 = vmatprep.subr.bf16.mxu0 %v19238_v11 }
 0x317   : > { %v13215_v52 = vpack.c.bf16 %v2000_v26, %v1999_v48 }
 0x318   : > { %19525 = vst [vmem:[#allocation53_spill] sm:$0xff] %v15452_v40  ;;  %2139 = vperm.xlu1 %13578, %v15450_v37   ;;  %2157 = vperm.xlu0 %13579, %v15452_v40   ;;  %19528 = vst [vmem:[#allocation56_spill] sm:$0xff] %v15468_v51 }
 0x319   : > { %v1924_v3 = vpop.permute.xlu1 %1923  ;;  %v1928_v46 = vpop.permute.xlu0 %1927  ;;  %13216 = vmatpush3.bf16.msra.mxu1 %v13215_v52 }
 0x31a   : > { %v15462_v27 = vadd.f32 %v1924_v3, %v1773_v50  ;;  %v15487_v56 = vadd.f32 %v1928_v46, %v1774_v63  ;;  %v19236_v50 = vmov 0.0   ;;  %13223 = vmatprep.subr.bf16.mxu1 %v19238_v11 }
 0x31b   : > { %12758 = vmatprep.mubr.msk.f32.mxu0 %vm14140_vm0, %v19236_v50  ;;  %12769 = vmatprep.mubr.msk.f32.mxu1 %vm14140_vm0, %v19236_v50 }
 0x31c   : > { %19527 = vst [vmem:[#allocation55_spill] sm:$0xff] %v15462_v27  ;;  %2154 = vperm.xlu1 %13578, %v15460_v24   ;;  %2160 = vperm.xlu0 %13579, %v15462_v27   ;;  %19530 = vst [vmem:[#allocation57_spill] sm:$0xff] %v15487_v56 }
 0x320   : > { %2151 = vperm.xlu1 %13578, %v15468_v51  }
 0x324   : > { %2163 = vperm.xlu1 %13578, %v15487_v56  }
 0x35b   : > { %v2074_v31 = vpop.permute.xlu0 %2073 }
 0x35c   : > { %v2175_v49 = vrot.slane %v2074_v31, %v14720_v16 }
 0x363   : > { %v2071_v19 = vpop.permute.xlu1 %2070 }
 0x364   : > { %v2170_v40 = vrot.slane %v2071_v19, %v14711_v8 }
 0x366   : > { %v2177_v44 = vsel %vm2176_vm1, %v2175_v49, %v2170_v40 }
 0x367   : > { %v2083_v3 = vpop.permute.xlu1 %2082  ;;  %v2077_v53 = vpop.permute.xlu0 %2076 }
 0x368   : > { %v2182_v37 = vrot.slane %v2077_v53, %v14722_v17  ;;  %v2195_v19 = vrot.slane %v2083_v3, %v14711_v8 }
 0x36a   : > { %v2184_v53 = vsel %vm2183_vm2, %v2182_v37, %v2177_v44 }
 0x36b   : > { %v2086_v46 = vpop.permute.xlu1 %2085  ;;  %v2095_v63 = vpop.permute.xlu0 %2094 }
 0x36c   : > { %v2199_v0 = vrot.slane %v2086_v46, %v14720_v16  ;;  %v2214_v36 = vrot.slane %v2095_v63, %v14711_v8 }
 0x36f   : > { %v2089_v55 = vpop.permute.xlu1 %2088  ;;  %v2080_v25 = vpop.permute.xlu0 %2079 }
 0x370   : > { %v2204_v35 = vrot.slane %v2089_v55, %v14722_v17  ;;  %v2189_v47 = vrot.slane %v2080_v25, %v14724_v18  ;;  %v2200_v55 = vsel %vm2176_vm1, %v2199_v0, %v2195_v19 }
 0x372   : > { %v2205_v3 = vsel %vm2183_vm2, %v2204_v35, %v2200_v55 }
 0x373   : > { %v2098_v61 = vpop.permute.xlu1 %2097  ;;  %v2101_v15 = vpop.permute.xlu0 %2100 }
 0x374   : > { %v2218_v1 = vrot.slane %v2098_v61, %v14720_v16  ;;  %v2223_v31 = vrot.slane %v2101_v15, %v14722_v17  ;;  %v2191_v61 = vsel %vm2190_vm3, %v2189_v47, %v2184_v53 }
 0x376   : > { %v2219_v44 = vsel %vm2176_vm1, %v2218_v1, %v2214_v36 }
 0x377   : > { %v2092_v60 = vpop.permute.xlu1 %2091  ;;  %v2110_v58 = vpop.permute.xlu0 %2109  ;;  %v2224_v15 = vsel %vm2183_vm2, %v2223_v31, %v2219_v44  ;;  %v2001_v44 = vld [vmem:[%s19529_s27 + $0x40] sm:$0xff] }
 0x378   : > { %v2209_v62 = vrot.slane %v2092_v60, %v14724_v18  ;;  %v2237_v49 = vrot.slane %v2110_v58, %v14720_v16 }
 0x37b   : > { %v2107_v23 = vpop.permute.xlu1 %2106  ;;  %v2113_v21 = vpop.permute.xlu0 %2112 }
 0x37c   : > { %v2233_v25 = vrot.slane %v2107_v23, %v14711_v8  ;;  %v2242_v37 = vrot.slane %v2113_v21, %v14722_v17  ;;  %v2210_v23 = vsel %vm2190_vm3, %v2209_v62, %v2205_v3 }
 0x37e   : > { %v2238_v36 = vsel %vm2176_vm1, %v2237_v49, %v2233_v25 }
 0x37f   : > { %v15510_v48 = vpop.permute.xlu1 %2103  ;;  %v2122_v2 = vpop.permute.xlu0 %2121  ;;  %v2243_v62 = vsel %vm2183_vm2, %v2242_v37, %v2238_v36 }
 0x380   : > { %v2256_v0 = vrot.slane %v2122_v2, %v14720_v16  ;;  %v2228_v60 = vrot.slane %v15510_v48, %v14724_v18 }
 0x382   : > { %v2229_v53 = vsel %vm2190_vm3, %v2228_v60, %v2224_v15  ;;  %v2005_v15 = vld [vmem:[%s19529_s27 + $0x60] sm:$0xff]  ;;  %v2006_v60 = vld [vmem:[%s19529_s27 + $0x68] sm:$0xff] }
 0x383   : > { %v2119_v26 = vpop.permute.xlu1 %2118  ;;  %v15512_v52 = vpop.permute.xlu0 %2124 }
 0x384   : > { %v2252_v63 = vrot.slane %v2119_v26, %v14711_v8  ;;  %v2261_v47 = vrot.slane %v15512_v52, %v14722_v17 }
 0x386   : > { %v2257_v52 = vsel %vm2176_vm1, %v2256_v0, %v2252_v63  ;;  %v2002_v0 = vld [vmem:[%s19529_s27 + $0x48] sm:$0xff] }
 0x387   : > { %v2116_v50 = vpop.permute.xlu1 %2115  ;;  %v15514_v11 = vpop.permute.xlu0 %2133 }
 0x388   : > { %v2247_v58 = vrot.slane %v2116_v50, %v14724_v18  ;;  %v2275_v21 = vrot.slane %v15514_v11, %v14720_v16 }
 0x38b   : > { %v2131_v56 = vpop.permute.xlu1 %2130  ;;  %v15516_v51 = vpop.permute.xlu0 %2136 }
 0x38c   : > { %v2271_v1 = vrot.slane %v2131_v56, %v14711_v8  ;;  %v2280_v48 = vrot.slane %v15516_v51, %v14722_v17  ;;  %v2248_v51 = vsel %vm2190_vm3, %v2247_v58, %v2243_v62 }
 0x38f   : > { %v15518_v27 = vpop.permute.xlu1 %2127  ;;  %v15520_v24 = vpop.permute.xlu0 %2145 }
 0x390   : > { %v2266_v2 = vrot.slane %v15518_v27, %v14724_v18  ;;  %v2294_v26 = vrot.slane %v15520_v24, %v14720_v16  ;;  %v2326_v27 = vsel %vm2325_vm4, %v2210_v23, %v2191_v61  ;;  %v2276_v24 = vsel %vm2176_vm1, %v2275_v21, %v2271_v1 }
 0x391   : > { %v2281_v49 = vsel %vm2183_vm2, %v2280_v48, %v2276_v24  ;;  %v2328_v37 = vsel %vm2327_vm5, %v2229_v53, %v2326_v27  ;;  %v13218_v48 = vpack.c.bf16 %v2002_v0, %v2001_v44  ;;  %v2623_v24 = vld [vmem:[%s19531_s24 + $0x8] sm:$0xff]  ;;  %v2628_v44 = vld [vmem:[%s19531_s24 + $0x30] sm:$0xff]  ;;  %v2630_v0 = vld [vmem:[%s19531_s24 + $0x40] sm:$0xff] }
 0x392   : > { %v2330_v58 = vsel %vm2329_vm6, %v2248_v51, %v2328_v37  ;;  %v2629_v37 = vld [vmem:[%s19531_s24 + $0x38] sm:$0xff] }
 0x393   : > { %v2143_v42 = vpop.permute.xlu1 %2142  ;;  %v15524_v32 = vpop.permute.xlu0 %2148 }
 0x394   : > { %v2290_v50 = vrot.slane %v2143_v42, %v14711_v8  ;;  %v2299_v11 = vrot.slane %v15524_v32, %v14722_v17  ;;  %v2262_v42 = vsel %vm2183_vm2, %v2261_v47, %v2257_v52 }
 0x395   : > { %v2267_v32 = vsel %vm2190_vm3, %v2266_v2, %v2262_v42  ;;  %v2622_v42 = vld [vmem:[%s19531_s24] sm:$0xff] }
 0x396   : > { %v2295_v3 = vsel %vm2176_vm1, %v2294_v26, %v2290_v50  ;;  %v2332_v23 = vsel %vm2331_vm7, %v2267_v32, %v2330_v58  ;;  %v13224_v50 = vpack.c.bf16 %v2006_v60, %v2005_v15  ;;  %v2003_v26 = vld [vmem:[%s19529_s27 + $0x50] sm:$0xff]  ;;  %v13230_v32 = vpack.c.bf16 %v2623_v24, %v2622_v42  ;;  %v2631_v15 = vld [vmem:[%s19531_s24 + $0x48] sm:$0xff]  ;;  %v2634_v60 = vld [vmem:[%s19531_s24 + $0x60] sm:$0xff] }
 0x397   : > { %v2140_v46 = vpop.permute.xlu1 %2139  ;;  %v2158_v40 = vpop.permute.xlu0 %2157  ;;  %v2635_v58 = vld [vmem:[%s19531_s24 + $0x68] sm:$0xff]  ;;  %v2953_v42 = vld [vmem:[%s19534_s2 + $0x38] sm:$0xff] }
 0x398   : > { %v2285_v56 = vrot.slane %v2140_v46, %v14724_v18  ;;  %v2313_v25 = vrot.slane %v2158_v40, %v14720_v16  ;;  %v2300_v40 = vsel %vm2183_vm2, %v2299_v11, %v2295_v3  ;;  %v2007_v11 = vld [vmem:[%s19529_s27 + $0x70] sm:$0xff] }
 0x399   : > { %v2624_v3 = vld [vmem:[%s19531_s24 + $0x10] sm:$0xff] }
 0x39a   : > { %v2286_v63 = vsel %vm2190_vm3, %v2285_v56, %v2281_v49  ;;  %v2004_v56 = vld [vmem:[%s19529_s27 + $0x58] sm:$0xff] }
 0x39b   : > { %v2155_v35 = vpop.permute.xlu1 %2154  ;;  %v2161_v19 = vpop.permute.xlu0 %2160  ;;  %v2334_v21 = vsel %vm2333_vm8, %v2286_v63, %v2332_v23  ;;  %v13221_v53 = vpack.c.bf16 %v2004_v56, %v2003_v26  ;;  %v2632_v23 = vld [vmem:[%s19531_s24 + $0x50] sm:$0xff]  ;;  %v2947_v26 = vld [vmem:[%s19534_s2 + $0x8] sm:$0xff] }
 0x39c   : > { %v2309_v55 = vrot.slane %v2155_v35, %v14711_v8  ;;  %v2318_v61 = vrot.slane %v2161_v19, %v14722_v17  ;;  %v2008_v19 = vld [vmem:[%s19529_s27 + $0x78] sm:$0xff] }
 0x39d   : > { %v13227_v51 = vpack.c.bf16 %v2008_v19, %v2007_v11  ;;  %v2948_v19 = vld [vmem:[%s19534_s2 + $0x10] sm:$0xff] }
 0x39e   : > { %v2314_v36 = vsel %vm2176_vm1, %v2313_v25, %v2309_v55  ;;  %v2626_v55 = vld [vmem:[%s19531_s24 + $0x20] sm:$0xff]  ;;  %v2627_v25 = vld [vmem:[%s19531_s24 + $0x28] sm:$0xff] }
 0x39f   : > { %v2152_v31 = vpop.permute.xlu1 %2151  ;;  %v2319_v2 = vsel %vm2183_vm2, %v2318_v61, %v2314_v36  ;;  %v13236_v49 = vpack.c.bf16 %v2627_v25, %v2626_v55  ;;  %v2625_v61 = vld [vmem:[%s19531_s24 + $0x18] sm:$0xff]  ;;  %v2954_v25 = vld [vmem:[%s19534_s2 + $0x40] sm:$0xff] }
 0x3a0   : > { %v2304_v46 = vrot.slane %v2152_v31, %v14724_v18  ;;  %v19532_v31 = vmov 0.0|0.0   ;;  %v13233_v63 = vpack.c.bf16 %v2625_v61, %v2624_v3  ;;  %v2633_v36 = vld [vmem:[%s19531_s24 + $0x58] sm:$0xff]  ;;  %v2959_v3 = vld [vmem:[%s19534_s2 + $0x68] sm:$0xff] }
 0x3a2   : > { %v2305_v47 = vsel %vm2190_vm3, %v2304_v46, %v2300_v40  ;;  %v19533_v46 = vmov 0.0   ;;  %v13239_v40 = vpack.c.bf16 %v2629_v37, %v2628_v44  ;;  %v2956_v37 = vld [vmem:[%s19534_s2 + $0x50] sm:$0xff] }
 0x3a3   : > { %v2164_v35 = vpop.permute.xlu1 %2163  ;;  %v2336_v62 = vsel %vm2335_vm9, %v2305_v47, %v2334_v21  ;;  %v13242_v47 = vpack.c.bf16 %v2631_v15, %v2630_v0  ;;  %v2637_v21 = vld [vmem:[%s19531_s24 + $0x78] sm:$0xff] }
 0x3a4   : > { %v2323_v1 = vrot.slane %v2164_v35, %v14724_v18  ;;  %v13248_v35 = vpack.c.bf16 %v2635_v58, %v2634_v60  ;;  %v2961_v0 = vld [vmem:[%s19534_s2 + $0x78] sm:$0xff] }
 0x3a6   : > { %v2324_v52 = vsel %vm2190_vm3, %v2323_v1, %v2319_v2  ;;  %v2636_v1 = vld [vmem:[%s19531_s24 + $0x70] sm:$0xff]  ;;  %v13245_v2 = vpack.c.bf16 %v2633_v36, %v2632_v23 }
 0x3a7   : > { %v15618_v27 = vsel %vm2337_vm10, %v2324_v52, %v2336_v62  ;;  %v2950_v62 = vld [vmem:[%s19534_s2 + $0x20] sm:$0xff]  ;;  %v2951_v52 = vld [vmem:[%s19534_s2 + $0x28] sm:$0xff] }
 0x3a8   : > { %12759 = vmatmul.mubr.msk.f32.vlgmr.msra.gmra.mrb[0].mxu0 %vm2339_vm11, %v15618_v27  ;;  %12770 = vmatmul.mubr.msk.f32.vlgmr.msra.gmra.mrb[0].mxu1 %vm2339_vm11, %v15618_v27  ;;  %v13260_v11 = vpack.c.bf16 %v2951_v52, %v2950_v62  ;;  %v12388_v52 = vld [vmem:[#allocation8 + $0x1] ss:$0 sm:$0xff] }
 0x3a9   : > { %13219 = vmatpush3.bf16.msra.mxu0 %v13218_v48  ;;  %13225 = vmatpush3.bf16.msra.mxu1 %v13224_v50  ;;  %v13251_v48 = vpack.c.bf16 %v2637_v21, %v2636_v1  ;;  %v2946_v50 = vld [vmem:[%s19534_s2] sm:$0xff] }
 0x3aa   : > { %13220 = vmatprep.subr.bf16.mxu0 %v19532_v31  ;;  %13226 = vmatprep.subr.bf16.mxu1 %v19532_v31  ;;  %v13254_v56 = vpack.c.bf16 %v2947_v26, %v2946_v50  ;;  %v12396_v50 = vld [vmem:[#allocation9 + $0x1] ss:$0 sm:$0xff] }
 0x3ab   : > { %12780 = vmatprep.mubr.msk.f32.mxu0 %vm14140_vm0, %v19533_v46  ;;  %12791 = vmatprep.mubr.msk.f32.mxu1 %vm14140_vm0, %v19533_v46 }
 0x3ad   : > { %13222 = vmatpush3.bf16.msra.mxu0 %v13221_v53  ;;  %13228 = vmatpush3.bf16.msra.mxu1 %v13227_v51  ;;  %v2949_v53 = vld [vmem:[%s19534_s2 + $0x18] sm:$0xff]  ;;  %v2952_v51 = vld [vmem:[%s19534_s2 + $0x30] sm:$0xff] }
 0x3ae   : > { %13229 = vmatprep.subr.bf16.mxu0 %v19532_v31  ;;  %13235 = vmatprep.subr.bf16.mxu1 %v19532_v31  ;;  %v13257_v24 = vpack.c.bf16 %v2949_v53, %v2948_v19  ;;  %v13263_v55 = vpack.c.bf16 %v2953_v42, %v2952_v51 }
 0x3b0   : > { %12781 = vmatmul.mubr.msk.f32.vlgmr.msra.gmra.mrb[2].mxu0 %vm2339_vm11, %v15618_v27  ;;  %12792 = vmatmul.mubr.msk.f32.vlgmr.msra.gmra.mrb[2].mxu1 %vm2339_vm11, %v15618_v27 }
 0x3b1   : > { %13231 = vmatpush3.bf16.msra.mxu0 %v13230_v32  ;;  %13237 = vmatpush3.bf16.msra.mxu1 %v13236_v49  ;;  %v2955_v32 = vld [vmem:[%s19534_s2 + $0x48] sm:$0xff]  ;;  %v2958_v49 = vld [vmem:[%s19534_s2 + $0x60] sm:$0xff] }
 0x3b2   : > { %13232 = vmatprep.subr.bf16.mxu0 %v19532_v31  ;;  %13238 = vmatprep.subr.bf16.mxu1 %v19532_v31  ;;  %v13266_v61 = vpack.c.bf16 %v2955_v32, %v2954_v25  ;;  %v13272_v44 = vpack.c.bf16 %v2959_v3, %v2958_v49  ;;  %v12389_v49 = vld [vmem:[#allocation8 + $0x2] ss:$0 sm:$0xff]  ;;  %v12390_v3 = vld [vmem:[#allocation8 + $0x3] ss:$0 sm:$0xff] }
 0x3b3   : > { %12802 = vmatprep.mubr.msk.f32.mxu0 %vm14140_vm0, %v19533_v46  ;;  %12813 = vmatprep.mubr.msk.f32.mxu1 %vm14140_vm0, %v19533_v46 }
 0x3b5   : > { %13234 = vmatpush3.bf16.msra.mxu0 %v13233_v63  ;;  %13240 = vmatpush3.bf16.msra.mxu1 %v13239_v40  ;;  %v2957_v63 = vld [vmem:[%s19534_s2 + $0x58] sm:$0xff]  ;;  %v2960_v40 = vld [vmem:[%s19534_s2 + $0x70] sm:$0xff] }
 0x3b6   : > { %13241 = vmatprep.subr.bf16.mxu0 %v19532_v31  ;;  %13247 = vmatprep.subr.bf16.mxu1 %v19532_v31  ;;  %v13269_v15 = vpack.c.bf16 %v2957_v63, %v2956_v37  ;;  %v13275_v60 = vpack.c.bf16 %v2961_v0, %v2960_v40 }
 0x3b8   : > { %12803 = vmatmul.mubr.msk.f32.vlgmr.msra.gmra.mrb[4].mxu0 %vm2339_vm11, %v15618_v27  ;;  %12814 = vmatmul.mubr.msk.f32.vlgmr.msra.gmra.mrb[4].mxu1 %vm2339_vm11, %v15618_v27 }
 0x3b9   : > { %13243 = vmatpush3.bf16.msra.mxu0 %v13242_v47  ;;  %13249 = vmatpush3.bf16.msra.mxu1 %v13248_v35 }
 0x3ba   : > { %13244 = vmatprep.subr.bf16.mxu0 %v19532_v31  ;;  %13250 = vmatprep.subr.bf16.mxu1 %v19532_v31 }
 0x3bb   : > { %12824 = vmatprep.mubr.msk.f32.mxu0 %vm14140_vm0, %v19533_v46  ;;  %12835 = vmatprep.mubr.msk.f32.mxu1 %vm14140_vm0, %v19533_v46 }
 0x3bd   : > { %13246 = vmatpush3.bf16.msra.mxu0 %v13245_v2  ;;  %13252 = vmatpush3.bf16.msra.mxu1 %v13251_v48  ;;  %v12395_v48 = vld [vmem:[#allocation9] ss:$0 sm:$0xff] }
 0x3be   : > { %13253 = vmatprep.subr.bf16.mxu0 %v19532_v31  ;;  %13259 = vmatprep.subr.bf16.mxu1 %v19532_v31 }
 0x3c0   : > { %12825 = vmatmul.mubr.msk.f32.vlgmr.msra.gmra.mrb[6].mxu0 %vm2339_vm11, %v15618_v27  ;;  %12836 = vmatmul.mubr.msk.f32.vlgmr.msra.gmra.mrb[6].mxu1 %vm2339_vm11, %v15618_v27 }
 0x3c1   : > { %13255 = vmatpush3.bf16.msra.mxu0 %v13254_v56  ;;  %13261 = vmatpush3.bf16.msra.mxu1 %v13260_v11 }
 0x3c2   : > { %13256 = vmatprep.subr.bf16.mxu0 %v19532_v31  ;;  %13262 = vmatprep.subr.bf16.mxu1 %v19532_v31 }
 0x3c3   : > { %12846 = vmatprep.mubr.msk.f32.mxu0 %vm14140_vm0, %v19533_v46  ;;  %12857 = vmatprep.mubr.msk.f32.mxu1 %vm14140_vm0, %v19533_v46 }
 0x3c5   : > { %13258 = vmatpush3.bf16.msra.mxu0 %v13257_v24  ;;  %13264 = vmatpush3.bf16.msra.mxu1 %v13263_v55  ;;  %v12397_v24 = vld [vmem:[#allocation9 + $0x2] ss:$0 sm:$0xff]  ;;  %v12398_v55 = vld [vmem:[#allocation9 + $0x3] ss:$0 sm:$0xff] }
 0x3c6   : > { %13265 = vmatprep.subr.bf16.mxu0 %v19532_v31  ;;  %13271 = vmatprep.subr.bf16.mxu1 %v19532_v31 }
 0x3c8   : > { %12847 = vmatmul.mubr.msk.f32.vlgmr.msra.gmra.mrb[8].mxu0 %vm2339_vm11, %v15618_v27  ;;  %12858 = vmatmul.mubr.msk.f32.vlgmr.msra.gmra.mrb[8].mxu1 %vm2339_vm11, %v15618_v27 }
 0x3c9   : > { %13267 = vmatpush3.bf16.msra.mxu0 %v13266_v61  ;;  %13273 = vmatpush3.bf16.msra.mxu1 %v13272_v44 }
 0x3ca   : > { %13268 = vmatprep.subr.bf16.mxu0 %v19532_v31  ;;  %13274 = vmatprep.subr.bf16.mxu1 %v19532_v31 }
 0x3cb   : > { %12868 = vmatprep.mubr.msk.f32.mxu0 %vm14140_vm0, %v19533_v46  ;;  %12879 = vmatprep.mubr.msk.f32.mxu1 %vm14140_vm0, %v19533_v46 }
 0x3cd   : > { %13270 = vmatpush3.bf16.msra.mxu0 %v13269_v15  ;;  %13276 = vmatpush3.bf16.msra.mxu1 %v13275_v60  ;;  %v12403_v15 = vld [vmem:[#allocation11] ss:$0 sm:$0xff]  ;;  %v12404_v60 = vld [vmem:[#allocation11 + $0x1] ss:$0 sm:$0xff] }
 0x3ce   : > { %12882 = vmatprep.subr.mxu0 %v19533_v46  ;;  %12887 = vmatprep.subr.mxu1 %v19533_v46 }
 0x3d0   : > { %12869 = vmatmul.mubr.msk.f32.vlgmr.msra.gmra.mrb[10].mxu0 %vm2339_vm11, %v15618_v27  ;;  %12880 = vmatmul.mubr.msk.f32.vlgmr.msra.gmra.mrb[10].mxu1 %vm2339_vm11, %v15618_v27  ;;  %v12387_v27 = vld [vmem:[#allocation8] ss:$0 sm:$0xff] }
 0x3d1   : > { %12884 = vmatprep.mubr.msk.f32.mxu0 %vm14140_vm0, %v19533_v46  ;;  %12889 = vmatprep.mubr.msk.f32.mxu1 %vm14140_vm0, %v19533_v46 }
 0x47b   : > { %v2408_v58 = vpop.f32.mrb[0].mxu0  ;;  %v2478_v47 = vpop.f32.mrb[0].mxu1 }
 0x47c   : > { %v12760_v35 = vpop.f32.mrb[1].mxu0  ;;  %v12771_v23 = vpop.f32.mrb[1].mxu1  ;;  %v2409_v51 = vadd.f32 %v12387_v27, %v2408_v58  ;;  %v2479_v42 = vadd.f32 %v12388_v52, %v2478_v47 }
 0x483   : > { %v2548_v36 = vpop.f32.mrb[2].mxu0  ;;  %v2618_v1 = vpop.f32.mrb[2].mxu1 }
 0x484   : > { %v12782_v21 = vpop.f32.mrb[3].mxu0  ;;  %v12793_v2 = vpop.f32.mrb[3].mxu1  ;;  %v2549_v40 = vadd.f32 %v12389_v49, %v2548_v36  ;;  %v2619_v0 = vadd.f32 %v12390_v3, %v2618_v1 }
 0x48b   : > { %v2732_v26 = vpop.f32.mrb[4].mxu0  ;;  %v2802_v62 = vpop.f32.mrb[4].mxu1 }
 0x48c   : > { %v2733_v56 = vadd.f32 %v12395_v48, %v2732_v26  ;;  %v2803_v11 = vadd.f32 %v12396_v50, %v2802_v62  ;;  %v12804_v19 = vpop.f32.mrb[5].mxu0  ;;  %v12815_v53 = vpop.f32.mrb[5].mxu1 }
 0x48e   : > { %12883 = vmatpush3.xpose.msk.msra.mxu0 %vm3270_vm12, %v2733_v56  ;;  %12888 = vmatpush3.xpose.msk.msra.mxu1 %vm3270_vm12, %v2803_v11 }
 0x48f   : > { %12892 = vmatprep.subr.mxu0 %v19533_v46  ;;  %12897 = vmatprep.subr.mxu1 %v19533_v46 }
 0x491   : > { %12885 = vmatmul.mubr.msk.f32.vlgmr.msra.gmra.mrb[12].mxu0 %vm3270_vm12, %v2409_v51  ;;  %12890 = vmatmul.mubr.msk.f32.vlgmr.msra.gmra.mrb[12].mxu1 %vm3270_vm12, %v2479_v42 }
 0x492   : > { %12894 = vmatprep.mubr.msk.f32.mxu0 %vm14140_vm0, %v19533_v46  ;;  %12899 = vmatprep.mubr.msk.f32.mxu1 %vm14140_vm0, %v19533_v46 }
 0x493   : > { %v2872_v25 = vpop.f32.mrb[6].mxu0  ;;  %v2942_v32 = vpop.f32.mrb[6].mxu1 }
 0x494   : > { %v2873_v61 = vadd.f32 %v12397_v24, %v2872_v25  ;;  %v2943_v44 = vadd.f32 %v12398_v55, %v2942_v32  ;;  %v12826_v37 = vpop.f32.mrb[7].mxu0  ;;  %v12837_v63 = vpop.f32.mrb[7].mxu1 }
 0x496   : > { %12893 = vmatpush3.xpose.msk.msra.mxu0 %vm3270_vm12, %v2873_v61  ;;  %12898 = vmatpush3.xpose.msk.msra.mxu1 %vm3270_vm12, %v2943_v44 }
 0x497   : > { %12902 = vmatprep.subr.mxu0 %v19533_v46  ;;  %12907 = vmatprep.subr.mxu1 %v19533_v46 }
 0x499   : > { %12895 = vmatmul.mubr.msk.f32.vlgmr.msra.gmra.mrb[14].mxu0 %vm3270_vm12, %v2549_v40  ;;  %12900 = vmatmul.mubr.msk.f32.vlgmr.msra.gmra.mrb[14].mxu1 %vm3270_vm12, %v2619_v0 }
 0x49a   : > { %12904 = vmatprep.mubr.msk.f32.mxu0 %vm14140_vm0, %v19533_v46  ;;  %12909 = vmatprep.mubr.msk.f32.mxu1 %vm14140_vm0, %v19533_v46 }
 0x49b   : > { %v3056_v58 = vpop.f32.mrb[8].mxu0  ;;  %v3126_v47 = vpop.f32.mrb[8].mxu1 }
 0x49c   : > { %v3057_v35 = vadd.f32 %v12403_v15, %v3056_v58  ;;  %v3127_v23 = vadd.f32 %v12404_v60, %v3126_v47  ;;  %v12848_v36 = vpop.f32.mrb[9].mxu0  ;;  %v12859_v1 = vpop.f32.mrb[9].mxu1 }
 0x49e   : > { %12903 = vmatpush3.msra.mxu0 %v3057_v35  ;;  %12908 = vmatpush3.msra.mxu1 %v3127_v23 }
 0x49f   : > { %12912 = vmatprep.subr.mxu0 %v19533_v46  ;;  %12917 = vmatprep.subr.mxu1 %v19533_v46 }
 0x4a3   : > { %v15806_v21 = vpop.f32.mrb[10].mxu0  ;;  %v15808_v2 = vpop.f32.mrb[10].mxu1 }
 0x4a4   : > { %v12870_v48 = vpop.f32.mrb[11].mxu0  ;;  %v12881_v50 = vpop.f32.mrb[11].mxu1 }
 0x564   : > { %v3343_v26 = vpop.f32.mrb[12].mxu0  ;;  %v3419_v62 = vpop.f32.mrb[12].mxu1 }
 0x565   : > { %v3575_v27 = vmul.f32 0.35355338, %v3343_v26  ;;  %v3576_v52 = vmul.f32 0.35355338, %v3419_v62  ;;  %v12886_v56 = vpop.f32.mrb[13].mxu0  ;;  %v12891_v11 = vpop.f32.mrb[13].mxu1 }
 0x567   : > { %v3582_v19 = vsel %vm3270_vm12, %v3576_v52, -inf  ;;  %v3579_v53 = vsel %vm3270_vm12, %v3575_v27, -inf }
 0x568   : > { %3583 = vmax.xlane.f32.xlu1 %v3582_v19  ;;  %3580 = vmax.xlane.f32.xlu0 %v3579_v53  ;;  %v12406_v53 = vld [vmem:[#allocation11 + $0x3] ss:$0 sm:$0xff] }
 0x56c   : > { %v3495_v51 = vpop.f32.mrb[14].mxu0  ;;  %v3571_v42 = vpop.f32.mrb[14].mxu1 }
 0x56d   : > { %v3577_v24 = vmul.f32 0.35355338, %v3495_v51  ;;  %v12896_v55 = vpop.f32.mrb[15].mxu0  ;;  %v12901_v25 = vpop.f32.mrb[15].mxu1  ;;  %v3578_v32 = vmul.f32 0.35355338, %v3571_v42 }
 0x56e   : > { %v12405_v42 = vld [vmem:[#allocation11 + $0x2] ss:$0 sm:$0xff] }
 0x56f   : > { %v3585_v49 = vsel %vm3270_vm12, %v3577_v24, -inf  ;;  %v3588_v3 = vsel %vm3270_vm12, %v3578_v32, -inf }
 0x570   : > { %3586 = vmax.xlane.f32.xlu0 %v3585_v49 }
 0x574   : > { %3589 = vmax.xlane.f32.xlu0 %v3588_v3  ;;  %v3197_v3 = vadd.f32 %v12405_v42, %v15806_v21 }
 0x5f5   : > { %v3584_v61 = vpop.xlane.xlu1 %3583  ;;  %v3581_v44 = vpop.xlane.xlu0 %3580 }
 0x5f6   : > { %v3592_v37 = vsub.f32 %v3576_v52, %v3584_v61  ;;  %v3591_v63 = vsub.f32 %v3575_v27, %v3581_v44 }
 0x5f8   : > { %v3597_v40 = vmul.f32 1.442695, %v3592_v37  ;;  %v3595_v0 = vmul.f32 1.442695, %v3591_v63  ;;  %v3915_v37 = vld [vmem:[#allocation12] sm:$0xff]  ;;  %v3916_v63 = vld [vmem:[#allocation12 + $0x8] sm:$0xff] }
 0x5fa   : > { %13580 = vpow2.f32 %v3597_v40  ;;  %v3918_v40 = vld [vmem:[#allocation12 + $0x18] sm:$0xff] }
 0x5fb   : > { %13582 = vpow2.f32 %v3595_v0 }
 0x5fd   : > { %v3587_v15 = vpop.xlane.xlu0 %3586 }
 0x5fe   : > { %v3593_v60 = vsub.f32 %v3577_v24, %v3587_v15  ;;  %v3917_v15 = vld [vmem:[#allocation12 + $0x10] sm:$0xff] }
 0x600   : > { %v3599_v58 = vmul.f32 1.442695, %v3593_v60 }
 0x601   : > { %v3590_v47 = vpop.xlane.xlu0 %3589 }
 0x602   : > { %13584 = vpow2.f32 %v3599_v58  ;;  %v3594_v35 = vsub.f32 %v3578_v32, %v3590_v47  ;;  %v3267_v32 = vadd.f32 %v12406_v53, %v15808_v2 }
 0x604   : > { %v13581_v23 = vpop.eup %13580  ;;  %v3601_v36 = vmul.f32 1.442695, %v3594_v35 }
 0x605   : > { %v13583_v1 = vpop.eup %13582  ;;  %v3606_v48 = vsel %vm3270_vm12, %v13581_v23, 0.0 }
 0x606   : > { %13586 = vpow2.f32 %v3601_v36  ;;  %3607 = vadd.xlane.f32.xlu1 %v3606_v48  ;;  %v3603_v50 = vsel %vm3270_vm12, %v13583_v1, 0.0 }
 0x607   : > { %3604 = vadd.xlane.f32.xlu0 %v3603_v50 }
 0x60c   : > { %v13585_v26 = vpop.eup %13584 }
 0x60d   : > { %v3609_v62 = vsel %vm3270_vm12, %v13585_v26, 0.0 }
 0x60e   : > { %3610 = vadd.xlane.f32.xlu0 %v3609_v62 }
 0x610   : > { %v13587_v27 = vpop.eup %13586 }
 0x611   : > { %v3612_v52 = vsel %vm3270_vm12, %v13587_v27, 0.0 }
 0x612   : > { %3613 = vadd.xlane.f32.xlu1 %v3612_v52 }
 0x693   : > { %v3608_v56 = vpop.xlane.xlu1 %3607 }
 0x694   : > { %13588 = vrcp.f32 %v3608_v56  ;;  %v3605_v11 = vpop.xlane.xlu0 %3604 }
 0x695   : > { %13590 = vrcp.f32 %v3605_v11 }
 0x69b   : > { %v3611_v19 = vpop.xlane.xlu0 %3610 }
 0x69c   : > { %13592 = vrcp.f32 %v3611_v19 }
 0x69e   : > { %v13589_v51 = vpop.eup %13588 }
 0x69f   : > { %v13591_v24 = vpop.eup %13590  ;;  %v3614_v55 = vpop.xlane.xlu1 %3613  ;;  %v3620_v25 = vmul.f32 %v13589_v51, %v13581_v23 }
 0x6a0   : > { %13594 = vrcp.f32 %v3614_v55  ;;  %v3619_v49 = vmul.f32 %v13591_v24, %v13583_v1  ;;  %v12427_v55 = vld [vmem:[#allocation14] ss:$0 sm:$0xff] }
 0x6a1   : > { %12910 = vmatmul.mubr.msk.f32.vlgmr.msra.gmra.mrb[16].mxu1 %vm3270_vm12, %v3620_v25 }
 0x6a2   : > { %12905 = vmatmul.mubr.msk.f32.vlgmr.msra.gmra.mrb[16].mxu0 %vm3270_vm12, %v3619_v49  ;;  %12918 = vmatpush3.msra.mxu1 %v3267_v32 }
 0x6a3   : > { %12913 = vmatpush3.msra.mxu0 %v3197_v3  ;;  %12914 = vmatprep.mubr.msk.f32.mxu0 %vm14140_vm0, %v19533_v46 }
 0x6a4   : > { %12919 = vmatprep.mubr.msk.f32.mxu1 %vm14140_vm0, %v19533_v46  ;;  %12922 = vmatprep.subr.mxu0 %v19533_v46 }
 0x6a5   : > { %12927 = vmatprep.subr.mxu1 %v19533_v46 }
 0x6a6   : > { %v13593_v2 = vpop.eup %13592 }
 0x6a7   : > { %v3621_v61 = vmul.f32 %v13593_v2, %v13585_v26 }
 0x6a9   : > { %12915 = vmatmul.mubr.msk.f32.vlgmr.msra.gmra.mrb[18].mxu0 %vm3270_vm12, %v3621_v61 }
 0x6aa   : > { %v13595_v21 = vpop.eup %13594  ;;  %12924 = vmatprep.mubr.msk.f32.mxu0 %vm14140_vm0, %v19533_v46  ;;  %12923 = vmatpush3.msra.mxu0 %v3915_v37 }
 0x6ab   : > { %v3622_v44 = vmul.f32 %v13595_v21, %v13587_v27  ;;  %12932 = vmatprep.subr.mxu0 %v19533_v46 }
 0x6ad   : > { %12920 = vmatmul.mubr.msk.f32.vlgmr.msra.gmra.mrb[18].mxu1 %vm3270_vm12, %v3622_v44 }
 0x6ae   : > { %12929 = vmatprep.mubr.msk.f32.mxu1 %vm14140_vm0, %v19533_v46  ;;  %12928 = vmatpush3.msra.mxu1 %v3916_v63 }
 0x6af   : > { %12937 = vmatprep.subr.mxu1 %v19533_v46 }
 0x774   : > { %v3765_v0 = vpop.f32.mrb[16].mxu1 }
 0x775   : > { %v3692_v60 = vpop.f32.mrb[16].mxu0  ;;  %v12911_v58 = vpop.f32.mrb[17].mxu1  ;;  %12930 = vmatmul.mubr.msk.f32.vlgmr.msra.gmra.mrb[20].mxu1 %vm3270_vm12, %v3765_v0 }
 0x776   : > { %v12906_v47 = vpop.f32.mrb[17].mxu0  ;;  %12925 = vmatmul.mubr.msk.f32.vlgmr.msra.gmra.mrb[20].mxu0 %vm3270_vm12, %v3692_v60  ;;  %12938 = vmatpush3.msra.mxu1 %v3918_v40 }
 0x777   : > { %12933 = vmatpush3.msra.mxu0 %v3917_v15  ;;  %12934 = vmatprep.mubr.msk.f32.mxu0 %vm14140_vm0, %v19533_v46 }
 0x778   : > { %12939 = vmatprep.mubr.msk.f32.mxu1 %vm14140_vm0, %v19533_v46  ;;  %13277 = vmatprep.subr.bf16.mxu0 %v19532_v31 }
 0x779   : > { %13283 = vmatprep.subr.bf16.mxu1 %v19532_v31 }
 0x77c   : > { %v3838_v35 = vpop.f32.mrb[18].mxu0 }
 0x77d   : > { %v12916_v23 = vpop.f32.mrb[19].mxu0  ;;  %12935 = vmatmul.mubr.msk.f32.vlgmr.msra.gmra.mrb[22].mxu0 %vm3270_vm12, %v3838_v35 }
 0x77e   : > { %12950 = vmatprep.mubr.msk.f32.mxu0 %vm14140_vm0, %v19533_v46 }
 0x780   : > { %v3911_v36 = vpop.f32.mrb[18].mxu1 }
 0x781   : > { %v12921_v1 = vpop.f32.mrb[19].mxu1  ;;  %12940 = vmatmul.mubr.msk.f32.vlgmr.msra.gmra.mrb[22].mxu1 %vm3270_vm12, %v3911_v36 }
 0x782   : > { %12969 = vmatprep.mubr.msk.f32.mxu1 %vm14140_vm0, %v19533_v46 }
 0x848   : > { %v4061_v48 = vpop.f32.mrb[20].mxu1 }
 0x849   : > { %v3988_v50 = vpop.f32.mrb[20].mxu0  ;;  %v4212_v26 = vsel %vm2339_vm11, %v4061_v48, 0.0  ;;  %v12931_v62 = vpop.f32.mrb[21].mxu1 }
 0x84a   : > { %v4211_v27 = vsel %vm2339_vm11, %v3988_v50, 0.0  ;;  %v12926_v52 = vpop.f32.mrb[21].mxu0 }
 0x84b   : > { %v4213_v56 = vadd.f32 %v4212_v26, %v4211_v27 }
 0x850   : > { %v4134_v11 = vpop.f32.mrb[22].mxu0 }
 0x851   : > { %v4214_v19 = vsel %vm2339_vm11, %v4134_v11, 0.0  ;;  %v12936_v53 = vpop.f32.mrb[23].mxu0 }
 0x852   : > { %v4215_v51 = vadd.f32 %v4214_v19, %v4213_v56 }
 0x854   : > { %v4207_v42 = vpop.f32.mrb[22].mxu1 }
 0x855   : > { %v4216_v24 = vsel %vm2339_vm11, %v4207_v42, 0.0  ;;  %v12941_v25 = vpop.f32.mrb[23].mxu1 }
 0x856   : > { %v4217_v32 = vadd.f32 %v4216_v24, %v4215_v51  ;;  %v19540_v24 = vld [vmem:[#allocation42_spill] sm:$0xff] }
 0x858   : > { %v4225_v49 = vadd.f32 %v12427_v55, %v4217_v32 }
 0x85a   : > { %v4230_v3 = vrot.slane %v4225_v49, %v14703_v4  ;;  %v4249_v2 = vrot.slane %v4225_v49, %v14705_v5  ;;  %v4268_v61 = vrot.slane %v4225_v49, %v14707_v6  ;;  %v4287_v21 = vrot.slane %v4225_v49, %v14709_v7 }
 0x85b   : > { %v4306_v44 = vrot.slane %v4225_v49, %v14713_v12  ;;  %v4325_v37 = vrot.slane %v4225_v49, %v14715_v13  ;;  %v4344_v63 = vrot.slane %v4225_v49, %v14717_v14  ;;  %v4363_v40 = vrot.slane %v4225_v49, %v14728_v22  ;;  %v19543_v49 = vld [vmem:[#allocation44_spill] sm:$0xff] }
 0x85c   : > { %4236 = vbcast.lane.b32.xlu1 %v4230_v3, 264  ;;  %4232 = vbcast.lane.b32.xlu0 %v4230_v3, 256 }
 0x860   : > { %4251 = vbcast.lane.b32.xlu1 %v4249_v2, 256  ;;  %4240 = vbcast.lane.b32.xlu0 %v4230_v3, 272 }
 0x864   : > { %4255 = vbcast.lane.b32.xlu1 %v4249_v2, 264  ;;  %4270 = vbcast.lane.b32.xlu0 %v4268_v61, 256 }
 0x868   : > { %4259 = vbcast.lane.b32.xlu1 %v4249_v2, 272  ;;  %4244 = vbcast.lane.b32.xlu0 %v4230_v3, 280 }
 0x86c   : > { %4274 = vbcast.lane.b32.xlu1 %v4268_v61, 264  ;;  %4278 = vbcast.lane.b32.xlu0 %v4268_v61, 272 }
 0x870   : > { %4263 = vbcast.lane.b32.xlu1 %v4249_v2, 280  ;;  %4293 = vbcast.lane.b32.xlu0 %v4287_v21, 264 }
 0x874   : > { %4289 = vbcast.lane.b32.xlu1 %v4287_v21, 256  ;;  %4297 = vbcast.lane.b32.xlu0 %v4287_v21, 272 }
 0x878   : > { %4282 = vbcast.lane.b32.xlu1 %v4268_v61, 280  ;;  %4312 = vbcast.lane.b32.xlu0 %v4306_v44, 264  ;;  %v19545_v61 = vld [vmem:[#allocation45_spill] sm:$0xff] }
 0x87c   : > { %4308 = vbcast.lane.b32.xlu1 %v4306_v44, 256  ;;  %4316 = vbcast.lane.b32.xlu0 %v4306_v44, 272 }
 0x880   : > { %4301 = vbcast.lane.b32.xlu1 %v4287_v21, 280  ;;  %4331 = vbcast.lane.b32.xlu0 %v4325_v37, 264 }
 0x884   : > { %4327 = vbcast.lane.b32.xlu1 %v4325_v37, 256  ;;  %4335 = vbcast.lane.b32.xlu0 %v4325_v37, 272 }
 0x888   : > { %4320 = vbcast.lane.b32.xlu1 %v4306_v44, 280  ;;  %4350 = vbcast.lane.b32.xlu0 %v4344_v63, 264  ;;  %v19546_v44 = vld [vmem:[#allocation46_spill] sm:$0xff] }
 0x88c   : > { %4346 = vbcast.lane.b32.xlu1 %v4344_v63, 256  ;;  %4354 = vbcast.lane.b32.xlu0 %v4344_v63, 272 }
 0x890   : > { %4339 = vbcast.lane.b32.xlu1 %v4325_v37, 280  ;;  %4369 = vbcast.lane.b32.xlu0 %v4363_v40, 264 }
 0x894   : > { %4365 = vbcast.lane.b32.xlu1 %v4363_v40, 256  ;;  %4373 = vbcast.lane.b32.xlu0 %v4363_v40, 272 }
 0x898   : > { %4358 = vbcast.lane.b32.xlu1 %v4344_v63, 280 }
 0x89c   : > { %4377 = vbcast.lane.b32.xlu1 %v4363_v40, 280 }
 0x8ce   : > { %v4237_v0 = vpop.permute.xlu1 %4236  ;;  %v4233_v15 = vpop.permute.xlu0 %4232 }
 0x8cf   : > { %v15863_v60 = vadd.f32 %v4237_v0, %v15323_v38  ;;  %v15866_v58 = vadd.f32 %v4233_v15, %v15329_v57  ;;  %v19548_v0 = vld [vmem:[#allocation47_spill] sm:$0xff] }
 0x8d1   : > { %4481 = vperm.xlu1 %13578, %v15863_v60   ;;  %4478 = vperm.xlu0 %13579, %v15866_v58  }
 0x8d2   : > { %v4252_v47 = vpop.permute.xlu1 %4251  ;;  %v4241_v35 = vpop.permute.xlu0 %4240 }
 0x8d3   : > { %v15871_v23 = vadd.f32 %v4252_v47, %v15334_v30  ;;  %v15875_v48 = vadd.f32 %v4241_v35, %v15336_v41  ;;  %v19549_v47 = vld [vmem:[#allocation48_spill] sm:$0xff] }
 0x8d5   : > { %4490 = vperm.xlu0 %13579, %v15871_v23  }
 0x8d6   : > { %v4256_v36 = vpop.permute.xlu1 %4255  ;;  %v4271_v1 = vpop.permute.xlu0 %4270 }
 0x8d7   : > { %v15878_v38 = vadd.f32 %v4256_v36, %v15342_v20  ;;  %v15883_v26 = vadd.f32 %v4271_v1, %v15344_v9 }
 0x8d9   : > { %4493 = vperm.xlu1 %13578, %v15878_v38   ;;  %4484 = vperm.xlu0 %13579, %v15875_v48  }
 0x8da   : > { %v4260_v57 = vpop.permute.xlu1 %4259  ;;  %v4245_v50 = vpop.permute.xlu0 %4244 }
 0x8db   : > { %v15886_v30 = vadd.f32 %v4260_v57, %v15351_v45  ;;  %v15891_v20 = vadd.f32 %v4245_v50, %v15353_v10  ;;  %v19551_v57 = vld [vmem:[#allocation49_spill] sm:$0xff] }
 0x8dd   : > { %4496 = vperm.xlu1 %13578, %v15886_v30   ;;  %4502 = vperm.xlu0 %13579, %v15883_v26  }
 0x8de   : > { %v4275_v41 = vpop.permute.xlu1 %4274  ;;  %v4279_v62 = vpop.permute.xlu0 %4278 }
 0x8df   : > { %v15894_v27 = vadd.f32 %v4275_v41, %v15360_v28  ;;  %v15899_v45 = vadd.f32 %v4279_v62, %v15362_v34  ;;  %v19552_v41 = vld [vmem:[#allocation50_spill] sm:$0xff] }
 0x8e1   : > { %4505 = vperm.xlu1 %13578, %v15894_v27   ;;  %4487 = vperm.xlu0 %13579, %v15891_v20   ;;  %19535 = vst [vmem:[#allocation58_spill] sm:$0xff] %v15899_v45 }
 0x8e2   : > { %v4264_v9 = vpop.permute.xlu1 %4263  ;;  %v4294_v52 = vpop.permute.xlu0 %4293 }
 0x8e3   : > { %v15902_v56 = vadd.f32 %v4264_v9, %v15370_v29  ;;  %v15907_v28 = vadd.f32 %v4294_v52, %v15372_v59 }
 0x8e5   : > { %19536 = vst [vmem:[#allocation59_spill] sm:$0xff] %v15902_v56  ;;  %4499 = vperm.xlu1 %13578, %v15902_v56   ;;  %4508 = vperm.xlu0 %13579, %v15899_v45   ;;  %19537 = vst [vmem:[#allocation60_spill] sm:$0xff] %v15907_v28 }
 0x8e6   : > { %v4290_v10 = vpop.permute.xlu1 %4289  ;;  %v4298_v11 = vpop.permute.xlu0 %4297 }
 0x8e7   : > { %v15910_v19 = vadd.f32 %v4290_v10, %v15380_v39  ;;  %v15915_v29 = vadd.f32 %v4298_v11, %v15382_v33  ;;  %v19554_v10 = vld [vmem:[#allocation51_spill] sm:$0xff] }
 0x8e9   : > { %19538 = vst [vmem:[#allocation61_spill] sm:$0xff] %v15910_v19  ;;  %4514 = vperm.xlu1 %13578, %v15910_v19   ;;  %4517 = vperm.xlu0 %13579, %v15907_v28  }
 0x8ea   : > { %v4283_v34 = vpop.permute.xlu1 %4282  ;;  %v4313_v53 = vpop.permute.xlu0 %4312 }
 0x8eb   : > { %v15918_v51 = vadd.f32 %v4283_v34, %v15390_v54  ;;  %v15923_v39 = vadd.f32 %v4313_v53, %v15392_v43  ;;  %v19542_v54 = vld [vmem:[#allocation43_spill] sm:$0xff]  ;;  %v19555_v34 = vld [vmem:[#allocation52_spill] sm:$0xff] }
 0x8ed   : > { %19539 = vst [vmem:[#allocation62_spill] sm:$0xff] %v15918_v51  ;;  %4511 = vperm.xlu1 %13578, %v15918_v51   ;;  %4520 = vperm.xlu0 %13579, %v15915_v29  }
 0x8ee   : > { %v4309_v59 = vpop.permute.xlu1 %4308  ;;  %v4317_v42 = vpop.permute.xlu0 %4316 }
 0x8ef   : > { %v15926_v55 = vadd.f32 %v4309_v59, %v19540_v24  ;;  %v15931_v32 = vadd.f32 %v4317_v42, %v19542_v54  ;;  %v19557_v42 = vld [vmem:[#allocation53_spill] sm:$0xff] }
 0x8f1   : > { %19541 = vst [vmem:[#allocation42_spill] sm:$0xff] %v15926_v55  ;;  %4526 = vperm.xlu1 %13578, %v15926_v55   ;;  %4529 = vperm.xlu0 %13579, %v15923_v39  }
 0x8f2   : > { %v4302_v33 = vpop.permute.xlu1 %4301  ;;  %v4332_v25 = vpop.permute.xlu0 %4331 }
 0x8f3   : > { %v15934_v3 = vadd.f32 %v4302_v33, %v19543_v49  ;;  %v15939_v21 = vadd.f32 %v4332_v25, %v19545_v61  ;;  %v19559_v33 = vld [vmem:[#allocation54_spill] sm:$0xff]  ;;  %v19563_v61 = vld [vmem:[#allocation56_spill] sm:$0xff] }
 0x8f5   : > { %19544 = vst [vmem:[#allocation43_spill] sm:$0xff] %v15934_v3  ;;  %4523 = vperm.xlu1 %13578, %v15934_v3   ;;  %4532 = vperm.xlu0 %13579, %v15931_v32  }
 0x8f6   : > { %v4328_v43 = vpop.permute.xlu1 %4327  ;;  %v4336_v2 = vpop.permute.xlu0 %4335 }
 0x8f7   : > { %v15942_v37 = vadd.f32 %v4328_v43, %v19546_v44  ;;  %v15947_v15 = vadd.f32 %v4336_v2, %v19548_v0  ;;  %v19561_v43 = vld [vmem:[#allocation55_spill] sm:$0xff] }
 0x8f9   : > { %19547 = vst [vmem:[#allocation44_spill] sm:$0xff] %v15942_v37  ;;  %4538 = vperm.xlu1 %13578, %v15942_v37   ;;  %4541 = vperm.xlu0 %13579, %v15939_v21  }
 0x8fa   : > { %v4321_v63 = vpop.permute.xlu1 %4320  ;;  %v4351_v40 = vpop.permute.xlu0 %4350 }
 0x8fb   : > { %v15950_v35 = vadd.f32 %v4321_v63, %v19549_v47  ;;  %v15955_v50 = vadd.f32 %v4351_v40, %v19551_v57  ;;  %v19565_v40 = vld [vmem:[#allocation57_spill] sm:$0xff] }
 0x8fd   : > { %19550 = vst [vmem:[#allocation45_spill] sm:$0xff] %v15950_v35  ;;  %4535 = vperm.xlu1 %13578, %v15950_v35   ;;  %4544 = vperm.xlu0 %13579, %v15947_v15  }
 0x8fe   : > { %v4347_v36 = vpop.permute.xlu1 %4346  ;;  %v4355_v1 = vpop.permute.xlu0 %4354 }
 0x8ff   : > { %v15958_v62 = vadd.f32 %v4347_v36, %v19552_v41  ;;  %v15963_v11 = vadd.f32 %v4355_v1, %v19554_v10 }
 0x901   : > { %19553 = vst [vmem:[#allocation46_spill] sm:$0xff] %v15958_v62  ;;  %4550 = vperm.xlu1 %13578, %v15958_v62   ;;  %4553 = vperm.xlu0 %13579, %v15955_v50  }
 0x902   : > { %v4340_v9 = vpop.permute.xlu1 %4339  ;;  %v4370_v52 = vpop.permute.xlu0 %4369 }
 0x903   : > { %v15966_v53 = vadd.f32 %v4340_v9, %v19555_v34  ;;  %v15971_v24 = vadd.f32 %v4370_v52, %v19557_v42 }
 0x905   : > { %19556 = vst [vmem:[#allocation47_spill] sm:$0xff] %v15966_v53  ;;  %4547 = vperm.xlu1 %13578, %v15966_v53   ;;  %4556 = vperm.xlu0 %13579, %v15963_v11   ;;  %19558 = vst [vmem:[#allocation48_spill] sm:$0xff] %v15971_v24 }
 0x906   : > { %v4366_v59 = vpop.permute.xlu1 %4365  ;;  %v4374_v54 = vpop.permute.xlu0 %4373 }
 0x907   : > { %v15974_v25 = vadd.f32 %v4366_v59, %v19559_v33  ;;  %v15979_v2 = vadd.f32 %v4374_v54, %v19561_v43 }
 0x909   : > { %19560 = vst [vmem:[#allocation49_spill] sm:$0xff] %v15974_v25  ;;  %4562 = vperm.xlu1 %13578, %v15974_v25   ;;  %4565 = vperm.xlu0 %13579, %v15971_v24   ;;  %19562 = vst [vmem:[#allocation50_spill] sm:$0xff] %v15979_v2 }
 0x90a   : > { %v4359_v49 = vpop.permute.xlu1 %4358 }
 0x90b   : > { %v15982_v44 = vadd.f32 %v4359_v49, %v19563_v61 }
 0x90d   : > { %19564 = vst [vmem:[#allocation51_spill] sm:$0xff] %v15982_v44  ;;  %4559 = vperm.xlu1 %13578, %v15982_v44   ;;  %4568 = vperm.xlu0 %13579, %v15979_v2  }
 0x90e   : > { %v4378_v63 = vpop.permute.xlu1 %4377 }
 0x90f   : > { %v15987_v0 = vadd.f32 %v4378_v63, %v19565_v40 }
 0x911   : > { %19566 = vst [vmem:[#allocation52_spill] sm:$0xff] %v15987_v0  ;;  %4571 = vperm.xlu1 %13578, %v15987_v0  }
 0x950   : > { %v4479_v47 = vpop.permute.xlu0 %4478  ;;  %v4482_v36 = vpop.permute.xlu1 %4481 }
 0x951   : > { %v4580_v53 = vrot.slane %v4482_v36, %v14720_v16  ;;  %v4576_v62 = vrot.slane %v4479_v47, %v14711_v8 }
 0x953   : > { %v4581_v2 = vsel %vm2176_vm1, %v4580_v53, %v4576_v62 }
 0x954   : > { %v4491_v1 = vpop.permute.xlu0 %4490 }
 0x955   : > { %v4595_v19 = vrot.slane %v4491_v1, %v14711_v8 }
 0x958   : > { %v4494_v57 = vpop.permute.xlu1 %4493  ;;  %v4485_v41 = vpop.permute.xlu0 %4484 }
 0x959   : > { %v4599_v3 = vrot.slane %v4494_v57, %v14720_v16  ;;  %v4585_v55 = vrot.slane %v4485_v41, %v14722_v17 }
 0x95b   : > { %v4600_v57 = vsel %vm2176_vm1, %v4599_v3, %v4595_v19  ;;  %v4586_v1 = vsel %vm2183_vm2, %v4585_v55, %v4581_v2 }
 0x95c   : > { %v4497_v9 = vpop.permute.xlu1 %4496  ;;  %v4503_v52 = vpop.permute.xlu0 %4502 }
 0x95d   : > { %v4604_v51 = vrot.slane %v4497_v9, %v14722_v17  ;;  %v4614_v36 = vrot.slane %v4503_v52, %v14711_v8 }
 0x960   : > { %v4506_v10 = vpop.permute.xlu1 %4505  ;;  %v4488_v34 = vpop.permute.xlu0 %4487 }
 0x961   : > { %v4618_v28 = vrot.slane %v4506_v10, %v14720_v16  ;;  %v4590_v45 = vrot.slane %v4488_v34, %v14724_v18  ;;  %v4605_v34 = vsel %vm2183_vm2, %v4604_v51, %v4600_v57 }
 0x963   : > { %v4619_v62 = vsel %vm2176_vm1, %v4618_v28, %v4614_v36  ;;  %v4591_v53 = vsel %vm2190_vm3, %v4590_v45, %v4586_v1 }
 0x964   : > { %v4500_v59 = vpop.permute.xlu1 %4499  ;;  %v4509_v42 = vpop.permute.xlu0 %4508 }
 0x965   : > { %v4609_v47 = vrot.slane %v4500_v59, %v14724_v18  ;;  %v4623_v41 = vrot.slane %v4509_v42, %v14722_v17 }
 0x967   : > { %v4610_v3 = vsel %vm2190_vm3, %v4609_v47, %v4605_v34  ;;  %v4624_v28 = vsel %vm2183_vm2, %v4623_v41, %v4619_v62 }
 0x968   : > { %v4515_v33 = vpop.permute.xlu1 %4514  ;;  %v4518_v54 = vpop.permute.xlu0 %4517 }
 0x969   : > { %v4633_v9 = vrot.slane %v4515_v33, %v14711_v8  ;;  %v4637_v10 = vrot.slane %v4518_v54, %v14720_v16 }
 0x96b   : > { %v4638_v45 = vsel %vm2176_vm1, %v4637_v10, %v4633_v9 }
 0x96c   : > { %v4512_v49 = vpop.permute.xlu1 %4511  ;;  %v4521_v43 = vpop.permute.xlu0 %4520 }
 0x96d   : > { %v4642_v52 = vrot.slane %v4521_v43, %v14722_v17  ;;  %v4628_v42 = vrot.slane %v4512_v49, %v14724_v18 }
 0x970   : > { %v4527_v61 = vpop.permute.xlu1 %4526  ;;  %v4530_v63 = vpop.permute.xlu0 %4529 }
 0x971   : > { %v4652_v59 = vrot.slane %v4527_v61, %v14711_v8  ;;  %v4656_v19 = vrot.slane %v4530_v63, %v14720_v16 }
 0x973   : > { %v4657_v36 = vsel %vm2176_vm1, %v4656_v19, %v4652_v59 }
 0x974   : > { %v4524_v40 = vpop.permute.xlu1 %4523  ;;  %v4533_v46 = vpop.permute.xlu0 %4532 }
 0x975   : > { %v4647_v33 = vrot.slane %v4524_v40, %v14724_v18  ;;  %v4661_v55 = vrot.slane %v4533_v46, %v14722_v17  ;;  %v4643_v46 = vsel %vm2183_vm2, %v4642_v52, %v4638_v45 }
 0x978   : > { %v4539_v31 = vpop.permute.xlu1 %4538  ;;  %v4542_v0 = vpop.permute.xlu0 %4541 }
 0x979   : > { %v4671_v54 = vrot.slane %v4539_v31, %v14711_v8  ;;  %v4675_v43 = vrot.slane %v4542_v0, %v14720_v16  ;;  %v4725_v31 = vsel %vm2325_vm4, %v4610_v3, %v4591_v53  ;;  %v4629_v0 = vsel %vm2190_vm3, %v4628_v42, %v4624_v28 }
 0x97a   : > { %v4726_v53 = vsel %vm2327_vm5, %v4629_v0, %v4725_v31 }
 0x97c   : > { %v4536_v44 = vpop.permute.xlu1 %4535  ;;  %v4545_v25 = vpop.permute.xlu0 %4544 }
 0x97d   : > { %v4666_v61 = vrot.slane %v4536_v44, %v14724_v18  ;;  %v4680_v63 = vrot.slane %v4545_v25, %v14722_v17  ;;  %v4648_v44 = vsel %vm2190_vm3, %v4647_v33, %v4643_v46  ;;  %v4662_v25 = vsel %vm2183_vm2, %v4661_v55, %v4657_v36 }
 0x97e   : > { %v4727_v19 = vsel %vm2329_vm6, %v4648_v44, %v4726_v53 }
 0x980   : > { %v4551_v35 = vpop.permute.xlu1 %4550  ;;  %v4554_v37 = vpop.permute.xlu0 %4553 }
 0x981   : > { %v4690_v49 = vrot.slane %v4551_v35, %v14711_v8  ;;  %v4694_v40 = vrot.slane %v4554_v37, %v14720_v16  ;;  %v4676_v37 = vsel %vm2176_vm1, %v4675_v43, %v4671_v54 }
 0x982   : > { %v4681_v1 = vsel %vm2183_vm2, %v4680_v63, %v4676_v37 }
 0x983   : > { %v4695_v34 = vsel %vm2176_vm1, %v4694_v40, %v4690_v49 }
 0x984   : > { %v4548_v56 = vpop.permute.xlu1 %4547  ;;  %v4557_v24 = vpop.permute.xlu0 %4556 }
 0x985   : > { %v4685_v47 = vrot.slane %v4548_v56, %v14724_v18  ;;  %v4699_v57 = vrot.slane %v4557_v24, %v14722_v17  ;;  %v4667_v24 = vsel %vm2190_vm3, %v4666_v61, %v4662_v25 }
 0x986   : > { %v4728_v33 = vsel %vm2331_vm7, %v4667_v24, %v4727_v19 }
 0x987   : > { %v4686_v52 = vsel %vm2190_vm3, %v4685_v47, %v4681_v1  ;;  %v4700_v59 = vsel %vm2183_vm2, %v4699_v57, %v4695_v34 }
 0x988   : > { %v4563_v2 = vpop.permute.xlu1 %4562  ;;  %v4566_v51 = vpop.permute.xlu0 %4565  ;;  %v4729_v28 = vsel %vm2333_vm8, %v4686_v52, %v4728_v33 }
 0x989   : > { %v4709_v9 = vrot.slane %v4563_v2, %v14711_v8  ;;  %v4713_v10 = vrot.slane %v4566_v51, %v14720_v16 }
 0x98b   : > { %v4714_v55 = vsel %vm2176_vm1, %v4713_v10, %v4709_v9 }
 0x98c   : > { %v4560_v41 = vpop.permute.xlu1 %4559  ;;  %v4569_v35 = vpop.permute.xlu0 %4568 }
 0x98d   : > { %v4704_v56 = vrot.slane %v4560_v41, %v14724_v18  ;;  %v4718_v62 = vrot.slane %v4569_v35, %v14722_v17 }
 0x98f   : > { %v4705_v3 = vsel %vm2190_vm3, %v4704_v56, %v4700_v59  ;;  %v4719_v51 = vsel %vm2183_vm2, %v4718_v62, %v4714_v55  ;;  %v19571_v55 = vld [vmem:[#allocation48_spill] sm:$0xff] }
 0x990   : > { %v4572_v42 = vpop.permute.xlu1 %4571  ;;  %v4730_v54 = vsel %vm2335_vm9, %v4705_v3, %v4729_v28 }
 0x991   : > { %v4723_v2 = vrot.slane %v4572_v42, %v14724_v18 }
 0x993   : > { %v4724_v45 = vsel %vm2190_vm3, %v4723_v2, %v4719_v51  ;;  %v19573_v51 = vld [vmem:[#allocation59_spill] sm:$0xff] }
 0x994   : > { %v4731_v43 = vsel %vm2337_vm10, %v4724_v45, %v4730_v54  ;;  %v19574_v45 = vld [vmem:[#allocation50_spill] sm:$0xff] }
 0x995   : > { %v4733_v61 = vsel %vm2339_vm11, %v4731_v43, 0.0  ;;  %v19576_v43 = vld [vmem:[#allocation58_spill] sm:$0xff] }
 0x996   : > { %4734 = vadd.xlane.f32.xlu0 %v4733_v61 }
 0xa23   : > { %v4735_v63 = vpop.xlane.xlu0 %4734 }
 0xa24   : > { %v4737_v49 = vmul.f32 0.03125, %v4735_v63 }
 0xa26   : > { %v16055_v40 = vrot.slane %v4737_v49, %v14707_v6  ;;  %v4742_v46 = vrot.slane %v4737_v49, %v14703_v4  ;;  %v16059_v36 = vrot.slane %v4737_v49, %v14709_v7  ;;  %v16069_v31 = vrot.slane %v4737_v49, %v14713_v12 }
 0xa27   : > { %v4746_v0 = vrot.slane %v4737_v49, %v14705_v5 }
 0xa28   : > { %v16063_v47 = vsub.f32 %v15894_v27, %v16055_v40  ;;  %v16066_v57 = vsub.f32 %v15866_v58, %v4742_v46  ;;  %v16078_v41 = vsub.f32 %v15915_v29, %v16059_v36  ;;  %v16081_v27 = vsub.f32 %v15863_v60, %v4742_v46 }
 0xa29   : > { %v16089_v37 = vsub.f32 %v15923_v39, %v16069_v31  ;;  %v16092_v9 = vsub.f32 %v15871_v23, %v4746_v0  ;;  %v16095_v60 = vrot.slane %v4737_v49, %v14715_v13  ;;  %v16103_v56 = vsub.f32 %v15931_v32, %v16069_v31 }
 0xa2a   : > { %v4820_v44 = vmul.f32 %v16063_v47, %v16063_v47  ;;  %v4811_v25 = vmul.f32 %v16066_v57, %v16066_v57  ;;  %v4825_v58 = vmul.f32 %v16078_v41, %v16078_v41  ;;  %v4812_v35 = vmul.f32 %v16081_v27, %v16081_v27 }
 0xa2b   : > { %v4828_v29 = vmul.f32 %v16089_v37, %v16089_v37  ;;  %v4815_v10 = vmul.f32 %v16092_v9, %v16092_v9  ;;  %v16106_v39 = vsub.f32 %v15878_v38, %v4746_v0  ;;  %v4829_v23 = vmul.f32 %v16103_v56, %v16103_v56 }
 0xa2c   : > { %4903 = vperm.xlu0 %13579, %v4820_v44   ;;  %4876 = vperm.xlu1 %13578, %v4811_v25   ;;  %v16114_v1 = vsub.f32 %v15939_v21, %v16095_v60  ;;  %v16117_v34 = vsub.f32 %v15875_v48, %v4742_v46  ;;  %v16120_v38 = vrot.slane %v4737_v49, %v14717_v14  ;;  %v19578_v25 = vld [vmem:[#allocation60_spill] sm:$0xff] }
 0xa2d   : > { %v4816_v24 = vmul.f32 %v16106_v39, %v16106_v39  ;;  %v16128_v53 = vsub.f32 %v15947_v15, %v16095_v60  ;;  %v16131_v21 = vsub.f32 %v15886_v30, %v4746_v0  ;;  %v16143_v19 = vsub.f32 %v15883_v26, %v16055_v40 }
 0xa2e   : > { %19567 = vst [vmem:[#allocation53_spill] sm:$0xff] %v16114_v1  ;;  %v4832_v32 = vmul.f32 %v16114_v1, %v16114_v1  ;;  %v4813_v62 = vmul.f32 %v16117_v34, %v16117_v34  ;;  %v16139_v59 = vsub.f32 %v15955_v50, %v16120_v38  ;;  %v4770_v30 = vrot.slane %v4737_v49, %v14728_v22 }
 0xa2f   : > { %19568 = vst [vmem:[#allocation54_spill] sm:$0xff] %v16128_v53  ;;  %v4833_v48 = vmul.f32 %v16128_v53, %v16128_v53  ;;  %v4817_v52 = vmul.f32 %v16131_v21, %v16131_v21  ;;  %v4819_v3 = vmul.f32 %v16143_v19, %v16143_v19  ;;  %v16152_v42 = vsub.f32 %v15963_v11, %v16120_v38 }
 0xa30   : > { %4918 = vperm.xlu0 %13579, %v4825_v58   ;;  %4879 = vperm.xlu1 %13578, %v4812_v35   ;;  %19569 = vst [vmem:[#allocation55_spill] sm:$0xff] %v16139_v59  ;;  %v4836_v15 = vmul.f32 %v16139_v59, %v16139_v59  ;;  %v16155_v50 = vsub.f32 %v15891_v20, %v4742_v46  ;;  %v19577_v46 = vld [vmem:[#allocation61_spill] sm:$0xff] }
 0xa31   : > { %19570 = vst [vmem:[#allocation56_spill] sm:$0xff] %v16152_v42  ;;  %v4837_v26 = vmul.f32 %v16152_v42, %v16152_v42  ;;  %v16162_v2 = vsub.f32 %v19571_v55, %v4770_v30  ;;  %v16165_v28 = vsub.f32 %v19573_v51, %v4746_v0  ;;  %v16172_v54 = vsub.f32 %v19574_v45, %v4770_v30  ;;  %v19588_v51 = vld [vmem:[#allocation46_spill] sm:$0xff]  ;;  %v19590_v45 = vld [vmem:[#allocation47_spill] sm:$0xff] }
 0xa32   : > { %v4814_v33 = vmul.f32 %v16155_v50, %v16155_v50  ;;  %v16176_v61 = vsub.f32 %v19576_v43, %v16055_v40  ;;  %v16184_v0 = vsub.f32 %v19577_v46, %v16059_v36  ;;  %v16190_v58 = vsub.f32 %v19578_v25, %v16059_v36 }
 0xa33   : > { %19572 = vst [vmem:[#allocation57_spill] sm:$0xff] %v16162_v2  ;;  %v4840_v20 = vmul.f32 %v16162_v2, %v16162_v2  ;;  %v4818_v11 = vmul.f32 %v16165_v28, %v16165_v28  ;;  %19575 = vst [vmem:[#allocation48_spill] sm:$0xff] %v16172_v54  ;;  %v4841_v63 = vmul.f32 %v16172_v54, %v16172_v54 }
 0xa34   : > { %4927 = vperm.xlu0 %13579, %v4828_v29   ;;  %4888 = vperm.xlu1 %13578, %v4815_v10   ;;  %v4821_v49 = vmul.f32 %v16176_v61, %v16176_v61  ;;  %v4823_v44 = vmul.f32 %v16184_v0, %v16184_v0  ;;  %v4824_v35 = vmul.f32 %v16190_v58, %v16190_v58  ;;  %v19579_v29 = vld [vmem:[#allocation62_spill] sm:$0xff] }
 0xa35   : > { %v16196_v10 = vsub.f32 %v19579_v29, %v16055_v40  ;;  %v16232_v43 = vsub.f32 %v19590_v45, %v16095_v60 }
 0xa37   : > { %19591 = vst [vmem:[#allocation62_spill] sm:$0xff] %v16232_v43 }
 0xa38   : > { %4930 = vperm.xlu0 %13579, %v4829_v23   ;;  %4891 = vperm.xlu1 %13578, %v4816_v24   ;;  %v4822_v23 = vmul.f32 %v16196_v10, %v16196_v10  ;;  %v19580_v24 = vld [vmem:[#allocation42_spill] sm:$0xff] }
 0xa3c   : > { %4939 = vperm.xlu0 %13579, %v4832_v32   ;;  %4882 = vperm.xlu1 %13578, %v4813_v62   ;;  %v16202_v32 = vsub.f32 %v19580_v24, %v16069_v31  ;;  %v12428_v24 = vld [vmem:[#allocation15] ss:$0 sm:$0xff] }
 0xa3e   : > { %19581 = vst [vmem:[#allocation59_spill] sm:$0xff] %v16202_v32  ;;  %v4827_v62 = vmul.f32 %v16202_v32, %v16202_v32 }
 0xa40   : > { %4942 = vperm.xlu0 %13579, %v4833_v48   ;;  %4894 = vperm.xlu1 %13578, %v4817_v52   ;;  %v19582_v48 = vld [vmem:[#allocation43_spill] sm:$0xff] }
 0xa41   : > { %v16208_v52 = vsub.f32 %v19582_v48, %v16059_v36 }
 0xa43   : > { %19583 = vst [vmem:[#allocation50_spill] sm:$0xff] %v16208_v52  ;;  %v4826_v40 = vmul.f32 %v16208_v52, %v16208_v52 }
 0xa44   : > { %4951 = vperm.xlu0 %13579, %v4836_v15   ;;  %4900 = vperm.xlu1 %13578, %v4819_v3   ;;  %v19584_v15 = vld [vmem:[#allocation44_spill] sm:$0xff] }
 0xa45   : > { %v16214_v3 = vsub.f32 %v19584_v15, %v16095_v60 }
 0xa47   : > { %19585 = vst [vmem:[#allocation58_spill] sm:$0xff] %v16214_v3 }
 0xa48   : > { %4954 = vperm.xlu0 %13579, %v4837_v26   ;;  %4885 = vperm.xlu1 %13578, %v4814_v33   ;;  %v4831_v26 = vmul.f32 %v16214_v3, %v16214_v3  ;;  %v19586_v33 = vld [vmem:[#allocation45_spill] sm:$0xff] }
 0xa49   : > { %v16220_v55 = vsub.f32 %v19586_v33, %v16069_v31  ;;  %v4834_v31 = vmul.f32 %v16232_v43, %v16232_v43 }
 0xa4b   : > { %19587 = vst [vmem:[#allocation61_spill] sm:$0xff] %v16220_v55  ;;  %v4830_v36 = vmul.f32 %v16220_v55, %v16220_v55 }
 0xa4c   : > { %4963 = vperm.xlu0 %13579, %v4840_v20   ;;  %4897 = vperm.xlu1 %13578, %v4818_v11   ;;  %v16226_v20 = vsub.f32 %v19588_v51, %v16120_v38 }
 0xa4e   : > { %19589 = vst [vmem:[#allocation60_spill] sm:$0xff] %v16226_v20  ;;  %v4835_v11 = vmul.f32 %v16226_v20, %v16226_v20 }
 0xa50   : > { %4966 = vperm.xlu0 %13579, %v4841_v63   ;;  %4906 = vperm.xlu1 %13578, %v4821_v49   ;;  %v19592_v63 = vld [vmem:[#allocation49_spill] sm:$0xff] }
 0xa51   : > { %v16237_v49 = vsub.f32 %v19592_v63, %v4770_v30 }
 0xa53   : > { %19593 = vst [vmem:[#allocation42_spill] sm:$0xff] %v16237_v49  ;;  %v4839_v46 = vmul.f32 %v16237_v49, %v16237_v49 }
 0xa54   : > { %4912 = vperm.xlu1 %13578, %v4823_v44   ;;  %v19594_v44 = vld [vmem:[#allocation51_spill] sm:$0xff] }
 0xa55   : > { %v16243_v25 = vsub.f32 %v19594_v44, %v16120_v38 }
 0xa57   : > { %19595 = vst [vmem:[#allocation43_spill] sm:$0xff] %v16243_v25  ;;  %v4838_v60 = vmul.f32 %v16243_v25, %v16243_v25 }
 0xa58   : > { %4915 = vperm.xlu1 %13578, %v4824_v35   ;;  %v19596_v35 = vld [vmem:[#allocation52_spill] sm:$0xff] }
 0xa59   : > { %v16248_v29 = vsub.f32 %v19596_v35, %v4770_v30 }
 0xa5b   : > { %19597 = vst [vmem:[#allocation44_spill] sm:$0xff] %v16248_v29 }
 0xa5c   : > { %4909 = vperm.xlu1 %13578, %v4822_v23   ;;  %v4842_v23 = vmul.f32 %v16248_v29, %v16248_v29 }
 0xa60   : > { %4924 = vperm.xlu1 %13578, %v4827_v62   ;;  %v12429_v62 = vld [vmem:[#allocation17] ss:$0 sm:$0xff] }
 0xa64   : > { %4921 = vperm.xlu1 %13578, %v4826_v40  }
 0xa68   : > { %4936 = vperm.xlu1 %13578, %v4831_v26  }
 0xa6c   : > { %4933 = vperm.xlu1 %13578, %v4830_v36  }
 0xa70   : > { %4948 = vperm.xlu1 %13578, %v4835_v11  }
 0xa74   : > { %4945 = vperm.xlu1 %13578, %v4834_v31  }
 0xa78   : > { %4960 = vperm.xlu1 %13578, %v4839_v46  }
 0xa7c   : > { %4957 = vperm.xlu1 %13578, %v4838_v60  }
 0xa80   : > { %4969 = vperm.xlu1 %13578, %v4842_v23  }
 0xa84   : > { %5216 = vbcast.lane.b32.xlu1 %v12428_v24, 256 }
 0xa88   : > { %5220 = vbcast.lane.b32.xlu1 %v12428_v24, 264 }
 0xa8c   : > { %5224 = vbcast.lane.b32.xlu1 %v12428_v24, 272 }
 0xa90   : > { %5228 = vbcast.lane.b32.xlu1 %v12428_v24, 280 }
 0xa94   : > { %5272 = vbcast.lane.b32.xlu1 %v12429_v62, 256 }
 0xa98   : > { %5276 = vbcast.lane.b32.xlu1 %v12429_v62, 264 }
 0xa9c   : > { %5280 = vbcast.lane.b32.xlu1 %v12429_v62, 272 }
 0xaa0   : > { %5284 = vbcast.lane.b32.xlu1 %v12429_v62, 280 }
 0xaab   : > { %v4877_v38 = vpop.permute.xlu1 %4876  ;;  %v4904_v36 = vpop.permute.xlu0 %4903 }
 0xaac   : > { %v4974_v42 = vrot.slane %v4877_v38, %v14711_v8  ;;  %v5016_v3 = vrot.slane %v4904_v36, %v14720_v16 }
 0xaaf   : > { %v4880_v48 = vpop.permute.xlu1 %4879  ;;  %v4919_v45 = vpop.permute.xlu0 %4918 }
 0xab0   : > { %v4978_v54 = vrot.slane %v4880_v48, %v14720_v16  ;;  %v5040_v52 = vrot.slane %v4919_v45, %v14722_v17 }
 0xab2   : > { %v4979_v53 = vsel %vm2176_vm1, %v4978_v54, %v4974_v42 }
 0xab3   : > { %v4889_v40 = vpop.permute.xlu1 %4888  ;;  %v4928_v63 = vpop.permute.xlu0 %4927 }
 0xab4   : > { %v4993_v59 = vrot.slane %v4889_v40, %v14711_v8  ;;  %v5054_v14 = vrot.slane %v4928_v63, %v14720_v16 }
 0xab7   : > { %v4892_v30 = vpop.permute.xlu1 %4891  ;;  %v4931_v60 = vpop.permute.xlu0 %4930 }
 0xab8   : > { %v4997_v2 = vrot.slane %v4892_v30, %v14720_v16  ;;  %v5059_v30 = vrot.slane %v4931_v60, %v14722_v17 }
 0xaba   : > { %v4998_v1 = vsel %vm2176_vm1, %v4997_v2, %v4993_v59 }
 0xabb   : > { %v4883_v15 = vpop.permute.xlu1 %4882  ;;  %v4940_v23 = vpop.permute.xlu0 %4939 }
 0xabc   : > { %v4983_v22 = vrot.slane %v4883_v15, %v14722_v17  ;;  %v5073_v36 = vrot.slane %v4940_v23, %v14720_v16 }
 0xabe   : > { %v4984_v40 = vsel %vm2183_vm2, %v4983_v22, %v4979_v53 }
 0xabf   : > { %v4895_v26 = vpop.permute.xlu1 %4894  ;;  %v4943_v29 = vpop.permute.xlu0 %4942 }
 0xac0   : > { %v5002_v48 = vrot.slane %v4895_v26, %v14722_v17  ;;  %v5078_v54 = vrot.slane %v4943_v29, %v14722_v17 }
 0xac2   : > { %v5003_v2 = vsel %vm2183_vm2, %v5002_v48, %v4998_v1 }
 0xac3   : > { %v4901_v33 = vpop.permute.xlu1 %4900  ;;  %v4952_v49 = vpop.permute.xlu0 %4951 }
 0xac4   : > { %v5012_v38 = vrot.slane %v4901_v33, %v14711_v8 }
 0xac6   : > { %v5017_v29 = vsel %vm2176_vm1, %v5016_v3, %v5012_v38 }
 0xac7   : > { %v4886_v51 = vpop.permute.xlu1 %4885  ;;  %v4955_v55 = vpop.permute.xlu0 %4954 }
 0xac8   : > { %v4988_v33 = vrot.slane %v4886_v51, %v14724_v18 }
 0xacb   : > { %v4898_v11 = vpop.permute.xlu1 %4897  ;;  %v4964_v26 = vpop.permute.xlu0 %4963 }
 0xacc   : > { %v5007_v45 = vrot.slane %v4898_v11, %v14724_v18  ;;  %v5092_v11 = vrot.slane %v4952_v49, %v14720_v16 }
 0xacf   : > { %v4907_v31 = vpop.permute.xlu1 %4906 }
 0xad0   : > { %v5021_v63 = vrot.slane %v4907_v31, %v14722_v17 }
 0xad3   : > { %v4913_v46 = vpop.permute.xlu1 %4912 }
 0xad4   : > { %v5031_v60 = vrot.slane %v4913_v46, %v14711_v8  ;;  %v5097_v46 = vrot.slane %v4955_v55, %v14722_v17 }
 0xad7   : > { %v4916_v44 = vpop.permute.xlu1 %4915 }
 0xad8   : > { %v5035_v15 = vrot.slane %v4916_v44, %v14720_v16 }
 0xada   : > { %v5036_v23 = vsel %vm2176_vm1, %v5035_v15, %v5031_v60 }
 0xadb   : > { %v4910_v35 = vpop.permute.xlu1 %4909  ;;  %v5041_v55 = vsel %vm2183_vm2, %v5040_v52, %v5036_v23 }
 0xadc   : > { %v5026_v44 = vrot.slane %v4910_v35, %v14724_v18  ;;  %v5022_v35 = vsel %vm2183_vm2, %v5021_v63, %v5017_v29 }
 0xadf   : > { %v4925_v24 = vpop.permute.xlu1 %4924 }
 0xae0   : > { %v5050_v42 = vrot.slane %v4925_v24, %v14711_v8  ;;  %v4989_v24 = vsel %vm2190_vm3, %v4988_v33, %v4984_v40 }
 0xae2   : > { %v5055_v1 = vsel %vm2176_vm1, %v5054_v14, %v5050_v42  ;;  %v5111_v14 = vrot.slane %v4964_v26, %v14720_v16 }
 0xae3   : > { %v4922_v62 = vpop.permute.xlu1 %4921 }
 0xae4   : > { %v5045_v31 = vrot.slane %v4922_v62, %v14724_v18  ;;  %v5027_v62 = vsel %vm2190_vm3, %v5026_v44, %v5022_v35 }
 0xae6   : > { %v5046_v15 = vsel %vm2190_vm3, %v5045_v31, %v5041_v55 }
 0xae7   : > { %v4937_v25 = vpop.permute.xlu1 %4936 }
 0xae8   : > { %v5069_v59 = vrot.slane %v4937_v25, %v14711_v8  ;;  %v5008_v25 = vsel %vm2190_vm3, %v5007_v45, %v5003_v2 }
 0xae9   : > { %v5123_v45 = vsel %vm2325_vm4, %v5008_v25, %v4989_v24 }
 0xaea   : > { %v5124_v52 = vsel %vm2327_vm5, %v5027_v62, %v5123_v45 }
 0xaeb   : > { %v4934_v43 = vpop.permute.xlu1 %4933 }
 0xaec   : > { %v5064_v51 = vrot.slane %v4934_v43, %v14724_v18  ;;  %v4967_v43 = vpop.permute.xlu0 %4966 }
 0xaef   : > { %v4949_v20 = vpop.permute.xlu1 %4948 }
 0xaf0   : > { %v5088_v22 = vrot.slane %v4949_v20, %v14711_v8  ;;  %v5074_v20 = vsel %vm2176_vm1, %v5073_v36, %v5069_v59  ;;  %v5060_v36 = vsel %vm2183_vm2, %v5059_v30, %v5055_v1  ;;  %v5116_v59 = vrot.slane %v4967_v43, %v14722_v17 }
 0xaf1   : > { %v5065_v40 = vsel %vm2190_vm3, %v5064_v51, %v5060_v36  ;;  %v5079_v42 = vsel %vm2183_vm2, %v5078_v54, %v5074_v20  ;;  %v5125_v30 = vsel %vm2329_vm6, %v5046_v15, %v5124_v52 }
 0xaf2   : > { %v5093_v48 = vsel %vm2176_vm1, %v5092_v11, %v5088_v22  ;;  %v5126_v44 = vsel %vm2331_vm7, %v5065_v40, %v5125_v30 }
 0xaf3   : > { %v4946_v32 = vpop.permute.xlu1 %4945  ;;  %v5098_v26 = vsel %vm2183_vm2, %v5097_v46, %v5093_v48 }
 0xaf4   : > { %v5083_v49 = vrot.slane %v4946_v32, %v14724_v18 }
 0xaf6   : > { %v5084_v63 = vsel %vm2190_vm3, %v5083_v49, %v5079_v42 }
 0xaf7   : > { %v4961_v53 = vpop.permute.xlu1 %4960 }
 0xaf8   : > { %v5107_v3 = vrot.slane %v4961_v53, %v14711_v8  ;;  %v5127_v53 = vsel %vm2333_vm8, %v5084_v63, %v5126_v44 }
 0xafa   : > { %v5112_v60 = vsel %vm2176_vm1, %v5111_v14, %v5107_v3 }
 0xafb   : > { %v4958_v38 = vpop.permute.xlu1 %4957  ;;  %v5117_v54 = vsel %vm2183_vm2, %v5116_v59, %v5112_v60 }
 0xafc   : > { %v5102_v32 = vrot.slane %v4958_v38, %v14724_v18 }
 0xafe   : > { %v5103_v2 = vsel %vm2190_vm3, %v5102_v32, %v5098_v26 }
 0xaff   : > { %v4970_v33 = vpop.permute.xlu1 %4969  ;;  %v5128_v29 = vsel %vm2335_vm9, %v5103_v2, %v5127_v53 }
 0xb00   : > { %v5121_v22 = vrot.slane %v4970_v33, %v14724_v18 }
 0xb02   : > { %v5122_v11 = vsel %vm2190_vm3, %v5121_v22, %v5117_v54 }
 0xb03   : > { %v5129_v23 = vsel %vm2337_vm10, %v5122_v11, %v5128_v29  ;;  %v16316_v46 = vpop.permute.xlu1 %5216 }
 0xb04   : > { %v5131_v31 = vsel %vm2339_vm11, %v5129_v23, 0.0 }
 0xb05   : > { %5132 = vadd.xlane.f32.xlu0 %v5131_v31 }
 0xb07   : > { %v16318_v25 = vpop.permute.xlu1 %5220 }
 0xb0b   : > { %v16320_v1 = vpop.permute.xlu1 %5224 }
 0xb0f   : > { %v16322_v49 = vpop.permute.xlu1 %5228 }
 0xb13   : > { %v16324_v3 = vpop.permute.xlu1 %5272 }
 0xb17   : > { %v16328_v62 = vpop.permute.xlu1 %5276 }
 0xb1b   : > { %v16345_v40 = vpop.permute.xlu1 %5280 }
 0xb1f   : > { %v16372_v2 = vpop.permute.xlu1 %5284 }
 0xb92   : > { %v5133_v51 = vpop.xlane.xlu0 %5132 }
 0xb93   : > { %v5134_v35 = vmul.f32 0.03125, %v5133_v51 }
 0xb95   : > { %v5135_v20 = vadd.f32 1e-05, %v5134_v35 }
 0xb97   : > { %13596 = vrsqrt.f32 %v5135_v20 }
 0xba1   : > { %v16326_v24 = vpop.eup %13596 }
 0xba2   : > { %v5141_v55 = vrot.slane %v16326_v24, %v14703_v4  ;;  %v16334_v48 = vrot.slane %v16326_v24, %v14707_v6  ;;  %v5145_v38 = vrot.slane %v16326_v24, %v14705_v5  ;;  %v5157_v29 = vrot.slane %v16326_v24, %v14713_v12 }
 0xba4   : > { %v5178_v14 = vmul.f32 %v5141_v55, %v16066_v57  ;;  %v5179_v43 = vmul.f32 %v5141_v55, %v16081_v27  ;;  %v5186_v15 = vmul.f32 %v16334_v48, %v16143_v19  ;;  %v5182_v36 = vmul.f32 %v5145_v38, %v16092_v9 }
 0xba5   : > { %v5183_v42 = vmul.f32 %v5145_v38, %v16106_v39  ;;  %v5181_v52 = vmul.f32 %v5141_v55, %v16155_v50  ;;  %v5180_v19 = vmul.f32 %v5141_v55, %v16117_v34  ;;  %v5188_v39 = vmul.f32 %v16334_v48, %v16176_v61 }
 0xba6   : > { %v5234_v32 = vmul.f32 %v16316_v46, %v5178_v14  ;;  %v5235_v45 = vmul.f32 %v16318_v25, %v5179_v43  ;;  %v5242_v27 = vmul.f32 %v16316_v46, %v5186_v15  ;;  %v5238_v9 = vmul.f32 %v16316_v46, %v5182_v36 }
 0xba7   : > { %v5153_v50 = vrot.slane %v16326_v24, %v14709_v7  ;;  %v5239_v59 = vmul.f32 %v16318_v25, %v5183_v42  ;;  %v5237_v30 = vmul.f32 %v16322_v49, %v5181_v52  ;;  %v5236_v34 = vmul.f32 %v16320_v1, %v5180_v19  ;;  %v19601_v19 = vld [vmem:[#allocation59_spill] sm:$0xff] }
 0xba8   : > { %v16350_v63 = vadd.f32 %v16324_v3, %v5234_v32  ;;  %v16353_v57 = vadd.f32 %v16328_v62, %v5235_v45  ;;  %v16365_v60 = vadd.f32 %v16324_v3, %v5242_v27  ;;  %v16368_v26 = vadd.f32 %v16324_v3, %v5238_v9  ;;  %v19600_v27 = vld [vmem:[#allocation53_spill] sm:$0xff] }
 0xba9   : > { %v5244_v61 = vmul.f32 %v16320_v1, %v5188_v39  ;;  %v16379_v33 = vadd.f32 %v16328_v62, %v5239_v59  ;;  %v16382_v44 = vadd.f32 %v16372_v2, %v5237_v30  ;;  %v5184_v22 = vmul.f32 %v5145_v38, %v16131_v21  ;;  %v19602_v59 = vld [vmem:[#allocation40_spill] sm:$0xff] }
 0xbaa   : > { %5366 = vperm.xlu0 %13579, %v16350_v63   ;;  %5369 = vperm.xlu1 %13578, %v16353_v57   ;;  %v5191_v54 = vmul.f32 %v5153_v50, %v16190_v58  ;;  %v16389_v53 = vadd.f32 %v16345_v40, %v5236_v34  ;;  %v5187_v21 = vmul.f32 %v16334_v48, %v16063_v47 }
 0xbab   : > { %v16392_v11 = vadd.f32 %v16345_v40, %v5244_v61  ;;  %v5240_v23 = vmul.f32 %v16320_v1, %v5184_v22  ;;  %v5192_v58 = vmul.f32 %v5153_v50, %v16078_v41  ;;  %v5185_v51 = vmul.f32 %v5145_v38, %v16165_v28 }
 0xbac   : > { %v5247_v31 = vmul.f32 %v16318_v25, %v5191_v54  ;;  %v5195_v35 = vmul.f32 %v5157_v29, %v16089_v37  ;;  %v5243_v14 = vmul.f32 %v16318_v25, %v5187_v21  ;;  %v5190_v28 = vmul.f32 %v5153_v50, %v16184_v0  ;;  %v19605_v54 = vld [vmem:[#allocation50_spill] sm:$0xff] }
 0xbad   : > { %v16406_v20 = vadd.f32 %v16345_v40, %v5240_v23  ;;  %v5248_v47 = vmul.f32 %v16320_v1, %v5192_v58  ;;  %v5241_v41 = vmul.f32 %v16322_v49, %v5185_v51  ;;  %v5161_v37 = vrot.slane %v16326_v24, %v14715_v13 }
 0xbae   : > { %5390 = vperm.xlu0 %13579, %v16365_v60   ;;  %5378 = vperm.xlu1 %13578, %v16368_v26   ;;  %v16409_v55 = vadd.f32 %v16328_v62, %v5247_v31  ;;  %v16420_v38 = vadd.f32 %v16328_v62, %v5243_v14  ;;  %v5251_v15 = vmul.f32 %v16318_v25, %v5195_v35  ;;  %v19606_v31 = vld [vmem:[#allocation55_spill] sm:$0xff] }
 0xbaf   : > { %v16423_v43 = vadd.f32 %v16345_v40, %v5248_v47  ;;  %v5196_v36 = vmul.f32 %v5157_v29, %v16103_v56  ;;  %v16430_v32 = vadd.f32 %v16372_v2, %v5241_v41  ;;  %v5246_v0 = vmul.f32 %v16316_v46, %v5190_v28  ;;  %v19608_v41 = vld [vmem:[#allocation58_spill] sm:$0xff]  ;;  %v19609_v28 = vld [vmem:[#allocation41_spill] sm:$0xff] }
 0xbb0   : > { %v16434_v45 = vadd.f32 %v16328_v62, %v5251_v15  ;;  %v5189_v52 = vmul.f32 %v16334_v48, %v16196_v10  ;;  %v5199_v9 = vmul.f32 %v5161_v37, %v19600_v27  ;;  %v5194_v39 = vmul.f32 %v5157_v29, %v19601_v19  ;;  %v19604_v48 = vld [vmem:[#allocation54_spill] sm:$0xff] }
 0xbb1   : > { %19598 = vst [vmem:[#allocation45_spill] sm:$0xff] %v16423_v43  ;;  %v5252_v42 = vmul.f32 %v16320_v1, %v5196_v36  ;;  %v16443_v56 = vadd.f32 %v16324_v3, %v5246_v0  ;;  %v5165_v30 = vrot.slane %v16326_v24, %v19602_v59  ;;  %v5200_v22 = vmul.f32 %v5161_v37, %v19604_v48  ;;  %v19616_v48 = vld [vmem:[#allocation57_spill] sm:$0xff] }
 0xbb2   : > { %5381 = vperm.xlu1 %13578, %v16379_v33   ;;  %5375 = vperm.xlu0 %13579, %v16382_v44   ;;  %19599 = vst [vmem:[#allocation46_spill] sm:$0xff] %v16434_v45  ;;  %v5245_v61 = vmul.f32 %v16322_v49, %v5189_v52  ;;  %v5255_v10 = vmul.f32 %v16318_v25, %v5199_v9  ;;  %v19612_v52 = vld [vmem:[#allocation56_spill] sm:$0xff] }
 0xbb3   : > { %v16449_v34 = vadd.f32 %v16345_v40, %v5252_v42  ;;  %v5193_v23 = vmul.f32 %v5153_v50, %v19605_v54  ;;  %v5203_v21 = vmul.f32 %v5165_v30, %v19606_v31  ;;  %v5250_v35 = vmul.f32 %v16316_v46, %v5194_v39 }
 0xbb4   : > { %v16459_v58 = vadd.f32 %v16372_v2, %v5245_v61  ;;  %v16462_v51 = vadd.f32 %v16328_v62, %v5255_v10  ;;  %v5256_v14 = vmul.f32 %v16320_v1, %v5200_v22  ;;  %v5198_v50 = vmul.f32 %v5161_v37, %v19608_v41  ;;  %v19615_v61 = vld [vmem:[#allocation61_spill] sm:$0xff]  ;;  %v19621_v41 = vld [vmem:[#allocation62_spill] sm:$0xff] }
 0xbb5   : > { %19603 = vst [vmem:[#allocation47_spill] sm:$0xff] %v16449_v34  ;;  %v5249_v47 = vmul.f32 %v16322_v49, %v5193_v23  ;;  %v5169_v15 = vrot.slane %v16326_v24, %v19609_v28  ;;  %v16473_v36 = vadd.f32 %v16324_v3, %v5250_v35  ;;  %v5259_v42 = vmul.f32 %v16318_v25, %v5203_v21  ;;  %v19618_v23 = vld [vmem:[#allocation60_spill] sm:$0xff] }
 0xbb6   : > { %5372 = vperm.xlu1 %13578, %v16389_v53   ;;  %5396 = vperm.xlu0 %13579, %v16392_v11   ;;  %19607 = vst [vmem:[#allocation49_spill] sm:$0xff] %v16462_v51  ;;  %v16476_v0 = vadd.f32 %v16345_v40, %v5256_v14  ;;  %v5204_v27 = vmul.f32 %v5165_v30, %v19612_v52 }
 0xbb7   : > { %19610 = vst [vmem:[#allocation51_spill] sm:$0xff] %v16473_v36  ;;  %v16483_v9 = vadd.f32 %v16372_v2, %v5249_v47  ;;  %v5254_v19 = vmul.f32 %v16316_v46, %v5198_v50  ;;  %v16487_v24 = vadd.f32 %v16328_v62, %v5259_v42  ;;  %v5197_v10 = vmul.f32 %v5157_v29, %v19615_v61  ;;  %v19620_v47 = vld [vmem:[#allocation48_spill] sm:$0xff]  ;;  %v19626_v61 = vld [vmem:[#allocation42_spill] sm:$0xff] }
 0xbb8   : > { %19611 = vst [vmem:[#allocation52_spill] sm:$0xff] %v16476_v0  ;;  %v5260_v39 = vmul.f32 %v16320_v1, %v5204_v27  ;;  %v5207_v22 = vmul.f32 %v5169_v15, %v19616_v48  ;;  %v5202_v31 = vmul.f32 %v5165_v30, %v19618_v23  ;;  %v5208_v29 = vmul.f32 %v5169_v15, %v19620_v47  ;;  %v19628_v48 = vld [vmem:[#allocation43_spill] sm:$0xff] }
 0xbb9   : > { %19613 = vst [vmem:[#allocation53_spill] sm:$0xff] %v16483_v9  ;;  %19614 = vst [vmem:[#allocation59_spill] sm:$0xff] %v16487_v24  ;;  %v16495_v54 = vadd.f32 %v16324_v3, %v5254_v19  ;;  %v5253_v35 = vmul.f32 %v16322_v49, %v5197_v10  ;;  %v5201_v50 = vmul.f32 %v5161_v37, %v19621_v41  ;;  %v19633_v41 = vmov 0.0|0.0  }
 0xbba   : > { %5384 = vperm.xlu1 %13578, %v16406_v20   ;;  %5405 = vperm.xlu0 %13579, %v16409_v55   ;;  %v16499_v21 = vadd.f32 %v16345_v40, %v5260_v39  ;;  %v5263_v14 = vmul.f32 %v16318_v25, %v5207_v22  ;;  %v5258_v27 = vmul.f32 %v16316_v46, %v5202_v31  ;;  %v19630_v31 = vld [vmem:[#allocation44_spill] sm:$0xff] }
 0xbbb   : > { %19617 = vst [vmem:[#allocation40_spill] sm:$0xff] %v16495_v54  ;;  %v16508_v42 = vadd.f32 %v16372_v2, %v5253_v35  ;;  %v5264_v19 = vmul.f32 %v16320_v1, %v5208_v29  ;;  %v5257_v37 = vmul.f32 %v16322_v49, %v5201_v50  ;;  %v5206_v10 = vmul.f32 %v5169_v15, %v19626_v61  ;;  %v5323_v29 = vld [vmem:[#allocation21 + $0x8] sm:$0xff]  ;;  %v5325_v50 = vld [vmem:[#allocation21 + $0x18] sm:$0xff] }
 0xbbc   : > { %19619 = vst [vmem:[#allocation54_spill] sm:$0xff] %v16499_v21  ;;  %v16511_v52 = vadd.f32 %v16328_v62, %v5263_v14  ;;  %v16518_v25 = vadd.f32 %v16324_v3, %v5258_v27  ;;  %v5205_v22 = vmul.f32 %v5165_v30, %v19628_v48  ;;  %v5209_v35 = vmul.f32 %v5169_v15, %v19630_v31  ;;  %v5322_v30 = vld [vmem:[#allocation21] sm:$0xff]  ;;  %v5324_v15 = vld [vmem:[#allocation21 + $0x10] sm:$0xff] }
 0xbbd   : > { %19622 = vst [vmem:[#allocation50_spill] sm:$0xff] %v16508_v42  ;;  %v16521_v39 = vadd.f32 %v16345_v40, %v5264_v19  ;;  %v16528_v1 = vadd.f32 %v16372_v2, %v5257_v37  ;;  %v5262_v62 = vmul.f32 %v16316_v46, %v5206_v10  ;;  %v13281_v27 = vpack.c.bf16 %v5325_v50, %v5324_v15 }
 0xbbe   : > { %5393 = vperm.xlu1 %13578, %v16420_v38   ;;  %5408 = vperm.xlu0 %13579, %v16423_v43   ;;  %19623 = vst [vmem:[#allocation55_spill] sm:$0xff] %v16511_v52  ;;  %19624 = vst [vmem:[#allocation58_spill] sm:$0xff] %v16518_v25  ;;  %v5261_v23 = vmul.f32 %v16322_v49, %v5205_v22  ;;  %v5265_v47 = vmul.f32 %v16322_v49, %v5209_v35 }
 0xbbf   : > { %19625 = vst [vmem:[#allocation56_spill] sm:$0xff] %v16521_v39  ;;  %19627 = vst [vmem:[#allocation61_spill] sm:$0xff] %v16528_v1  ;;  %v16534_v40 = vadd.f32 %v16324_v3, %v5262_v62  ;;  %v13278_v3 = vpack.c.bf16 %v5323_v29, %v5322_v30 }
 0xbc0   : > { %v16540_v14 = vadd.f32 %v16372_v2, %v5261_v23  ;;  %v16545_v46 = vadd.f32 %v16372_v2, %v5265_v47 }
 0xbc1   : > { %19629 = vst [vmem:[#allocation57_spill] sm:$0xff] %v16534_v40  ;;  %13279 = vmatpush3.bf16.msra.mxu0 %v13278_v3 }
 0xbc2   : > { %5387 = vperm.xlu1 %13578, %v16430_v32   ;;  %5417 = vperm.xlu0 %13579, %v16434_v45   ;;  %19631 = vst [vmem:[#allocation60_spill] sm:$0xff] %v16540_v14  ;;  %19632 = vst [vmem:[#allocation48_spill] sm:$0xff] %v16545_v46 }
 0xbc3   : > { %13280 = vmatprep.subr.bf16.mxu0 %v19633_v41 }
 0xbc5   : > { %13282 = vmatpush3.bf16.msra.mxu0 %v13281_v27 }
 0xbc6   : > { %5402 = vperm.xlu1 %13578, %v16443_v56   ;;  %5420 = vperm.xlu0 %13579, %v16449_v34  }
 0xbc7   : > { %13295 = vmatprep.subr.bf16.mxu0 %v19633_v41 }
 0xbca   : > { %5399 = vperm.xlu1 %13578, %v16459_v58   ;;  %5429 = vperm.xlu0 %13579, %v16462_v51  }
 0xbce   : > { %5414 = vperm.xlu1 %13578, %v16473_v36   ;;  %5432 = vperm.xlu0 %13579, %v16476_v0  }
 0xbd2   : > { %5411 = vperm.xlu1 %13578, %v16483_v9   ;;  %5441 = vperm.xlu0 %13579, %v16487_v24  }
 0xbd6   : > { %5426 = vperm.xlu1 %13578, %v16495_v54   ;;  %5444 = vperm.xlu0 %13579, %v16499_v21  }
 0xbda   : > { %5423 = vperm.xlu1 %13578, %v16508_v42   ;;  %5453 = vperm.xlu0 %13579, %v16511_v52  }
 0xbde   : > { %5438 = vperm.xlu1 %13578, %v16518_v25   ;;  %5456 = vperm.xlu0 %13579, %v16521_v39  }
 0xbe2   : > { %5435 = vperm.xlu1 %13578, %v16528_v1  }
 0xbe6   : > { %5450 = vperm.xlu1 %13578, %v16534_v40  }
 0xbea   : > { %5447 = vperm.xlu1 %13578, %v16540_v14  }
 0xbee   : > { %5459 = vperm.xlu1 %13578, %v16545_v46  }
 0xc29   : > { %v5367_v49 = vpop.permute.xlu0 %5366  ;;  %v5370_v19 = vpop.permute.xlu1 %5369 }
 0xc2a   : > { %v5464_v40 = vrot.slane %v5367_v49, %v14711_v8  ;;  %v5468_v24 = vrot.slane %v5370_v19, %v14720_v16 }
 0xc2c   : > { %v5469_v34 = vsel %vm2176_vm1, %v5468_v24, %v5464_v40 }
 0xc2d   : > { %v5391_v37 = vpop.permute.xlu0 %5390  ;;  %v5379_v61 = vpop.permute.xlu1 %5378 }
 0xc2e   : > { %v5483_v54 = vrot.slane %v5379_v61, %v14711_v8  ;;  %v5502_v9 = vrot.slane %v5391_v37, %v14711_v8 }
 0xc31   : > { %v5376_v2 = vpop.permute.xlu0 %5375  ;;  %v5382_v10 = vpop.permute.xlu1 %5381 }
 0xc32   : > { %v5487_v25 = vrot.slane %v5382_v10, %v14720_v16 }
 0xc34   : > { %v5488_v10 = vsel %vm2176_vm1, %v5487_v25, %v5483_v54 }
 0xc35   : > { %v5397_v62 = vpop.permute.xlu0 %5396  ;;  %v5373_v48 = vpop.permute.xlu1 %5372 }
 0xc36   : > { %v5473_v1 = vrot.slane %v5373_v48, %v14722_v17  ;;  %v5478_v48 = vrot.slane %v5376_v2, %v14724_v18 }
 0xc38   : > { %v5474_v49 = vsel %vm2183_vm2, %v5473_v1, %v5469_v34 }
 0xc39   : > { %v5406_v22 = vpop.permute.xlu0 %5405  ;;  %v5385_v23 = vpop.permute.xlu1 %5384  ;;  %v5479_v37 = vsel %vm2190_vm3, %v5478_v48, %v5474_v49 }
 0xc3a   : > { %v5492_v45 = vrot.slane %v5385_v23, %v14722_v17  ;;  %v5525_v24 = vrot.slane %v5406_v22, %v14720_v16 }
 0xc3c   : > { %v5493_v34 = vsel %vm2183_vm2, %v5492_v45, %v5488_v10 }
 0xc3d   : > { %v5409_v31 = vpop.permute.xlu0 %5408  ;;  %v5394_v35 = vpop.permute.xlu1 %5393 }
 0xc3e   : > { %v5506_v42 = vrot.slane %v5394_v35, %v14720_v16  ;;  %v5511_v35 = vrot.slane %v5397_v62, %v14722_v17  ;;  %v5530_v54 = vrot.slane %v5409_v31, %v14722_v17 }
 0xc40   : > { %v5507_v40 = vsel %vm2176_vm1, %v5506_v42, %v5502_v9 }
 0xc41   : > { %v5418_v47 = vpop.permute.xlu0 %5417  ;;  %v5388_v30 = vpop.permute.xlu1 %5387 }
 0xc42   : > { %v5497_v61 = vrot.slane %v5388_v30, %v14724_v18  ;;  %v5544_v1 = vrot.slane %v5418_v47, %v14720_v16  ;;  %v5512_v30 = vsel %vm2183_vm2, %v5511_v35, %v5507_v40 }
 0xc45   : > { %v5403_v29 = vpop.permute.xlu1 %5402  ;;  %v5421_v3 = vpop.permute.xlu0 %5420 }
 0xc46   : > { %v5521_v19 = vrot.slane %v5403_v29, %v14711_v8  ;;  %v5549_v29 = vrot.slane %v5421_v3, %v14722_v17 }
 0xc48   : > { %v5526_v25 = vsel %vm2176_vm1, %v5525_v24, %v5521_v19 }
 0xc49   : > { %v5400_v15 = vpop.permute.xlu1 %5399  ;;  %v5430_v50 = vpop.permute.xlu0 %5429 }
 0xc4a   : > { %v5516_v62 = vrot.slane %v5400_v15, %v14724_v18  ;;  %v5563_v42 = vrot.slane %v5430_v50, %v14720_v16  ;;  %v5531_v15 = vsel %vm2183_vm2, %v5530_v54, %v5526_v25 }
 0xc4d   : > { %v5415_v27 = vpop.permute.xlu1 %5414  ;;  %v5433_v46 = vpop.permute.xlu0 %5432 }
 0xc4e   : > { %v5540_v36 = vrot.slane %v5415_v27, %v14711_v8 }
 0xc50   : > { %v5545_v45 = vsel %vm2176_vm1, %v5544_v1, %v5540_v36  ;;  %v5517_v36 = vsel %vm2190_vm3, %v5516_v62, %v5512_v30 }
 0xc51   : > { %v5412_v39 = vpop.permute.xlu1 %5411  ;;  %v5442_v14 = vpop.permute.xlu0 %5441  ;;  %v5550_v19 = vsel %vm2183_vm2, %v5549_v29, %v5545_v45  ;;  %v5698_v29 = vld [vmem:[%s19635_s21 + $0x8] sm:$0xff] }
 0xc52   : > { %v5535_v47 = vrot.slane %v5412_v39, %v14724_v18  ;;  %v5582_v31 = vrot.slane %v5442_v14, %v14720_v16  ;;  %v5568_v39 = vrot.slane %v5433_v46, %v14722_v17 }
 0xc54   : > { %v5536_v14 = vsel %vm2190_vm3, %v5535_v47, %v5531_v15  ;;  %v19634_v47 = vmov 0.0   ;;  %v5700_v15 = vld [vmem:[%s19635_s21 + $0x18] sm:$0xff] }
 0xc55   : > { %v5427_v52 = vpop.permute.xlu1 %5426  ;;  %v5445_v51 = vpop.permute.xlu0 %5444 }
 0xc56   : > { %v5559_v2 = vrot.slane %v5427_v52, %v14711_v8  ;;  %v5498_v52 = vsel %vm2190_vm3, %v5497_v61, %v5493_v34 }
 0xc57   : > { %v5613_v24 = vsel %vm2325_vm4, %v5498_v52, %v5479_v37  ;;  %v5697_v52 = vld [vmem:[%s19635_s21] sm:$0xff] }
 0xc58   : > { %v5614_v61 = vsel %vm2327_vm5, %v5517_v36, %v5613_v24 }
 0xc59   : > { %v5424_v21 = vpop.permute.xlu1 %5423  ;;  %v5454_v23 = vpop.permute.xlu0 %5453 }
 0xc5a   : > { %v5554_v27 = vrot.slane %v5424_v21, %v14724_v18  ;;  %v5587_v21 = vrot.slane %v5445_v51, %v14722_v17  ;;  %v5601_v10 = vrot.slane %v5454_v23, %v14720_v16  ;;  %v5615_v51 = vsel %vm2329_vm6, %v5536_v14, %v5614_v61  ;;  %v12432_v61 = vld [vmem:[#allocation24] ss:$0 sm:$0xff] }
 0xc5c   : > { %v5555_v40 = vsel %vm2190_vm3, %v5554_v27, %v5550_v19  ;;  %v13284_v27 = vpack.c.bf16 %v5698_v29, %v5697_v52  ;;  %v5704_v19 = vld [vmem:[%s19635_s21 + $0x38] sm:$0xff] }
 0xc5d   : > { %v5439_v0 = vpop.permute.xlu1 %5438  ;;  %v5457_v35 = vpop.permute.xlu0 %5456  ;;  %v5616_v37 = vsel %vm2331_vm7, %v5555_v40, %v5615_v51 }
 0xc5e   : > { %v5578_v22 = vrot.slane %v5439_v0, %v14711_v8  ;;  %v5564_v0 = vsel %vm2176_vm1, %v5563_v42, %v5559_v2  ;;  %v5606_v23 = vrot.slane %v5457_v35, %v14722_v17  ;;  %13285 = vmatpush3.bf16.msra.mxu1 %v13284_v27 }
 0xc5f   : > { %v5569_v46 = vsel %vm2183_vm2, %v5568_v39, %v5564_v0  ;;  %13286 = vmatprep.subr.bf16.mxu1 %v19633_v41  ;;  %v5703_v39 = vld [vmem:[%s19635_s21 + $0x30] sm:$0xff] }
 0xc60   : > { %v5583_v3 = vsel %vm2176_vm1, %v5582_v31, %v5578_v22  ;;  %v5699_v31 = vld [vmem:[%s19635_s21 + $0x10] sm:$0xff] }
 0xc61   : > { %v5436_v43 = vpop.permute.xlu1 %5435  ;;  %v5588_v2 = vsel %vm2183_vm2, %v5587_v21, %v5583_v3  ;;  %v13287_v0 = vpack.c.bf16 %v5700_v15, %v5699_v31  ;;  %v13293_v3 = vpack.c.bf16 %v5704_v19, %v5703_v39 }
 0xc62   : > { %v5573_v50 = vrot.slane %v5436_v43, %v14724_v18 }
 0xc63   : > { %13288 = vmatpush3.bf16.msra.mxu1 %v13287_v0 }
 0xc64   : > { %v5574_v34 = vsel %vm2190_vm3, %v5573_v50, %v5569_v46  ;;  %v5701_v50 = vld [vmem:[%s19635_s21 + $0x20] sm:$0xff]  ;;  %13289 = vmatprep.subr.bf16.mxu1 %v19633_v41 }
 0xc65   : > { %v5451_v9 = vpop.permute.xlu1 %5450  ;;  %v5617_v22 = vsel %vm2333_vm8, %v5574_v34, %v5616_v37 }
 0xc66   : > { %v5597_v49 = vrot.slane %v5451_v9, %v14711_v8 }
 0xc68   : > { %v5602_v1 = vsel %vm2176_vm1, %v5601_v10, %v5597_v49  ;;  %v5702_v49 = vld [vmem:[%s19635_s21 + $0x28] sm:$0xff] }
 0xc69   : > { %v5448_v48 = vpop.permute.xlu1 %5447  ;;  %v5607_v9 = vsel %vm2183_vm2, %v5606_v23, %v5602_v1  ;;  %v13290_v36 = vpack.c.bf16 %v5702_v49, %v5701_v50 }
 0xc6a   : > { %v5592_v43 = vrot.slane %v5448_v48, %v14724_v18  ;;  %v12430_v48 = vld [vmem:[#allocation23] ss:$0 sm:$0xff] }
 0xc6b   : > { %13291 = vmatpush3.bf16.msra.mxu1 %v13290_v36 }
 0xc6c   : > { %v5593_v54 = vsel %vm2190_vm3, %v5592_v43, %v5588_v2  ;;  %13292 = vmatprep.subr.bf16.mxu1 %v19633_v41 }
 0xc6d   : > { %v5460_v25 = vpop.permute.xlu1 %5459  ;;  %v5618_v30 = vsel %vm2335_vm9, %v5593_v54, %v5617_v22 }
 0xc6e   : > { %v5611_v62 = vrot.slane %v5460_v25, %v14724_v18 }
 0xc6f   : > { %13294 = vmatpush3.bf16.msra.mxu1 %v13293_v3 }
 0xc70   : > { %v5612_v42 = vsel %vm2190_vm3, %v5611_v62, %v5607_v9  ;;  %13307 = vmatprep.subr.bf16.mxu1 %v19633_v41 }
 0xc71   : > { %v5619_v45 = vsel %vm2337_vm10, %v5612_v42, %v5618_v30 }
 0xc72   : > { %12951 = vmatmul.mubr.msk.f32.vlgmr.msra.gmra.mrb[24].mxu0 %vm2339_vm11, %v5619_v45 }
 0xc73   : > { %12980 = vmatprep.mubr.msk.f32.mxu0 %vm14140_vm0, %v19634_v47 }
 0xd45   : > { %v5688_v14 = vpop.f32.mrb[24].mxu0 }
 0xd46   : > { %v5689_v21 = vadd.f32 %v12430_v48, %v5688_v14  ;;  %v12952_v10 = vpop.f32.mrb[25].mxu0 }
 0xd48   : > { %v5693_v35 = vmul.f32 0.70710677, %v5689_v21  ;;  %v5692_v24 = vmul.f32 0.5, %v5689_v21 }
 0xd4a   : > { %13598 = verf.f32 %v5693_v35 }
 0xd54   : > { %v13599_v43 = vpop.eup %13598 }
 0xd55   : > { %v5695_v40 = vadd.f32 1.0, %v13599_v43  ;;  %v19644_v43 = vld [vmem:[#allocation45_spill] sm:$0xff] }
 0xd57   : > { %v5696_v46 = vmul.f32 %v5695_v40, %v5692_v24 }
 0xd59   : > { %12970 = vmatmul.mubr.msk.f32.vlgmr.msra.gmra.mrb[24].mxu1 %vm5712_vm13, %v5696_v46 }
 0xd5a   : > { %13002 = vmatprep.mubr.msk.f32.mxu1 %vm14140_vm0, %v19634_v47 }
 0xe2c   : > { %v5782_v34 = vpop.f32.mrb[24].mxu1 }
 0xe2d   : > { %v5783_v1 = vadd.f32 %v12432_v61, %v5782_v34  ;;  %v12971_v2 = vpop.f32.mrb[25].mxu1  ;;  %v19647_v61 = vld [vmem:[#allocation46_spill] sm:$0xff] }
 0xe2f   : > { %v5790_v51 = vrot.slane %v5783_v1, %v14703_v4  ;;  %v5809_v23 = vrot.slane %v5783_v1, %v14705_v5  ;;  %v5828_v54 = vrot.slane %v5783_v1, %v14707_v6  ;;  %v5847_v25 = vrot.slane %v5783_v1, %v14709_v7 }
 0xe30   : > { %v5866_v37 = vrot.slane %v5783_v1, %v14713_v12  ;;  %v5885_v62 = vrot.slane %v5783_v1, %v14715_v13  ;;  %v5904_v22 = vrot.slane %v5783_v1, %v19602_v59  ;;  %v5923_v9 = vrot.slane %v5783_v1, %v19609_v28 }
 0xe31   : > { %5796 = vbcast.lane.b32.xlu1 %v5790_v51, 264  ;;  %5792 = vbcast.lane.b32.xlu0 %v5790_v51, 256 }
 0xe35   : > { %5815 = vbcast.lane.b32.xlu1 %v5809_v23, 264  ;;  %5811 = vbcast.lane.b32.xlu0 %v5809_v23, 256 }
 0xe39   : > { %5819 = vbcast.lane.b32.xlu1 %v5809_v23, 272  ;;  %5800 = vbcast.lane.b32.xlu0 %v5790_v51, 272 }
 0xe3d   : > { %5834 = vbcast.lane.b32.xlu1 %v5828_v54, 264  ;;  %5830 = vbcast.lane.b32.xlu0 %v5828_v54, 256 }
 0xe41   : > { %5823 = vbcast.lane.b32.xlu1 %v5809_v23, 280  ;;  %5804 = vbcast.lane.b32.xlu0 %v5790_v51, 280  ;;  %v19648_v51 = vld [vmem:[#allocation40_spill] sm:$0xff] }
 0xe45   : > { %5849 = vbcast.lane.b32.xlu1 %v5847_v25, 256  ;;  %5838 = vbcast.lane.b32.xlu0 %v5828_v54, 272 }
 0xe49   : > { %5842 = vbcast.lane.b32.xlu1 %v5828_v54, 280  ;;  %5853 = vbcast.lane.b32.xlu0 %v5847_v25, 264  ;;  %v19650_v54 = vld [vmem:[#allocation47_spill] sm:$0xff] }
 0xe4d   : > { %5868 = vbcast.lane.b32.xlu1 %v5866_v37, 256  ;;  %5857 = vbcast.lane.b32.xlu0 %v5847_v25, 272 }
 0xe51   : > { %5861 = vbcast.lane.b32.xlu1 %v5847_v25, 280  ;;  %5872 = vbcast.lane.b32.xlu0 %v5866_v37, 264 }
 0xe55   : > { %5887 = vbcast.lane.b32.xlu1 %v5885_v62, 256  ;;  %5876 = vbcast.lane.b32.xlu0 %v5866_v37, 272 }
 0xe59   : > { %5880 = vbcast.lane.b32.xlu1 %v5866_v37, 280  ;;  %5891 = vbcast.lane.b32.xlu0 %v5885_v62, 264 }
 0xe5d   : > { %5906 = vbcast.lane.b32.xlu1 %v5904_v22, 256  ;;  %5895 = vbcast.lane.b32.xlu0 %v5885_v62, 272 }
 0xe61   : > { %5899 = vbcast.lane.b32.xlu1 %v5885_v62, 280  ;;  %5910 = vbcast.lane.b32.xlu0 %v5904_v22, 264 }
 0xe65   : > { %5925 = vbcast.lane.b32.xlu1 %v5923_v9, 256  ;;  %5914 = vbcast.lane.b32.xlu0 %v5904_v22, 272 }
 0xe69   : > { %5918 = vbcast.lane.b32.xlu1 %v5904_v22, 280  ;;  %5929 = vbcast.lane.b32.xlu0 %v5923_v9, 264  ;;  %v19651_v22 = vld [vmem:[#allocation50_spill] sm:$0xff] }
 0xe6d   : > { %5937 = vbcast.lane.b32.xlu1 %v5923_v9, 280  ;;  %5933 = vbcast.lane.b32.xlu0 %v5923_v9, 272 }
 0xea3   : > { %v5797_v42 = vpop.permute.xlu1 %5796  ;;  %v5793_v30 = vpop.permute.xlu0 %5792 }
 0xea4   : > { %v16656_v45 = vadd.f32 %v5797_v42, %v16353_v57  ;;  %v16659_v52 = vadd.f32 %v5793_v30, %v16350_v63  ;;  %v19653_v42 = vld [vmem:[#allocation49_spill] sm:$0xff] }
 0xea6   : > { %6041 = vperm.xlu1 %13578, %v16656_v45   ;;  %6038 = vperm.xlu0 %13579, %v16659_v52  }
 0xea7   : > { %v5816_v29 = vpop.permute.xlu1 %5815  ;;  %v5812_v31 = vpop.permute.xlu0 %5811 }
 0xea8   : > { %v16664_v27 = vadd.f32 %v5816_v29, %v16379_v33  ;;  %v16667_v15 = vadd.f32 %v5812_v31, %v16368_v26 }
 0xeaa   : > { %6053 = vperm.xlu1 %13578, %v16664_v27   ;;  %6050 = vperm.xlu0 %13579, %v16667_v15  }
 0xeab   : > { %v5820_v57 = vpop.permute.xlu1 %5819  ;;  %v5801_v0 = vpop.permute.xlu0 %5800 }
 0xeac   : > { %v16672_v63 = vadd.f32 %v5820_v57, %v16406_v20  ;;  %v16675_v50 = vadd.f32 %v5801_v0, %v16389_v53  ;;  %v19654_v57 = vld [vmem:[#allocation58_spill] sm:$0xff] }
 0xeae   : > { %6056 = vperm.xlu1 %13578, %v16672_v63   ;;  %6044 = vperm.xlu0 %13579, %v16675_v50  }
 0xeaf   : > { %v5835_v33 = vpop.permute.xlu1 %5834  ;;  %v5831_v49 = vpop.permute.xlu0 %5830 }
 0xeb0   : > { %v16680_v26 = vadd.f32 %v5835_v33, %v16420_v38  ;;  %v16683_v36 = vadd.f32 %v5831_v49, %v16365_v60  ;;  %v19656_v33 = vld [vmem:[#allocation52_spill] sm:$0xff] }
 0xeb2   : > { %19636 = vst [vmem:[#allocation62_spill] sm:$0xff] %v16680_v26  ;;  %6065 = vperm.xlu1 %13578, %v16680_v26   ;;  %6062 = vperm.xlu0 %13579, %v16683_v36  }
 0xeb3   : > { %v5824_v20 = vpop.permute.xlu1 %5823  ;;  %v5805_v39 = vpop.permute.xlu0 %5804 }
 0xeb4   : > { %v16688_v53 = vadd.f32 %v5824_v20, %v16430_v32  ;;  %v16691_v19 = vadd.f32 %v5805_v39, %v16382_v44 }
 0xeb6   : > { %19637 = vst [vmem:[#allocation42_spill] sm:$0xff] %v16688_v53  ;;  %6059 = vperm.xlu1 %13578, %v16688_v53   ;;  %6047 = vperm.xlu0 %13579, %v16691_v19  }
 0xeb7   : > { %v5850_v38 = vpop.permute.xlu1 %5849  ;;  %v5839_v3 = vpop.permute.xlu0 %5838 }
 0xeb8   : > { %v16696_v60 = vadd.f32 %v5850_v38, %v16443_v56  ;;  %v16699_v48 = vadd.f32 %v5839_v3, %v16392_v11  ;;  %v19642_v11 = vld [vmem:[#allocation51_spill] sm:$0xff]  ;;  %v19657_v38 = vld [vmem:[#allocation61_spill] sm:$0xff] }
 0xeba   : > { %19638 = vst [vmem:[#allocation43_spill] sm:$0xff] %v16696_v60  ;;  %19639 = vst [vmem:[#allocation44_spill] sm:$0xff] %v16699_v48  ;;  %6074 = vperm.xlu1 %13578, %v16696_v60   ;;  %6068 = vperm.xlu0 %13579, %v16699_v48  }
 0xebb   : > { %v5843_v32 = vpop.permute.xlu1 %5842  ;;  %v5854_v14 = vpop.permute.xlu0 %5853 }
 0xebc   : > { %v16704_v44 = vadd.f32 %v5843_v32, %v16459_v58  ;;  %v16707_v21 = vadd.f32 %v5854_v14, %v16409_v55  ;;  %v19645_v55 = vld [vmem:[#allocation53_spill] sm:$0xff]  ;;  %v19659_v32 = vld [vmem:[#allocation59_spill] sm:$0xff] }
 0xebe   : > { %19640 = vst [vmem:[#allocation63_spill] sm:$0xff] %v16704_v44  ;;  %19641 = vst [vmem:[#allocation64_spill] sm:$0xff] %v16707_v21  ;;  %6071 = vperm.xlu1 %13578, %v16704_v44   ;;  %6077 = vperm.xlu0 %13579, %v16707_v21  }
 0xebf   : > { %v5869_v56 = vpop.permute.xlu1 %5868  ;;  %v5858_v10 = vpop.permute.xlu0 %5857 }
 0xec0   : > { %v16712_v35 = vadd.f32 %v5869_v56, %v19642_v11  ;;  %v16715_v24 = vadd.f32 %v5858_v10, %v19644_v43  ;;  %v19660_v11 = vld [vmem:[#allocation57_spill] sm:$0xff] }
 0xec2   : > { %19643 = vst [vmem:[#allocation51_spill] sm:$0xff] %v16712_v35  ;;  %6086 = vperm.xlu1 %13578, %v16712_v35   ;;  %6080 = vperm.xlu0 %13579, %v16715_v24  }
 0xec3   : > { %v5862_v58 = vpop.permute.xlu1 %5861  ;;  %v5873_v40 = vpop.permute.xlu0 %5872 }
 0xec4   : > { %v16720_v46 = vadd.f32 %v5862_v58, %v19645_v55  ;;  %v16723_v34 = vadd.f32 %v5873_v40, %v19647_v61  ;;  %v19662_v58 = vld [vmem:[#allocation54_spill] sm:$0xff] }
 0xec6   : > { %19646 = vst [vmem:[#allocation45_spill] sm:$0xff] %v16720_v46  ;;  %6083 = vperm.xlu1 %13578, %v16720_v46   ;;  %6089 = vperm.xlu0 %13579, %v16723_v34  }
 0xec7   : > { %v5888_v1 = vpop.permute.xlu1 %5887  ;;  %v5877_v2 = vpop.permute.xlu0 %5876 }
 0xec8   : > { %v16728_v23 = vadd.f32 %v5888_v1, %v19648_v51  ;;  %v16731_v25 = vadd.f32 %v5877_v2, %v19650_v54  ;;  %v19663_v1 = vld [vmem:[#allocation60_spill] sm:$0xff]  ;;  %v19665_v51 = vld [vmem:[#allocation55_spill] sm:$0xff] }
 0xeca   : > { %19649 = vst [vmem:[#allocation53_spill] sm:$0xff] %v16728_v23  ;;  %6098 = vperm.xlu1 %13578, %v16728_v23   ;;  %6092 = vperm.xlu0 %13579, %v16731_v25  }
 0xecb   : > { %v5881_v37 = vpop.permute.xlu1 %5880  ;;  %v5892_v62 = vpop.permute.xlu0 %5891 }
 0xecc   : > { %v16736_v9 = vadd.f32 %v5881_v37, %v19651_v22  ;;  %v16739_v30 = vadd.f32 %v5892_v62, %v19653_v42  ;;  %v19667_v22 = vld [vmem:[#allocation48_spill] sm:$0xff] }
 0xece   : > { %19652 = vst [vmem:[#allocation46_spill] sm:$0xff] %v16736_v9  ;;  %6095 = vperm.xlu1 %13578, %v16736_v9   ;;  %6101 = vperm.xlu0 %13579, %v16739_v30  }
 0xecf   : > { %v5907_v29 = vpop.permute.xlu1 %5906  ;;  %v5896_v31 = vpop.permute.xlu0 %5895 }
 0xed0   : > { %v16744_v0 = vadd.f32 %v5907_v29, %v19654_v57  ;;  %v16747_v49 = vadd.f32 %v5896_v31, %v19656_v33  ;;  %v19669_v29 = vld [vmem:[#allocation56_spill] sm:$0xff] }
 0xed2   : > { %19655 = vst [vmem:[#allocation40_spill] sm:$0xff] %v16744_v0  ;;  %6110 = vperm.xlu1 %13578, %v16744_v0   ;;  %6104 = vperm.xlu0 %13579, %v16747_v49  }
 0xed3   : > { %v5900_v20 = vpop.permute.xlu1 %5899  ;;  %v5911_v39 = vpop.permute.xlu0 %5910 }
 0xed4   : > { %v16752_v3 = vadd.f32 %v5900_v20, %v19657_v38  ;;  %v16755_v14 = vadd.f32 %v5911_v39, %v19659_v32 }
 0xed6   : > { %19658 = vst [vmem:[#allocation47_spill] sm:$0xff] %v16752_v3  ;;  %6107 = vperm.xlu1 %13578, %v16752_v3   ;;  %6113 = vperm.xlu0 %13579, %v16755_v14  }
 0xed7   : > { %v5926_v56 = vpop.permute.xlu1 %5925  ;;  %v5915_v10 = vpop.permute.xlu0 %5914 }
 0xed8   : > { %v16760_v43 = vadd.f32 %v5926_v56, %v19660_v11  ;;  %v16763_v40 = vadd.f32 %v5915_v10, %v19662_v58 }
 0xeda   : > { %19661 = vst [vmem:[#allocation50_spill] sm:$0xff] %v16760_v43  ;;  %6122 = vperm.xlu1 %13578, %v16760_v43   ;;  %6116 = vperm.xlu0 %13579, %v16763_v40  }
 0xedb   : > { %v5919_v55 = vpop.permute.xlu1 %5918  ;;  %v5930_v61 = vpop.permute.xlu0 %5929 }
 0xedc   : > { %v16768_v2 = vadd.f32 %v5919_v55, %v19663_v1  ;;  %v16771_v54 = vadd.f32 %v5930_v61, %v19665_v51 }
 0xede   : > { %19664 = vst [vmem:[#allocation49_spill] sm:$0xff] %v16768_v2  ;;  %19666 = vst [vmem:[#allocation58_spill] sm:$0xff] %v16771_v54  ;;  %6119 = vperm.xlu1 %13578, %v16768_v2   ;;  %6125 = vperm.xlu0 %13579, %v16771_v54  }
 0xedf   : > { %v5938_v37 = vpop.permute.xlu1 %5937  ;;  %v5934_v62 = vpop.permute.xlu0 %5933 }
 0xee0   : > { %v16776_v42 = vadd.f32 %v5938_v37, %v19667_v22  ;;  %v16779_v31 = vadd.f32 %v5934_v62, %v19669_v29 }
 0xee2   : > { %19668 = vst [vmem:[#allocation52_spill] sm:$0xff] %v16776_v42  ;;  %19670 = vst [vmem:[#allocation61_spill] sm:$0xff] %v16779_v31  ;;  %6131 = vperm.xlu1 %13578, %v16776_v42   ;;  %6128 = vperm.xlu0 %13579, %v16779_v31  }
 0xf25   : > { %v6042_v57 = vpop.permute.xlu1 %6041  ;;  %v6039_v33 = vpop.permute.xlu0 %6038 }
 0xf26   : > { %v6140_v0 = vrot.slane %v6042_v57, %v14720_v16  ;;  %v6136_v9 = vrot.slane %v6039_v33, %v14711_v8 }
 0xf29   : > { %v6054_v20 = vpop.permute.xlu1 %6053  ;;  %v6051_v39 = vpop.permute.xlu0 %6050 }
 0xf2a   : > { %v6159_v23 = vrot.slane %v6054_v20, %v14720_v16  ;;  %v6155_v46 = vrot.slane %v6051_v39, %v14711_v8  ;;  %v6141_v20 = vsel %vm2176_vm1, %v6140_v0, %v6136_v9 }
 0xf2c   : > { %v6160_v39 = vsel %vm2176_vm1, %v6159_v23, %v6155_v46 }
 0xf2d   : > { %v6057_v38 = vpop.permute.xlu1 %6056  ;;  %v6045_v32 = vpop.permute.xlu0 %6044 }
 0xf2e   : > { %v6164_v35 = vrot.slane %v6057_v38, %v14722_v17  ;;  %v6145_v44 = vrot.slane %v6045_v32, %v14722_v17 }
 0xf30   : > { %v6165_v32 = vsel %vm2183_vm2, %v6164_v35, %v6160_v39 }
 0xf31   : > { %v6066_v56 = vpop.permute.xlu1 %6065  ;;  %v6063_v10 = vpop.permute.xlu0 %6062 }
 0xf32   : > { %v6178_v21 = vrot.slane %v6066_v56, %v14720_v16  ;;  %v6174_v60 = vrot.slane %v6063_v10, %v14711_v8  ;;  %v6146_v56 = vsel %vm2183_vm2, %v6145_v44, %v6141_v20 }
 0xf34   : > { %v6179_v10 = vsel %vm2176_vm1, %v6178_v21, %v6174_v60 }
 0xf35   : > { %v6060_v11 = vpop.permute.xlu1 %6059  ;;  %v6048_v58 = vpop.permute.xlu0 %6047 }
 0xf36   : > { %v6169_v48 = vrot.slane %v6060_v11, %v14724_v18  ;;  %v6150_v31 = vrot.slane %v6048_v58, %v14724_v18 }
 0xf38   : > { %v6170_v11 = vsel %vm2190_vm3, %v6169_v48, %v6165_v32  ;;  %v6151_v58 = vsel %vm2190_vm3, %v6150_v31, %v6146_v56 }
 0xf39   : > { %v6075_v55 = vpop.permute.xlu1 %6074  ;;  %v6069_v61 = vpop.permute.xlu0 %6068  ;;  %v6285_v20 = vsel %vm2325_vm4, %v6170_v11, %v6151_v58 }
 0xf3a   : > { %v6183_v33 = vrot.slane %v6069_v61, %v14722_v17  ;;  %v6193_v9 = vrot.slane %v6075_v55, %v14711_v8 }
 0xf3c   : > { %v6184_v46 = vsel %vm2183_vm2, %v6183_v33, %v6179_v10 }
 0xf3d   : > { %v6072_v1 = vpop.permute.xlu1 %6071  ;;  %v6078_v51 = vpop.permute.xlu0 %6077 }
 0xf3e   : > { %v6188_v38 = vrot.slane %v6072_v1, %v14724_v18  ;;  %v6197_v54 = vrot.slane %v6078_v51, %v14720_v16 }
 0xf40   : > { %v6189_v44 = vsel %vm2190_vm3, %v6188_v38, %v6184_v46  ;;  %v6198_v51 = vsel %vm2176_vm1, %v6197_v54, %v6193_v9 }
 0xf41   : > { %v6087_v37 = vpop.permute.xlu1 %6086  ;;  %v6081_v62 = vpop.permute.xlu0 %6080 }
 0xf42   : > { %v6202_v23 = vrot.slane %v6081_v62, %v14722_v17  ;;  %v6212_v0 = vrot.slane %v6087_v37, %v14711_v8 }
 0xf45   : > { %v6084_v22 = vpop.permute.xlu1 %6083  ;;  %v6090_v29 = vpop.permute.xlu0 %6089 }
 0xf46   : > { %v6216_v35 = vrot.slane %v6090_v29, %v14720_v16  ;;  %v6207_v60 = vrot.slane %v6084_v22, %v14724_v18 }
 0xf48   : > { %v6217_v37 = vsel %vm2176_vm1, %v6216_v35, %v6212_v0 }
 0xf49   : > { %v6099_v47 = vpop.permute.xlu1 %6098  ;;  %v6093_v41 = vpop.permute.xlu0 %6092 }
 0xf4a   : > { %v6221_v48 = vrot.slane %v6093_v41, %v14722_v17  ;;  %v6231_v62 = vrot.slane %v6099_v47, %v14711_v8 }
 0xf4c   : > { %v6222_v54 = vsel %vm2183_vm2, %v6221_v48, %v6217_v37 }
 0xf4d   : > { %v6096_v42 = vpop.permute.xlu1 %6095  ;;  %v6102_v2 = vpop.permute.xlu0 %6101 }
 0xf4e   : > { %v6235_v21 = vrot.slane %v6102_v2, %v14720_v16  ;;  %v6226_v31 = vrot.slane %v6096_v42, %v14724_v18  ;;  %v6203_v2 = vsel %vm2183_vm2, %v6202_v23, %v6198_v51 }
 0xf50   : > { %v6236_v47 = vsel %vm2176_vm1, %v6235_v21, %v6231_v62  ;;  %v6227_v39 = vsel %vm2190_vm3, %v6226_v31, %v6222_v54 }
 0xf51   : > { %v6111_v43 = vpop.permute.xlu1 %6110  ;;  %v6105_v3 = vpop.permute.xlu0 %6104 }
 0xf52   : > { %v6240_v55 = vrot.slane %v6105_v3, %v14722_v17  ;;  %v6250_v42 = vrot.slane %v6111_v43, %v14711_v8  ;;  %v6286_v43 = vsel %vm2327_vm5, %v6189_v44, %v6285_v20 }
 0xf54   : > { %v6241_v38 = vsel %vm2183_vm2, %v6240_v55, %v6236_v47 }
 0xf55   : > { %v6108_v53 = vpop.permute.xlu1 %6107  ;;  %v6114_v57 = vpop.permute.xlu0 %6113 }
 0xf56   : > { %v6254_v1 = vrot.slane %v6114_v57, %v14720_v16  ;;  %v6245_v29 = vrot.slane %v6108_v53, %v14724_v18  ;;  %v6208_v57 = vsel %vm2190_vm3, %v6207_v60, %v6203_v2 }
 0xf57   : > { %v6287_v23 = vsel %vm2329_vm6, %v6208_v57, %v6286_v43 }
 0xf58   : > { %v6255_v32 = vsel %vm2176_vm1, %v6254_v1, %v6250_v42  ;;  %v6246_v56 = vsel %vm2190_vm3, %v6245_v29, %v6241_v38  ;;  %v6288_v60 = vsel %vm2331_vm7, %v6227_v39, %v6287_v23 }
 0xf59   : > { %v6123_v26 = vpop.permute.xlu1 %6122  ;;  %v6117_v61 = vpop.permute.xlu0 %6116 }
 0xf5a   : > { %v6259_v22 = vrot.slane %v6117_v61, %v14722_v17  ;;  %v6269_v10 = vrot.slane %v6123_v26, %v14711_v8  ;;  %v6289_v26 = vsel %vm2333_vm8, %v6246_v56, %v6288_v60  ;;  %v19679_v60 = vld [vmem:[#allocation58_spill] sm:$0xff] }
 0xf5c   : > { %v6260_v61 = vsel %vm2183_vm2, %v6259_v22, %v6255_v32 }
 0xf5d   : > { %v6120_v33 = vpop.permute.xlu1 %6119  ;;  %v6126_v41 = vpop.permute.xlu0 %6125 }
 0xf5e   : > { %v6264_v3 = vrot.slane %v6120_v33, %v14724_v18  ;;  %v6273_v53 = vrot.slane %v6126_v41, %v14720_v16 }
 0xf60   : > { %v6265_v11 = vsel %vm2190_vm3, %v6264_v3, %v6260_v61  ;;  %v6274_v44 = vsel %vm2176_vm1, %v6273_v53, %v6269_v10 }
 0xf61   : > { %v6132_v9 = vpop.permute.xlu1 %6131  ;;  %v6129_v46 = vpop.permute.xlu0 %6128  ;;  %v6290_v0 = vsel %vm2335_vm9, %v6265_v11, %v6289_v26 }
 0xf62   : > { %v6283_v58 = vrot.slane %v6132_v9, %v14724_v18  ;;  %v6278_v35 = vrot.slane %v6129_v46, %v14722_v17 }
 0xf64   : > { %v6279_v48 = vsel %vm2183_vm2, %v6278_v35, %v6274_v44 }
 0xf65   : > { %v6284_v21 = vsel %vm2190_vm3, %v6283_v58, %v6279_v48  ;;  %v19678_v58 = vld [vmem:[#allocation62_spill] sm:$0xff] }
 0xf66   : > { %v6291_v31 = vsel %vm2337_vm10, %v6284_v21, %v6290_v0  ;;  %v19681_v48 = vld [vmem:[#allocation42_spill] sm:$0xff]  ;;  %v19682_v0 = vld [vmem:[#allocation61_spill] sm:$0xff] }
 0xf67   : > { %v6293_v55 = vsel %vm2339_vm11, %v6291_v31, 0.0 }
 0xf68   : > { %6294 = vadd.xlane.f32.xlu0 %v6293_v55  ;;  %v19684_v55 = vld [vmem:[#allocation44_spill] sm:$0xff] }
 0xff5   : > { %v6295_v1 = vpop.xlane.xlu0 %6294 }
 0xff6   : > { %v6296_v51 = vmul.f32 0.03125, %v6295_v1 }
 0xff8   : > { %v6301_v62 = vrot.slane %v6296_v51, %v14703_v4  ;;  %v16849_v29 = vrot.slane %v6296_v51, %v14709_v7  ;;  %v16858_v41 = vrot.slane %v6296_v51, %v14713_v12  ;;  %v6305_v2 = vrot.slane %v6296_v51, %v14705_v5 }
 0xffa   : > { %v16852_v22 = vsub.f32 %v16691_v19, %v6301_v62  ;;  %v16855_v33 = vsub.f32 %v16659_v52, %v6301_v62  ;;  %v16867_v3 = vsub.f32 %v16715_v24, %v16849_v29  ;;  %v16870_v19 = vsub.f32 %v16656_v45, %v6301_v62 }
 0xffb   : > { %v16878_v54 = vsub.f32 %v16723_v34, %v16858_v41  ;;  %v16881_v47 = vsub.f32 %v16667_v15, %v6305_v2  ;;  %v16884_v45 = vrot.slane %v6296_v51, %v14715_v13  ;;  %v16892_v20 = vsub.f32 %v16731_v25, %v16858_v41 }
 0xffc   : > { %v6373_v37 = vmul.f32 %v16852_v22, %v16852_v22  ;;  %v6370_v42 = vmul.f32 %v16855_v33, %v16855_v33  ;;  %19671 = vst [vmem:[#allocation59_spill] sm:$0xff] %v16867_v3  ;;  %v6384_v52 = vmul.f32 %v16867_v3, %v16867_v3  ;;  %v6371_v57 = vmul.f32 %v16870_v19, %v16870_v19 }
 0xffd   : > { %19672 = vst [vmem:[#allocation57_spill] sm:$0xff] %v16878_v54  ;;  %v6387_v24 = vmul.f32 %v16878_v54, %v16878_v54  ;;  %v6374_v53 = vmul.f32 %v16881_v47, %v16881_v47  ;;  %19673 = vst [vmem:[#allocation54_spill] sm:$0xff] %v16892_v20  ;;  %v16895_v34 = vsub.f32 %v16664_v27, %v6305_v2 }
 0xffe   : > { %6444 = vperm.xlu0 %13579, %v6373_v37   ;;  %6435 = vperm.xlu1 %13578, %v6370_v42   ;;  %v6388_v15 = vmul.f32 %v16892_v20, %v16892_v20  ;;  %v16903_v38 = vsub.f32 %v16739_v30, %v16884_v45  ;;  %v16906_v32 = vsub.f32 %v16675_v50, %v6301_v62 }
 0xfff   : > { %v6375_v39 = vmul.f32 %v16895_v34, %v16895_v34  ;;  %v16909_v27 = vrot.slane %v6296_v51, %v19602_v59  ;;  %v6309_v25 = vrot.slane %v6296_v51, %v14707_v6  ;;  %v16918_v30 = vsub.f32 %v16747_v49, %v16884_v45 }
0x1000   : > { %19674 = vst [vmem:[#allocation60_spill] sm:$0xff] %v16903_v38  ;;  %v6391_v43 = vmul.f32 %v16903_v38, %v16903_v38  ;;  %v6372_v56 = vmul.f32 %v16906_v32, %v16906_v32  ;;  %v16921_v50 = vsub.f32 %v16672_v63, %v6305_v2  ;;  %v6329_v63 = vrot.slane %v6296_v51, %v19609_v28 }
0x1001   : > { %19675 = vst [vmem:[#allocation55_spill] sm:$0xff] %v16918_v30  ;;  %v6392_v10 = vmul.f32 %v16918_v30, %v16918_v30  ;;  %v16929_v9 = vsub.f32 %v16755_v14, %v16909_v27  ;;  %v16932_v46 = vsub.f32 %v16683_v36, %v6309_v25  ;;  %v16941_v11 = vsub.f32 %v16763_v40, %v16909_v27 }
0x1002   : > { %6477 = vperm.xlu0 %13579, %v6384_v52   ;;  %6438 = vperm.xlu1 %13578, %v6371_v57   ;;  %v6376_v61 = vmul.f32 %v16921_v50, %v16921_v50  ;;  %v16944_v14 = vsub.f32 %v19678_v58, %v6309_v25  ;;  %v16951_v44 = vsub.f32 %v19679_v60, %v6329_v63  ;;  %v19686_v52 = vld [vmem:[#allocation64_spill] sm:$0xff] }
0x1003   : > { %19676 = vst [vmem:[#allocation48_spill] sm:$0xff] %v16929_v9  ;;  %v6395_v49 = vmul.f32 %v16929_v9, %v16929_v9  ;;  %v6378_v23 = vmul.f32 %v16932_v46, %v16932_v46  ;;  %19677 = vst [vmem:[#allocation56_spill] sm:$0xff] %v16941_v11  ;;  %v6396_v36 = vmul.f32 %v16941_v11, %v16941_v11 }
0x1004   : > { %v6379_v35 = vmul.f32 %v16944_v14, %v16944_v14  ;;  %19680 = vst [vmem:[#allocation62_spill] sm:$0xff] %v16951_v44  ;;  %v16954_v26 = vsub.f32 %v19681_v48, %v6305_v2  ;;  %v6399_v40 = vmul.f32 %v16951_v44, %v16951_v44  ;;  %v16961_v31 = vsub.f32 %v19682_v0, %v6329_v63  ;;  %v19685_v2 = vld [vmem:[#allocation43_spill] sm:$0xff]  ;;  %v19694_v48 = vld [vmem:[#allocation40_spill] sm:$0xff] }
0x1005   : > { %v16964_v1 = vsub.f32 %v19684_v55, %v6309_v25  ;;  %v16972_v37 = vsub.f32 %v19685_v2, %v16849_v29  ;;  %v16978_v57 = vsub.f32 %v19686_v52, %v16849_v29  ;;  %v19696_v0 = vld [vmem:[#allocation47_spill] sm:$0xff] }
0x1006   : > { %6486 = vperm.xlu0 %13579, %v6387_v24   ;;  %6447 = vperm.xlu1 %13578, %v6374_v53   ;;  %v6377_v21 = vmul.f32 %v16954_v26, %v16954_v26  ;;  %19683 = vst [vmem:[#allocation58_spill] sm:$0xff] %v16961_v31  ;;  %v6400_v51 = vmul.f32 %v16961_v31, %v16961_v31  ;;  %v19688_v53 = vld [vmem:[#allocation63_spill] sm:$0xff] }
0x1007   : > { %v6380_v62 = vmul.f32 %v16964_v1, %v16964_v1  ;;  %v6382_v42 = vmul.f32 %v16972_v37, %v16972_v37  ;;  %19687 = vst [vmem:[#allocation42_spill] sm:$0xff] %v16978_v57  ;;  %v6383_v24 = vmul.f32 %v16978_v57, %v16978_v57  ;;  %v17019_v55 = vsub.f32 %v19696_v0, %v16884_v45 }
0x1009   : > { %19697 = vst [vmem:[#allocation43_spill] sm:$0xff] %v17019_v55 }
0x100a   : > { %6489 = vperm.xlu0 %13579, %v6388_v15   ;;  %6450 = vperm.xlu1 %13578, %v6375_v39   ;;  %v16983_v15 = vsub.f32 %v19688_v53, %v6309_v25 }
0x100c   : > { %v6381_v39 = vmul.f32 %v16983_v15, %v16983_v15 }
0x100e   : > { %6498 = vperm.xlu0 %13579, %v6391_v43   ;;  %6441 = vperm.xlu1 %13578, %v6372_v56   ;;  %v19689_v43 = vld [vmem:[#allocation51_spill] sm:$0xff] }
0x100f   : > { %v16989_v56 = vsub.f32 %v19689_v43, %v16858_v41  ;;  %v12434_v43 = vld [vmem:[#allocation18] ss:$0 sm:$0xff] }
0x1012   : > { %6501 = vperm.xlu0 %13579, %v6392_v10   ;;  %6453 = vperm.xlu1 %13578, %v6376_v61   ;;  %v6386_v10 = vmul.f32 %v16989_v56, %v16989_v56  ;;  %v19690_v61 = vld [vmem:[#allocation45_spill] sm:$0xff] }
0x1016   : > { %6510 = vperm.xlu0 %13579, %v6395_v49   ;;  %6459 = vperm.xlu1 %13578, %v6378_v23   ;;  %v16995_v49 = vsub.f32 %v19690_v61, %v16849_v29  ;;  %v19691_v23 = vld [vmem:[#allocation53_spill] sm:$0xff] }
0x1017   : > { %v17001_v58 = vsub.f32 %v19691_v23, %v16884_v45 }
0x1018   : > { %v6385_v25 = vmul.f32 %v16995_v49, %v16995_v49 }
0x101a   : > { %6513 = vperm.xlu0 %13579, %v6396_v36   ;;  %6462 = vperm.xlu1 %13578, %v6379_v35   ;;  %v6390_v36 = vmul.f32 %v17001_v58, %v17001_v58  ;;  %v19692_v35 = vld [vmem:[#allocation46_spill] sm:$0xff] }
0x101b   : > { %v17007_v60 = vsub.f32 %v19692_v35, %v16858_v41  ;;  %v6393_v41 = vmul.f32 %v17019_v55, %v17019_v55 }
0x101d   : > { %19693 = vst [vmem:[#allocation61_spill] sm:$0xff] %v17007_v60  ;;  %v6389_v29 = vmul.f32 %v17007_v60, %v17007_v60 }
0x101e   : > { %6522 = vperm.xlu0 %13579, %v6399_v40   ;;  %6456 = vperm.xlu1 %13578, %v6377_v21   ;;  %v17013_v40 = vsub.f32 %v19694_v48, %v16909_v27 }
0x1020   : > { %19695 = vst [vmem:[#allocation44_spill] sm:$0xff] %v17013_v40  ;;  %v6394_v21 = vmul.f32 %v17013_v40, %v17013_v40 }
0x1022   : > { %6525 = vperm.xlu0 %13579, %v6400_v51   ;;  %6465 = vperm.xlu1 %13578, %v6380_v62   ;;  %v19698_v51 = vld [vmem:[#allocation50_spill] sm:$0xff] }
0x1023   : > { %v17024_v62 = vsub.f32 %v19698_v51, %v6329_v63 }
0x1025   : > { %19699 = vst [vmem:[#allocation64_spill] sm:$0xff] %v17024_v62  ;;  %v6398_v2 = vmul.f32 %v17024_v62, %v17024_v62 }
0x1026   : > { %6471 = vperm.xlu1 %13578, %v6382_v42   ;;  %v19700_v42 = vld [vmem:[#allocation49_spill] sm:$0xff] }
0x1027   : > { %v17030_v52 = vsub.f32 %v19700_v42, %v16909_v27 }
0x1029   : > { %19701 = vst [vmem:[#allocation63_spill] sm:$0xff] %v17030_v52  ;;  %v6397_v45 = vmul.f32 %v17030_v52, %v17030_v52 }
0x102a   : > { %6474 = vperm.xlu1 %13578, %v6383_v24   ;;  %v19702_v24 = vld [vmem:[#allocation52_spill] sm:$0xff] }
0x102b   : > { %v17035_v53 = vsub.f32 %v19702_v24, %v6329_v63 }
0x102d   : > { %19703 = vst [vmem:[#allocation51_spill] sm:$0xff] %v17035_v53 }
0x102e   : > { %6468 = vperm.xlu1 %13578, %v6381_v39   ;;  %v6401_v39 = vmul.f32 %v17035_v53, %v17035_v53 }
0x1032   : > { %6483 = vperm.xlu1 %13578, %v6386_v10   ;;  %v12435_v10 = vld [vmem:[#allocation20] ss:$0 sm:$0xff] }
0x1036   : > { %6480 = vperm.xlu1 %13578, %v6385_v25  }
0x103a   : > { %6495 = vperm.xlu1 %13578, %v6390_v36  }
0x103e   : > { %6492 = vperm.xlu1 %13578, %v6389_v29  }
0x1042   : > { %6507 = vperm.xlu1 %13578, %v6394_v21  }
0x1046   : > { %6504 = vperm.xlu1 %13578, %v6393_v41  }
0x104a   : > { %6519 = vperm.xlu1 %13578, %v6398_v2  }
0x104e   : > { %6516 = vperm.xlu1 %13578, %v6397_v45  }
0x1052   : > { %6528 = vperm.xlu1 %13578, %v6401_v39  }
0x1056   : > { %6775 = vbcast.lane.b32.xlu1 %v12434_v43, 256 }
0x105a   : > { %6779 = vbcast.lane.b32.xlu1 %v12434_v43, 264 }
0x105e   : > { %6783 = vbcast.lane.b32.xlu1 %v12434_v43, 272 }
0x1062   : > { %6787 = vbcast.lane.b32.xlu1 %v12434_v43, 280 }
0x1066   : > { %6831 = vbcast.lane.b32.xlu1 %v12435_v10, 256 }
0x106a   : > { %6835 = vbcast.lane.b32.xlu1 %v12435_v10, 264 }
0x106e   : > { %6839 = vbcast.lane.b32.xlu1 %v12435_v10, 272 }
0x1072   : > { %6843 = vbcast.lane.b32.xlu1 %v12435_v10, 280 }
0x107d   : > { %v6436_v27 = vpop.permute.xlu1 %6435  ;;  %v6445_v29 = vpop.permute.xlu0 %6444 }
0x107e   : > { %v6533_v52 = vrot.slane %v6436_v27, %v14711_v8  ;;  %v6547_v55 = vrot.slane %v6445_v29, %v14724_v18 }
0x1081   : > { %v6439_v61 = vpop.permute.xlu1 %6438  ;;  %v6478_v0 = vpop.permute.xlu0 %6477 }
0x1082   : > { %v6537_v30 = vrot.slane %v6439_v61, %v14720_v16  ;;  %v6599_v3 = vrot.slane %v6478_v0, %v14722_v17 }
0x1084   : > { %v6538_v28 = vsel %vm2176_vm1, %v6537_v30, %v6533_v52 }
0x1085   : > { %v6448_v25 = vpop.permute.xlu1 %6447  ;;  %v6487_v51 = vpop.permute.xlu0 %6486 }
0x1086   : > { %v6552_v54 = vrot.slane %v6448_v25, %v14711_v8  ;;  %v6613_v40 = vrot.slane %v6487_v51, %v14720_v16 }
0x1089   : > { %v6451_v63 = vpop.permute.xlu1 %6450  ;;  %v6490_v45 = vpop.permute.xlu0 %6489 }
0x108a   : > { %v6556_v20 = vrot.slane %v6451_v63, %v14720_v16 }
0x108c   : > { %v6557_v27 = vsel %vm2176_vm1, %v6556_v20, %v6552_v54 }
0x108d   : > { %v6442_v23 = vpop.permute.xlu1 %6441  ;;  %v6499_v39 = vpop.permute.xlu0 %6498 }
0x108e   : > { %v6542_v53 = vrot.slane %v6442_v23, %v14722_v17  ;;  %v6618_v23 = vrot.slane %v6490_v45, %v14722_v17  ;;  %v6632_v30 = vrot.slane %v6499_v39, %v14720_v16 }
0x1090   : > { %v6543_v61 = vsel %vm2183_vm2, %v6542_v53, %v6538_v28 }
0x1091   : > { %v6454_v36 = vpop.permute.xlu1 %6453  ;;  %v6502_v31 = vpop.permute.xlu0 %6501  ;;  %v6548_v0 = vsel %vm2190_vm3, %v6547_v55, %v6543_v61 }
0x1092   : > { %v6561_v63 = vrot.slane %v6454_v36, %v14722_v17  ;;  %v6637_v20 = vrot.slane %v6502_v31, %v14722_v17 }
0x1094   : > { %v6562_v45 = vsel %vm2183_vm2, %v6561_v63, %v6557_v27 }
0x1095   : > { %v6460_v35 = vpop.permute.xlu1 %6459  ;;  %v6511_v11 = vpop.permute.xlu0 %6510 }
0x1096   : > { %v6571_v36 = vrot.slane %v6460_v35, %v14711_v8  ;;  %v6651_v55 = vrot.slane %v6511_v11, %v14720_v16 }
0x1099   : > { %v6463_v48 = vpop.permute.xlu1 %6462  ;;  %v6514_v62 = vpop.permute.xlu0 %6513 }
0x109a   : > { %v6575_v52 = vrot.slane %v6463_v48, %v14720_v16 }
0x109d   : > { %v6457_v21 = vpop.permute.xlu1 %6456  ;;  %v6523_v28 = vpop.permute.xlu0 %6522 }
0x109e   : > { %v6566_v25 = vrot.slane %v6457_v21, %v14724_v18 }
0x10a1   : > { %v6466_v41 = vpop.permute.xlu1 %6465 }
0x10a2   : > { %v6580_v53 = vrot.slane %v6466_v41, %v14722_v17 }
0x10a5   : > { %v6472_v2 = vpop.permute.xlu1 %6471 }
0x10a6   : > { %v6590_v51 = vrot.slane %v6472_v2, %v14711_v8  ;;  %v6576_v2 = vsel %vm2176_vm1, %v6575_v52, %v6571_v36 }
0x10a9   : > { %v6475_v42 = vpop.permute.xlu1 %6474 }
0x10aa   : > { %v6594_v60 = vrot.slane %v6475_v42, %v14720_v16 }
0x10ac   : > { %v6595_v39 = vsel %vm2176_vm1, %v6594_v60, %v6590_v51  ;;  %v6656_v60 = vrot.slane %v6514_v62, %v14722_v17 }
0x10ad   : > { %v6469_v24 = vpop.permute.xlu1 %6468  ;;  %v6600_v61 = vsel %vm2183_vm2, %v6599_v3, %v6595_v39 }
0x10ae   : > { %v6585_v42 = vrot.slane %v6469_v24, %v14724_v18  ;;  %v6581_v24 = vsel %vm2183_vm2, %v6580_v53, %v6576_v2 }
0x10b1   : > { %v6484_v43 = vpop.permute.xlu1 %6483 }
0x10b2   : > { %v6609_v29 = vrot.slane %v6484_v43, %v14711_v8 }
0x10b4   : > { %v6614_v31 = vsel %vm2176_vm1, %v6613_v40, %v6609_v29  ;;  %v6670_v40 = vrot.slane %v6523_v28, %v14720_v16 }
0x10b5   : > { %v6481_v10 = vpop.permute.xlu1 %6480 }
0x10b6   : > { %v6604_v41 = vrot.slane %v6481_v10, %v14724_v18  ;;  %v6586_v10 = vsel %vm2190_vm3, %v6585_v42, %v6581_v24 }
0x10b8   : > { %v6605_v52 = vsel %vm2190_vm3, %v6604_v41, %v6600_v61 }
0x10b9   : > { %v6496_v44 = vpop.permute.xlu1 %6495 }
0x10ba   : > { %v6628_v54 = vrot.slane %v6496_v44, %v14711_v8  ;;  %v6567_v44 = vsel %vm2190_vm3, %v6566_v25, %v6562_v45 }
0x10bb   : > { %v6682_v25 = vsel %vm2325_vm4, %v6567_v44, %v6548_v0 }
0x10bc   : > { %v6683_v3 = vsel %vm2327_vm5, %v6586_v10, %v6682_v25 }
0x10bd   : > { %v6493_v9 = vpop.permute.xlu1 %6492 }
0x10be   : > { %v6623_v35 = vrot.slane %v6493_v9, %v14724_v18  ;;  %v6526_v9 = vpop.permute.xlu0 %6525 }
0x10c1   : > { %v6508_v38 = vpop.permute.xlu1 %6507 }
0x10c2   : > { %v6647_v48 = vrot.slane %v6508_v38, %v14711_v8  ;;  %v6633_v38 = vsel %vm2176_vm1, %v6632_v30, %v6628_v54  ;;  %v6619_v30 = vsel %vm2183_vm2, %v6618_v23, %v6614_v31  ;;  %v6675_v54 = vrot.slane %v6526_v9, %v14722_v17 }
0x10c3   : > { %v6624_v62 = vsel %vm2190_vm3, %v6623_v35, %v6619_v30  ;;  %v6638_v29 = vsel %vm2183_vm2, %v6637_v20, %v6633_v38  ;;  %v6684_v23 = vsel %vm2329_vm6, %v6605_v52, %v6683_v3 }
0x10c4   : > { %v6652_v27 = vsel %vm2176_vm1, %v6651_v55, %v6647_v48  ;;  %v6685_v0 = vsel %vm2331_vm7, %v6624_v62, %v6684_v23 }
0x10c5   : > { %v6505_v57 = vpop.permute.xlu1 %6504  ;;  %v6657_v28 = vsel %vm2183_vm2, %v6656_v60, %v6652_v27 }
0x10c6   : > { %v6642_v43 = vrot.slane %v6505_v57, %v14724_v18 }
0x10c8   : > { %v6643_v53 = vsel %vm2190_vm3, %v6642_v43, %v6638_v29 }
0x10c9   : > { %v6520_v21 = vpop.permute.xlu1 %6519 }
0x10ca   : > { %v6666_v11 = vrot.slane %v6520_v21, %v14711_v8  ;;  %v6686_v21 = vsel %vm2333_vm8, %v6643_v53, %v6685_v0 }
0x10cc   : > { %v6671_v51 = vsel %vm2176_vm1, %v6670_v40, %v6666_v11 }
0x10cd   : > { %v6517_v63 = vpop.permute.xlu1 %6516  ;;  %v6676_v20 = vsel %vm2183_vm2, %v6675_v54, %v6671_v51 }
0x10ce   : > { %v6661_v57 = vrot.slane %v6517_v63, %v14724_v18 }
0x10d0   : > { %v6662_v36 = vsel %vm2190_vm3, %v6661_v57, %v6657_v28 }
0x10d1   : > { %v6529_v42 = vpop.permute.xlu1 %6528  ;;  %v6687_v55 = vsel %vm2335_vm9, %v6662_v36, %v6686_v21 }
0x10d2   : > { %v6680_v48 = vrot.slane %v6529_v42, %v14724_v18 }
0x10d4   : > { %v6681_v45 = vsel %vm2190_vm3, %v6680_v48, %v6676_v20 }
0x10d5   : > { %v6688_v39 = vsel %vm2337_vm10, %v6681_v45, %v6687_v55  ;;  %v17103_v2 = vpop.permute.xlu1 %6775 }
0x10d6   : > { %v6690_v41 = vsel %vm2339_vm11, %v6688_v39, 0.0 }
0x10d7   : > { %6691 = vadd.xlane.f32.xlu0 %v6690_v41 }
0x10d9   : > { %v17105_v44 = vpop.permute.xlu1 %6779 }
0x10dd   : > { %v17107_v31 = vpop.permute.xlu1 %6783 }
0x10e1   : > { %v17109_v43 = vpop.permute.xlu1 %6787 }
0x10e5   : > { %v17111_v11 = vpop.permute.xlu1 %6831 }
0x10e9   : > { %v17115_v10 = vpop.permute.xlu1 %6835 }
0x10ed   : > { %v17129_v62 = vpop.permute.xlu1 %6839 }
0x10f1   : > { %v17158_v36 = vpop.permute.xlu1 %6843 }
0x1164   : > { %v6692_v35 = vpop.xlane.xlu0 %6691 }
0x1165   : > { %v6693_v24 = vmul.f32 0.03125, %v6692_v35 }
0x1167   : > { %v6694_v38 = vadd.f32 1e-05, %v6693_v24 }
0x1169   : > { %13600 = vrsqrt.f32 %v6694_v38 }
0x1173   : > { %v17113_v60 = vpop.eup %13600 }
0x1174   : > { %v6700_v61 = vrot.slane %v17113_v60, %v14703_v4  ;;  %v6708_v27 = vrot.slane %v17113_v60, %v14707_v6  ;;  %v6704_v63 = vrot.slane %v17113_v60, %v14705_v5  ;;  %v17135_v53 = vrot.slane %v17113_v60, %v14709_v7 }
0x1175   : > { %v17166_v42 = vrot.slane %v17113_v60, %v14713_v12  ;;  %v6720_v38 = vrot.slane %v17113_v60, %v14715_v13 }
0x1176   : > { %v6737_v40 = vmul.f32 %v6700_v61, %v16855_v33  ;;  %v6738_v9 = vmul.f32 %v6700_v61, %v16870_v19  ;;  %v6746_v52 = vmul.f32 %v6708_v27, %v16944_v14  ;;  %v6741_v30 = vmul.f32 %v6704_v63, %v16881_v47 }
0x1177   : > { %v6742_v29 = vmul.f32 %v6704_v63, %v16895_v34  ;;  %v6744_v3 = vmul.f32 %v6704_v63, %v16954_v26  ;;  %v6739_v34 = vmul.f32 %v6700_v61, %v16906_v32  ;;  %v6749_v26 = vmul.f32 %v17135_v53, %v16972_v37 }
0x1178   : > { %v6793_v57 = vmul.f32 %v17103_v2, %v6737_v40  ;;  %v6794_v25 = vmul.f32 %v17105_v44, %v6738_v9  ;;  %v6802_v47 = vmul.f32 %v17105_v44, %v6746_v52  ;;  %v6797_v14 = vmul.f32 %v17103_v2, %v6741_v30 }
0x1179   : > { %v6798_v54 = vmul.f32 %v17105_v44, %v6742_v29  ;;  %v6800_v23 = vmul.f32 %v17109_v43, %v6744_v3  ;;  %v6795_v32 = vmul.f32 %v17107_v31, %v6739_v34  ;;  %v6805_v37 = vmul.f32 %v17103_v2, %v6749_v26  ;;  %v19709_v26 = vld [vmem:[#allocation44_spill] sm:$0xff] }
0x117a   : > { %v17138_v33 = vadd.f32 %v17111_v11, %v6793_v57  ;;  %v17141_v19 = vadd.f32 %v17115_v10, %v6794_v25  ;;  %v17151_v51 = vadd.f32 %v17115_v10, %v6802_v47  ;;  %v17154_v28 = vadd.f32 %v17111_v11, %v6797_v14  ;;  %v19706_v47 = vld [vmem:[#allocation61_spill] sm:$0xff] }
0x117b   : > { %v17169_v0 = vadd.f32 %v17115_v10, %v6798_v54  ;;  %v17172_v48 = vadd.f32 %v17158_v36, %v6800_v23  ;;  %v6743_v20 = vmul.f32 %v6704_v63, %v16921_v50  ;;  %v6748_v21 = vmul.f32 %v6708_v27, %v16983_v15 }
0x117c   : > { %6960 = vperm.xlu0 %13579, %v17138_v33   ;;  %6963 = vperm.xlu1 %13578, %v17141_v19   ;;  %v17179_v45 = vadd.f32 %v17129_v62, %v6795_v32  ;;  %v17182_v55 = vadd.f32 %v17111_v11, %v6805_v37  ;;  %v6745_v35 = vmul.f32 %v6708_v27, %v16932_v46 }
0x117d   : > { %v6799_v39 = vmul.f32 %v17107_v31, %v6743_v20  ;;  %v6804_v41 = vmul.f32 %v17109_v43, %v6748_v21  ;;  %v6753_v50 = vmul.f32 %v17166_v42, %v16989_v56  ;;  %v6752_v15 = vmul.f32 %v17135_v53, %v16995_v49  ;;  %v19710_v20 = vld [vmem:[#allocation59_spill] sm:$0xff] }
0x117e   : > { %v6740_v24 = vmul.f32 %v6700_v61, %v16852_v22  ;;  %v6801_v56 = vmul.f32 %v17103_v2, %v6745_v35  ;;  %v6757_v22 = vmul.f32 %v6720_v38, %v17001_v58  ;;  %v6747_v30 = vmul.f32 %v6708_v27, %v16964_v1  ;;  %v19707_v27 = vld [vmem:[#allocation42_spill] sm:$0xff]  ;;  %v19712_v35 = vld [vmem:[#allocation57_spill] sm:$0xff] }
0x117f   : > { %v17197_v63 = vadd.f32 %v17129_v62, %v6799_v39  ;;  %v17200_v46 = vadd.f32 %v17158_v36, %v6804_v41  ;;  %v6809_v40 = vmul.f32 %v17103_v2, %v6753_v50  ;;  %v6808_v49 = vmul.f32 %v17109_v43, %v6752_v15  ;;  %v19711_v39 = vld [vmem:[#allocation43_spill] sm:$0xff]  ;;  %v19713_v15 = vld [vmem:[#allocation41_spill] sm:$0xff] }
0x1180   : > { %6987 = vperm.xlu0 %13579, %v17151_v51   ;;  %6972 = vperm.xlu1 %13578, %v17154_v28   ;;  %v17209_v61 = vadd.f32 %v17111_v11, %v6801_v56  ;;  %v6796_v52 = vmul.f32 %v17109_v43, %v6740_v24  ;;  %v6813_v25 = vmul.f32 %v17103_v2, %v6757_v22 }
0x1181   : > { %v17212_v9 = vadd.f32 %v17111_v11, %v6809_v40  ;;  %v17219_v57 = vadd.f32 %v17158_v36, %v6808_v49  ;;  %v6724_v58 = vrot.slane %v17113_v60, %v19602_v59  ;;  %v6803_v3 = vmul.f32 %v17107_v31, %v6747_v30 }
0x1182   : > { %v17225_v29 = vadd.f32 %v17158_v36, %v6796_v52  ;;  %v6756_v1 = vmul.f32 %v17166_v42, %v19706_v47  ;;  %v6750_v14 = vmul.f32 %v17135_v53, %v19707_v27  ;;  %v17235_v34 = vadd.f32 %v17111_v11, %v6813_v25  ;;  %v19715_v52 = vld [vmem:[#allocation64_spill] sm:$0xff]  ;;  %v19718_v47 = vld [vmem:[#allocation54_spill] sm:$0xff] }
0x1183   : > { %19704 = vst [vmem:[#allocation45_spill] sm:$0xff] %v17212_v9  ;;  %19705 = vst [vmem:[#allocation53_spill] sm:$0xff] %v17219_v57  ;;  %v6761_v54 = vmul.f32 %v6724_v58, %v19709_v26  ;;  %v17239_v23 = vadd.f32 %v17129_v62, %v6803_v3  ;;  %v6751_v21 = vmul.f32 %v17135_v53, %v19710_v20  ;;  %v19722_v20 = vld [vmem:[#allocation60_spill] sm:$0xff] }
0x1184   : > { %6975 = vperm.xlu1 %13578, %v17169_v0   ;;  %6981 = vperm.xlu0 %13579, %v17172_v48   ;;  %19708 = vst [vmem:[#allocation46_spill] sm:$0xff] %v17235_v34  ;;  %v6812_v32 = vmul.f32 %v17109_v43, %v6756_v1  ;;  %v6806_v37 = vmul.f32 %v17105_v44, %v6750_v14 }
0x1185   : > { %v6760_v41 = vmul.f32 %v6720_v38, %v19711_v39  ;;  %v6754_v50 = vmul.f32 %v17166_v42, %v19712_v35  ;;  %v6728_v24 = vrot.slane %v17113_v60, %v19713_v15  ;;  %v6817_v53 = vmul.f32 %v17103_v2, %v6761_v54  ;;  %v19724_v39 = vld [vmem:[#allocation51_spill] sm:$0xff] }
0x1186   : > { %v17253_v56 = vadd.f32 %v17158_v36, %v6812_v32  ;;  %v17256_v40 = vadd.f32 %v17115_v10, %v6806_v37  ;;  %v6807_v49 = vmul.f32 %v17107_v31, %v6751_v21  ;;  %v6755_v1 = vmul.f32 %v17166_v42, %v19718_v47  ;;  %v19721_v32 = vld [vmem:[#allocation63_spill] sm:$0xff] }
0x1187   : > { %v6816_v22 = vmul.f32 %v17109_v43, %v6760_v41  ;;  %v6765_v30 = vmul.f32 %v6728_v24, %v19715_v52  ;;  %v17265_v60 = vadd.f32 %v17111_v11, %v6817_v53  ;;  %v6810_v3 = vmul.f32 %v17105_v44, %v6754_v50  ;;  %v19726_v53 = vld [vmem:[#allocation55_spill] sm:$0xff] }
0x1188   : > { %6966 = vperm.xlu1 %13578, %v17179_v45   ;;  %6996 = vperm.xlu0 %13579, %v17182_v55   ;;  %19714 = vst [vmem:[#allocation40_spill] sm:$0xff] %v17253_v56  ;;  %v17268_v25 = vadd.f32 %v17129_v62, %v6807_v49  ;;  %v6811_v54 = vmul.f32 %v17107_v31, %v6755_v1 }
0x1189   : > { %19716 = vst [vmem:[#allocation47_spill] sm:$0xff] %v17265_v60  ;;  %v17276_v27 = vadd.f32 %v17158_v36, %v6816_v22  ;;  %v6821_v14 = vmul.f32 %v17103_v2, %v6765_v30  ;;  %v17280_v26 = vadd.f32 %v17115_v10, %v6810_v3  ;;  %v6764_v37 = vmul.f32 %v6724_v58, %v19721_v32  ;;  %v19727_v22 = vld [vmem:[#allocation48_spill] sm:$0xff] }
0x118a   : > { %19717 = vst [vmem:[#allocation50_spill] sm:$0xff] %v17268_v25  ;;  %v6758_v21 = vmul.f32 %v6720_v38, %v19722_v20  ;;  %v6768_v41 = vmul.f32 %v6728_v24, %v19724_v39  ;;  %v17292_v2 = vadd.f32 %v17129_v62, %v6811_v54  ;;  %v6759_v49 = vmul.f32 %v6720_v38, %v19726_v53  ;;  %v19732_v54 = vld [vmem:[#allocation56_spill] sm:$0xff]  ;;  %v19734_v20 = vld [vmem:[#allocation62_spill] sm:$0xff] }
0x118b   : > { %19719 = vst [vmem:[#allocation49_spill] sm:$0xff] %v17276_v27  ;;  %19720 = vst [vmem:[#allocation52_spill] sm:$0xff] %v17280_v26  ;;  %v17288_v42 = vadd.f32 %v17111_v11, %v6821_v14  ;;  %v6820_v35 = vmul.f32 %v17109_v43, %v6764_v37  ;;  %v6762_v52 = vmul.f32 %v6724_v58, %v19727_v22  ;;  %v19739_v22 = vmov 0.0|0.0  }
0x118c   : > { %6978 = vperm.xlu1 %13578, %v17197_v63   ;;  %6993 = vperm.xlu0 %13579, %v17200_v46   ;;  %19725 = vst [vmem:[#allocation42_spill] sm:$0xff] %v17292_v2  ;;  %v6814_v50 = vmul.f32 %v17105_v44, %v6758_v21  ;;  %v6824_v3 = vmul.f32 %v17109_v43, %v6768_v41  ;;  %v19736_v41 = vld [vmem:[#allocation58_spill] sm:$0xff] }
0x118d   : > { %19723 = vst [vmem:[#allocation61_spill] sm:$0xff] %v17288_v42  ;;  %v17301_v11 = vadd.f32 %v17158_v36, %v6820_v35  ;;  %v6815_v47 = vmul.f32 %v17107_v31, %v6759_v49  ;;  %v6818_v14 = vmul.f32 %v17105_v44, %v6762_v52  ;;  %v6763_v32 = vmul.f32 %v6724_v58, %v19732_v54  ;;  %v12436_v49 = vld [vmem:[%s19529_s27 + $0x80] sm:$0xff]  ;;  %v12438_v52 = vld [vmem:[%s19529_s27 + $0x90] sm:$0xff]  ;;  %v12447_v54 = vld [vmem:[%s19529_s27 + $0xd8] sm:$0xff] }
0x118e   : > { %v17304_v30 = vadd.f32 %v17115_v10, %v6814_v50  ;;  %v17311_v38 = vadd.f32 %v17158_v36, %v6824_v3  ;;  %v6766_v21 = vmul.f32 %v6728_v24, %v19734_v20  ;;  %v6767_v58 = vmul.f32 %v6728_v24, %v19736_v41  ;;  %v12439_v3 = vld [vmem:[%s19529_s27 + $0x98] sm:$0xff] }
0x118f   : > { %19728 = vst [vmem:[#allocation44_spill] sm:$0xff] %v17301_v11  ;;  %v17314_v1 = vadd.f32 %v17129_v62, %v6815_v47  ;;  %v17321_v43 = vadd.f32 %v17115_v10, %v6818_v14  ;;  %v6819_v37 = vmul.f32 %v17107_v31, %v6763_v32  ;;  %v12446_v47 = vld [vmem:[%s19529_s27 + $0xd0] sm:$0xff]  ;;  %v13299_v14 = vpack.c.bf16 %v12439_v3, %v12438_v52 }
0x1190   : > { %6984 = vperm.xlu1 %13578, %v17209_v61   ;;  %7008 = vperm.xlu0 %13579, %v17212_v9   ;;  %19729 = vst [vmem:[#allocation59_spill] sm:$0xff] %v17304_v30  ;;  %19730 = vst [vmem:[#allocation43_spill] sm:$0xff] %v17311_v38  ;;  %v6822_v39 = vmul.f32 %v17105_v44, %v6766_v21  ;;  %v6823_v50 = vmul.f32 %v17107_v31, %v6767_v58  ;;  %v12437_v44 = vld [vmem:[%s19529_s27 + $0x88] sm:$0xff] }
0x1191   : > { %19731 = vst [vmem:[#allocation57_spill] sm:$0xff] %v17314_v1  ;;  %19733 = vst [vmem:[#allocation64_spill] sm:$0xff] %v17321_v43  ;;  %v17327_v36 = vadd.f32 %v17129_v62, %v6819_v37  ;;  %v13296_v24 = vpack.c.bf16 %v12437_v44, %v12436_v49  ;;  %v12445_v31 = vld [vmem:[%s19529_s27 + $0xc8] sm:$0xff]  ;;  %v13311_v32 = vpack.c.bf16 %v12447_v54, %v12446_v47 }
0x1192   : > { %v17333_v35 = vadd.f32 %v17115_v10, %v6822_v39  ;;  %v17338_v53 = vadd.f32 %v17129_v62, %v6823_v50  ;;  %v12444_v10 = vld [vmem:[%s19529_s27 + $0xc0] sm:$0xff] }
0x1193   : > { %19735 = vst [vmem:[#allocation54_spill] sm:$0xff] %v17327_v36  ;;  %v13308_v62 = vpack.c.bf16 %v12445_v31, %v12444_v10  ;;  %13297 = vmatpush3.bf16.msra.mxu0 %v13296_v24 }
0x1194   : > { %7005 = vperm.xlu0 %13579, %v17219_v57   ;;  %6969 = vperm.xlu1 %13578, %v17225_v29   ;;  %19737 = vst [vmem:[#allocation63_spill] sm:$0xff] %v17333_v35  ;;  %19738 = vst [vmem:[#allocation60_spill] sm:$0xff] %v17338_v53 }
0x1195   : > { %13309 = vmatpush3.bf16.msra.mxu1 %v13308_v62  ;;  %13298 = vmatprep.subr.bf16.mxu0 %v19739_v22 }
0x1196   : > { %13310 = vmatprep.subr.bf16.mxu1 %v19739_v22 }
0x1197   : > { %13300 = vmatpush3.bf16.msra.mxu0 %v13299_v14 }
0x1198   : > { %7020 = vperm.xlu0 %13579, %v17235_v34   ;;  %6990 = vperm.xlu1 %13578, %v17239_v23  }
0x1199   : > { %13312 = vmatpush3.bf16.msra.mxu1 %v13311_v32  ;;  %13301 = vmatprep.subr.bf16.mxu0 %v19739_v22 }
0x119a   : > { %13319 = vmatprep.subr.bf16.mxu1 %v19739_v22 }
0x119c   : > { %7017 = vperm.xlu0 %13579, %v17253_v56   ;;  %6999 = vperm.xlu1 %13578, %v17256_v40  }
0x11a0   : > { %7032 = vperm.xlu0 %13579, %v17265_v60   ;;  %7002 = vperm.xlu1 %13578, %v17268_v25  }
0x11a4   : > { %7029 = vperm.xlu0 %13579, %v17276_v27   ;;  %7011 = vperm.xlu1 %13578, %v17280_v26  }
0x11a8   : > { %7044 = vperm.xlu0 %13579, %v17288_v42   ;;  %7014 = vperm.xlu1 %13578, %v17292_v2  }
0x11ac   : > { %7041 = vperm.xlu0 %13579, %v17301_v11   ;;  %7023 = vperm.xlu1 %13578, %v17304_v30  }
0x11b0   : > { %7053 = vperm.xlu0 %13579, %v17311_v38   ;;  %7026 = vperm.xlu1 %13578, %v17314_v1  }
0x11b4   : > { %7035 = vperm.xlu1 %13578, %v17321_v43  }
0x11b8   : > { %7038 = vperm.xlu1 %13578, %v17327_v36  }
0x11bc   : > { %7047 = vperm.xlu1 %13578, %v17333_v35  }
0x11c0   : > { %7050 = vperm.xlu1 %13578, %v17338_v53  }
0x11fb   : > { %v6961_v37 = vpop.permute.xlu0 %6960  ;;  %v6964_v20 = vpop.permute.xlu1 %6963 }
0x11fc   : > { %v7058_v43 = vrot.slane %v6961_v37, %v14711_v8  ;;  %v7062_v27 = vrot.slane %v6964_v20, %v14720_v16 }
0x11fe   : > { %v7063_v26 = vsel %vm2176_vm1, %v7062_v27, %v7058_v43 }
0x11ff   : > { %v6988_v21 = vpop.permute.xlu0 %6987  ;;  %v6973_v39 = vpop.permute.xlu1 %6972 }
0x1200   : > { %v7077_v56 = vrot.slane %v6973_v39, %v14711_v8  ;;  %v7100_v57 = vrot.slane %v6988_v21, %v14720_v16 }
0x1203   : > { %v6982_v41 = vpop.permute.xlu0 %6981  ;;  %v6976_v58 = vpop.permute.xlu1 %6975 }
0x1204   : > { %v7081_v1 = vrot.slane %v6976_v58, %v14720_v16  ;;  %v7091_v25 = vrot.slane %v6982_v41, %v14724_v18 }
0x1206   : > { %v7082_v20 = vsel %vm2176_vm1, %v7081_v1, %v7077_v56 }
0x1207   : > { %v6997_v50 = vpop.permute.xlu0 %6996  ;;  %v6967_v49 = vpop.permute.xlu1 %6966 }
0x1208   : > { %v7067_v60 = vrot.slane %v6967_v49, %v14722_v17  ;;  %v7115_v58 = vrot.slane %v6997_v50, %v14711_v8 }
0x120a   : > { %v7068_v39 = vsel %vm2183_vm2, %v7067_v60, %v7063_v26 }
0x120b   : > { %v6994_v44 = vpop.permute.xlu0 %6993  ;;  %v6979_v10 = vpop.permute.xlu1 %6978 }
0x120c   : > { %v7086_v2 = vrot.slane %v6979_v10, %v14722_v17  ;;  %v7110_v10 = vrot.slane %v6994_v44, %v14724_v18 }
0x120e   : > { %v7087_v21 = vsel %vm2183_vm2, %v7086_v2, %v7082_v20 }
0x120f   : > { %v7009_v24 = vpop.permute.xlu0 %7008  ;;  %v6985_v31 = vpop.permute.xlu1 %6984 }
0x1210   : > { %v7096_v37 = vrot.slane %v6985_v31, %v14711_v8  ;;  %v7134_v31 = vrot.slane %v7009_v24, %v14711_v8 }
0x1213   : > { %v6970_v62 = vpop.permute.xlu1 %6969  ;;  %v7006_v52 = vpop.permute.xlu0 %7005 }
0x1214   : > { %v7072_v41 = vrot.slane %v6970_v62, %v14724_v18 }
0x1217   : > { %v6991_v3 = vpop.permute.xlu1 %6990  ;;  %v7021_v47 = vpop.permute.xlu0 %7020 }
0x1218   : > { %v7105_v49 = vrot.slane %v6991_v3, %v14722_v17  ;;  %v7101_v3 = vsel %vm2176_vm1, %v7100_v57, %v7096_v37 }
0x121a   : > { %v7106_v2 = vsel %vm2183_vm2, %v7105_v49, %v7101_v3  ;;  %v12461_v3 = vld [vmem:[%s19531_s24 + $0x88] sm:$0xff] }
0x121b   : > { %v7000_v14 = vpop.permute.xlu1 %6999  ;;  %v7018_v32 = vpop.permute.xlu0 %7017 }
0x121c   : > { %v7119_v9 = vrot.slane %v7000_v14, %v14720_v16  ;;  %v7148_v20 = vrot.slane %v7018_v32, %v14724_v18  ;;  %v12440_v32 = vld [vmem:[%s19529_s27 + $0xa0] sm:$0xff] }
0x121e   : > { %v7120_v62 = vsel %vm2176_vm1, %v7119_v9, %v7115_v58  ;;  %v7111_v9 = vsel %vm2190_vm3, %v7110_v10, %v7106_v2 }
0x121f   : > { %v7003_v54 = vpop.permute.xlu1 %7002  ;;  %v7033_v38 = vpop.permute.xlu0 %7032 }
0x1220   : > { %v7124_v27 = vrot.slane %v7003_v54, %v14722_v17  ;;  %v7172_v14 = vrot.slane %v7033_v38, %v14711_v8 }
0x1222   : > { %v7125_v24 = vsel %vm2183_vm2, %v7124_v27, %v7120_v62 }
0x1223   : > { %v7012_v53 = vpop.permute.xlu1 %7011  ;;  %v7030_v36 = vpop.permute.xlu0 %7029 }
0x1224   : > { %v7138_v43 = vrot.slane %v7012_v53, %v14720_v16  ;;  %v7153_v53 = vrot.slane %v7021_v47, %v14711_v8  ;;  %v7167_v49 = vrot.slane %v7030_v36, %v14724_v18 }
0x1226   : > { %v7139_v57 = vsel %vm2176_vm1, %v7138_v43, %v7134_v31  ;;  %v12460_v31 = vld [vmem:[%s19531_s24 + $0x80] sm:$0xff] }
0x1227   : > { %v7015_v35 = vpop.permute.xlu1 %7014  ;;  %v17373_v30 = vpop.permute.xlu0 %7044 }
0x1228   : > { %v7143_v56 = vrot.slane %v7015_v35, %v14722_v17  ;;  %v7191_v36 = vrot.slane %v17373_v30, %v14711_v8 }
0x122a   : > { %v7144_v47 = vsel %vm2183_vm2, %v7143_v56, %v7139_v57 }
0x122b   : > { %v7024_v11 = vpop.permute.xlu1 %7023  ;;  %v7042_v60 = vpop.permute.xlu0 %7041  ;;  %v7149_v43 = vsel %vm2190_vm3, %v7148_v20, %v7144_v47  ;;  %v12462_v47 = vld [vmem:[%s19531_s24 + $0x90] sm:$0xff] }
0x122c   : > { %v7157_v1 = vrot.slane %v7024_v11, %v14720_v16  ;;  %v7092_v11 = vsel %vm2190_vm3, %v7091_v25, %v7087_v21  ;;  %v7186_v10 = vrot.slane %v7042_v60, %v14724_v18 }
0x122e   : > { %v7158_v54 = vsel %vm2176_vm1, %v7157_v1, %v7153_v53 }
0x122f   : > { %v7027_v42 = vpop.permute.xlu1 %7026  ;;  %v7054_v21 = vpop.permute.xlu0 %7053 }
0x1230   : > { %v7162_v26 = vrot.slane %v7027_v42, %v14722_v17  ;;  %v7129_v42 = vrot.slane %v7006_v52, %v14724_v18  ;;  %v7205_v53 = vrot.slane %v7054_v21, %v14724_v18  ;;  %v12470_v21 = vld [vmem:[%s19531_s24 + $0xd0] sm:$0xff] }
0x1232   : > { %v7163_v25 = vsel %vm2183_vm2, %v7162_v26, %v7158_v54  ;;  %v7130_v58 = vsel %vm2190_vm3, %v7129_v42, %v7125_v24  ;;  %v12442_v24 = vld [vmem:[%s19529_s27 + $0xb0] sm:$0xff]  ;;  %v12463_v54 = vld [vmem:[%s19531_s24 + $0x98] sm:$0xff] }
0x1233   : > { %v7036_v34 = vpop.permute.xlu1 %7035  ;;  %v7168_v56 = vsel %vm2190_vm3, %v7167_v49, %v7163_v25  ;;  %v13323_v20 = vpack.c.bf16 %v12463_v54, %v12462_v47  ;;  %v12448_v25 = vld [vmem:[%s19529_s27 + $0xe0] sm:$0xff]  ;;  %v12469_v49 = vld [vmem:[%s19531_s24 + $0xc8] sm:$0xff]  ;;  %v12475_v47 = vld [vmem:[%s19531_s24 + $0xf8] sm:$0xff] }
0x1234   : > { %v7176_v44 = vrot.slane %v7036_v34, %v14720_v16  ;;  %v7073_v34 = vsel %vm2190_vm3, %v7072_v41, %v7068_v39  ;;  %v12494_v54 = vld [vmem:[%s19534_s2 + $0xd0] sm:$0xff] }
0x1235   : > { %v7207_v27 = vsel %vm2325_vm4, %v7092_v11, %v7073_v34  ;;  %v12443_v34 = vld [vmem:[%s19529_s27 + $0xb8] sm:$0xff] }
0x1236   : > { %v7177_v38 = vsel %vm2176_vm1, %v7176_v44, %v7172_v14  ;;  %v7208_v41 = vsel %vm2327_vm5, %v7111_v9, %v7207_v27  ;;  %v13320_v14 = vpack.c.bf16 %v12461_v3, %v12460_v31  ;;  %v13305_v9 = vpack.c.bf16 %v12443_v34, %v12442_v24  ;;  %v12485_v31 = vld [vmem:[%s19534_s2 + $0x88] sm:$0xff]  ;;  %v12474_v34 = vld [vmem:[%s19531_s24 + $0xf0] sm:$0xff] }
0x1237   : > { %v7039_v50 = vpop.permute.xlu1 %7038  ;;  %v7209_v60 = vsel %vm2329_vm6, %v7130_v58, %v7208_v41  ;;  %v12468_v58 = vld [vmem:[%s19531_s24 + $0xc0] sm:$0xff]  ;;  %v12493_v24 = vld [vmem:[%s19534_s2 + $0xc8] sm:$0xff] }
0x1238   : > { %v7181_v35 = vrot.slane %v7039_v50, %v14722_v17  ;;  %v12441_v50 = vld [vmem:[%s19529_s27 + $0xa8] sm:$0xff]  ;;  %v7210_v44 = vsel %vm2331_vm7, %v7149_v43, %v7209_v60  ;;  %v13332_v27 = vpack.c.bf16 %v12469_v49, %v12468_v58  ;;  %v12450_v43 = vld [vmem:[%s19529_s27 + $0xf0] sm:$0xff] }
0x1239   : > { %v7211_v62 = vsel %vm2333_vm8, %v7168_v56, %v7210_v44  ;;  %v13302_v11 = vpack.c.bf16 %v12441_v50, %v12440_v32  ;;  %v12471_v32 = vld [vmem:[%s19531_s24 + $0xd8] sm:$0xff]  ;;  %v12464_v56 = vld [vmem:[%s19531_s24 + $0xa0] sm:$0xff]  ;;  %v12486_v44 = vld [vmem:[%s19534_s2 + $0x90] sm:$0xff] }
0x123a   : > { %v7182_v52 = vsel %vm2183_vm2, %v7181_v35, %v7177_v38  ;;  %v12449_v38 = vld [vmem:[%s19529_s27 + $0xe8] sm:$0xff]  ;;  %v12484_v50 = vld [vmem:[%s19534_s2 + $0x80] sm:$0xff] }
0x123b   : > { %v7048_v37 = vpop.permute.xlu1 %7047  ;;  %v7187_v26 = vsel %vm2190_vm3, %v7186_v10, %v7182_v52  ;;  %v19740_v52 = vmov 0.0   ;;  %v12451_v10 = vld [vmem:[%s19529_s27 + $0xf8] sm:$0xff]  ;;  %v13344_v60 = vpack.c.bf16 %v12485_v31, %v12484_v50  ;;  %v12489_v58 = vld [vmem:[%s19534_s2 + $0xa8] sm:$0xff] }
0x123c   : > { %v7195_v39 = vrot.slane %v7048_v37, %v14720_v16  ;;  %v7212_v57 = vsel %vm2335_vm9, %v7187_v26, %v7211_v62  ;;  %v13317_v41 = vpack.c.bf16 %v12451_v10, %v12450_v43  ;;  %v12466_v26 = vld [vmem:[%s19531_s24 + $0xb0] sm:$0xff]  ;;  %v12496_v10 = vld [vmem:[%s19534_s2 + $0xe0] sm:$0xff] }
0x123e   : > { %v7196_v2 = vsel %vm2176_vm1, %v7195_v39, %v7191_v36  ;;  %v13314_v39 = vpack.c.bf16 %v12449_v38, %v12448_v25  ;;  %v13335_v36 = vpack.c.bf16 %v12471_v32, %v12470_v21  ;;  %v12488_v38 = vld [vmem:[%s19534_s2 + $0xa0] sm:$0xff]  ;;  %v12497_v21 = vld [vmem:[%s19534_s2 + $0xe8] sm:$0xff] }
0x123f   : > { %v7051_v1 = vpop.permute.xlu1 %7050  ;;  %v13350_v49 = vpack.c.bf16 %v12489_v58, %v12488_v38  ;;  %v13362_v32 = vpack.c.bf16 %v12497_v21, %v12496_v10  ;;  %v12453_v38 = vld [vmem:[#allocation8 + $0x5] ss:$0 sm:$0xff]  ;;  %v12479_v10 = vld [vmem:[#allocation9 + $0x7] ss:$0 sm:$0xff] }
0x1240   : > { %v7200_v30 = vrot.slane %v7051_v1, %v14722_v17  ;;  %v12465_v1 = vld [vmem:[%s19531_s24 + $0xa8] sm:$0xff] }
0x1241   : > { %v13326_v3 = vpack.c.bf16 %v12465_v1, %v12464_v56 }
0x1242   : > { %v7201_v35 = vsel %vm2183_vm2, %v7200_v30, %v7196_v2  ;;  %v12467_v30 = vld [vmem:[%s19531_s24 + $0xb8] sm:$0xff] }
0x1243   : > { %v7206_v42 = vsel %vm2190_vm3, %v7205_v53, %v7201_v35  ;;  %v12487_v53 = vld [vmem:[%s19534_s2 + $0x98] sm:$0xff]  ;;  %v13329_v2 = vpack.c.bf16 %v12467_v30, %v12466_v26  ;;  %v12472_v35 = vld [vmem:[%s19531_s24 + $0xe0] sm:$0xff] }
0x1244   : > { %v17459_v37 = vsel %vm2337_vm10, %v7206_v42, %v7212_v57  ;;  %v13347_v62 = vpack.c.bf16 %v12487_v53, %v12486_v44  ;;  %v12452_v44 = vld [vmem:[#allocation8 + $0x4] ss:$0 sm:$0xff] }
0x1245   : > { %12981 = vmatmul.mubr.msk.f32.vlgmr.msra.gmra.mrb[26].mxu0 %vm2339_vm11, %v17459_v37  ;;  %13003 = vmatmul.mubr.msk.f32.vlgmr.msra.gmra.mrb[26].mxu1 %vm2339_vm11, %v17459_v37 }
0x1246   : > { %13303 = vmatpush3.bf16.msra.mxu0 %v13302_v11  ;;  %13321 = vmatpush3.bf16.msra.mxu1 %v13320_v14  ;;  %v12473_v11 = vld [vmem:[%s19531_s24 + $0xe8] sm:$0xff]  ;;  %v12492_v14 = vld [vmem:[%s19534_s2 + $0xc0] sm:$0xff] }
0x1247   : > { %13304 = vmatprep.subr.bf16.mxu0 %v19739_v22  ;;  %13322 = vmatprep.subr.bf16.mxu1 %v19739_v22  ;;  %v13338_v57 = vpack.c.bf16 %v12473_v11, %v12472_v35  ;;  %v13356_v42 = vpack.c.bf16 %v12493_v24, %v12492_v14  ;;  %v12454_v24 = vld [vmem:[#allocation8 + $0x6] ss:$0 sm:$0xff] }
0x1248   : > { %12991 = vmatprep.mubr.msk.f32.mxu0 %vm14140_vm0, %v19740_v52  ;;  %13024 = vmatprep.mubr.msk.f32.mxu1 %vm14140_vm0, %v19740_v52 }
0x124a   : > { %13306 = vmatpush3.bf16.msra.mxu0 %v13305_v9  ;;  %13324 = vmatpush3.bf16.msra.mxu1 %v13323_v20  ;;  %v12495_v9 = vld [vmem:[%s19534_s2 + $0xd8] sm:$0xff]  ;;  %v13341_v20 = vpack.c.bf16 %v12475_v47, %v12474_v34 }
0x124b   : > { %13313 = vmatprep.subr.bf16.mxu0 %v19739_v22  ;;  %13331 = vmatprep.subr.bf16.mxu1 %v19739_v22  ;;  %v13359_v25 = vpack.c.bf16 %v12495_v9, %v12494_v54  ;;  %v12477_v54 = vld [vmem:[#allocation9 + $0x5] ss:$0 sm:$0xff]  ;;  %v12500_v9 = vld [vmem:[#allocation11 + $0x4] ss:$0 sm:$0xff] }
0x124d   : > { %12992 = vmatmul.mubr.msk.f32.vlgmr.msra.gmra.mrb[28].mxu0 %vm2339_vm11, %v17459_v37  ;;  %13025 = vmatmul.mubr.msk.f32.vlgmr.msra.gmra.mrb[28].mxu1 %vm2339_vm11, %v17459_v37 }
0x124e   : > { %13315 = vmatpush3.bf16.msra.mxu0 %v13314_v39  ;;  %13333 = vmatpush3.bf16.msra.mxu1 %v13332_v27  ;;  %v12490_v39 = vld [vmem:[%s19534_s2 + $0xb0] sm:$0xff]  ;;  %v12491_v27 = vld [vmem:[%s19534_s2 + $0xb8] sm:$0xff] }
0x124f   : > { %13316 = vmatprep.subr.bf16.mxu0 %v19739_v22  ;;  %13334 = vmatprep.subr.bf16.mxu1 %v19739_v22  ;;  %v13353_v43 = vpack.c.bf16 %v12491_v27, %v12490_v39 }
0x1250   : > { %13013 = vmatprep.mubr.msk.f32.mxu0 %vm14140_vm0, %v19740_v52  ;;  %13046 = vmatprep.mubr.msk.f32.mxu1 %vm14140_vm0, %v19740_v52 }
0x1252   : > { %13318 = vmatpush3.bf16.msra.mxu0 %v13317_v41  ;;  %13336 = vmatpush3.bf16.msra.mxu1 %v13335_v36  ;;  %v12498_v41 = vld [vmem:[%s19534_s2 + $0xf0] sm:$0xff]  ;;  %v12499_v36 = vld [vmem:[%s19534_s2 + $0xf8] sm:$0xff] }
0x1253   : > { %13325 = vmatprep.subr.bf16.mxu0 %v19739_v22  ;;  %13343 = vmatprep.subr.bf16.mxu1 %v19739_v22  ;;  %v13365_v56 = vpack.c.bf16 %v12499_v36, %v12498_v41  ;;  %v12455_v41 = vld [vmem:[#allocation8 + $0x7] ss:$0 sm:$0xff] }
0x1255   : > { %13014 = vmatmul.mubr.msk.f32.vlgmr.msra.gmra.mrb[30].mxu0 %vm2339_vm11, %v17459_v37  ;;  %13047 = vmatmul.mubr.msk.f32.vlgmr.msra.gmra.mrb[30].mxu1 %vm2339_vm11, %v17459_v37 }
0x1256   : > { %13327 = vmatpush3.bf16.msra.mxu0 %v13326_v3  ;;  %13345 = vmatpush3.bf16.msra.mxu1 %v13344_v60  ;;  %v12476_v60 = vld [vmem:[#allocation9 + $0x4] ss:$0 sm:$0xff] }
0x1257   : > { %13328 = vmatprep.subr.bf16.mxu0 %v19739_v22  ;;  %13346 = vmatprep.subr.bf16.mxu1 %v19739_v22 }
0x1258   : > { %13035 = vmatprep.mubr.msk.f32.mxu0 %vm14140_vm0, %v19740_v52  ;;  %13068 = vmatprep.mubr.msk.f32.mxu1 %vm14140_vm0, %v19740_v52 }
0x125a   : > { %13330 = vmatpush3.bf16.msra.mxu0 %v13329_v2  ;;  %13348 = vmatpush3.bf16.msra.mxu1 %v13347_v62 }
0x125b   : > { %13337 = vmatprep.subr.bf16.mxu0 %v19739_v22  ;;  %13355 = vmatprep.subr.bf16.mxu1 %v19739_v22 }
0x125d   : > { %13036 = vmatmul.mubr.msk.f32.vlgmr.msra.gmra.mrb[32].mxu0 %vm2339_vm11, %v17459_v37  ;;  %13069 = vmatmul.mubr.msk.f32.vlgmr.msra.gmra.mrb[32].mxu1 %vm2339_vm11, %v17459_v37 }
0x125e   : > { %13339 = vmatpush3.bf16.msra.mxu0 %v13338_v57  ;;  %13357 = vmatpush3.bf16.msra.mxu1 %v13356_v42 }
0x125f   : > { %13340 = vmatprep.subr.bf16.mxu0 %v19739_v22  ;;  %13358 = vmatprep.subr.bf16.mxu1 %v19739_v22 }
0x1260   : > { %13057 = vmatprep.mubr.msk.f32.mxu0 %vm14140_vm0, %v19740_v52  ;;  %13090 = vmatprep.mubr.msk.f32.mxu1 %vm14140_vm0, %v19740_v52 }
0x1262   : > { %13342 = vmatpush3.bf16.msra.mxu0 %v13341_v20  ;;  %13360 = vmatpush3.bf16.msra.mxu1 %v13359_v25 }
0x1263   : > { %13349 = vmatprep.subr.bf16.mxu0 %v19739_v22  ;;  %13104 = vmatprep.subr.mxu1 %v19740_v52 }
0x1265   : > { %13058 = vmatmul.mubr.msk.f32.vlgmr.msra.gmra.mrb[34].mxu0 %vm2339_vm11, %v17459_v37  ;;  %13091 = vmatmul.mubr.msk.f32.vlgmr.msra.gmra.mrb[34].mxu1 %vm2339_vm11, %v17459_v37 }
0x1266   : > { %13351 = vmatpush3.bf16.msra.mxu0 %v13350_v49  ;;  %13079 = vmatprep.mubr.msk.f32.mxu0 %vm14140_vm0, %v19740_v52 }
0x1267   : > { %13352 = vmatprep.subr.bf16.mxu0 %v19739_v22  ;;  %13106 = vmatprep.mubr.msk.f32.mxu1 %vm14140_vm0, %v19740_v52 }
0x126a   : > { %13354 = vmatpush3.bf16.msra.mxu0 %v13353_v43 }
0x126b   : > { %13361 = vmatprep.subr.bf16.mxu0 %v19739_v22 }
0x126d   : > { %13080 = vmatmul.mubr.msk.f32.vlgmr.msra.gmra.mrb[36].mxu0 %vm2339_vm11, %v17459_v37 }
0x126e   : > { %13363 = vmatpush3.bf16.msra.mxu0 %v13362_v32  ;;  %13101 = vmatprep.mubr.msk.f32.mxu0 %vm14140_vm0, %v19740_v52 }
0x126f   : > { %13364 = vmatprep.subr.bf16.mxu0 %v19739_v22 }
0x1272   : > { %13366 = vmatpush3.bf16.msra.mxu0 %v13365_v56 }
0x1273   : > { %13114 = vmatprep.subr.mxu0 %v19740_v52 }
0x1275   : > { %13102 = vmatmul.mubr.msk.f32.vlgmr.msra.gmra.mrb[38].mxu0 %vm2339_vm11, %v17459_v37  ;;  %v12478_v37 = vld [vmem:[#allocation9 + $0x6] ss:$0 sm:$0xff] }
0x1276   : > { %13116 = vmatprep.mubr.msk.f32.mxu0 %vm14140_vm0, %v19740_v52 }
0x1318   : > { %v7282_v1 = vpop.f32.mrb[26].mxu0  ;;  %v7422_v50 = vpop.f32.mrb[26].mxu1 }
0x1319   : > { %v12982_v31 = vpop.f32.mrb[27].mxu0  ;;  %v13004_v3 = vpop.f32.mrb[27].mxu1  ;;  %v7283_v35 = vadd.f32 %v12452_v44, %v7282_v1  ;;  %v7423_v47 = vadd.f32 %v12454_v24, %v7422_v50 }
0x131a   : > { %v12501_v31 = vld [vmem:[#allocation11 + $0x5] ss:$0 sm:$0xff] }
0x1320   : > { %v7352_v26 = vpop.f32.mrb[28].mxu0  ;;  %v7608_v30 = vpop.f32.mrb[28].mxu1 }
0x1321   : > { %v7609_v53 = vadd.f32 %v12476_v60, %v7608_v30  ;;  %v12993_v2 = vpop.f32.mrb[29].mxu0  ;;  %v13026_v62 = vpop.f32.mrb[29].mxu1  ;;  %v7353_v43 = vadd.f32 %v12453_v38, %v7352_v26 }
0x1323   : > { %13105 = vmatpush3.xpose.msk.msra.mxu1 %vm3270_vm12, %v7609_v53 }
0x1324   : > { %13109 = vmatprep.subr.mxu1 %v19740_v52 }
0x1326   : > { %13107 = vmatmul.mubr.msk.f32.vlgmr.msra.gmra.mrb[36].mxu1 %vm3270_vm12, %v7283_v35 }
0x1327   : > { %13111 = vmatprep.mubr.msk.f32.mxu1 %vm14140_vm0, %v19740_v52 }
0x1328   : > { %v7492_v11 = vpop.f32.mrb[30].mxu0  ;;  %v7748_v14 = vpop.f32.mrb[30].mxu1 }
0x1329   : > { %v7749_v57 = vadd.f32 %v12478_v37, %v7748_v14  ;;  %v13015_v42 = vpop.f32.mrb[31].mxu0  ;;  %v13048_v34 = vpop.f32.mrb[31].mxu1  ;;  %v7493_v50 = vadd.f32 %v12455_v41, %v7492_v11 }
0x132b   : > { %13115 = vmatpush3.xpose.msk.msra.mxu0 %vm3270_vm12, %v7749_v57 }
0x132c   : > { %13124 = vmatprep.subr.mxu0 %v19740_v52 }
0x132e   : > { %13117 = vmatmul.mubr.msk.f32.vlgmr.msra.gmra.mrb[40].mxu0 %vm3270_vm12, %v7423_v47 }
0x132f   : > { %13126 = vmatprep.mubr.msk.f32.mxu0 %vm14140_vm0, %v19740_v52 }
0x1330   : > { %v7678_v20 = vpop.f32.mrb[32].mxu0  ;;  %v7934_v25 = vpop.f32.mrb[32].mxu1 }
0x1331   : > { %v7679_v58 = vadd.f32 %v12477_v54, %v7678_v20  ;;  %v7935_v49 = vadd.f32 %v12500_v9, %v7934_v25  ;;  %v13037_v39 = vpop.f32.mrb[33].mxu0  ;;  %v13070_v27 = vpop.f32.mrb[33].mxu1 }
0x1333   : > { %13110 = vmatpush3.xpose.msk.msra.mxu1 %vm3270_vm12, %v7679_v58  ;;  %13125 = vmatpush3.msra.mxu0 %v7935_v49 }
0x1334   : > { %13119 = vmatprep.subr.mxu1 %v19740_v52  ;;  %13134 = vmatprep.subr.mxu0 %v19740_v52 }
0x1336   : > { %13112 = vmatmul.mubr.msk.f32.vlgmr.msra.gmra.mrb[38].mxu1 %vm3270_vm12, %v7353_v43 }
0x1337   : > { %13121 = vmatprep.mubr.msk.f32.mxu1 %vm14140_vm0, %v19740_v52 }
0x1338   : > { %v7818_v21 = vpop.f32.mrb[34].mxu0  ;;  %v17641_v32 = vpop.f32.mrb[34].mxu1 }
0x1339   : > { %v7819_v36 = vadd.f32 %v12479_v10, %v7818_v21  ;;  %v13059_v56 = vpop.f32.mrb[35].mxu0  ;;  %v13092_v1 = vpop.f32.mrb[35].mxu1 }
0x133b   : > { %13120 = vmatpush3.xpose.msk.msra.mxu1 %vm3270_vm12, %v7819_v36 }
0x133c   : > { %13129 = vmatprep.subr.mxu1 %v19740_v52 }
0x133e   : > { %13122 = vmatmul.mubr.msk.f32.vlgmr.msra.gmra.mrb[40].mxu1 %vm3270_vm12, %v7493_v50 }
0x133f   : > { %13131 = vmatprep.mubr.msk.f32.mxu1 %vm14140_vm0, %v19740_v52 }
0x1340   : > { %v8004_v3 = vpop.f32.mrb[36].mxu0 }
0x1341   : > { %v8005_v60 = vadd.f32 %v12501_v31, %v8004_v3  ;;  %v13081_v26 = vpop.f32.mrb[37].mxu0 }
0x1343   : > { %13130 = vmatpush3.msra.mxu1 %v8005_v60 }
0x1344   : > { %13139 = vmatprep.subr.mxu1 %v19740_v52 }
0x1348   : > { %v17649_v30 = vpop.f32.mrb[38].mxu0 }
0x1349   : > { %v13103_v44 = vpop.f32.mrb[39].mxu0 }
0x13f9   : > { %v8220_v53 = vpop.f32.mrb[36].mxu1 }
0x13fa   : > { %v8452_v2 = vmul.f32 0.35355338, %v8220_v53  ;;  %v13108_v62 = vpop.f32.mrb[37].mxu1 }
0x13fc   : > { %v8456_v35 = vsel %vm3270_vm12, %v8452_v2, -inf }
0x13fd   : > { %8457 = vmax.xlane.f32.xlu1 %v8456_v35 }
0x1401   : > { %v8372_v37 = vpop.f32.mrb[40].mxu0 }
0x1402   : > { %v8454_v11 = vmul.f32 0.35355338, %v8372_v37  ;;  %v13118_v14 = vpop.f32.mrb[41].mxu0  ;;  %v12502_v37 = vld [vmem:[#allocation11 + $0x6] ss:$0 sm:$0xff] }
0x1404   : > { %v8462_v24 = vsel %vm3270_vm12, %v8454_v11, -inf }
0x1405   : > { %8463 = vmax.xlane.f32.xlu0 %v8462_v24  ;;  %v8075_v24 = vadd.f32 %v12502_v37, %v17641_v32  ;;  %v12503_v32 = vld [vmem:[#allocation11 + $0x7] ss:$0 sm:$0xff] }
0x1409   : > { %v8296_v57 = vpop.f32.mrb[38].mxu1 }
0x140a   : > { %v8453_v42 = vmul.f32 0.35355338, %v8296_v57  ;;  %v13113_v34 = vpop.f32.mrb[39].mxu1 }
0x140c   : > { %v8459_v47 = vsel %vm3270_vm12, %v8453_v42, -inf }
0x140d   : > { %8460 = vmax.xlane.f32.xlu0 %v8459_v47 }
0x1411   : > { %v8448_v54 = vpop.f32.mrb[40].mxu1 }
0x1412   : > { %v8455_v9 = vmul.f32 0.35355338, %v8448_v54  ;;  %v13123_v20 = vpop.f32.mrb[41].mxu1 }
0x1413   : > { %v8145_v20 = vadd.f32 %v12503_v32, %v17649_v30  ;;  %v8794_v30 = vld [vmem:[#allocation12 + $0x28] sm:$0xff] }
0x1414   : > { %v8465_v25 = vsel %vm3270_vm12, %v8455_v9, -inf }
0x1415   : > { %8466 = vmax.xlane.f32.xlu0 %v8465_v25 }
0x148a   : > { %v8458_v38 = vpop.xlane.xlu1 %8457 }
0x148b   : > { %v8468_v58 = vsub.f32 %v8452_v2, %v8458_v38 }
0x148d   : > { %v8472_v49 = vmul.f32 1.442695, %v8468_v58  ;;  %v8793_v58 = vld [vmem:[#allocation12 + $0x20] sm:$0xff] }
0x148f   : > { %13602 = vpow2.f32 %v8472_v49  ;;  %v8795_v49 = vld [vmem:[#allocation12 + $0x30] sm:$0xff] }
0x1492   : > { %v8464_v39 = vpop.xlane.xlu0 %8463 }
0x1493   : > { %v8470_v27 = vsub.f32 %v8454_v11, %v8464_v39 }
0x1495   : > { %v8476_v43 = vmul.f32 1.442695, %v8470_v27 }
0x1497   : > { %13604 = vpow2.f32 %v8476_v43 }
0x1499   : > { %v13603_v10 = vpop.eup %13602 }
0x149a   : > { %v8461_v21 = vpop.xlane.xlu0 %8460  ;;  %v8480_v41 = vsel %vm3270_vm12, %v13603_v10, 0.0 }
0x149b   : > { %v8469_v36 = vsub.f32 %v8453_v42, %v8461_v21  ;;  %8481 = vadd.xlane.f32.xlu1 %v8480_v41  ;;  %v8796_v21 = vld [vmem:[#allocation12 + $0x38] sm:$0xff] }
0x149d   : > { %v8474_v56 = vmul.f32 1.442695, %v8469_v36 }
0x149f   : > { %13606 = vpow2.f32 %v8474_v56 }
0x14a1   : > { %v13605_v1 = vpop.eup %13604 }
0x14a2   : > { %v8467_v50 = vpop.xlane.xlu0 %8466  ;;  %v8486_v31 = vsel %vm3270_vm12, %v13605_v1, 0.0 }
0x14a3   : > { %v8471_v3 = vsub.f32 %v8455_v9, %v8467_v50  ;;  %8487 = vadd.xlane.f32.xlu1 %v8486_v31 }
0x14a5   : > { %v8478_v60 = vmul.f32 1.442695, %v8471_v3 }
0x14a7   : > { %13608 = vpow2.f32 %v8478_v60 }
0x14a9   : > { %v13607_v26 = vpop.eup %13606 }
0x14aa   : > { %v8483_v44 = vsel %vm3270_vm12, %v13607_v26, 0.0 }
0x14ab   : > { %8484 = vadd.xlane.f32.xlu0 %v8483_v44 }
0x14b1   : > { %v13609_v53 = vpop.eup %13608 }
0x14b2   : > { %v8489_v2 = vsel %vm3270_vm12, %v13609_v53, 0.0 }
0x14b3   : > { %8490 = vadd.xlane.f32.xlu0 %v8489_v2 }
0x1528   : > { %v8482_v62 = vpop.xlane.xlu1 %8481 }
0x1529   : > { %13610 = vrcp.f32 %v8482_v62 }
0x1530   : > { %v8488_v35 = vpop.xlane.xlu1 %8487 }
0x1531   : > { %13612 = vrcp.f32 %v8488_v35 }
0x1533   : > { %v13611_v11 = vpop.eup %13610 }
0x1534   : > { %v8496_v14 = vmul.f32 %v13611_v11, %v13603_v10 }
0x1536   : > { %13127 = vmatmul.mubr.msk.f32.vlgmr.msra.gmra.mrb[42].mxu0 %vm3270_vm12, %v8496_v14 }
0x1537   : > { %13135 = vmatpush3.msra.mxu0 %v8075_v24  ;;  %13136 = vmatprep.mubr.msk.f32.mxu0 %vm14140_vm0, %v19740_v52  ;;  %v12524_v24 = vld [vmem:[#allocation14 + $0x1] ss:$0 sm:$0xff] }
0x1538   : > { %v8485_v57 = vpop.xlane.xlu0 %8484  ;;  %13144 = vmatprep.subr.mxu0 %v19740_v52 }
0x1539   : > { %13614 = vrcp.f32 %v8485_v57 }
0x153b   : > { %v13613_v42 = vpop.eup %13612 }
0x153c   : > { %v8498_v34 = vmul.f32 %v13613_v42, %v13605_v1 }
0x153e   : > { %13137 = vmatmul.mubr.msk.f32.vlgmr.msra.gmra.mrb[44].mxu0 %vm3270_vm12, %v8498_v34 }
0x153f   : > { %13146 = vmatprep.mubr.msk.f32.mxu0 %vm14140_vm0, %v19740_v52  ;;  %13145 = vmatpush3.msra.mxu0 %v8793_v58 }
0x1540   : > { %v8491_v47 = vpop.xlane.xlu0 %8490  ;;  %13154 = vmatprep.subr.mxu0 %v19740_v52 }
0x1541   : > { %13616 = vrcp.f32 %v8491_v47 }
0x1543   : > { %v13615_v54 = vpop.eup %13614 }
0x1544   : > { %v8497_v9 = vmul.f32 %v13615_v54, %v13607_v26 }
0x1546   : > { %13132 = vmatmul.mubr.msk.f32.vlgmr.msra.gmra.mrb[42].mxu1 %vm3270_vm12, %v8497_v9 }
0x1547   : > { %13140 = vmatpush3.msra.mxu1 %v8145_v20  ;;  %13141 = vmatprep.mubr.msk.f32.mxu1 %vm14140_vm0, %v19740_v52 }
0x1548   : > { %13149 = vmatprep.subr.mxu1 %v19740_v52 }
0x154b   : > { %v13617_v25 = vpop.eup %13616 }
0x154c   : > { %v8499_v38 = vmul.f32 %v13617_v25, %v13609_v53 }
0x154e   : > { %13142 = vmatmul.mubr.msk.f32.vlgmr.msra.gmra.mrb[44].mxu1 %vm3270_vm12, %v8499_v38 }
0x154f   : > { %13151 = vmatprep.mubr.msk.f32.mxu1 %vm14140_vm0, %v19740_v52  ;;  %13150 = vmatpush3.msra.mxu1 %v8794_v30 }
0x1550   : > { %13159 = vmatprep.subr.mxu1 %v19740_v52 }
0x1609   : > { %v8569_v39 = vpop.f32.mrb[42].mxu0 }
0x160a   : > { %v13128_v27 = vpop.f32.mrb[43].mxu0  ;;  %13147 = vmatmul.mubr.msk.f32.vlgmr.msra.gmra.mrb[46].mxu0 %vm3270_vm12, %v8569_v39 }
0x160b   : > { %13155 = vmatpush3.msra.mxu0 %v8795_v49  ;;  %13156 = vmatprep.mubr.msk.f32.mxu0 %vm14140_vm0, %v19740_v52 }
0x160c   : > { %13367 = vmatprep.subr.bf16.mxu0 %v19739_v22 }
0x1611   : > { %v8715_v43 = vpop.f32.mrb[44].mxu0 }
0x1612   : > { %v13138_v10 = vpop.f32.mrb[45].mxu0  ;;  %13157 = vmatmul.mubr.msk.f32.vlgmr.msra.gmra.mrb[48].mxu0 %vm3270_vm12, %v8715_v43 }
0x1613   : > { %13172 = vmatprep.mubr.msk.f32.mxu0 %vm14140_vm0, %v19740_v52 }
0x1619   : > { %v8642_v41 = vpop.f32.mrb[42].mxu1 }
0x161a   : > { %v13133_v36 = vpop.f32.mrb[43].mxu1  ;;  %13152 = vmatmul.mubr.msk.f32.vlgmr.msra.gmra.mrb[46].mxu1 %vm3270_vm12, %v8642_v41 }
0x161b   : > { %13160 = vmatpush3.msra.mxu1 %v8796_v21  ;;  %13161 = vmatprep.mubr.msk.f32.mxu1 %vm14140_vm0, %v19740_v52 }
0x161c   : > { %13373 = vmatprep.subr.bf16.mxu1 %v19739_v22 }
0x1621   : > { %v8788_v56 = vpop.f32.mrb[44].mxu1 }
0x1622   : > { %v13143_v1 = vpop.f32.mrb[45].mxu1  ;;  %13162 = vmatmul.mubr.msk.f32.vlgmr.msra.gmra.mrb[48].mxu1 %vm3270_vm12, %v8788_v56 }
0x1623   : > { %13191 = vmatprep.mubr.msk.f32.mxu1 %vm14140_vm0, %v19740_v52 }
0x16dd   : > { %v8866_v50 = vpop.f32.mrb[46].mxu0 }
0x16de   : > { %v13148_v31 = vpop.f32.mrb[47].mxu0  ;;  %v9089_v44 = vsel %vm2339_vm11, %v8866_v50, 0.0 }
0x16e5   : > { %v9012_v3 = vpop.f32.mrb[48].mxu0 }
0x16e6   : > { %v13158_v60 = vpop.f32.mrb[49].mxu0  ;;  %v9092_v35 = vsel %vm2339_vm11, %v9012_v3, 0.0 }
0x16ed   : > { %v8939_v26 = vpop.f32.mrb[46].mxu1 }
0x16ee   : > { %v9090_v53 = vsel %vm2339_vm11, %v8939_v26, 0.0  ;;  %v13153_v2 = vpop.f32.mrb[47].mxu1 }
0x16ef   : > { %v9091_v62 = vadd.f32 %v9090_v53, %v9089_v44 }
0x16f1   : > { %v9093_v37 = vadd.f32 %v9092_v35, %v9091_v62 }
0x16f5   : > { %v9085_v11 = vpop.f32.mrb[48].mxu1 }
0x16f6   : > { %v9094_v14 = vsel %vm2339_vm11, %v9085_v11, 0.0  ;;  %v13163_v57 = vpop.f32.mrb[49].mxu1  ;;  %v19748_v11 = vld [vmem:[#allocation50_spill] sm:$0xff] }
0x16f7   : > { %v9095_v42 = vadd.f32 %v9094_v14, %v9093_v37 }
0x16f9   : > { %v9104_v34 = vadd.f32 %v12524_v24, %v9095_v42  ;;  %v19751_v42 = vld [vmem:[#allocation52_spill] sm:$0xff] }
0x16fb   : > { %v9109_v47 = vrot.slane %v9104_v34, %v14703_v4  ;;  %v9128_v32 = vrot.slane %v9104_v34, %v14705_v5  ;;  %v9147_v54 = vrot.slane %v9104_v34, %v14707_v6  ;;  %v9166_v9 = vrot.slane %v9104_v34, %v14709_v7 }
0x16fc   : > { %v9185_v20 = vrot.slane %v9104_v34, %v14713_v12  ;;  %v9204_v25 = vrot.slane %v9104_v34, %v14715_v13  ;;  %v9223_v38 = vrot.slane %v9104_v34, %v19602_v59  ;;  %v9242_v58 = vrot.slane %v9104_v34, %v19713_v15 }
0x16fd   : > { %9115 = vbcast.lane.b32.xlu0 %v9109_v47, 264  ;;  %9111 = vbcast.lane.b32.xlu1 %v9109_v47, 256 }
0x1701   : > { %9138 = vbcast.lane.b32.xlu0 %v9128_v32, 272  ;;  %9130 = vbcast.lane.b32.xlu1 %v9128_v32, 256 }
0x1705   : > { %9153 = vbcast.lane.b32.xlu0 %v9147_v54, 264  ;;  %9134 = vbcast.lane.b32.xlu1 %v9128_v32, 264 }
0x1709   : > { %9142 = vbcast.lane.b32.xlu0 %v9128_v32, 280  ;;  %9119 = vbcast.lane.b32.xlu1 %v9109_v47, 272 }
0x170d   : > { %9168 = vbcast.lane.b32.xlu0 %v9166_v9, 256  ;;  %9149 = vbcast.lane.b32.xlu1 %v9147_v54, 256 }
0x1711   : > { %9161 = vbcast.lane.b32.xlu0 %v9147_v54, 280  ;;  %9123 = vbcast.lane.b32.xlu1 %v9109_v47, 280 }
0x1715   : > { %9187 = vbcast.lane.b32.xlu0 %v9185_v20, 256  ;;  %9157 = vbcast.lane.b32.xlu1 %v9147_v54, 272  ;;  %v19753_v54 = vld [vmem:[#allocation46_spill] sm:$0xff] }
0x1719   : > { %9180 = vbcast.lane.b32.xlu0 %v9166_v9, 280  ;;  %9172 = vbcast.lane.b32.xlu1 %v9166_v9, 264 }
0x171d   : > { %9206 = vbcast.lane.b32.xlu0 %v9204_v25, 256  ;;  %9176 = vbcast.lane.b32.xlu1 %v9166_v9, 272 }
0x1721   : > { %9199 = vbcast.lane.b32.xlu0 %v9185_v20, 280  ;;  %9191 = vbcast.lane.b32.xlu1 %v9185_v20, 264 }
0x1725   : > { %9225 = vbcast.lane.b32.xlu0 %v9223_v38, 256  ;;  %9195 = vbcast.lane.b32.xlu1 %v9185_v20, 272  ;;  %v19754_v20 = vld [vmem:[#allocation42_spill] sm:$0xff] }
0x1729   : > { %9218 = vbcast.lane.b32.xlu0 %v9204_v25, 280  ;;  %9210 = vbcast.lane.b32.xlu1 %v9204_v25, 264 }
0x172d   : > { %9244 = vbcast.lane.b32.xlu0 %v9242_v58, 256  ;;  %9214 = vbcast.lane.b32.xlu1 %v9204_v25, 272 }
0x1731   : > { %9237 = vbcast.lane.b32.xlu0 %v9223_v38, 280  ;;  %9229 = vbcast.lane.b32.xlu1 %v9223_v38, 264 }
0x1735   : > { %9256 = vbcast.lane.b32.xlu0 %v9242_v58, 280  ;;  %9233 = vbcast.lane.b32.xlu1 %v9223_v38, 272 }
0x1739   : > { %9248 = vbcast.lane.b32.xlu1 %v9242_v58, 264 }
0x173d   : > { %9252 = vbcast.lane.b32.xlu1 %v9242_v58, 272 }
0x176f   : > { %v9116_v30 = vpop.permute.xlu0 %9115  ;;  %v9112_v49 = vpop.permute.xlu1 %9111 }
0x1770   : > { %v17704_v39 = vadd.f32 %v9116_v30, %v17141_v19  ;;  %v17707_v27 = vadd.f32 %v9112_v49, %v17138_v33  ;;  %v19756_v30 = vld [vmem:[#allocation40_spill] sm:$0xff] }
0x1772   : > { %9362 = vperm.xlu0 %13579, %v17704_v39   ;;  %9359 = vperm.xlu1 %13578, %v17707_v27  }
0x1773   : > { %v9139_v43 = vpop.permute.xlu0 %9138  ;;  %v9131_v10 = vpop.permute.xlu1 %9130 }
0x1774   : > { %v17712_v21 = vadd.f32 %v9131_v10, %v17154_v28  ;;  %v17720_v1 = vadd.f32 %v9139_v43, %v17197_v63  ;;  %v19757_v43 = vld [vmem:[#allocation59_spill] sm:$0xff] }
0x1776   : > { %9371 = vperm.xlu1 %13578, %v17712_v21  }
0x1777   : > { %v9154_v41 = vpop.permute.xlu0 %9153  ;;  %v9135_v36 = vpop.permute.xlu1 %9134 }
0x1778   : > { %v17716_v56 = vadd.f32 %v9135_v36, %v17169_v0  ;;  %v17728_v3 = vadd.f32 %v9154_v41, %v17151_v51  ;;  %v19759_v36 = vld [vmem:[#allocation47_spill] sm:$0xff] }
0x177a   : > { %9374 = vperm.xlu0 %13579, %v17716_v56   ;;  %19741 = vst [vmem:[#allocation51_spill] sm:$0xff] %v17728_v3 }
0x177b   : > { %v9143_v33 = vpop.permute.xlu0 %9142  ;;  %v9120_v19 = vpop.permute.xlu1 %9119 }
0x177c   : > { %v17723_v50 = vadd.f32 %v9120_v19, %v17179_v45  ;;  %v17736_v45 = vadd.f32 %v9143_v33, %v17172_v48  ;;  %v19760_v19 = vld [vmem:[#allocation57_spill] sm:$0xff] }
0x177e   : > { %9377 = vperm.xlu0 %13579, %v17720_v1   ;;  %9365 = vperm.xlu1 %13578, %v17723_v50  }
0x177f   : > { %v9169_v28 = vpop.permute.xlu0 %9168  ;;  %v9150_v31 = vpop.permute.xlu1 %9149 }
0x1780   : > { %v17731_v0 = vadd.f32 %v9150_v31, %v17209_v61  ;;  %v17744_v61 = vadd.f32 %v9169_v28, %v17182_v55 }
0x1782   : > { %9386 = vperm.xlu0 %13579, %v17728_v3   ;;  %9383 = vperm.xlu1 %13578, %v17731_v0   ;;  %19743 = vst [vmem:[#allocation48_spill] sm:$0xff] %v17744_v61 }
0x1783   : > { %v9162_v63 = vpop.permute.xlu0 %9161  ;;  %v9124_v60 = vpop.permute.xlu1 %9123 }
0x1784   : > { %v17739_v26 = vadd.f32 %v9124_v60, %v17225_v29  ;;  %v17752_v29 = vadd.f32 %v9162_v63, %v17200_v46  ;;  %v19762_v60 = vld [vmem:[#allocation49_spill] sm:$0xff] }
0x1786   : > { %19742 = vst [vmem:[#allocation55_spill] sm:$0xff] %v17739_v26  ;;  %9380 = vperm.xlu0 %13579, %v17736_v45   ;;  %9368 = vperm.xlu1 %13578, %v17739_v26   ;;  %19745 = vst [vmem:[#allocation62_spill] sm:$0xff] %v17752_v29 }
0x1787   : > { %v9188_v51 = vpop.permute.xlu0 %9187  ;;  %v9158_v44 = vpop.permute.xlu1 %9157 }
0x1788   : > { %v17747_v53 = vadd.f32 %v9158_v44, %v17239_v23  ;;  %v19747_v23 = vld [vmem:[#allocation45_spill] sm:$0xff]  ;;  %v19763_v44 = vld [vmem:[#allocation64_spill] sm:$0xff] }
0x1789   : > { %v17760_v37 = vadd.f32 %v9188_v51, %v19747_v23 }
0x178a   : > { %19744 = vst [vmem:[#allocation56_spill] sm:$0xff] %v17747_v53  ;;  %9395 = vperm.xlu0 %13579, %v17744_v61   ;;  %9389 = vperm.xlu1 %13578, %v17747_v53  }
0x178b   : > { %v9181_v48 = vpop.permute.xlu0 %9180  ;;  %v9173_v2 = vpop.permute.xlu1 %9172 }
0x178c   : > { %v17755_v62 = vadd.f32 %v9173_v2, %v17256_v40  ;;  %v19750_v40 = vld [vmem:[#allocation53_spill] sm:$0xff] }
0x178d   : > { %v17768_v57 = vadd.f32 %v9181_v48, %v19750_v40  ;;  %v19768_v40 = vld [vmem:[#allocation44_spill] sm:$0xff] }
0x178e   : > { %19746 = vst [vmem:[#allocation58_spill] sm:$0xff] %v17755_v62  ;;  %9392 = vperm.xlu0 %13579, %v17752_v29   ;;  %9398 = vperm.xlu1 %13578, %v17755_v62  }
0x178f   : > { %v9207_v55 = vpop.permute.xlu0 %9206  ;;  %v9177_v35 = vpop.permute.xlu1 %9176 }
0x1790   : > { %v17763_v14 = vadd.f32 %v9177_v35, %v19748_v11  ;;  %v17776_v9 = vadd.f32 %v9207_v55, %v19753_v54  ;;  %v19765_v35 = vld [vmem:[#allocation61_spill] sm:$0xff]  ;;  %v19766_v11 = vld [vmem:[#allocation54_spill] sm:$0xff] }
0x1792   : > { %19749 = vst [vmem:[#allocation45_spill] sm:$0xff] %v17763_v14  ;;  %9407 = vperm.xlu0 %13579, %v17760_v37   ;;  %9401 = vperm.xlu1 %13578, %v17763_v14  }
0x1793   : > { %v9200_v46 = vpop.permute.xlu0 %9199  ;;  %v9192_v24 = vpop.permute.xlu1 %9191 }
0x1794   : > { %v17771_v34 = vadd.f32 %v9192_v24, %v19751_v42  ;;  %v17784_v49 = vadd.f32 %v9200_v46, %v19756_v30  ;;  %v19774_v30 = vld [vmem:[#allocation60_spill] sm:$0xff] }
0x1796   : > { %19752 = vst [vmem:[#allocation50_spill] sm:$0xff] %v17771_v34  ;;  %9404 = vperm.xlu0 %13579, %v17768_v57   ;;  %9410 = vperm.xlu1 %13578, %v17771_v34  }
0x1797   : > { %v9226_v47 = vpop.permute.xlu0 %9225  ;;  %v9196_v32 = vpop.permute.xlu1 %9195 }
0x1798   : > { %v17779_v25 = vadd.f32 %v9196_v32, %v19754_v20  ;;  %v17792_v33 = vadd.f32 %v9226_v47, %v19759_v36  ;;  %v19770_v47 = vld [vmem:[#allocation63_spill] sm:$0xff] }
0x179a   : > { %19755 = vst [vmem:[#allocation53_spill] sm:$0xff] %v17779_v25  ;;  %9419 = vperm.xlu0 %13579, %v17776_v9   ;;  %9413 = vperm.xlu1 %13578, %v17779_v25  }
0x179b   : > { %v9219_v38 = vpop.permute.xlu0 %9218  ;;  %v9211_v58 = vpop.permute.xlu1 %9210 }
0x179c   : > { %v17787_v10 = vadd.f32 %v9211_v58, %v19757_v43  ;;  %v17800_v51 = vadd.f32 %v9219_v38, %v19762_v60  ;;  %v19772_v38 = vld [vmem:[#allocation43_spill] sm:$0xff] }
0x179e   : > { %19758 = vst [vmem:[#allocation52_spill] sm:$0xff] %v17787_v10  ;;  %9416 = vperm.xlu0 %13579, %v17784_v49   ;;  %9422 = vperm.xlu1 %13578, %v17787_v10  }
0x179f   : > { %v9215_v41 = vpop.permute.xlu1 %9214  ;;  %v9245_v31 = vpop.permute.xlu0 %9244 }
0x17a0   : > { %v17795_v28 = vadd.f32 %v9215_v41, %v19760_v19  ;;  %v17808_v23 = vadd.f32 %v9245_v31, %v19765_v35 }
0x17a2   : > { %19761 = vst [vmem:[#allocation46_spill] sm:$0xff] %v17795_v28  ;;  %9431 = vperm.xlu0 %13579, %v17792_v33   ;;  %9425 = vperm.xlu1 %13578, %v17795_v28  }
0x17a3   : > { %v9230_v63 = vpop.permute.xlu1 %9229  ;;  %v9238_v2 = vpop.permute.xlu0 %9237 }
0x17a4   : > { %v17803_v48 = vadd.f32 %v9230_v63, %v19763_v44  ;;  %v17816_v42 = vadd.f32 %v9238_v2, %v19768_v40 }
0x17a6   : > { %19764 = vst [vmem:[#allocation42_spill] sm:$0xff] %v17803_v48  ;;  %9428 = vperm.xlu0 %13579, %v17800_v51   ;;  %9434 = vperm.xlu1 %13578, %v17803_v48   ;;  %19769 = vst [vmem:[#allocation59_spill] sm:$0xff] %v17816_v42 }
0x17a7   : > { %v9234_v55 = vpop.permute.xlu1 %9233  ;;  %v9257_v54 = vpop.permute.xlu0 %9256 }
0x17a8   : > { %v17811_v46 = vadd.f32 %v9234_v55, %v19766_v11  ;;  %v17824_v58 = vadd.f32 %v9257_v54, %v19772_v38 }
0x17aa   : > { %19767 = vst [vmem:[#allocation40_spill] sm:$0xff] %v17811_v46  ;;  %9443 = vperm.xlu0 %13579, %v17808_v23   ;;  %9437 = vperm.xlu1 %13578, %v17811_v46   ;;  %19773 = vst [vmem:[#allocation57_spill] sm:$0xff] %v17824_v58 }
0x17ab   : > { %v9249_v24 = vpop.permute.xlu1 %9248 }
0x17ac   : > { %v17819_v32 = vadd.f32 %v9249_v24, %v19770_v47 }
0x17ae   : > { %19771 = vst [vmem:[#allocation47_spill] sm:$0xff] %v17819_v32  ;;  %9440 = vperm.xlu0 %13579, %v17816_v42   ;;  %9446 = vperm.xlu1 %13578, %v17819_v32  }
0x17af   : > { %v9253_v20 = vpop.permute.xlu1 %9252 }
0x17b0   : > { %v17827_v43 = vadd.f32 %v9253_v20, %v19774_v30 }
0x17b2   : > { %19775 = vst [vmem:[#allocation49_spill] sm:$0xff] %v17827_v43  ;;  %9452 = vperm.xlu0 %13579, %v17824_v58   ;;  %9449 = vperm.xlu1 %13578, %v17827_v43  }
0x17f1   : > { %v9360_v41 = vpop.permute.xlu1 %9359  ;;  %v9363_v36 = vpop.permute.xlu0 %9362 }
0x17f2   : > { %v9461_v28 = vrot.slane %v9363_v36, %v14720_v16  ;;  %v9457_v10 = vrot.slane %v9360_v41, %v14711_v8 }
0x17f5   : > { %v9372_v19 = vpop.permute.xlu1 %9371 }
0x17f6   : > { %v9476_v34 = vrot.slane %v9372_v19, %v14711_v8 }
0x17f9   : > { %v9375_v31 = vpop.permute.xlu0 %9374 }
0x17fa   : > { %v9480_v25 = vrot.slane %v9375_v31, %v14720_v16  ;;  %v9462_v31 = vsel %vm2176_vm1, %v9461_v28, %v9457_v10 }
0x17fc   : > { %v9481_v19 = vsel %vm2176_vm1, %v9480_v25, %v9476_v34 }
0x17fd   : > { %v9378_v63 = vpop.permute.xlu0 %9377  ;;  %v9366_v60 = vpop.permute.xlu1 %9365 }
0x17fe   : > { %v9485_v14 = vrot.slane %v9378_v63, %v14722_v17  ;;  %v9466_v29 = vrot.slane %v9366_v60, %v14722_v17 }
0x1800   : > { %v9486_v60 = vsel %vm2183_vm2, %v9485_v14, %v9481_v19 }
0x1801   : > { %v9387_v44 = vpop.permute.xlu0 %9386  ;;  %v9384_v2 = vpop.permute.xlu1 %9383 }
0x1802   : > { %v9499_v62 = vrot.slane %v9387_v44, %v14720_v16  ;;  %v9495_v61 = vrot.slane %v9384_v2, %v14711_v8  ;;  %v9467_v44 = vsel %vm2183_vm2, %v9466_v29, %v9462_v31 }
0x1804   : > { %v9500_v2 = vsel %vm2176_vm1, %v9499_v62, %v9495_v61 }
0x1805   : > { %v9381_v55 = vpop.permute.xlu0 %9380  ;;  %v9369_v35 = vpop.permute.xlu1 %9368 }
0x1806   : > { %v9490_v53 = vrot.slane %v9381_v55, %v14724_v18  ;;  %v9471_v58 = vrot.slane %v9369_v35, %v14724_v18 }
0x1808   : > { %v9491_v55 = vsel %vm2190_vm3, %v9490_v53, %v9486_v60  ;;  %v9472_v35 = vsel %vm2190_vm3, %v9471_v58, %v9467_v44 }
0x1809   : > { %v9396_v11 = vpop.permute.xlu0 %9395  ;;  %v9390_v24 = vpop.permute.xlu1 %9389  ;;  %v9606_v31 = vsel %vm2325_vm4, %v9491_v55, %v9472_v35 }
0x180a   : > { %v9504_v41 = vrot.slane %v9390_v24, %v14722_v17  ;;  %v9514_v10 = vrot.slane %v9396_v11, %v14711_v8 }
0x180c   : > { %v9505_v34 = vsel %vm2183_vm2, %v9504_v41, %v9500_v2 }
0x180d   : > { %v9393_v40 = vpop.permute.xlu0 %9392  ;;  %v9399_v47 = vpop.permute.xlu1 %9398 }
0x180e   : > { %v9509_v63 = vrot.slane %v9393_v40, %v14724_v18  ;;  %v9518_v42 = vrot.slane %v9399_v47, %v14720_v16 }
0x1810   : > { %v9510_v29 = vsel %vm2190_vm3, %v9509_v63, %v9505_v34  ;;  %v9519_v47 = vsel %vm2176_vm1, %v9518_v42, %v9514_v10 }
0x1811   : > { %v9408_v54 = vpop.permute.xlu0 %9407  ;;  %v9402_v20 = vpop.permute.xlu1 %9401 }
0x1812   : > { %v9523_v25 = vrot.slane %v9402_v20, %v14722_v17  ;;  %v9533_v28 = vrot.slane %v9408_v54, %v14711_v8 }
0x1815   : > { %v9405_v38 = vpop.permute.xlu0 %9404  ;;  %v9411_v30 = vpop.permute.xlu1 %9410 }
0x1816   : > { %v9537_v14 = vrot.slane %v9411_v30, %v14720_v16  ;;  %v9528_v61 = vrot.slane %v9405_v38, %v14724_v18 }
0x1818   : > { %v9538_v54 = vsel %vm2176_vm1, %v9537_v14, %v9533_v28 }
0x1819   : > { %v9420_v52 = vpop.permute.xlu0 %9419  ;;  %v9414_v22 = vpop.permute.xlu1 %9413 }
0x181a   : > { %v9542_v53 = vrot.slane %v9414_v22, %v14722_v17  ;;  %v9552_v20 = vrot.slane %v9420_v52, %v14711_v8 }
0x181c   : > { %v9543_v42 = vsel %vm2183_vm2, %v9542_v53, %v9538_v54 }
0x181d   : > { %v9417_v43 = vpop.permute.xlu0 %9416  ;;  %v9423_v32 = vpop.permute.xlu1 %9422 }
0x181e   : > { %v9556_v62 = vrot.slane %v9423_v32, %v14720_v16  ;;  %v9547_v58 = vrot.slane %v9417_v43, %v14724_v18  ;;  %v9524_v32 = vsel %vm2183_vm2, %v9523_v25, %v9519_v47 }
0x1820   : > { %v9557_v52 = vsel %vm2176_vm1, %v9556_v62, %v9552_v20  ;;  %v9548_v19 = vsel %vm2190_vm3, %v9547_v58, %v9543_v42 }
0x1821   : > { %v9432_v46 = vpop.permute.xlu0 %9431  ;;  %v9426_v48 = vpop.permute.xlu1 %9425 }
0x1822   : > { %v9561_v11 = vrot.slane %v9426_v48, %v14722_v17  ;;  %v9571_v43 = vrot.slane %v9432_v46, %v14711_v8  ;;  %v9607_v46 = vsel %vm2327_vm5, %v9510_v29, %v9606_v31 }
0x1824   : > { %v9562_v63 = vsel %vm2183_vm2, %v9561_v11, %v9557_v52 }
0x1825   : > { %v9429_v26 = vpop.permute.xlu0 %9428  ;;  %v9435_v36 = vpop.permute.xlu1 %9434 }
0x1826   : > { %v9575_v40 = vrot.slane %v9435_v36, %v14720_v16  ;;  %v9566_v30 = vrot.slane %v9429_v26, %v14724_v18  ;;  %v9529_v36 = vsel %vm2190_vm3, %v9528_v61, %v9524_v32 }
0x1827   : > { %v9608_v25 = vsel %vm2329_vm6, %v9529_v36, %v9607_v46 }
0x1828   : > { %v9576_v60 = vsel %vm2176_vm1, %v9575_v40, %v9571_v43  ;;  %v9567_v44 = vsel %vm2190_vm3, %v9566_v30, %v9562_v63  ;;  %v9609_v61 = vsel %vm2331_vm7, %v9548_v19, %v9608_v25 }
0x1829   : > { %v9444_v3 = vpop.permute.xlu0 %9443  ;;  %v9438_v24 = vpop.permute.xlu1 %9437 }
0x182a   : > { %v9580_v38 = vrot.slane %v9438_v24, %v14722_v17  ;;  %v9590_v2 = vrot.slane %v9444_v3, %v14711_v8  ;;  %v9610_v3 = vsel %vm2333_vm8, %v9567_v44, %v9609_v61  ;;  %v19781_v61 = vld [vmem:[#allocation59_spill] sm:$0xff] }
0x182c   : > { %v9581_v24 = vsel %vm2183_vm2, %v9580_v38, %v9576_v60 }
0x182d   : > { %v9441_v41 = vpop.permute.xlu0 %9440  ;;  %v9447_v22 = vpop.permute.xlu1 %9446 }
0x182e   : > { %v9585_v48 = vrot.slane %v9441_v41, %v14724_v18  ;;  %v9594_v26 = vrot.slane %v9447_v22, %v14720_v16 }
0x1830   : > { %v9586_v55 = vsel %vm2190_vm3, %v9585_v48, %v9581_v24  ;;  %v9595_v29 = vsel %vm2176_vm1, %v9594_v26, %v9590_v2 }
0x1831   : > { %v9453_v10 = vpop.permute.xlu0 %9452  ;;  %v9450_v34 = vpop.permute.xlu1 %9449  ;;  %v9611_v28 = vsel %vm2335_vm9, %v9586_v55, %v9610_v3 }
0x1832   : > { %v9604_v35 = vrot.slane %v9453_v10, %v14724_v18  ;;  %v9599_v14 = vrot.slane %v9450_v34, %v14722_v17 }
0x1834   : > { %v9600_v53 = vsel %vm2183_vm2, %v9599_v14, %v9595_v29 }
0x1835   : > { %v9605_v62 = vsel %vm2190_vm3, %v9604_v35, %v9600_v53  ;;  %v19780_v35 = vld [vmem:[#allocation51_spill] sm:$0xff] }
0x1836   : > { %v9612_v58 = vsel %vm2337_vm10, %v9605_v62, %v9611_v28  ;;  %v19783_v53 = vld [vmem:[#allocation55_spill] sm:$0xff]  ;;  %v19784_v28 = vld [vmem:[#allocation57_spill] sm:$0xff] }
0x1837   : > { %v9614_v11 = vsel %vm2339_vm11, %v9612_v58, 0.0 }
0x1838   : > { %9615 = vadd.xlane.f32.xlu1 %v9614_v11  ;;  %v19786_v11 = vld [vmem:[#allocation56_spill] sm:$0xff] }
0x18c5   : > { %v9616_v40 = vpop.xlane.xlu1 %9615 }
0x18c6   : > { %v9617_v47 = vmul.f32 0.03125, %v9616_v40 }
0x18c8   : > { %v9626_v20 = vrot.slane %v9617_v47, %v14705_v5  ;;  %v9622_v30 = vrot.slane %v9617_v47, %v14703_v4  ;;  %v17898_v38 = vrot.slane %v9617_v47, %v14713_v12  ;;  %v17907_v32 = vrot.slane %v9617_v47, %v14709_v7 }
0x18ca   : > { %v17901_v41 = vsub.f32 %v17736_v45, %v9626_v20  ;;  %v17904_v22 = vsub.f32 %v17707_v27, %v9622_v30  ;;  %v17915_v48 = vsub.f32 %v17760_v37, %v17898_v38  ;;  %v17918_v36 = vsub.f32 %v17704_v39, %v9622_v30 }
0x18cb   : > { %v17921_v27 = vrot.slane %v9617_v47, %v14715_v13  ;;  %v17929_v52 = vsub.f32 %v17768_v57, %v17907_v32  ;;  %v17932_v37 = vsub.f32 %v17712_v21, %v9626_v20  ;;  %v17943_v19 = vsub.f32 %v17716_v56, %v9626_v20 }
0x18cc   : > { %v9698_v54 = vmul.f32 %v17901_v41, %v17901_v41  ;;  %v9691_v43 = vmul.f32 %v17904_v22, %v17904_v22  ;;  %v9707_v45 = vmul.f32 %v17915_v48, %v17915_v48  ;;  %v9692_v42 = vmul.f32 %v17918_v36, %v17918_v36 }
0x18cd   : > { %v9706_v39 = vmul.f32 %v17929_v52, %v17929_v52  ;;  %v9695_v26 = vmul.f32 %v17932_v37, %v17932_v37  ;;  %v17940_v31 = vsub.f32 %v17776_v9, %v17921_v27  ;;  %v17946_v21 = vrot.slane %v9617_v47, %v19602_v59 }
0x18ce   : > { %9777 = vperm.xlu1 %13578, %v9698_v54   ;;  %9756 = vperm.xlu0 %13579, %v9691_v43   ;;  %v9696_v63 = vmul.f32 %v17943_v19, %v17943_v19  ;;  %v17954_v60 = vsub.f32 %v17784_v49, %v17898_v38  ;;  %v17957_v9 = vsub.f32 %v17723_v50, %v9622_v30 }
0x18cf   : > { %v9711_v57 = vmul.f32 %v17940_v31, %v17940_v31  ;;  %v9630_v56 = vrot.slane %v9617_v47, %v14707_v6  ;;  %v17966_v2 = vsub.f32 %v17792_v33, %v17946_v21  ;;  %v17969_v49 = vsub.f32 %v17720_v1, %v9626_v20 }
0x18d0   : > { %19776 = vst [vmem:[#allocation64_spill] sm:$0xff] %v17954_v60  ;;  %v9710_v46 = vmul.f32 %v17954_v60, %v17954_v60  ;;  %v9693_v44 = vmul.f32 %v17957_v9, %v17957_v9  ;;  %v9650_v50 = vrot.slane %v9617_v47, %v19713_v15  ;;  %v17978_v34 = vsub.f32 %v17800_v51, %v17921_v27 }
0x18d1   : > { %19777 = vst [vmem:[#allocation61_spill] sm:$0xff] %v17966_v2  ;;  %v9715_v24 = vmul.f32 %v17966_v2, %v17966_v2  ;;  %v9697_v10 = vmul.f32 %v17969_v49, %v17969_v49  ;;  %v17981_v33 = vsub.f32 %v17731_v0, %v9630_v56  ;;  %v17991_v14 = vsub.f32 %v19780_v35, %v9630_v56 }
0x18d2   : > { %9804 = vperm.xlu1 %13578, %v9707_v45   ;;  %9759 = vperm.xlu0 %13579, %v9692_v42   ;;  %19778 = vst [vmem:[#allocation54_spill] sm:$0xff] %v17978_v34  ;;  %v9714_v1 = vmul.f32 %v17978_v34, %v17978_v34  ;;  %v17988_v55 = vsub.f32 %v17808_v23, %v9650_v50  ;;  %v19788_v45 = vld [vmem:[#allocation58_spill] sm:$0xff] }
0x18d3   : > { %v9699_v25 = vmul.f32 %v17981_v33, %v17981_v33  ;;  %v9700_v51 = vmul.f32 %v17991_v14, %v17991_v14  ;;  %v17999_v29 = vsub.f32 %v19781_v61, %v17946_v21  ;;  %v18002_v3 = vsub.f32 %v19783_v53, %v9622_v30  ;;  %v19787_v30 = vld [vmem:[#allocation48_spill] sm:$0xff]  ;;  %v19799_v53 = vld [vmem:[#allocation46_spill] sm:$0xff] }
0x18d4   : > { %19779 = vst [vmem:[#allocation44_spill] sm:$0xff] %v17988_v55  ;;  %v9719_v0 = vmul.f32 %v17988_v55, %v17988_v55  ;;  %v18009_v58 = vsub.f32 %v19784_v28, %v9650_v50  ;;  %v18012_v40 = vsub.f32 %v19786_v11, %v9630_v56  ;;  %v18020_v54 = vsub.f32 %v19787_v30, %v17907_v32  ;;  %v19805_v30 = vld [vmem:[#allocation47_spill] sm:$0xff] }
0x18d5   : > { %19782 = vst [vmem:[#allocation63_spill] sm:$0xff] %v17999_v29  ;;  %v9718_v23 = vmul.f32 %v17999_v29, %v17999_v29  ;;  %v9694_v62 = vmul.f32 %v18002_v3, %v18002_v3  ;;  %v18026_v42 = vsub.f32 %v19788_v45, %v17907_v32 }
0x18d6   : > { %9801 = vperm.xlu1 %13578, %v9706_v39   ;;  %9768 = vperm.xlu0 %13579, %v9695_v26   ;;  %19785 = vst [vmem:[#allocation43_spill] sm:$0xff] %v18009_v58  ;;  %v9722_v47 = vmul.f32 %v18009_v58, %v18009_v58  ;;  %v9701_v20 = vmul.f32 %v18012_v40, %v18012_v40  ;;  %v19790_v26 = vld [vmem:[#allocation62_spill] sm:$0xff] }
0x18d7   : > { %v9703_v43 = vmul.f32 %v18020_v54, %v18020_v54  ;;  %19789 = vst [vmem:[#allocation60_spill] sm:$0xff] %v18026_v42  ;;  %v9704_v39 = vmul.f32 %v18026_v42, %v18026_v42 }
0x18da   : > { %9816 = vperm.xlu1 %13578, %v9711_v57   ;;  %9771 = vperm.xlu0 %13579, %v9696_v63   ;;  %v18031_v57 = vsub.f32 %v19790_v26, %v9630_v56 }
0x18dc   : > { %v9702_v63 = vmul.f32 %v18031_v57, %v18031_v57 }
0x18de   : > { %9813 = vperm.xlu1 %13578, %v9710_v46   ;;  %9762 = vperm.xlu0 %13579, %v9693_v44   ;;  %v19791_v46 = vld [vmem:[#allocation45_spill] sm:$0xff] }
0x18df   : > { %v18037_v44 = vsub.f32 %v19791_v46, %v17907_v32  ;;  %v12526_v46 = vld [vmem:[#allocation17 + $0x1] ss:$0 sm:$0xff] }
0x18e1   : > { %19792 = vst [vmem:[#allocation51_spill] sm:$0xff] %v18037_v44 }
0x18e2   : > { %9828 = vperm.xlu1 %13578, %v9715_v24   ;;  %9774 = vperm.xlu0 %13579, %v9697_v10   ;;  %v9705_v24 = vmul.f32 %v18037_v44, %v18037_v44  ;;  %v19793_v10 = vld [vmem:[#allocation50_spill] sm:$0xff] }
0x18e6   : > { %9825 = vperm.xlu1 %13578, %v9714_v1   ;;  %9780 = vperm.xlu0 %13579, %v9699_v25   ;;  %v18043_v1 = vsub.f32 %v19793_v10, %v17898_v38  ;;  %v19795_v25 = vld [vmem:[#allocation53_spill] sm:$0xff] }
0x18e7   : > { %v18049_v35 = vsub.f32 %v19795_v25, %v17898_v38 }
0x18e8   : > { %19794 = vst [vmem:[#allocation59_spill] sm:$0xff] %v18043_v1  ;;  %v9708_v56 = vmul.f32 %v18043_v1, %v18043_v1 }
0x18e9   : > { %19796 = vst [vmem:[#allocation55_spill] sm:$0xff] %v18049_v35  ;;  %v9709_v32 = vmul.f32 %v18049_v35, %v18049_v35 }
0x18ea   : > { %9840 = vperm.xlu1 %13578, %v9719_v0   ;;  %9783 = vperm.xlu0 %13579, %v9700_v51   ;;  %v19797_v0 = vld [vmem:[#allocation52_spill] sm:$0xff] }
0x18eb   : > { %v18055_v51 = vsub.f32 %v19797_v0, %v17921_v27 }
0x18ed   : > { %19798 = vst [vmem:[#allocation57_spill] sm:$0xff] %v18055_v51  ;;  %v9712_v61 = vmul.f32 %v18055_v51, %v18055_v51 }
0x18ee   : > { %9837 = vperm.xlu1 %13578, %v9718_v23   ;;  %9765 = vperm.xlu0 %13579, %v9694_v62   ;;  %v18061_v23 = vsub.f32 %v19799_v53, %v17921_v27  ;;  %v19801_v62 = vld [vmem:[#allocation42_spill] sm:$0xff] }
0x18ef   : > { %v18067_v28 = vsub.f32 %v19801_v62, %v17946_v21 }
0x18f0   : > { %19800 = vst [vmem:[#allocation56_spill] sm:$0xff] %v18061_v23  ;;  %v9713_v38 = vmul.f32 %v18061_v23, %v18061_v23 }
0x18f1   : > { %19802 = vst [vmem:[#allocation48_spill] sm:$0xff] %v18067_v28  ;;  %v9716_v11 = vmul.f32 %v18067_v28, %v18067_v28 }
0x18f2   : > { %9849 = vperm.xlu1 %13578, %v9722_v47   ;;  %9786 = vperm.xlu0 %13579, %v9701_v20   ;;  %v19803_v47 = vld [vmem:[#allocation40_spill] sm:$0xff] }
0x18f3   : > { %v18073_v20 = vsub.f32 %v19803_v47, %v17946_v21  ;;  %v12525_v21 = vld [vmem:[#allocation15 + $0x1] ss:$0 sm:$0xff] }
0x18f5   : > { %19804 = vst [vmem:[#allocation58_spill] sm:$0xff] %v18073_v20  ;;  %v9717_v27 = vmul.f32 %v18073_v20, %v18073_v20 }
0x18f6   : > { %9792 = vperm.xlu0 %13579, %v9703_v43   ;;  %v18078_v43 = vsub.f32 %v19805_v30, %v9650_v50  ;;  %10096 = vbcast.lane.b32.xlu1 %v12525_v21, 256 }
0x18f8   : > { %19806 = vst [vmem:[#allocation62_spill] sm:$0xff] %v18078_v43  ;;  %v9720_v45 = vmul.f32 %v18078_v43, %v18078_v43 }
0x18fa   : > { %9795 = vperm.xlu0 %13579, %v9704_v39   ;;  %v19807_v39 = vld [vmem:[#allocation49_spill] sm:$0xff]  ;;  %10100 = vbcast.lane.b32.xlu1 %v12525_v21, 264 }
0x18fb   : > { %v18083_v26 = vsub.f32 %v19807_v39, %v9650_v50 }
0x18fd   : > { %19808 = vst [vmem:[#allocation45_spill] sm:$0xff] %v18083_v26 }
0x18fe   : > { %9789 = vperm.xlu0 %13579, %v9702_v63   ;;  %v9721_v63 = vmul.f32 %v18083_v26, %v18083_v26  ;;  %10104 = vbcast.lane.b32.xlu1 %v12525_v21, 272 }
0x1902   : > { %9798 = vperm.xlu0 %13579, %v9705_v24   ;;  %10108 = vbcast.lane.b32.xlu1 %v12525_v21, 280 }
0x1906   : > { %9807 = vperm.xlu0 %13579, %v9708_v56   ;;  %10152 = vbcast.lane.b32.xlu1 %v12526_v46, 256 }
0x190a   : > { %9810 = vperm.xlu0 %13579, %v9709_v32   ;;  %10156 = vbcast.lane.b32.xlu1 %v12526_v46, 264 }
0x190e   : > { %9819 = vperm.xlu0 %13579, %v9712_v61   ;;  %10160 = vbcast.lane.b32.xlu1 %v12526_v46, 272 }
0x1912   : > { %9822 = vperm.xlu0 %13579, %v9713_v38   ;;  %10164 = vbcast.lane.b32.xlu1 %v12526_v46, 280 }
0x1916   : > { %9831 = vperm.xlu0 %13579, %v9716_v11  }
0x191a   : > { %9834 = vperm.xlu0 %13579, %v9717_v27  }
0x191e   : > { %9843 = vperm.xlu0 %13579, %v9720_v45  }
0x1922   : > { %9846 = vperm.xlu0 %13579, %v9721_v63  }
0x194d   : > { %v9757_v24 = vpop.permute.xlu0 %9756  ;;  %v9778_v53 = vpop.permute.xlu1 %9777 }
0x194e   : > { %v9854_v51 = vrot.slane %v9757_v24, %v14711_v8  ;;  %v9887_v15 = vrot.slane %v9778_v53, %v14724_v18 }
0x1951   : > { %v9760_v10 = vpop.permute.xlu0 %9759  ;;  %v9805_v62 = vpop.permute.xlu1 %9804 }
0x1952   : > { %v9858_v23 = vrot.slane %v9760_v10, %v14720_v16  ;;  %v9930_v34 = vrot.slane %v9805_v62, %v14711_v8 }
0x1954   : > { %v9859_v2 = vsel %vm2176_vm1, %v9858_v23, %v9854_v51 }
0x1955   : > { %v9769_v56 = vpop.permute.xlu0 %9768  ;;  %v9802_v27 = vpop.permute.xlu1 %9801 }
0x1956   : > { %v9873_v55 = vrot.slane %v9769_v56, %v14711_v8  ;;  %v9925_v44 = vrot.slane %v9802_v27, %v14724_v18 }
0x1959   : > { %v9772_v50 = vpop.permute.xlu0 %9771  ;;  %v9817_v45 = vpop.permute.xlu1 %9816 }
0x195a   : > { %v9877_v29 = vrot.slane %v9772_v50, %v14720_v16  ;;  %v9949_v60 = vrot.slane %v9817_v45, %v14711_v8 }
0x195c   : > { %v9878_v10 = vsel %vm2176_vm1, %v9877_v29, %v9873_v55 }
0x195d   : > { %v9763_v25 = vpop.permute.xlu0 %9762  ;;  %v18087_v21 = vpop.permute.xlu1 %9813 }
0x195e   : > { %v9944_v50 = vrot.slane %v18087_v21, %v14724_v18  ;;  %v9863_v24 = vrot.slane %v9763_v25, %v14722_v17 }
0x1960   : > { %v9864_v21 = vsel %vm2183_vm2, %v9863_v24, %v9859_v2 }
0x1961   : > { %v9775_v32 = vpop.permute.xlu0 %9774  ;;  %v9829_v26 = vpop.permute.xlu1 %9828 }
0x1962   : > { %v9882_v56 = vrot.slane %v9775_v32, %v14722_v17 }
0x1965   : > { %v9781_v0 = vpop.permute.xlu0 %9780  ;;  %v9826_v28 = vpop.permute.xlu1 %9825 }
0x1966   : > { %v9892_v32 = vrot.slane %v9781_v0, %v14711_v8 }
0x1969   : > { %v9784_v61 = vpop.permute.xlu0 %9783  ;;  %v9841_v35 = vpop.permute.xlu1 %9840 }
0x196a   : > { %v9896_v62 = vrot.slane %v9784_v61, %v14720_v16 }
0x196d   : > { %v9766_v38 = vpop.permute.xlu0 %9765 }
0x196e   : > { %v9868_v42 = vrot.slane %v9766_v38, %v14724_v18 }
0x1971   : > { %v9787_v11 = vpop.permute.xlu0 %9786 }
0x1972   : > { %v9901_v27 = vrot.slane %v9787_v11, %v14722_v17  ;;  %v9883_v11 = vsel %vm2183_vm2, %v9882_v56, %v9878_v10 }
0x1973   : > { %v9888_v56 = vsel %vm2190_vm3, %v9887_v15, %v9883_v11 }
0x1975   : > { %v9793_v47 = vpop.permute.xlu0 %9792 }
0x1976   : > { %v9911_v55 = vrot.slane %v9793_v47, %v14711_v8 }
0x1979   : > { %v9796_v30 = vpop.permute.xlu0 %9795 }
0x197a   : > { %v9915_v53 = vrot.slane %v9796_v30, %v14720_v16  ;;  %v9838_v30 = vpop.permute.xlu1 %9837 }
0x197c   : > { %v9916_v47 = vsel %vm2176_vm1, %v9915_v53, %v9911_v55 }
0x197d   : > { %v9790_v39 = vpop.permute.xlu0 %9789 }
0x197e   : > { %v9906_v61 = vrot.slane %v9790_v39, %v14724_v18  ;;  %v9850_v55 = vpop.permute.xlu1 %9849 }
0x1981   : > { %v9799_v63 = vpop.permute.xlu0 %9798 }
0x1982   : > { %v9920_v51 = vrot.slane %v9799_v63, %v14722_v17 }
0x1984   : > { %v9921_v0 = vsel %vm2183_vm2, %v9920_v51, %v9916_v47  ;;  %v9963_v51 = vrot.slane %v9826_v28, %v14724_v18 }
0x1985   : > { %v9808_v46 = vpop.permute.xlu0 %9807 }
0x1986   : > { %v9934_v23 = vrot.slane %v9808_v46, %v14720_v16  ;;  %v9897_v46 = vsel %vm2176_vm1, %v9896_v62, %v9892_v32 }
0x1988   : > { %v9935_v39 = vsel %vm2176_vm1, %v9934_v23, %v9930_v34  ;;  %v9926_v34 = vsel %vm2190_vm3, %v9925_v44, %v9921_v0 }
0x1989   : > { %v9811_v43 = vpop.permute.xlu0 %9810 }
0x198a   : > { %v9939_v29 = vrot.slane %v9811_v43, %v14722_v17 }
0x198c   : > { %v9940_v2 = vsel %vm2183_vm2, %v9939_v29, %v9935_v39  ;;  %v9987_v29 = vrot.slane %v9841_v35, %v14711_v8 }
0x198d   : > { %v9820_v20 = vpop.permute.xlu0 %9819  ;;  %v9945_v15 = vsel %vm2190_vm3, %v9944_v50, %v9940_v2 }
0x198e   : > { %v9953_v25 = vrot.slane %v9820_v20, %v14720_v16  ;;  %v9968_v20 = vrot.slane %v9829_v26, %v14711_v8 }
0x1990   : > { %v9954_v10 = vsel %vm2176_vm1, %v9953_v25, %v9949_v60 }
0x1991   : > { %v9823_v58 = vpop.permute.xlu0 %9822 }
0x1992   : > { %v9958_v38 = vrot.slane %v9823_v58, %v14722_v17  ;;  %v9869_v58 = vsel %vm2190_vm3, %v9868_v42, %v9864_v21 }
0x1993   : > { %v10003_v60 = vsel %vm2325_vm4, %v9888_v56, %v9869_v58 }
0x1994   : > { %v9959_v26 = vsel %vm2183_vm2, %v9958_v38, %v9954_v10 }
0x1995   : > { %v9832_v1 = vpop.permute.xlu0 %9831 }
0x1996   : > { %v9972_v63 = vrot.slane %v9832_v1, %v14720_v16  ;;  %v9902_v1 = vsel %vm2183_vm2, %v9901_v27, %v9897_v46  ;;  %v9982_v27 = vrot.slane %v9838_v30, %v14724_v18  ;;  %v10001_v30 = vrot.slane %v9850_v55, %v14724_v18 }
0x1997   : > { %v9907_v53 = vsel %vm2190_vm3, %v9906_v61, %v9902_v1 }
0x1998   : > { %v9973_v62 = vsel %vm2176_vm1, %v9972_v63, %v9968_v20  ;;  %v10004_v25 = vsel %vm2327_vm5, %v9907_v53, %v10003_v60  ;;  %v18154_v20 = vpop.permute.xlu1 %10096 }
0x1999   : > { %v9835_v45 = vpop.permute.xlu0 %9834  ;;  %v10005_v44 = vsel %vm2329_vm6, %v9926_v34, %v10004_v25 }
0x199a   : > { %v9977_v43 = vrot.slane %v9835_v45, %v14722_v17  ;;  %v9964_v45 = vsel %vm2190_vm3, %v9963_v51, %v9959_v26  ;;  %v10006_v63 = vsel %vm2331_vm7, %v9945_v15, %v10005_v44 }
0x199b   : > { %v10007_v35 = vsel %vm2333_vm8, %v9964_v45, %v10006_v63 }
0x199c   : > { %v9978_v42 = vsel %vm2183_vm2, %v9977_v43, %v9973_v62  ;;  %v18156_v46 = vpop.permute.xlu1 %10100 }
0x199d   : > { %v9844_v24 = vpop.permute.xlu0 %9843  ;;  %v9983_v61 = vsel %vm2190_vm3, %v9982_v27, %v9978_v42 }
0x199e   : > { %v9991_v23 = vrot.slane %v9844_v24, %v14720_v16  ;;  %v10008_v11 = vsel %vm2335_vm9, %v9983_v61, %v10007_v35 }
0x19a0   : > { %v9992_v38 = vsel %vm2176_vm1, %v9991_v23, %v9987_v29  ;;  %v18158_v0 = vpop.permute.xlu1 %10104 }
0x19a1   : > { %v9847_v28 = vpop.permute.xlu0 %9846 }
0x19a2   : > { %v9996_v32 = vrot.slane %v9847_v28, %v14722_v17 }
0x19a4   : > { %v9997_v50 = vsel %vm2183_vm2, %v9996_v32, %v9992_v38  ;;  %v18160_v2 = vpop.permute.xlu1 %10108 }
0x19a5   : > { %v10002_v21 = vsel %vm2190_vm3, %v10001_v30, %v9997_v50 }
0x19a6   : > { %v10009_v47 = vsel %vm2337_vm10, %v10002_v21, %v10008_v11 }
0x19a7   : > { %v10011_v43 = vsel %vm2339_vm11, %v10009_v47, 0.0 }
0x19a8   : > { %10012 = vadd.xlane.f32.xlu0 %v10011_v43  ;;  %v18162_v10 = vpop.permute.xlu1 %10152 }
0x19ac   : > { %v18166_v56 = vpop.permute.xlu1 %10156 }
0x19b0   : > { %v18180_v55 = vpop.permute.xlu1 %10160 }
0x19b4   : > { %v18206_v61 = vpop.permute.xlu1 %10164 }
0x1a35   : > { %v10013_v39 = vpop.xlane.xlu0 %10012 }
0x1a36   : > { %v10014_v58 = vmul.f32 0.03125, %v10013_v39 }
0x1a38   : > { %v10015_v1 = vadd.f32 1e-05, %v10014_v58 }
0x1a3a   : > { %13618 = vrsqrt.f32 %v10015_v1 }
0x1a44   : > { %v18164_v24 = vpop.eup %13618 }
0x1a45   : > { %v10021_v53 = vrot.slane %v18164_v24, %v14703_v4  ;;  %v10025_v26 = vrot.slane %v18164_v24, %v14705_v5  ;;  %v10029_v62 = vrot.slane %v18164_v24, %v14707_v6  ;;  %v10033_v25 = vrot.slane %v18164_v24, %v14709_v7 }
0x1a46   : > { %v10037_v30 = vrot.slane %v18164_v24, %v14713_v12  ;;  %v10041_v1 = vrot.slane %v18164_v24, %v14715_v13 }
0x1a47   : > { %v10059_v51 = vmul.f32 %v10021_v53, %v17918_v36  ;;  %v10058_v34 = vmul.f32 %v10021_v53, %v17904_v22  ;;  %v10062_v42 = vmul.f32 %v10025_v26, %v17932_v37  ;;  %v10067_v23 = vmul.f32 %v10029_v62, %v17991_v14 }
0x1a48   : > { %v10063_v15 = vmul.f32 %v10025_v26, %v17943_v19  ;;  %v10065_v29 = vmul.f32 %v10025_v26, %v17901_v41  ;;  %v10060_v19 = vmul.f32 %v10021_v53, %v17957_v9  ;;  %v10070_v41 = vmul.f32 %v10033_v25, %v18020_v54 }
0x1a49   : > { %v10115_v27 = vmul.f32 %v18156_v46, %v10059_v51  ;;  %v10114_v60 = vmul.f32 %v18154_v20, %v10058_v34  ;;  %v10118_v37 = vmul.f32 %v18154_v20, %v10062_v42  ;;  %v10123_v14 = vmul.f32 %v18156_v46, %v10067_v23 }
0x1a4a   : > { %v10119_v44 = vmul.f32 %v18156_v46, %v10063_v15  ;;  %v10121_v32 = vmul.f32 %v18160_v2, %v10065_v29  ;;  %v10116_v9 = vmul.f32 %v18158_v0, %v10060_v19  ;;  %v10126_v54 = vmul.f32 %v18154_v20, %v10070_v41  ;;  %v19811_v29 = vld [vmem:[#allocation60_spill] sm:$0xff]  ;;  %v19813_v41 = vld [vmem:[#allocation51_spill] sm:$0xff] }
0x1a4b   : > { %v18187_v36 = vadd.f32 %v18166_v56, %v10115_v27  ;;  %v18190_v22 = vadd.f32 %v18162_v10, %v10114_v60  ;;  %v18199_v45 = vadd.f32 %v18162_v10, %v10118_v37  ;;  %v18202_v28 = vadd.f32 %v18166_v56, %v10123_v14 }
0x1a4c   : > { %v18215_v38 = vadd.f32 %v18166_v56, %v10119_v44  ;;  %v18218_v63 = vadd.f32 %v18206_v61, %v10121_v32  ;;  %v10064_v50 = vmul.f32 %v10025_v26, %v17969_v49  ;;  %v10069_v35 = vmul.f32 %v10029_v62, %v18031_v57 }
0x1a4d   : > { %10251 = vperm.xlu1 %13578, %v18187_v36   ;;  %10248 = vperm.xlu0 %13579, %v18190_v22   ;;  %v18225_v21 = vadd.f32 %v18180_v55, %v10116_v9  ;;  %v18228_v11 = vadd.f32 %v18162_v10, %v10126_v54  ;;  %v10066_v39 = vmul.f32 %v10029_v62, %v17981_v33 }
0x1a4e   : > { %v10120_v47 = vmul.f32 %v18158_v0, %v10064_v50  ;;  %v10125_v43 = vmul.f32 %v18160_v2, %v10069_v35  ;;  %v10074_v49 = vmul.f32 %v10037_v30, %v17915_v48  ;;  %v10061_v57 = vmul.f32 %v10021_v53, %v18002_v3  ;;  %v19815_v50 = vld [vmem:[#allocation61_spill] sm:$0xff] }
0x1a4f   : > { %v10073_v58 = vmul.f32 %v10033_v25, %v17929_v52  ;;  %v10122_v33 = vmul.f32 %v18154_v20, %v10066_v39  ;;  %v10068_v52 = vmul.f32 %v10029_v62, %v18012_v40  ;;  %v10078_v23 = vmul.f32 %v10041_v1, %v17940_v31  ;;  %v19812_v31 = vld [vmem:[#allocation64_spill] sm:$0xff]  ;;  %v19817_v39 = vld [vmem:[#allocation54_spill] sm:$0xff] }
0x1a50   : > { %v18241_v26 = vadd.f32 %v18180_v55, %v10120_v47  ;;  %v18244_v51 = vadd.f32 %v18206_v61, %v10125_v43  ;;  %v10130_v48 = vmul.f32 %v18154_v20, %v10074_v49  ;;  %v10117_v3 = vmul.f32 %v18160_v2, %v10061_v57  ;;  %v19816_v47 = vld [vmem:[#allocation59_spill] sm:$0xff]  ;;  %v19818_v57 = vld [vmem:[#allocation41_spill] sm:$0xff] }
0x1a51   : > { %10260 = vperm.xlu1 %13578, %v18199_v45   ;;  %10275 = vperm.xlu0 %13579, %v18202_v28   ;;  %v18253_v53 = vadd.f32 %v18162_v10, %v10122_v33  ;;  %v10129_v42 = vmul.f32 %v18160_v2, %v10073_v58  ;;  %v10124_v60 = vmul.f32 %v18158_v0, %v10068_v52 }
0x1a52   : > { %v18256_v34 = vadd.f32 %v18162_v10, %v10130_v48  ;;  %v18263_v27 = vadd.f32 %v18206_v61, %v10117_v3  ;;  %v10045_v40 = vrot.slane %v18164_v24, %v19602_v59  ;;  %v10134_v15 = vmul.f32 %v18154_v20, %v10078_v23 }
0x1a53   : > { %v18269_v62 = vadd.f32 %v18206_v61, %v10129_v42  ;;  %v10071_v37 = vmul.f32 %v10033_v25, %v19811_v29  ;;  %v10077_v14 = vmul.f32 %v10037_v30, %v19812_v31  ;;  %v18277_v19 = vadd.f32 %v18180_v55, %v10124_v60  ;;  %v19820_v42 = vld [vmem:[#allocation55_spill] sm:$0xff]  ;;  %v19823_v29 = vld [vmem:[#allocation44_spill] sm:$0xff] }
0x1a54   : > { %19809 = vst [vmem:[#allocation50_spill] sm:$0xff] %v18256_v34  ;;  %v10072_v44 = vmul.f32 %v10033_v25, %v19813_v41  ;;  %v18281_v32 = vadd.f32 %v18162_v10, %v10134_v15  ;;  %v10082_v35 = vmul.f32 %v10045_v40, %v19815_v50  ;;  %v10075_v43 = vmul.f32 %v10037_v30, %v19816_v47  ;;  %v19829_v47 = vld [vmem:[#allocation56_spill] sm:$0xff] }
0x1a55   : > { %10263 = vperm.xlu1 %13578, %v18215_v38   ;;  %10269 = vperm.xlu0 %13579, %v18218_v63   ;;  %19810 = vst [vmem:[#allocation53_spill] sm:$0xff] %v18269_v62  ;;  %v10127_v9 = vmul.f32 %v18156_v46, %v10071_v37  ;;  %v10133_v54 = vmul.f32 %v18160_v2, %v10077_v14 }
0x1a56   : > { %19814 = vst [vmem:[#allocation52_spill] sm:$0xff] %v18281_v32  ;;  %v10081_v49 = vmul.f32 %v10041_v1, %v19817_v39  ;;  %v10049_v25 = vrot.slane %v18164_v24, %v19818_v57  ;;  %v10128_v48 = vmul.f32 %v18158_v0, %v10072_v44  ;;  %v10138_v3 = vmul.f32 %v18154_v20, %v10082_v35  ;;  %v19826_v44 = vld [vmem:[#allocation57_spill] sm:$0xff] }
0x1a57   : > { %v18293_v58 = vadd.f32 %v18166_v56, %v10127_v9  ;;  %v18296_v33 = vadd.f32 %v18206_v61, %v10133_v54  ;;  %v10131_v52 = vmul.f32 %v18156_v46, %v10075_v43  ;;  %v10076_v23 = vmul.f32 %v10037_v30, %v19820_v42  ;;  %v19827_v54 = vld [vmem:[#allocation63_spill] sm:$0xff] }
0x1a58   : > { %v18305_v24 = vadd.f32 %v18180_v55, %v10128_v48  ;;  %v18308_v60 = vadd.f32 %v18162_v10, %v10138_v3  ;;  %v10137_v15 = vmul.f32 %v18160_v2, %v10081_v49  ;;  %v10086_v37 = vmul.f32 %v10049_v25, %v19823_v29  ;;  %v19831_v48 = vld [vmem:[#allocation43_spill] sm:$0xff] }
0x1a59   : > { %10254 = vperm.xlu1 %13578, %v18225_v21   ;;  %10284 = vperm.xlu0 %13579, %v18228_v11   ;;  %19819 = vst [vmem:[#allocation46_spill] sm:$0xff] %v18296_v33  ;;  %v18315_v31 = vadd.f32 %v18166_v56, %v10131_v52  ;;  %v10132_v14 = vmul.f32 %v18158_v0, %v10076_v23  ;;  %v19832_v52 = vld [vmem:[#allocation48_spill] sm:$0xff] }
0x1a5a   : > { %19821 = vst [vmem:[#allocation42_spill] sm:$0xff] %v18305_v24  ;;  %19822 = vst [vmem:[#allocation40_spill] sm:$0xff] %v18308_v60  ;;  %v18319_v30 = vadd.f32 %v18206_v61, %v10137_v15  ;;  %v10142_v41 = vmul.f32 %v18154_v20, %v10086_v37  ;;  %v10079_v9 = vmul.f32 %v10041_v1, %v19826_v44 }
0x1a5b   : > { %19824 = vst [vmem:[#allocation47_spill] sm:$0xff] %v18315_v31  ;;  %v10085_v50 = vmul.f32 %v10045_v40, %v19827_v54  ;;  %v18327_v35 = vadd.f32 %v18180_v55, %v10132_v14  ;;  %v10080_v43 = vmul.f32 %v10041_v1, %v19829_v47  ;;  %v10089_v3 = vmul.f32 %v10049_v25, %v19831_v48  ;;  %v19839_v54 = vld [vmem:[#allocation62_spill] sm:$0xff] }
0x1a5c   : > { %19825 = vst [vmem:[#allocation49_spill] sm:$0xff] %v18319_v30  ;;  %v18331_v39 = vadd.f32 %v18162_v10, %v10142_v41  ;;  %v10135_v49 = vmul.f32 %v18156_v46, %v10079_v9  ;;  %v10083_v42 = vmul.f32 %v10045_v40, %v19832_v52  ;;  %v19837_v41 = vld [vmem:[#allocation58_spill] sm:$0xff] }
0x1a5d   : > { %10266 = vperm.xlu1 %13578, %v18241_v26   ;;  %10281 = vperm.xlu0 %13579, %v18244_v51   ;;  %19828 = vst [vmem:[#allocation60_spill] sm:$0xff] %v18327_v35  ;;  %v10141_v20 = vmul.f32 %v18160_v2, %v10085_v50  ;;  %v10136_v10 = vmul.f32 %v18158_v0, %v10080_v43  ;;  %v19841_v43 = vld [vmem:[#allocation45_spill] sm:$0xff]  ;;  %v10204_v52 = vld [vmem:[#allocation21 + $0x28] sm:$0xff] }
0x1a5e   : > { %19830 = vst [vmem:[#allocation64_spill] sm:$0xff] %v18331_v39  ;;  %v18340_v23 = vadd.f32 %v18166_v56, %v10135_v49  ;;  %v10145_v15 = vmul.f32 %v18160_v2, %v10089_v3  ;;  %v10139_v14 = vmul.f32 %v18156_v46, %v10083_v42  ;;  %v10084_v44 = vmul.f32 %v10045_v40, %v19837_v41  ;;  %v10203_v3 = vld [vmem:[#allocation21 + $0x20] sm:$0xff] }
0x1a5f   : > { %v18343_v1 = vadd.f32 %v18206_v61, %v10141_v20  ;;  %v18350_v29 = vadd.f32 %v18180_v55, %v10136_v10  ;;  %v10087_v50 = vmul.f32 %v10049_v25, %v19839_v54  ;;  %v10088_v40 = vmul.f32 %v10049_v25, %v19841_v43  ;;  %v10205_v25 = vld [vmem:[#allocation21 + $0x30] sm:$0xff]  ;;  %v10206_v10 = vld [vmem:[#allocation21 + $0x38] sm:$0xff] }
0x1a60   : > { %19833 = vst [vmem:[#allocation51_spill] sm:$0xff] %v18340_v23  ;;  %v18353_v37 = vadd.f32 %v18206_v61, %v10145_v15  ;;  %v18360_v2 = vadd.f32 %v18166_v56, %v10139_v14  ;;  %v10140_v9 = vmul.f32 %v18158_v0, %v10084_v44  ;;  %v13368_v42 = vpack.c.bf16 %v10204_v52, %v10203_v3 }
0x1a61   : > { %10272 = vperm.xlu1 %13578, %v18253_v53   ;;  %10296 = vperm.xlu0 %13579, %v18256_v34   ;;  %19834 = vst [vmem:[#allocation61_spill] sm:$0xff] %v18343_v1  ;;  %19835 = vst [vmem:[#allocation59_spill] sm:$0xff] %v18350_v29  ;;  %v10143_v47 = vmul.f32 %v18156_v46, %v10087_v50  ;;  %v10144_v20 = vmul.f32 %v18158_v0, %v10088_v40  ;;  %v19844_v46 = vmov 0.0|0.0  }
0x1a62   : > { %19836 = vst [vmem:[#allocation54_spill] sm:$0xff] %v18353_v37  ;;  %19838 = vst [vmem:[#allocation55_spill] sm:$0xff] %v18360_v2  ;;  %v18366_v61 = vadd.f32 %v18180_v55, %v10140_v9  ;;  %13369 = vmatpush3.bf16.msra.mxu0 %v13368_v42  ;;  %v13371_v15 = vpack.c.bf16 %v10206_v10, %v10205_v25 }
0x1a63   : > { %v18372_v49 = vadd.f32 %v18166_v56, %v10143_v47  ;;  %v18377_v48 = vadd.f32 %v18180_v55, %v10144_v20  ;;  %13370 = vmatprep.subr.bf16.mxu0 %v19844_v46 }
0x1a64   : > { %19840 = vst [vmem:[#allocation44_spill] sm:$0xff] %v18366_v61 }
0x1a65   : > { %10257 = vperm.xlu1 %13578, %v18263_v27   ;;  %10293 = vperm.xlu0 %13579, %v18269_v62   ;;  %19842 = vst [vmem:[#allocation57_spill] sm:$0xff] %v18372_v49  ;;  %19843 = vst [vmem:[#allocation63_spill] sm:$0xff] %v18377_v48 }
0x1a66   : > { %13372 = vmatpush3.bf16.msra.mxu0 %v13371_v15 }
0x1a67   : > { %13385 = vmatprep.subr.bf16.mxu0 %v19844_v46 }
0x1a69   : > { %10278 = vperm.xlu1 %13578, %v18277_v19   ;;  %10308 = vperm.xlu0 %13579, %v18281_v32  }
0x1a6d   : > { %10287 = vperm.xlu1 %13578, %v18293_v58   ;;  %10305 = vperm.xlu0 %13579, %v18296_v33  }
0x1a71   : > { %10290 = vperm.xlu1 %13578, %v18305_v24   ;;  %10320 = vperm.xlu0 %13579, %v18308_v60  }
0x1a75   : > { %10299 = vperm.xlu1 %13578, %v18315_v31   ;;  %10317 = vperm.xlu0 %13579, %v18319_v30  }
0x1a79   : > { %10302 = vperm.xlu1 %13578, %v18327_v35   ;;  %10332 = vperm.xlu0 %13579, %v18331_v39  }
0x1a7d   : > { %10311 = vperm.xlu1 %13578, %v18340_v23   ;;  %10329 = vperm.xlu0 %13579, %v18343_v1  }
0x1a81   : > { %10314 = vperm.xlu1 %13578, %v18350_v29   ;;  %10341 = vperm.xlu0 %13579, %v18353_v37  }
0x1a85   : > { %10323 = vperm.xlu1 %13578, %v18360_v2  }
0x1a89   : > { %10326 = vperm.xlu1 %13578, %v18366_v61  }
0x1a8d   : > { %10335 = vperm.xlu1 %13578, %v18372_v49  }
0x1a91   : > { %10338 = vperm.xlu1 %13578, %v18377_v48  }
0x1acc   : > { %v10252_v0 = vpop.permute.xlu1 %10251  ;;  %v10249_v56 = vpop.permute.xlu0 %10248 }
0x1acd   : > { %v10350_v2 = vrot.slane %v10252_v0, %v14720_v16  ;;  %v10346_v30 = vrot.slane %v10249_v56, %v14711_v8 }
0x1acf   : > { %v10351_v31 = vsel %vm2176_vm1, %v10350_v2, %v10346_v30 }
0x1ad0   : > { %v10261_v14 = vpop.permute.xlu1 %10260  ;;  %v10276_v41 = vpop.permute.xlu0 %10275 }
0x1ad1   : > { %v10365_v33 = vrot.slane %v10261_v14, %v14711_v8  ;;  %v10388_v62 = vrot.slane %v10276_v41, %v14720_v16 }
0x1ad4   : > { %v10264_v55 = vpop.permute.xlu1 %10263  ;;  %v10270_v44 = vpop.permute.xlu0 %10269 }
0x1ad5   : > { %v10369_v29 = vrot.slane %v10264_v55, %v14720_v16  ;;  %v10379_v24 = vrot.slane %v10270_v44, %v14724_v18 }
0x1ad7   : > { %v10370_v56 = vsel %vm2176_vm1, %v10369_v29, %v10365_v33 }
0x1ad8   : > { %v10255_v9 = vpop.permute.xlu1 %10254  ;;  %v10285_v54 = vpop.permute.xlu0 %10284 }
0x1ad9   : > { %v10355_v60 = vrot.slane %v10255_v9, %v14722_v17  ;;  %v10403_v55 = vrot.slane %v10285_v54, %v14711_v8 }
0x1adb   : > { %v10356_v14 = vsel %vm2183_vm2, %v10355_v60, %v10351_v31 }
0x1adc   : > { %v10267_v50 = vpop.permute.xlu1 %10266  ;;  %v10282_v47 = vpop.permute.xlu0 %10281 }
0x1add   : > { %v10374_v35 = vrot.slane %v10267_v50, %v14722_v17  ;;  %v10398_v50 = vrot.slane %v10282_v47, %v14724_v18 }
0x1adf   : > { %v10375_v41 = vsel %vm2183_vm2, %v10374_v35, %v10370_v56 }
0x1ae0   : > { %v10273_v43 = vpop.permute.xlu1 %10272  ;;  %v10297_v40 = vpop.permute.xlu0 %10296 }
0x1ae1   : > { %v10384_v0 = vrot.slane %v10273_v43, %v14711_v8 }
0x1ae3   : > { %v10389_v43 = vsel %vm2176_vm1, %v10388_v62, %v10384_v0 }
0x1ae4   : > { %v10258_v20 = vpop.permute.xlu1 %10257  ;;  %v10294_v3 = vpop.permute.xlu0 %10293 }
0x1ae5   : > { %v10360_v44 = vrot.slane %v10258_v20, %v14724_v18 }
0x1ae8   : > { %v10279_v52 = vpop.permute.xlu1 %10278  ;;  %v10309_v42 = vpop.permute.xlu0 %10308 }
0x1ae9   : > { %v10393_v9 = vrot.slane %v10279_v52, %v14722_v17  ;;  %v10422_v52 = vrot.slane %v10297_v40, %v14711_v8  ;;  %v10441_v35 = vrot.slane %v10309_v42, %v14711_v8 }
0x1aec   : > { %v10288_v25 = vpop.permute.xlu1 %10287  ;;  %v10306_v15 = vpop.permute.xlu0 %10305 }
0x1aed   : > { %v10407_v34 = vrot.slane %v10288_v25, %v14720_v16  ;;  %v10436_v56 = vrot.slane %v10306_v15, %v14724_v18 }
0x1aef   : > { %v10408_v20 = vsel %vm2176_vm1, %v10407_v34, %v10403_v55 }
0x1af0   : > { %v10291_v10 = vpop.permute.xlu1 %10290  ;;  %v10321_v37 = vpop.permute.xlu0 %10320 }
0x1af1   : > { %v10412_v30 = vrot.slane %v10291_v10, %v14722_v17  ;;  %v10460_v62 = vrot.slane %v10321_v37, %v14711_v8 }
0x1af3   : > { %v10413_v25 = vsel %vm2183_vm2, %v10412_v30, %v10408_v20 }
0x1af4   : > { %v10300_v48 = vpop.permute.xlu1 %10299  ;;  %v10318_v61 = vpop.permute.xlu0 %10317 }
0x1af5   : > { %v10426_v2 = vrot.slane %v10300_v48, %v14720_v16  ;;  %v10394_v48 = vsel %vm2183_vm2, %v10393_v9, %v10389_v43  ;;  %v10455_v9 = vrot.slane %v10318_v61, %v14724_v18 }
0x1af6   : > { %v10399_v34 = vsel %vm2190_vm3, %v10398_v50, %v10394_v48 }
0x1af7   : > { %v10427_v40 = vsel %vm2176_vm1, %v10426_v2, %v10422_v52 }
0x1af8   : > { %v10303_v49 = vpop.permute.xlu1 %10302  ;;  %v10333_v23 = vpop.permute.xlu0 %10332 }
0x1af9   : > { %v10431_v33 = vrot.slane %v10303_v49, %v14722_v17 }
0x1afb   : > { %v10432_v10 = vsel %vm2183_vm2, %v10431_v33, %v10427_v40 }
0x1afc   : > { %v10312_v1 = vpop.permute.xlu1 %10311  ;;  %v10330_v60 = vpop.permute.xlu0 %10329  ;;  %v10437_v2 = vsel %vm2190_vm3, %v10436_v56, %v10432_v10  ;;  %v12533_v10 = vld [vmem:[%s19635_s21 + $0x60] sm:$0xff]  ;;  %v12536_v56 = vld [vmem:[%s19635_s21 + $0x78] sm:$0xff] }
0x1afd   : > { %v10445_v29 = vrot.slane %v10312_v1, %v14720_v16  ;;  %v10380_v1 = vsel %vm2190_vm3, %v10379_v24, %v10375_v41  ;;  %v10474_v50 = vrot.slane %v10330_v60, %v14724_v18 }
0x1aff   : > { %v10446_v42 = vsel %vm2176_vm1, %v10445_v29, %v10441_v35 }
0x1b00   : > { %v10315_v39 = vpop.permute.xlu1 %10314  ;;  %v10342_v41 = vpop.permute.xlu0 %10341 }
0x1b01   : > { %v10450_v31 = vrot.slane %v10315_v39, %v14722_v17  ;;  %v10361_v39 = vsel %vm2190_vm3, %v10360_v44, %v10356_v14  ;;  %v10479_v44 = vrot.slane %v10333_v23, %v14711_v8 }
0x1b02   : > { %v10495_v30 = vsel %vm2325_vm4, %v10380_v1, %v10361_v39  ;;  %v12529_v1 = vld [vmem:[%s19635_s21 + $0x40] sm:$0xff]  ;;  %v12532_v39 = vld [vmem:[%s19635_s21 + $0x58] sm:$0xff] }
0x1b03   : > { %v10451_v24 = vsel %vm2183_vm2, %v10450_v31, %v10446_v42  ;;  %v10496_v15 = vsel %vm2327_vm5, %v10399_v34, %v10495_v30  ;;  %v10493_v31 = vrot.slane %v10342_v41, %v14724_v18  ;;  %v12534_v42 = vld [vmem:[%s19635_s21 + $0x68] sm:$0xff]  ;;  %v12535_v34 = vld [vmem:[%s19635_s21 + $0x70] sm:$0xff] }
0x1b04   : > { %v10324_v32 = vpop.permute.xlu1 %10323  ;;  %v10456_v33 = vsel %vm2190_vm3, %v10455_v9, %v10451_v24  ;;  %v13383_v24 = vpack.c.bf16 %v12536_v56, %v12535_v34 }
0x1b05   : > { %v10464_v47 = vrot.slane %v10324_v32, %v14720_v16  ;;  %v10417_v32 = vrot.slane %v10294_v3, %v14724_v18 }
0x1b07   : > { %v10465_v55 = vsel %vm2176_vm1, %v10464_v47, %v10460_v62  ;;  %v10418_v37 = vsel %vm2190_vm3, %v10417_v32, %v10413_v25  ;;  %v12530_v25 = vld [vmem:[%s19635_s21 + $0x48] sm:$0xff]  ;;  %v12531_v62 = vld [vmem:[%s19635_s21 + $0x50] sm:$0xff] }
0x1b08   : > { %v10327_v54 = vpop.permute.xlu1 %10326  ;;  %v10497_v61 = vsel %vm2329_vm6, %v10418_v37, %v10496_v15  ;;  %v13374_v40 = vpack.c.bf16 %v12530_v25, %v12529_v1  ;;  %v13377_v32 = vpack.c.bf16 %v12532_v39, %v12531_v62  ;;  %v12537_v15 = vld [vmem:[#allocation24 + $0x1] ss:$0 sm:$0xff] }
0x1b09   : > { %v10469_v49 = vrot.slane %v10327_v54, %v14722_v17  ;;  %v10498_v52 = vsel %vm2331_vm7, %v10437_v2, %v10497_v61 }
0x1b0a   : > { %v10499_v48 = vsel %vm2333_vm8, %v10456_v33, %v10498_v52  ;;  %13375 = vmatpush3.bf16.msra.mxu1 %v13374_v40 }
0x1b0b   : > { %v10470_v14 = vsel %vm2183_vm2, %v10469_v49, %v10465_v55  ;;  %v19845_v49 = vmov 0.0   ;;  %13376 = vmatprep.subr.bf16.mxu1 %v19844_v46  ;;  %v12527_v55 = vld [vmem:[#allocation23 + $0x1] ss:$0 sm:$0xff] }
0x1b0c   : > { %v10336_v0 = vpop.permute.xlu1 %10335  ;;  %v10475_v54 = vsel %vm2190_vm3, %v10474_v50, %v10470_v14 }
0x1b0d   : > { %v10483_v3 = vrot.slane %v10336_v0, %v14720_v16  ;;  %v10500_v35 = vsel %vm2335_vm9, %v10475_v54, %v10499_v48  ;;  %v13380_v0 = vpack.c.bf16 %v12534_v42, %v12533_v10 }
0x1b0e   : > { %13378 = vmatpush3.bf16.msra.mxu1 %v13377_v32 }
0x1b0f   : > { %v10484_v60 = vsel %vm2176_vm1, %v10483_v3, %v10479_v44  ;;  %13379 = vmatprep.subr.bf16.mxu1 %v19844_v46 }
0x1b10   : > { %v10339_v29 = vpop.permute.xlu1 %10338 }
0x1b11   : > { %v10488_v43 = vrot.slane %v10339_v29, %v14722_v17 }
0x1b12   : > { %13381 = vmatpush3.bf16.msra.mxu1 %v13380_v0 }
0x1b13   : > { %v10489_v47 = vsel %vm2183_vm2, %v10488_v43, %v10484_v60  ;;  %13382 = vmatprep.subr.bf16.mxu1 %v19844_v46 }
0x1b14   : > { %v10494_v23 = vsel %vm2190_vm3, %v10493_v31, %v10489_v47 }
0x1b15   : > { %v10501_v20 = vsel %vm2337_vm10, %v10494_v23, %v10500_v35 }
0x1b16   : > { %13173 = vmatmul.mubr.msk.f32.vlgmr.msra.gmra.mrb[50].mxu0 %vm2339_vm11, %v10501_v20  ;;  %13384 = vmatpush3.bf16.msra.mxu1 %v13383_v24 }
0x1b17   : > { %13202 = vmatprep.mubr.msk.f32.mxu0 %vm14140_vm0, %v19845_v49 }
0x1be9   : > { %v10570_v37 = vpop.f32.mrb[50].mxu0 }
0x1bea   : > { %v10571_v9 = vadd.f32 %v12527_v55, %v10570_v37  ;;  %v13174_v14 = vpop.f32.mrb[51].mxu0 }
0x1bec   : > { %v10575_v3 = vmul.f32 0.70710677, %v10571_v9  ;;  %v10574_v2 = vmul.f32 0.5, %v10571_v9 }
0x1bee   : > { %13620 = verf.f32 %v10575_v3  ;;  %v19853_v3 = vld [vmem:[#allocation42_spill] sm:$0xff] }
0x1bf8   : > { %v13621_v30 = vpop.eup %13620 }
0x1bf9   : > { %v10577_v50 = vadd.f32 1.0, %v13621_v30 }
0x1bfb   : > { %v10578_v41 = vmul.f32 %v10577_v50, %v10574_v2 }
0x1bfd   : > { %13192 = vmatmul.mubr.msk.f32.vlgmr.msra.gmra.mrb[50].mxu1 %vm5712_vm13, %v10578_v41  ;;  %v19856_v41 = vld [vmem:[#allocation47_spill] sm:$0xff] }
0x1cd0   : > { %v10665_v44 = vpop.f32.mrb[50].mxu1 }
0x1cd1   : > { %v10666_v33 = vadd.f32 %v12537_v15, %v10665_v44  ;;  %v13193_v29 = vpop.f32.mrb[51].mxu1 }
0x1cd2   : > { %v19858_v29 = vld [vmem:[#allocation52_spill] sm:$0xff] }
0x1cd3   : > { %v10673_v61 = vrot.slane %v10666_v33, %v14703_v4  ;;  %v10692_v54 = vrot.slane %v10666_v33, %v14705_v5  ;;  %v10711_v43 = vrot.slane %v10666_v33, %v14707_v6  ;;  %v10730_v52 = vrot.slane %v10666_v33, %v14709_v7 }
0x1cd4   : > { %v10749_v31 = vrot.slane %v10666_v33, %v14713_v12  ;;  %v10768_v60 = vrot.slane %v10666_v33, %v14715_v13  ;;  %v10787_v47 = vrot.slane %v10666_v33, %v19602_v59  ;;  %v10806_v48 = vrot.slane %v10666_v33, %v19818_v57 }
0x1cd5   : > { %10679 = vbcast.lane.b32.xlu0 %v10673_v61, 264  ;;  %10675 = vbcast.lane.b32.xlu1 %v10673_v61, 256 }
0x1cd9   : > { %10698 = vbcast.lane.b32.xlu0 %v10692_v54, 264  ;;  %10694 = vbcast.lane.b32.xlu1 %v10692_v54, 256 }
0x1cdd   : > { %10702 = vbcast.lane.b32.xlu0 %v10692_v54, 272  ;;  %10683 = vbcast.lane.b32.xlu1 %v10673_v61, 272 }
0x1ce1   : > { %10717 = vbcast.lane.b32.xlu0 %v10711_v43, 264  ;;  %10713 = vbcast.lane.b32.xlu1 %v10711_v43, 256 }
0x1ce5   : > { %10706 = vbcast.lane.b32.xlu0 %v10692_v54, 280  ;;  %10687 = vbcast.lane.b32.xlu1 %v10673_v61, 280  ;;  %v19859_v54 = vld [vmem:[#allocation60_spill] sm:$0xff] }
0x1ce9   : > { %10732 = vbcast.lane.b32.xlu0 %v10730_v52, 256  ;;  %10721 = vbcast.lane.b32.xlu1 %v10711_v43, 272 }
0x1ced   : > { %10725 = vbcast.lane.b32.xlu0 %v10711_v43, 280  ;;  %10736 = vbcast.lane.b32.xlu1 %v10730_v52, 264 }
0x1cf1   : > { %10751 = vbcast.lane.b32.xlu0 %v10749_v31, 256  ;;  %10740 = vbcast.lane.b32.xlu1 %v10730_v52, 272 }
0x1cf5   : > { %10744 = vbcast.lane.b32.xlu0 %v10730_v52, 280  ;;  %10755 = vbcast.lane.b32.xlu1 %v10749_v31, 264 }
0x1cf9   : > { %10770 = vbcast.lane.b32.xlu0 %v10768_v60, 256  ;;  %10759 = vbcast.lane.b32.xlu1 %v10749_v31, 272 }
0x1cfd   : > { %10763 = vbcast.lane.b32.xlu0 %v10749_v31, 280  ;;  %10774 = vbcast.lane.b32.xlu1 %v10768_v60, 264 }
0x1d01   : > { %10789 = vbcast.lane.b32.xlu0 %v10787_v47, 256  ;;  %10778 = vbcast.lane.b32.xlu1 %v10768_v60, 272 }
0x1d05   : > { %10782 = vbcast.lane.b32.xlu0 %v10768_v60, 280  ;;  %10793 = vbcast.lane.b32.xlu1 %v10787_v47, 264  ;;  %v19861_v60 = vld [vmem:[#allocation46_spill] sm:$0xff] }
0x1d09   : > { %10808 = vbcast.lane.b32.xlu0 %v10806_v48, 256  ;;  %10797 = vbcast.lane.b32.xlu1 %v10787_v47, 272 }
0x1d0d   : > { %10801 = vbcast.lane.b32.xlu0 %v10787_v47, 280  ;;  %10812 = vbcast.lane.b32.xlu1 %v10806_v48, 264 }
0x1d11   : > { %10820 = vbcast.lane.b32.xlu0 %v10806_v48, 280  ;;  %10816 = vbcast.lane.b32.xlu1 %v10806_v48, 272  ;;  %v19862_v48 = vld [vmem:[#allocation51_spill] sm:$0xff] }
0x1d47   : > { %v10680_v23 = vpop.permute.xlu0 %10679  ;;  %v10676_v35 = vpop.permute.xlu1 %10675 }
0x1d48   : > { %v18485_v20 = vadd.f32 %v10680_v23, %v18187_v36  ;;  %v18488_v49 = vadd.f32 %v10676_v35, %v18190_v22 }
0x1d4a   : > { %10926 = vperm.xlu0 %13579, %v18485_v20   ;;  %10923 = vperm.xlu1 %13578, %v18488_v49  }
0x1d4b   : > { %v10699_v1 = vpop.permute.xlu0 %10698  ;;  %v10695_v25 = vpop.permute.xlu1 %10694 }
0x1d4c   : > { %v18493_v62 = vadd.f32 %v10699_v1, %v18215_v38  ;;  %v18496_v40 = vadd.f32 %v10695_v25, %v18199_v45  ;;  %v19864_v25 = vld [vmem:[#allocation40_spill] sm:$0xff] }
0x1d4e   : > { %10938 = vperm.xlu0 %13579, %v18493_v62   ;;  %10935 = vperm.xlu1 %13578, %v18496_v40  }
0x1d4f   : > { %v10703_v36 = vpop.permute.xlu0 %10702  ;;  %v10684_v39 = vpop.permute.xlu1 %10683 }
0x1d50   : > { %v18501_v22 = vadd.f32 %v10703_v36, %v18241_v26  ;;  %v18504_v32 = vadd.f32 %v10684_v39, %v18225_v21  ;;  %v19865_v39 = vld [vmem:[#allocation59_spill] sm:$0xff] }
0x1d52   : > { %10941 = vperm.xlu0 %13579, %v18501_v22   ;;  %10929 = vperm.xlu1 %13578, %v18504_v32  }
0x1d53   : > { %v10718_v38 = vpop.permute.xlu0 %10717  ;;  %v10714_v10 = vpop.permute.xlu1 %10713 }
0x1d54   : > { %v18509_v45 = vadd.f32 %v10718_v38, %v18202_v28  ;;  %v18512_v42 = vadd.f32 %v10714_v10, %v18253_v53 }
0x1d56   : > { %19846 = vst [vmem:[#allocation56_spill] sm:$0xff] %v18509_v45  ;;  %10950 = vperm.xlu0 %13579, %v18509_v45   ;;  %10947 = vperm.xlu1 %13578, %v18512_v42  }
0x1d57   : > { %v10707_v26 = vpop.permute.xlu0 %10706  ;;  %v10688_v0 = vpop.permute.xlu1 %10687 }
0x1d58   : > { %v18517_v21 = vadd.f32 %v10707_v26, %v18218_v63  ;;  %v18520_v34 = vadd.f32 %v10688_v0, %v18263_v27  ;;  %v19867_v0 = vld [vmem:[#allocation49_spill] sm:$0xff] }
0x1d5a   : > { %19847 = vst [vmem:[#allocation43_spill] sm:$0xff] %v18520_v34  ;;  %10944 = vperm.xlu0 %13579, %v18517_v21   ;;  %10932 = vperm.xlu1 %13578, %v18520_v34  }
0x1d5b   : > { %v10733_v28 = vpop.permute.xlu0 %10732  ;;  %v10722_v56 = vpop.permute.xlu1 %10721 }
0x1d5c   : > { %v18525_v53 = vadd.f32 %v10733_v28, %v18228_v11  ;;  %v18528_v24 = vadd.f32 %v10722_v56, %v18277_v19  ;;  %v19852_v19 = vld [vmem:[#allocation50_spill] sm:$0xff]  ;;  %v19868_v56 = vld [vmem:[#allocation55_spill] sm:$0xff] }
0x1d5e   : > { %19848 = vst [vmem:[#allocation48_spill] sm:$0xff] %v18525_v53  ;;  %19849 = vst [vmem:[#allocation58_spill] sm:$0xff] %v18528_v24  ;;  %10959 = vperm.xlu0 %13579, %v18525_v53   ;;  %10953 = vperm.xlu1 %13578, %v18528_v24  }
0x1d5f   : > { %v10726_v63 = vpop.permute.xlu0 %10725  ;;  %v10737_v55 = vpop.permute.xlu1 %10736 }
0x1d60   : > { %v18533_v27 = vadd.f32 %v10726_v63, %v18244_v51  ;;  %v18536_v37 = vadd.f32 %v10737_v55, %v18293_v58  ;;  %v19855_v58 = vld [vmem:[#allocation53_spill] sm:$0xff] }
0x1d62   : > { %19850 = vst [vmem:[#allocation62_spill] sm:$0xff] %v18533_v27  ;;  %19851 = vst [vmem:[#allocation45_spill] sm:$0xff] %v18536_v37  ;;  %10956 = vperm.xlu0 %13579, %v18533_v27   ;;  %10962 = vperm.xlu1 %13578, %v18536_v37  }
0x1d63   : > { %v10752_v11 = vpop.permute.xlu0 %10751  ;;  %v10741_v9 = vpop.permute.xlu1 %10740 }
0x1d64   : > { %v18541_v14 = vadd.f32 %v10752_v11, %v19852_v19  ;;  %v18544_v30 = vadd.f32 %v10741_v9, %v19853_v3  ;;  %v19870_v9 = vld [vmem:[#allocation64_spill] sm:$0xff] }
0x1d65   : > { %v19871_v3 = vld [vmem:[#allocation44_spill] sm:$0xff] }
0x1d66   : > { %19854 = vst [vmem:[#allocation50_spill] sm:$0xff] %v18544_v30  ;;  %10971 = vperm.xlu0 %13579, %v18541_v14   ;;  %10965 = vperm.xlu1 %13578, %v18544_v30  }
0x1d67   : > { %v10745_v51 = vpop.permute.xlu0 %10744  ;;  %v10756_v2 = vpop.permute.xlu1 %10755 }
0x1d68   : > { %v18549_v50 = vadd.f32 %v10745_v51, %v19855_v58  ;;  %v18552_v15 = vadd.f32 %v10756_v2, %v19856_v41  ;;  %v19873_v41 = vld [vmem:[#allocation61_spill] sm:$0xff] }
0x1d6a   : > { %19857 = vst [vmem:[#allocation42_spill] sm:$0xff] %v18552_v15  ;;  %10968 = vperm.xlu0 %13579, %v18549_v50   ;;  %10974 = vperm.xlu1 %13578, %v18552_v15  }
0x1d6b   : > { %v10771_v44 = vpop.permute.xlu0 %10770  ;;  %v10760_v33 = vpop.permute.xlu1 %10759 }
0x1d6c   : > { %v18557_v61 = vadd.f32 %v10771_v44, %v19858_v29  ;;  %v18560_v43 = vadd.f32 %v10760_v33, %v19859_v54  ;;  %v19875_v33 = vld [vmem:[#allocation57_spill] sm:$0xff] }
0x1d6e   : > { %19860 = vst [vmem:[#allocation53_spill] sm:$0xff] %v18560_v43  ;;  %10983 = vperm.xlu0 %13579, %v18557_v61   ;;  %10977 = vperm.xlu1 %13578, %v18560_v43  }
0x1d6f   : > { %v10764_v52 = vpop.permute.xlu0 %10763  ;;  %v10775_v31 = vpop.permute.xlu1 %10774 }
0x1d70   : > { %v18565_v47 = vadd.f32 %v10764_v52, %v19861_v60  ;;  %v18568_v23 = vadd.f32 %v10775_v31, %v19862_v48  ;;  %v19877_v31 = vld [vmem:[#allocation54_spill] sm:$0xff]  ;;  %v19879_v48 = vld [vmem:[#allocation63_spill] sm:$0xff] }
0x1d72   : > { %19863 = vst [vmem:[#allocation47_spill] sm:$0xff] %v18568_v23  ;;  %10980 = vperm.xlu0 %13579, %v18565_v47   ;;  %10986 = vperm.xlu1 %13578, %v18568_v23  }
0x1d73   : > { %v10790_v35 = vpop.permute.xlu0 %10789  ;;  %v10779_v1 = vpop.permute.xlu1 %10778 }
0x1d74   : > { %v18573_v36 = vadd.f32 %v10790_v35, %v19864_v25  ;;  %v18576_v38 = vadd.f32 %v10779_v1, %v19865_v39 }
0x1d76   : > { %19866 = vst [vmem:[#allocation52_spill] sm:$0xff] %v18576_v38  ;;  %10995 = vperm.xlu0 %13579, %v18573_v36   ;;  %10989 = vperm.xlu1 %13578, %v18576_v38  }
0x1d77   : > { %v10783_v10 = vpop.permute.xlu0 %10782  ;;  %v10794_v26 = vpop.permute.xlu1 %10793 }
0x1d78   : > { %v18581_v28 = vadd.f32 %v10783_v10, %v19867_v0  ;;  %v18584_v63 = vadd.f32 %v10794_v26, %v19868_v56 }
0x1d7a   : > { %19869 = vst [vmem:[#allocation60_spill] sm:$0xff] %v18584_v63  ;;  %10992 = vperm.xlu0 %13579, %v18581_v28   ;;  %10998 = vperm.xlu1 %13578, %v18584_v63  }
0x1d7b   : > { %v10809_v55 = vpop.permute.xlu0 %10808  ;;  %v10798_v11 = vpop.permute.xlu1 %10797 }
0x1d7c   : > { %v18589_v19 = vadd.f32 %v10809_v55, %v19870_v9  ;;  %v18592_v51 = vadd.f32 %v10798_v11, %v19871_v3 }
0x1d7e   : > { %19872 = vst [vmem:[#allocation46_spill] sm:$0xff] %v18592_v51  ;;  %11007 = vperm.xlu0 %13579, %v18589_v19   ;;  %11001 = vperm.xlu1 %13578, %v18592_v51  }
0x1d7f   : > { %v10802_v2 = vpop.permute.xlu0 %10801  ;;  %v10813_v58 = vpop.permute.xlu1 %10812 }
0x1d80   : > { %v18597_v44 = vadd.f32 %v10802_v2, %v19873_v41  ;;  %v18600_v29 = vadd.f32 %v10813_v58, %v19875_v33 }
0x1d82   : > { %19874 = vst [vmem:[#allocation51_spill] sm:$0xff] %v18597_v44  ;;  %19876 = vst [vmem:[#allocation40_spill] sm:$0xff] %v18600_v29  ;;  %11004 = vperm.xlu0 %13579, %v18597_v44   ;;  %11010 = vperm.xlu1 %13578, %v18600_v29  }
0x1d83   : > { %v10821_v54 = vpop.permute.xlu0 %10820  ;;  %v10817_v52 = vpop.permute.xlu1 %10816 }
0x1d84   : > { %v18605_v60 = vadd.f32 %v10821_v54, %v19877_v31  ;;  %v18608_v35 = vadd.f32 %v10817_v52, %v19879_v48 }
0x1d86   : > { %19878 = vst [vmem:[#allocation59_spill] sm:$0xff] %v18605_v60  ;;  %19880 = vst [vmem:[#allocation49_spill] sm:$0xff] %v18608_v35  ;;  %11016 = vperm.xlu0 %13579, %v18605_v60   ;;  %11013 = vperm.xlu1 %13578, %v18608_v35  }
0x1dc9   : > { %v10927_v1 = vpop.permute.xlu0 %10926  ;;  %v10924_v25 = vpop.permute.xlu1 %10923 }
0x1dca   : > { %v11025_v38 = vrot.slane %v10927_v1, %v14720_v16  ;;  %v11021_v23 = vrot.slane %v10924_v25, %v14711_v8 }
0x1dcd   : > { %v10939_v39 = vpop.permute.xlu0 %10938  ;;  %v10936_v10 = vpop.permute.xlu1 %10935 }
0x1dce   : > { %v11044_v43 = vrot.slane %v10939_v39, %v14720_v16  ;;  %v11040_v15 = vrot.slane %v10936_v10, %v14711_v8  ;;  %v11026_v39 = vsel %vm2176_vm1, %v11025_v38, %v11021_v23 }
0x1dd0   : > { %v11045_v10 = vsel %vm2176_vm1, %v11044_v43, %v11040_v15 }
0x1dd1   : > { %v10942_v26 = vpop.permute.xlu0 %10941  ;;  %v10930_v0 = vpop.permute.xlu1 %10929 }
0x1dd2   : > { %v11049_v30 = vrot.slane %v10942_v26, %v14722_v17  ;;  %v11030_v27 = vrot.slane %v10930_v0, %v14722_v17 }
0x1dd4   : > { %v11050_v0 = vsel %vm2183_vm2, %v11049_v30, %v11045_v10 }
0x1dd5   : > { %v10951_v56 = vpop.permute.xlu0 %10950  ;;  %v10948_v55 = vpop.permute.xlu1 %10947 }
0x1dd6   : > { %v11063_v37 = vrot.slane %v10951_v56, %v14720_v16  ;;  %v11059_v53 = vrot.slane %v10948_v55, %v14711_v8  ;;  %v11031_v56 = vsel %vm2183_vm2, %v11030_v27, %v11026_v39 }
0x1dd8   : > { %v11064_v55 = vsel %vm2176_vm1, %v11063_v37, %v11059_v53 }
0x1dd9   : > { %v10945_v11 = vpop.permute.xlu0 %10944  ;;  %v10933_v9 = vpop.permute.xlu1 %10932 }
0x1dda   : > { %v11054_v24 = vrot.slane %v10945_v11, %v14724_v18  ;;  %v11035_v60 = vrot.slane %v10933_v9, %v14724_v18 }
0x1ddc   : > { %v11055_v11 = vsel %vm2190_vm3, %v11054_v24, %v11050_v0  ;;  %v11036_v9 = vsel %vm2190_vm3, %v11035_v60, %v11031_v56 }
0x1ddd   : > { %v10960_v3 = vpop.permute.xlu0 %10959  ;;  %v10954_v2 = vpop.permute.xlu1 %10953  ;;  %v11170_v39 = vsel %vm2325_vm4, %v11055_v11, %v11036_v9 }
0x1dde   : > { %v11068_v25 = vrot.slane %v10954_v2, %v14722_v17  ;;  %v11078_v23 = vrot.slane %v10960_v3, %v14711_v8 }
0x1de0   : > { %v11069_v15 = vsel %vm2183_vm2, %v11068_v25, %v11064_v55 }
0x1de1   : > { %v10957_v58 = vpop.permute.xlu0 %10956  ;;  %v10963_v41 = vpop.permute.xlu1 %10962 }
0x1de2   : > { %v11073_v26 = vrot.slane %v10957_v58, %v14724_v18  ;;  %v11082_v44 = vrot.slane %v10963_v41, %v14720_v16 }
0x1de4   : > { %v11074_v27 = vsel %vm2190_vm3, %v11073_v26, %v11069_v15  ;;  %v11083_v41 = vsel %vm2176_vm1, %v11082_v44, %v11078_v23 }
0x1de5   : > { %v10972_v33 = vpop.permute.xlu0 %10971  ;;  %v10966_v54 = vpop.permute.xlu1 %10965 }
0x1de6   : > { %v11087_v43 = vrot.slane %v10966_v54, %v14722_v17  ;;  %v11097_v38 = vrot.slane %v10972_v33, %v14711_v8 }
0x1de9   : > { %v10969_v52 = vpop.permute.xlu0 %10968  ;;  %v10975_v31 = vpop.permute.xlu1 %10974 }
0x1dea   : > { %v11101_v30 = vrot.slane %v10975_v31, %v14720_v16  ;;  %v11092_v53 = vrot.slane %v10969_v52, %v14724_v18 }
0x1dec   : > { %v11102_v33 = vsel %vm2176_vm1, %v11101_v30, %v11097_v38 }
0x1ded   : > { %v10984_v48 = vpop.permute.xlu0 %10983  ;;  %v10978_v46 = vpop.permute.xlu1 %10977 }
0x1dee   : > { %v11106_v24 = vrot.slane %v10978_v46, %v14722_v17  ;;  %v11116_v54 = vrot.slane %v10984_v48, %v14711_v8 }
0x1df0   : > { %v11107_v44 = vsel %vm2183_vm2, %v11106_v24, %v11102_v33 }
0x1df1   : > { %v10981_v35 = vpop.permute.xlu0 %10980  ;;  %v10987_v29 = vpop.permute.xlu1 %10986 }
0x1df2   : > { %v11120_v37 = vrot.slane %v10987_v29, %v14720_v16  ;;  %v11111_v60 = vrot.slane %v10981_v35, %v14724_v18  ;;  %v11088_v29 = vsel %vm2183_vm2, %v11087_v43, %v11083_v41 }
0x1df4   : > { %v11121_v48 = vsel %vm2176_vm1, %v11120_v37, %v11116_v54  ;;  %v11112_v10 = vsel %vm2190_vm3, %v11111_v60, %v11107_v44 }
0x1df5   : > { %v10996_v51 = vpop.permute.xlu0 %10995  ;;  %v10990_v63 = vpop.permute.xlu1 %10989 }
0x1df6   : > { %v11125_v3 = vrot.slane %v10990_v63, %v14722_v17  ;;  %v11135_v35 = vrot.slane %v10996_v51, %v14711_v8  ;;  %v11171_v51 = vsel %vm2327_vm5, %v11074_v27, %v11170_v39 }
0x1df8   : > { %v11126_v26 = vsel %vm2183_vm2, %v11125_v3, %v11121_v48 }
0x1df9   : > { %v10993_v34 = vpop.permute.xlu0 %10992  ;;  %v10999_v1 = vpop.permute.xlu1 %10998 }
0x1dfa   : > { %v11139_v58 = vrot.slane %v10999_v1, %v14720_v16  ;;  %v11130_v31 = vrot.slane %v10993_v34, %v14724_v18  ;;  %v11093_v1 = vsel %vm2190_vm3, %v11092_v53, %v11088_v29 }
0x1dfb   : > { %v11172_v43 = vsel %vm2329_vm6, %v11093_v1, %v11171_v51 }
0x1dfc   : > { %v11140_v0 = vsel %vm2176_vm1, %v11139_v58, %v11135_v35  ;;  %v11131_v56 = vsel %vm2190_vm3, %v11130_v31, %v11126_v26  ;;  %v11173_v53 = vsel %vm2331_vm7, %v11112_v10, %v11172_v43 }
0x1dfd   : > { %v11008_v45 = vpop.permute.xlu0 %11007  ;;  %v11002_v2 = vpop.permute.xlu1 %11001 }
0x1dfe   : > { %v11144_v52 = vrot.slane %v11002_v2, %v14722_v17  ;;  %v11154_v55 = vrot.slane %v11008_v45, %v14711_v8  ;;  %v11174_v45 = vsel %vm2333_vm8, %v11131_v56, %v11173_v53  ;;  %v19884_v53 = vld [vmem:[#allocation51_spill] sm:$0xff] }
0x1e00   : > { %v11145_v2 = vsel %vm2183_vm2, %v11144_v52, %v11140_v0 }
0x1e01   : > { %v11005_v25 = vpop.permute.xlu0 %11004  ;;  %v11011_v46 = vpop.permute.xlu1 %11010 }
0x1e02   : > { %v11149_v63 = vrot.slane %v11005_v25, %v14724_v18  ;;  %v11158_v34 = vrot.slane %v11011_v46, %v14720_v16 }
0x1e04   : > { %v11150_v11 = vsel %vm2190_vm3, %v11149_v63, %v11145_v2  ;;  %v11159_v27 = vsel %vm2176_vm1, %v11158_v34, %v11154_v55 }
0x1e05   : > { %v11017_v23 = vpop.permute.xlu0 %11016  ;;  %v11014_v15 = vpop.permute.xlu1 %11013  ;;  %v11175_v38 = vsel %vm2335_vm9, %v11150_v11, %v11174_v45 }
0x1e06   : > { %v11168_v9 = vrot.slane %v11017_v23, %v14724_v18  ;;  %v11163_v30 = vrot.slane %v11014_v15, %v14722_v17 }
0x1e08   : > { %v11164_v24 = vsel %vm2183_vm2, %v11163_v30, %v11159_v27 }
0x1e09   : > { %v11169_v37 = vsel %vm2190_vm3, %v11168_v9, %v11164_v24  ;;  %v19883_v9 = vld [vmem:[#allocation56_spill] sm:$0xff]  ;;  %v19886_v24 = vld [vmem:[#allocation43_spill] sm:$0xff] }
0x1e0a   : > { %v11176_v60 = vsel %vm2337_vm10, %v11169_v37, %v11175_v38  ;;  %v19887_v38 = vld [vmem:[#allocation59_spill] sm:$0xff] }
0x1e0b   : > { %v11178_v3 = vsel %vm2339_vm11, %v11176_v60, 0.0 }
0x1e0c   : > { %11179 = vadd.xlane.f32.xlu1 %v11178_v3  ;;  %v19889_v3 = vld [vmem:[#allocation58_spill] sm:$0xff] }
0x1e99   : > { %v11180_v58 = vpop.xlane.xlu1 %11179 }
0x1e9a   : > { %v11181_v41 = vmul.f32 0.03125, %v11180_v58 }
0x1e9c   : > { %v11190_v54 = vrot.slane %v11181_v41, %v14705_v5  ;;  %v11186_v31 = vrot.slane %v11181_v41, %v14703_v4  ;;  %v18679_v52 = vrot.slane %v11181_v41, %v14713_v12  ;;  %v18688_v29 = vrot.slane %v11181_v41, %v14709_v7 }
0x1e9e   : > { %v18682_v25 = vsub.f32 %v18517_v21, %v11190_v54  ;;  %v18685_v46 = vsub.f32 %v18488_v49, %v11186_v31  ;;  %v18696_v63 = vsub.f32 %v18541_v14, %v18679_v52  ;;  %v18699_v1 = vsub.f32 %v18485_v20, %v11186_v31 }
0x1e9f   : > { %v18702_v49 = vrot.slane %v11181_v41, %v14715_v13  ;;  %v18710_v48 = vsub.f32 %v18549_v50, %v18688_v29  ;;  %v18713_v14 = vsub.f32 %v18496_v40, %v11190_v54  ;;  %v18724_v10 = vsub.f32 %v18493_v62, %v11190_v54 }
0x1ea0   : > { %v11262_v33 = vmul.f32 %v18682_v25, %v18682_v25  ;;  %v11255_v35 = vmul.f32 %v18685_v46, %v18685_v46  ;;  %v11271_v21 = vmul.f32 %v18696_v63, %v18696_v63  ;;  %v11256_v44 = vmul.f32 %v18699_v1, %v18699_v1 }
0x1ea1   : > { %v11270_v20 = vmul.f32 %v18710_v48, %v18710_v48  ;;  %v11259_v34 = vmul.f32 %v18713_v14, %v18713_v14  ;;  %v18721_v39 = vsub.f32 %v18557_v61, %v18702_v49  ;;  %v18727_v40 = vrot.slane %v11181_v41, %v19602_v59 }
0x1ea2   : > { %11341 = vperm.xlu1 %13578, %v11262_v33   ;;  %11320 = vperm.xlu0 %13579, %v11255_v35   ;;  %v11260_v26 = vmul.f32 %v18724_v10, %v18724_v10  ;;  %v18735_v0 = vsub.f32 %v18565_v47, %v18679_v52  ;;  %v18738_v61 = vsub.f32 %v18504_v32, %v11186_v31 }
0x1ea3   : > { %v11275_v50 = vmul.f32 %v18721_v39, %v18721_v39  ;;  %v11194_v62 = vrot.slane %v11181_v41, %v14707_v6  ;;  %v18747_v55 = vsub.f32 %v18573_v36, %v18727_v40  ;;  %v18750_v47 = vsub.f32 %v18501_v22, %v11190_v54 }
0x1ea4   : > { %v11274_v51 = vmul.f32 %v18735_v0, %v18735_v0  ;;  %v11257_v56 = vmul.f32 %v18738_v61, %v18738_v61  ;;  %v11214_v32 = vrot.slane %v11181_v41, %v19818_v57  ;;  %v18759_v15 = vsub.f32 %v18581_v28, %v18702_v49 }
0x1ea5   : > { %v11279_v2 = vmul.f32 %v18747_v55, %v18747_v55  ;;  %v11261_v23 = vmul.f32 %v18750_v47, %v18750_v47  ;;  %v18762_v36 = vsub.f32 %v18512_v42, %v11194_v62  ;;  %v18772_v30 = vsub.f32 %v19883_v9, %v11194_v62 }
0x1ea6   : > { %11368 = vperm.xlu1 %13578, %v11271_v21   ;;  %11323 = vperm.xlu0 %13579, %v11256_v44   ;;  %19881 = vst [vmem:[#allocation55_spill] sm:$0xff] %v18759_v15  ;;  %v11278_v22 = vmul.f32 %v18759_v15, %v18759_v15  ;;  %v18769_v11 = vsub.f32 %v18589_v19, %v11214_v32  ;;  %v19891_v21 = vld [vmem:[#allocation45_spill] sm:$0xff] }
0x1ea7   : > { %v11263_v43 = vmul.f32 %v18762_v36, %v18762_v36  ;;  %v11264_v28 = vmul.f32 %v18772_v30, %v18772_v30  ;;  %v18780_v27 = vsub.f32 %v19884_v53, %v18727_v40  ;;  %v18783_v45 = vsub.f32 %v19886_v24, %v11186_v31  ;;  %v19890_v31 = vld [vmem:[#allocation48_spill] sm:$0xff] }
0x1ea8   : > { %19882 = vst [vmem:[#allocation64_spill] sm:$0xff] %v18769_v11  ;;  %v11283_v42 = vmul.f32 %v18769_v11, %v18769_v11  ;;  %v18790_v60 = vsub.f32 %v19887_v38, %v11214_v32  ;;  %v18793_v58 = vsub.f32 %v19889_v3, %v11194_v62  ;;  %v18801_v33 = vsub.f32 %v19890_v31, %v18688_v29  ;;  %v19900_v24 = vld [vmem:[#allocation52_spill] sm:$0xff] }
0x1ea9   : > { %19885 = vst [vmem:[#allocation44_spill] sm:$0xff] %v18780_v27  ;;  %v11282_v19 = vmul.f32 %v18780_v27, %v18780_v27  ;;  %v11258_v37 = vmul.f32 %v18783_v45, %v18783_v45  ;;  %v18807_v44 = vsub.f32 %v19891_v21, %v18688_v29  ;;  %v19906_v31 = vld [vmem:[#allocation40_spill] sm:$0xff] }
0x1eaa   : > { %11365 = vperm.xlu1 %13578, %v11270_v20   ;;  %11332 = vperm.xlu0 %13579, %v11259_v34   ;;  %19888 = vst [vmem:[#allocation61_spill] sm:$0xff] %v18790_v60  ;;  %v11286_v41 = vmul.f32 %v18790_v60, %v18790_v60  ;;  %v11265_v54 = vmul.f32 %v18793_v58, %v18793_v58  ;;  %v19892_v34 = vld [vmem:[#allocation62_spill] sm:$0xff] }
0x1eab   : > { %v11267_v35 = vmul.f32 %v18801_v33, %v18801_v33  ;;  %v11268_v20 = vmul.f32 %v18807_v44, %v18807_v44 }
0x1eae   : > { %11380 = vperm.xlu1 %13578, %v11275_v50   ;;  %11335 = vperm.xlu0 %13579, %v11260_v26   ;;  %v18812_v50 = vsub.f32 %v19892_v34, %v11194_v62 }
0x1eb0   : > { %v11266_v26 = vmul.f32 %v18812_v50, %v18812_v50 }
0x1eb2   : > { %11377 = vperm.xlu1 %13578, %v11274_v51   ;;  %11326 = vperm.xlu0 %13579, %v11257_v56   ;;  %v19893_v51 = vld [vmem:[#allocation50_spill] sm:$0xff] }
0x1eb3   : > { %v18818_v56 = vsub.f32 %v19893_v51, %v18688_v29  ;;  %v12540_v51 = vld [vmem:[#allocation20 + $0x1] ss:$0 sm:$0xff] }
0x1eb6   : > { %11392 = vperm.xlu1 %13578, %v11279_v2   ;;  %11338 = vperm.xlu0 %13579, %v11261_v23   ;;  %v11269_v2 = vmul.f32 %v18818_v56, %v18818_v56  ;;  %v19894_v23 = vld [vmem:[#allocation42_spill] sm:$0xff] }
0x1eba   : > { %11389 = vperm.xlu1 %13578, %v11278_v22   ;;  %11344 = vperm.xlu0 %13579, %v11263_v43   ;;  %v18824_v22 = vsub.f32 %v19894_v23, %v18679_v52  ;;  %v19896_v43 = vld [vmem:[#allocation53_spill] sm:$0xff] }
0x1ebb   : > { %v18830_v9 = vsub.f32 %v19896_v43, %v18679_v52 }
0x1ebc   : > { %19895 = vst [vmem:[#allocation57_spill] sm:$0xff] %v18824_v22  ;;  %v11272_v62 = vmul.f32 %v18824_v22, %v18824_v22 }
0x1ebd   : > { %19897 = vst [vmem:[#allocation54_spill] sm:$0xff] %v18830_v9  ;;  %v11273_v29 = vmul.f32 %v18830_v9, %v18830_v9 }
0x1ebe   : > { %11404 = vperm.xlu1 %13578, %v11283_v42   ;;  %11347 = vperm.xlu0 %13579, %v11264_v28   ;;  %v19898_v42 = vld [vmem:[#allocation47_spill] sm:$0xff] }
0x1ebf   : > { %v18836_v28 = vsub.f32 %v19898_v42, %v18702_v49 }
0x1ec1   : > { %19899 = vst [vmem:[#allocation63_spill] sm:$0xff] %v18836_v28  ;;  %v11276_v53 = vmul.f32 %v18836_v28, %v18836_v28 }
0x1ec2   : > { %11401 = vperm.xlu1 %13578, %v11282_v19   ;;  %11329 = vperm.xlu0 %13579, %v11258_v37   ;;  %v18842_v19 = vsub.f32 %v19900_v24, %v18702_v49  ;;  %v19902_v37 = vld [vmem:[#allocation60_spill] sm:$0xff] }
0x1ec3   : > { %v18848_v38 = vsub.f32 %v19902_v37, %v18727_v40 }
0x1ec4   : > { %19901 = vst [vmem:[#allocation56_spill] sm:$0xff] %v18842_v19  ;;  %v11277_v52 = vmul.f32 %v18842_v19, %v18842_v19 }
0x1ec5   : > { %19903 = vst [vmem:[#allocation51_spill] sm:$0xff] %v18848_v38  ;;  %v11280_v3 = vmul.f32 %v18848_v38, %v18848_v38 }
0x1ec6   : > { %11413 = vperm.xlu1 %13578, %v11286_v41   ;;  %11350 = vperm.xlu0 %13579, %v11265_v54   ;;  %v19904_v41 = vld [vmem:[#allocation46_spill] sm:$0xff] }
0x1ec7   : > { %v18854_v54 = vsub.f32 %v19904_v41, %v18727_v40  ;;  %v12539_v40 = vld [vmem:[#allocation18 + $0x1] ss:$0 sm:$0xff] }
0x1ec9   : > { %19905 = vst [vmem:[#allocation43_spill] sm:$0xff] %v18854_v54  ;;  %v11281_v49 = vmul.f32 %v18854_v54, %v18854_v54 }
0x1eca   : > { %11356 = vperm.xlu0 %13579, %v11267_v35   ;;  %v18859_v35 = vsub.f32 %v19906_v31, %v11214_v32  ;;  %11660 = vbcast.lane.b32.xlu1 %v12539_v40, 256 }
0x1ecc   : > { %19907 = vst [vmem:[#allocation59_spill] sm:$0xff] %v18859_v35  ;;  %v11284_v21 = vmul.f32 %v18859_v35, %v18859_v35 }
0x1ece   : > { %11359 = vperm.xlu0 %13579, %v11268_v20   ;;  %v19908_v20 = vld [vmem:[#allocation49_spill] sm:$0xff]  ;;  %11664 = vbcast.lane.b32.xlu1 %v12539_v40, 264 }
0x1ecf   : > { %v18864_v34 = vsub.f32 %v19908_v20, %v11214_v32 }
0x1ed1   : > { %19909 = vst [vmem:[#allocation58_spill] sm:$0xff] %v18864_v34 }
0x1ed2   : > { %11353 = vperm.xlu0 %13579, %v11266_v26   ;;  %v11285_v26 = vmul.f32 %v18864_v34, %v18864_v34  ;;  %11668 = vbcast.lane.b32.xlu1 %v12539_v40, 272 }
0x1ed6   : > { %11362 = vperm.xlu0 %13579, %v11269_v2   ;;  %11672 = vbcast.lane.b32.xlu1 %v12539_v40, 280 }
0x1eda   : > { %11371 = vperm.xlu0 %13579, %v11272_v62   ;;  %11716 = vbcast.lane.b32.xlu1 %v12540_v51, 256 }
0x1ede   : > { %11374 = vperm.xlu0 %13579, %v11273_v29   ;;  %11720 = vbcast.lane.b32.xlu1 %v12540_v51, 264 }
0x1ee2   : > { %11383 = vperm.xlu0 %13579, %v11276_v53   ;;  %11724 = vbcast.lane.b32.xlu1 %v12540_v51, 272 }
0x1ee6   : > { %11386 = vperm.xlu0 %13579, %v11277_v52   ;;  %11728 = vbcast.lane.b32.xlu1 %v12540_v51, 280 }
0x1eea   : > { %11395 = vperm.xlu0 %13579, %v11280_v3  }
0x1eee   : > { %11398 = vperm.xlu0 %13579, %v11281_v49  }
0x1ef2   : > { %11407 = vperm.xlu0 %13579, %v11284_v21  }
0x1ef6   : > { %11410 = vperm.xlu0 %13579, %v11285_v26  }
0x1f21   : > { %v11321_v2 = vpop.permute.xlu0 %11320  ;;  %v11342_v21 = vpop.permute.xlu1 %11341 }
0x1f22   : > { %v11418_v32 = vrot.slane %v11321_v2, %v14711_v8  ;;  %v11451_v51 = vrot.slane %v11342_v21, %v14724_v18 }
0x1f25   : > { %v11324_v23 = vpop.permute.xlu0 %11323 }
0x1f26   : > { %v11422_v62 = vrot.slane %v11324_v23, %v14720_v16 }
0x1f28   : > { %v11423_v43 = vsel %vm2176_vm1, %v11422_v62, %v11418_v32  ;;  %v11369_v32 = vpop.permute.xlu1 %11368 }
0x1f29   : > { %v11333_v29 = vpop.permute.xlu0 %11332 }
0x1f2a   : > { %v11437_v53 = vrot.slane %v11333_v29, %v14711_v8 }
0x1f2d   : > { %v11336_v42 = vpop.permute.xlu0 %11335 }
0x1f2e   : > { %v11441_v24 = vrot.slane %v11336_v42, %v14720_v16 }
0x1f30   : > { %v11442_v52 = vsel %vm2176_vm1, %v11441_v24, %v11437_v53 }
0x1f31   : > { %v11327_v37 = vpop.permute.xlu0 %11326 }
0x1f32   : > { %v11427_v20 = vrot.slane %v11327_v37, %v14722_v17 }
0x1f34   : > { %v11428_v23 = vsel %vm2183_vm2, %v11427_v20, %v11423_v43 }
0x1f35   : > { %v11339_v3 = vpop.permute.xlu0 %11338 }
0x1f36   : > { %v11446_v49 = vrot.slane %v11339_v3, %v14722_v17  ;;  %v11366_v3 = vpop.permute.xlu1 %11365 }
0x1f38   : > { %v11447_v26 = vsel %vm2183_vm2, %v11446_v49, %v11442_v52 }
0x1f39   : > { %v11345_v41 = vpop.permute.xlu0 %11344  ;;  %v11452_v62 = vsel %vm2190_vm3, %v11451_v51, %v11447_v26 }
0x1f3a   : > { %v11381_v34 = vpop.permute.xlu1 %11380  ;;  %v11456_v57 = vrot.slane %v11345_v41, %v14711_v8 }
0x1f3d   : > { %v11348_v31 = vpop.permute.xlu0 %11347 }
0x1f3e   : > { %v11378_v35 = vpop.permute.xlu1 %11377 }
0x1f41   : > { %v11330_v40 = vpop.permute.xlu0 %11329 }
0x1f42   : > { %v11432_v2 = vrot.slane %v11330_v40, %v14724_v18  ;;  %v11393_v54 = vpop.permute.xlu1 %11392 }
0x1f44   : > { %v11433_v29 = vsel %vm2190_vm3, %v11432_v2, %v11428_v23  ;;  %v11494_v2 = vrot.slane %v11369_v32, %v14711_v8  ;;  %v11460_v23 = vrot.slane %v11348_v31, %v14720_v16 }
0x1f45   : > { %v11567_v42 = vsel %vm2325_vm4, %v11452_v62, %v11433_v29  ;;  %v11351_v53 = vpop.permute.xlu0 %11350 }
0x1f46   : > { %v11390_v43 = vpop.permute.xlu1 %11389  ;;  %v11465_v19 = vrot.slane %v11351_v53, %v14722_v17 }
0x1f49   : > { %v11357_v24 = vpop.permute.xlu0 %11356 }
0x1f4a   : > { %v11405_v60 = vpop.permute.xlu1 %11404  ;;  %v11475_v27 = vrot.slane %v11357_v24, %v14711_v8 }
0x1f4d   : > { %v11360_v37 = vpop.permute.xlu0 %11359 }
0x1f4e   : > { %v11479_v51 = vrot.slane %v11360_v37, %v14720_v16  ;;  %v11402_v37 = vpop.permute.xlu1 %11401 }
0x1f50   : > { %v11480_v53 = vsel %vm2176_vm1, %v11479_v51, %v11475_v27  ;;  %v11508_v27 = vrot.slane %v11378_v35, %v14724_v18  ;;  %v11527_v51 = vrot.slane %v11390_v43, %v14724_v18  ;;  %v11551_v35 = vrot.slane %v11405_v60, %v14711_v8 }
0x1f51   : > { %v11354_v52 = vpop.permute.xlu0 %11353 }
0x1f52   : > { %v11470_v32 = vrot.slane %v11354_v52, %v14724_v18  ;;  %v11489_v52 = vrot.slane %v11366_v3, %v14724_v18 }
0x1f55   : > { %v11363_v49 = vpop.permute.xlu0 %11362 }
0x1f56   : > { %v11484_v62 = vrot.slane %v11363_v49, %v14722_v17 }
0x1f58   : > { %v11485_v15 = vsel %vm2183_vm2, %v11484_v62, %v11480_v53 }
0x1f59   : > { %v11372_v21 = vpop.permute.xlu0 %11371 }
0x1f5a   : > { %v11498_v29 = vrot.slane %v11372_v21, %v14720_v16  ;;  %v11513_v21 = vrot.slane %v11381_v34, %v14711_v8 }
0x1f5c   : > { %v11499_v41 = vsel %vm2176_vm1, %v11498_v29, %v11494_v2  ;;  %v11490_v2 = vsel %vm2190_vm3, %v11489_v52, %v11485_v15 }
0x1f5d   : > { %v11375_v40 = vpop.permute.xlu0 %11374 }
0x1f5e   : > { %v11503_v28 = vrot.slane %v11375_v40, %v14722_v17  ;;  %v11532_v40 = vrot.slane %v11393_v54, %v14711_v8 }
0x1f61   : > { %v11384_v38 = vpop.permute.xlu0 %11383 }
0x1f62   : > { %v11517_v11 = vrot.slane %v11384_v38, %v14720_v16  ;;  %v11461_v38 = vsel %vm2176_vm1, %v11460_v23, %v11456_v57 }
0x1f64   : > { %v11518_v34 = vsel %vm2176_vm1, %v11517_v11, %v11513_v21  ;;  %v11414_v11 = vpop.permute.xlu1 %11413 }
0x1f65   : > { %v11387_v20 = vpop.permute.xlu0 %11386 }
0x1f66   : > { %v11522_v31 = vrot.slane %v11387_v20, %v14722_v17  ;;  %v11466_v20 = vsel %vm2183_vm2, %v11465_v19, %v11461_v38 }
0x1f68   : > { %v11523_v54 = vsel %vm2183_vm2, %v11522_v31, %v11518_v34  ;;  %v18932_v38 = vpop.permute.xlu1 %11660 }
0x1f69   : > { %v11396_v26 = vpop.permute.xlu0 %11395  ;;  %v11528_v29 = vsel %vm2190_vm3, %v11527_v51, %v11523_v54 }
0x1f6a   : > { %v11536_v49 = vrot.slane %v11396_v26, %v14720_v16  ;;  %v11504_v26 = vsel %vm2183_vm2, %v11503_v28, %v11499_v41  ;;  %v11546_v28 = vrot.slane %v11402_v37, %v14724_v18 }
0x1f6b   : > { %v11509_v23 = vsel %vm2190_vm3, %v11508_v27, %v11504_v26 }
0x1f6c   : > { %v11537_v57 = vsel %vm2176_vm1, %v11536_v49, %v11532_v40  ;;  %v18934_v41 = vpop.permute.xlu1 %11664 }
0x1f6d   : > { %v11399_v9 = vpop.permute.xlu0 %11398 }
0x1f6e   : > { %v11541_v24 = vrot.slane %v11399_v9, %v14722_v17  ;;  %v11471_v9 = vsel %vm2190_vm3, %v11470_v32, %v11466_v20 }
0x1f6f   : > { %v11568_v62 = vsel %vm2327_vm5, %v11471_v9, %v11567_v42 }
0x1f70   : > { %v11542_v3 = vsel %vm2183_vm2, %v11541_v24, %v11537_v57  ;;  %v11569_v43 = vsel %vm2329_vm6, %v11490_v2, %v11568_v62  ;;  %v18936_v52 = vpop.permute.xlu1 %11668 }
0x1f71   : > { %v11408_v22 = vpop.permute.xlu0 %11407  ;;  %v11547_v31 = vsel %vm2190_vm3, %v11546_v28, %v11542_v3  ;;  %v11570_v49 = vsel %vm2331_vm7, %v11509_v23, %v11569_v43 }
0x1f72   : > { %v11555_v19 = vrot.slane %v11408_v22, %v14720_v16  ;;  %v11565_v22 = vrot.slane %v11414_v11, %v14724_v18  ;;  %v11571_v60 = vsel %vm2333_vm8, %v11528_v29, %v11570_v49 }
0x1f73   : > { %v11572_v53 = vsel %vm2335_vm9, %v11547_v31, %v11571_v60 }
0x1f74   : > { %v11556_v37 = vsel %vm2176_vm1, %v11555_v19, %v11551_v35  ;;  %v18938_v27 = vpop.permute.xlu1 %11672 }
0x1f75   : > { %v11411_v32 = vpop.permute.xlu0 %11410 }
0x1f76   : > { %v11560_v15 = vrot.slane %v11411_v32, %v14722_v17 }
0x1f78   : > { %v11561_v21 = vsel %vm2183_vm2, %v11560_v15, %v11556_v37  ;;  %v18940_v9 = vpop.permute.xlu1 %11716 }
0x1f79   : > { %v11566_v42 = vsel %vm2190_vm3, %v11565_v22, %v11561_v21 }
0x1f7a   : > { %v11573_v24 = vsel %vm2337_vm10, %v11566_v42, %v11572_v53 }
0x1f7b   : > { %v11575_v40 = vsel %vm2339_vm11, %v11573_v24, 0.0 }
0x1f7c   : > { %11576 = vadd.xlane.f32.xlu0 %v11575_v40  ;;  %v18944_v57 = vpop.permute.xlu1 %11720 }
0x1f80   : > { %v18958_v29 = vpop.permute.xlu1 %11724 }
0x1f84   : > { %v18974_v31 = vpop.permute.xlu1 %11728 }
0x2009   : > { %v11577_v20 = vpop.xlane.xlu0 %11576 }
0x200a   : > { %v11578_v26 = vmul.f32 0.03125, %v11577_v20 }
0x200c   : > { %v11579_v34 = vadd.f32 1e-05, %v11578_v26 }
0x200e   : > { %13622 = vrsqrt.f32 %v11579_v34 }
0x2018   : > { %v18942_v54 = vpop.eup %13622 }
0x2019   : > { %v11585_v51 = vrot.slane %v18942_v54, %v14703_v4  ;;  %v11589_v2 = vrot.slane %v18942_v54, %v14705_v5  ;;  %v11593_v3 = vrot.slane %v18942_v54, %v14707_v6  ;;  %v11597_v6 = vrot.slane %v18942_v54, %v14709_v7 }
0x201a   : > { %v11605_v26 = vrot.slane %v18942_v54, %v14715_v13 }
0x201b   : > { %v11623_v19 = vmul.f32 %v11585_v51, %v18699_v1  ;;  %v11622_v28 = vmul.f32 %v11585_v51, %v18685_v46  ;;  %v11626_v11 = vmul.f32 %v11589_v2, %v18713_v14  ;;  %v11631_v23 = vmul.f32 %v11593_v3, %v18772_v30 }
0x201c   : > { %v11627_v4 = vmul.f32 %v11589_v2, %v18724_v10  ;;  %v11629_v5 = vmul.f32 %v11589_v2, %v18682_v25  ;;  %v11624_v32 = vmul.f32 %v11585_v51, %v18738_v61  ;;  %v11634_v43 = vmul.f32 %v11597_v6, %v18801_v33 }
0x201d   : > { %v11679_v35 = vmul.f32 %v18934_v41, %v11623_v19  ;;  %v11678_v62 = vmul.f32 %v18932_v38, %v11622_v28  ;;  %v11682_v14 = vmul.f32 %v18932_v38, %v11626_v11  ;;  %v11687_v30 = vmul.f32 %v18934_v41, %v11631_v23 }
0x201e   : > { %v11683_v7 = vmul.f32 %v18934_v41, %v11627_v4  ;;  %v11685_v15 = vmul.f32 %v18938_v27, %v11629_v5  ;;  %v11680_v22 = vmul.f32 %v18936_v52, %v11624_v32  ;;  %v11690_v37 = vmul.f32 %v18932_v38, %v11634_v43  ;;  %v19911_v32 = vld [vmem:[#allocation55_spill] sm:$0xff]  ;;  %v19912_v43 = vld [vmem:[#allocation41_spill] sm:$0xff] }
0x201f   : > { %v11735_v1 = vadd.f32 %v18944_v57, %v11679_v35  ;;  %v11734_v46 = vadd.f32 %v18940_v9, %v11678_v62  ;;  %v11738_v10 = vadd.f32 %v18940_v9, %v11682_v14  ;;  %v11743_v25 = vadd.f32 %v18944_v57, %v11687_v30  ;;  %v19910_v30 = vld [vmem:[#allocation57_spill] sm:$0xff] }
0x2020   : > { %v11601_v61 = vrot.slane %v18942_v54, %v14713_v12  ;;  %v11739_v33 = vadd.f32 %v18944_v57, %v11683_v7  ;;  %v11741_v49 = vadd.f32 %v18974_v31, %v11685_v15  ;;  %v11628_v21 = vmul.f32 %v11589_v2, %v18750_v47  ;;  %v19913_v15 = vld [vmem:[#allocation54_spill] sm:$0xff] }
0x2021   : > { %11813 = vperm.xlu1 %13578, %v11735_v1   ;;  %11810 = vperm.xlu0 %13579, %v11734_v46   ;;  %v11633_v60 = vmul.f32 %v11593_v3, %v18812_v50  ;;  %v11736_v42 = vadd.f32 %v18958_v29, %v11680_v22  ;;  %v11746_v53 = vadd.f32 %v18940_v9, %v11690_v37 }
0x2022   : > { %v11684_v24 = vmul.f32 %v18936_v52, %v11628_v21  ;;  %v11630_v12 = vmul.f32 %v11593_v3, %v18762_v36  ;;  %v11638_v20 = vmul.f32 %v11601_v61, %v18696_v63  ;;  %v11625_v47 = vmul.f32 %v11585_v51, %v18783_v45 }
0x2023   : > { %v11689_v40 = vmul.f32 %v18938_v27, %v11633_v60  ;;  %v11637_v50 = vmul.f32 %v11597_v6, %v18710_v48  ;;  %v11632_v36 = vmul.f32 %v11593_v3, %v18793_v58  ;;  %v11642_v51 = vmul.f32 %v11605_v26, %v18721_v39 }
0x2024   : > { %v11740_v34 = vadd.f32 %v18958_v29, %v11684_v24  ;;  %v11686_v19 = vmul.f32 %v18932_v38, %v11630_v12  ;;  %v11694_v28 = vmul.f32 %v18932_v38, %v11638_v20  ;;  %v11681_v63 = vmul.f32 %v18938_v27, %v11625_v47  ;;  %v19916_v12 = vld [vmem:[#allocation44_spill] sm:$0xff] }
0x2025   : > { %11822 = vperm.xlu1 %13578, %v11738_v10   ;;  %11837 = vperm.xlu0 %13579, %v11743_v25   ;;  %v11745_v2 = vadd.f32 %v18974_v31, %v11689_v40  ;;  %v11693_v13 = vmul.f32 %v18938_v27, %v11637_v50  ;;  %v11688_v23 = vmul.f32 %v18936_v52, %v11632_v36  ;;  %v19915_v40 = vld [vmem:[#allocation63_spill] sm:$0xff]  ;;  %v19917_v50 = vld [vmem:[#allocation56_spill] sm:$0xff] }
0x2026   : > { %v11742_v45 = vadd.f32 %v18940_v9, %v11686_v19  ;;  %v11750_v48 = vadd.f32 %v18940_v9, %v11694_v28  ;;  %v11737_v11 = vadd.f32 %v18974_v31, %v11681_v63  ;;  %v11609_v35 = vrot.slane %v18942_v54, %v19602_v59  ;;  %v19918_v63 = vld [vmem:[#allocation61_spill] sm:$0xff] }
0x2027   : > { %v11749_v62 = vadd.f32 %v18974_v31, %v11693_v13  ;;  %v11698_v58 = vmul.f32 %v18932_v38, %v11642_v51  ;;  %v11635_v3 = vmul.f32 %v11597_v6, %v18807_v44  ;;  %v11641_v4 = vmul.f32 %v11601_v61, %v18735_v0 }
0x2028   : > { %v11744_v39 = vadd.f32 %v18958_v29, %v11688_v23  ;;  %v11636_v5 = vmul.f32 %v11597_v6, %v18818_v56  ;;  %v11646_v14 = vmul.f32 %v11609_v35, %v18747_v55  ;;  %v11639_v44 = vmul.f32 %v11601_v61, %v19910_v30  ;;  %v11766_v30 = vld [vmem:[%s19923_s28] sm:$0xff] }
0x2029   : > { %11825 = vperm.xlu1 %13578, %v11739_v33   ;;  %11831 = vperm.xlu0 %13579, %v11741_v49   ;;  %v11754_v1 = vadd.f32 %v18940_v9, %v11698_v58  ;;  %v11691_v46 = vmul.f32 %v18934_v41, %v11635_v3  ;;  %v11697_v59 = vmul.f32 %v18938_v27, %v11641_v4  ;;  %v19914_v49 = vld [vmem:[#allocation64_spill] sm:$0xff] }
0x202a   : > { %v11645_v0 = vmul.f32 %v11605_v26, %v19911_v32  ;;  %v11613_v10 = vrot.slane %v18942_v54, %v19912_v43  ;;  %v11692_v6 = vmul.f32 %v18936_v52, %v11636_v5  ;;  %v11702_v7 = vmul.f32 %v18932_v38, %v11646_v14 }
0x202b   : > { %v11747_v25 = vadd.f32 %v18944_v57, %v11691_v46  ;;  %v11753_v56 = vadd.f32 %v18974_v31, %v11697_v59  ;;  %v11695_v55 = vmul.f32 %v18934_v41, %v11639_v44  ;;  %v11640_v22 = vmul.f32 %v11601_v61, %v19913_v15  ;;  %v19922_v46 = vld [vmem:[#allocation58_spill] sm:$0xff] }
0x202c   : > { %v11748_v37 = vadd.f32 %v18958_v29, %v11692_v6  ;;  %v11758_v33 = vadd.f32 %v18940_v9, %v11702_v7  ;;  %v11701_v54 = vmul.f32 %v18938_v27, %v11645_v0  ;;  %v11650_v21 = vmul.f32 %v11613_v10, %v19914_v49  ;;  %v11767_v44 = vld [vmem:[%s19923_s28 + $0x8] sm:$0xff] }
0x202d   : > { %11816 = vperm.xlu1 %13578, %v11736_v42   ;;  %11846 = vperm.xlu0 %13579, %v11746_v53   ;;  %v11751_v60 = vadd.f32 %v18944_v57, %v11695_v55  ;;  %v11696_v42 = vmul.f32 %v18936_v52, %v11640_v22  ;;  %v11643_v61 = vmul.f32 %v11605_v26, %v19915_v40 }
0x202e   : > { %v11757_v53 = vadd.f32 %v18974_v31, %v11701_v54  ;;  %v11706_v24 = vmul.f32 %v18932_v38, %v11650_v21  ;;  %v11649_v20 = vmul.f32 %v11609_v35, %v19916_v12  ;;  %v11653_v36 = vmul.f32 %v11613_v10, %v19918_v63  ;;  %v19919_v38 = vld [vmem:[#allocation51_spill] sm:$0xff] }
0x202f   : > { %v11752_v47 = vadd.f32 %v18958_v29, %v11696_v42  ;;  %v11699_v19 = vmul.f32 %v18934_v41, %v11643_v61  ;;  %v11652_v59 = vmul.f32 %v11613_v10, %v19922_v46  ;;  %v13386_v32 = vpack.c.bf16 %v11767_v44, %v11766_v30 }
0x2030   : > { %v11705_v28 = vmul.f32 %v18938_v27, %v11649_v20 }
0x2031   : > { %11828 = vperm.xlu1 %13578, %v11740_v34   ;;  %11843 = vperm.xlu0 %13579, %v11745_v2   ;;  %v11644_v34 = vmul.f32 %v11605_v26, %v19917_v50  ;;  %v11762_v2 = vadd.f32 %v18940_v9, %v11706_v24  ;;  %v11709_v26 = vmul.f32 %v18938_v27, %v11653_v36 }
0x2032   : > { %v11761_v13 = vadd.f32 %v18974_v31, %v11705_v28  ;;  %13387 = vmatpush3.bf16.msra.mxu0 %v13386_v32 }
0x2033   : > { %v11700_v51 = vmul.f32 %v18936_v52, %v11644_v34 }
0x2035   : > { %11834 = vperm.xlu1 %13578, %v11742_v45   ;;  %11858 = vperm.xlu0 %13579, %v11750_v48   ;;  %v11647_v45 = vmul.f32 %v11609_v35, %v19919_v38  ;;  %v11755_v48 = vadd.f32 %v18944_v57, %v11699_v19  ;;  %v11756_v9 = vadd.f32 %v18958_v29, %v11700_v51 }
0x2037   : > { %v11703_v23 = vmul.f32 %v18934_v41, %v11647_v45 }
0x2039   : > { %11819 = vperm.xlu1 %13578, %v11737_v11   ;;  %11855 = vperm.xlu0 %13579, %v11749_v62   ;;  %v11765_v11 = vadd.f32 %v18974_v31, %v11709_v26  ;;  %v19920_v62 = vld [vmem:[#allocation43_spill] sm:$0xff]  ;;  %v11759_v3 = vadd.f32 %v18944_v57, %v11703_v23 }
0x203a   : > { %v11648_v58 = vmul.f32 %v11609_v35, %v19920_v62  ;;  %v11708_v35 = vmul.f32 %v18936_v52, %v11652_v59 }
0x203c   : > { %v11704_v4 = vmul.f32 %v18936_v52, %v11648_v58  ;;  %v11764_v14 = vadd.f32 %v18958_v29, %v11708_v35  ;;  %v11768_v52 = vld [vmem:[%s19923_s28 + $0x10] sm:$0xff] }
0x203d   : > { %11840 = vperm.xlu1 %13578, %v11744_v39   ;;  %11870 = vperm.xlu0 %13579, %v11754_v1   ;;  %v19921_v39 = vld [vmem:[#allocation59_spill] sm:$0xff] }
0x203e   : > { %v11651_v5 = vmul.f32 %v11613_v10, %v19921_v39  ;;  %v11760_v27 = vadd.f32 %v18958_v29, %v11704_v4 }
0x2040   : > { %v11707_v1 = vmul.f32 %v18934_v41, %v11651_v5  ;;  %v19924_v41 = vmov 0.0|0.0  }
0x2041   : > { %11849 = vperm.xlu1 %13578, %v11747_v25   ;;  %11867 = vperm.xlu0 %13579, %v11753_v56  }
0x2042   : > { %v11763_v31 = vadd.f32 %v18944_v57, %v11707_v1  ;;  %13388 = vmatprep.subr.bf16.mxu0 %v19924_v41  ;;  %v11769_v57 = vld [vmem:[%s19923_s28 + $0x18] sm:$0xff] }
0x2043   : > { %v13389_v29 = vpack.c.bf16 %v11769_v57, %v11768_v52 }
0x2045   : > { %11852 = vperm.xlu1 %13578, %v11748_v37   ;;  %11882 = vperm.xlu0 %13579, %v11758_v33  }
0x2046   : > { %13390 = vmatpush3.bf16.msra.mxu0 %v13389_v29 }
0x2049   : > { %11861 = vperm.xlu1 %13578, %v11751_v60   ;;  %11879 = vperm.xlu0 %13579, %v11757_v53  }
0x204d   : > { %11864 = vperm.xlu1 %13578, %v11752_v47   ;;  %11894 = vperm.xlu0 %13579, %v11762_v2  }
0x2051   : > { %11873 = vperm.xlu1 %13578, %v11755_v48   ;;  %11891 = vperm.xlu0 %13579, %v11761_v13  }
0x2055   : > { %11876 = vperm.xlu1 %13578, %v11756_v9   ;;  %11903 = vperm.xlu0 %13579, %v11765_v11  }
0x2059   : > { %11885 = vperm.xlu1 %13578, %v11759_v3  }
0x205d   : > { %11888 = vperm.xlu1 %13578, %v11760_v27  }
0x2061   : > { %11897 = vperm.xlu1 %13578, %v11763_v31  }
0x2065   : > { %11900 = vperm.xlu1 %13578, %v11764_v14  }
0x20a0   : > { %v11814_v0 = vpop.permute.xlu1 %11813  ;;  %v11811_v43 = vpop.permute.xlu0 %11810 }
0x20a1   : > { %v11912_v34 = vrot.slane %v11814_v0, %v14720_v16  ;;  %v11908_v2 = vrot.slane %v11811_v43, %v14711_v8 }
0x20a3   : > { %v11913_v48 = vsel %vm2176_vm1, %v11912_v34, %v11908_v2 }
0x20a4   : > { %v11823_v10 = vpop.permute.xlu1 %11822  ;;  %v11838_v25 = vpop.permute.xlu0 %11837 }
0x20a5   : > { %v11927_v36 = vrot.slane %v11823_v10, %v14711_v8  ;;  %v11950_v13 = vrot.slane %v11838_v25, %v14720_v16 }
0x20a8   : > { %v11826_v56 = vpop.permute.xlu1 %11825  ;;  %v11832_v6 = vpop.permute.xlu0 %11831 }
0x20a9   : > { %v11931_v19 = vrot.slane %v11826_v56, %v14720_v16  ;;  %v11941_v51 = vrot.slane %v11832_v6, %v14724_v18 }
0x20ab   : > { %v11932_v9 = vsel %vm2176_vm1, %v11931_v19, %v11927_v36 }
0x20ac   : > { %v11817_v7 = vpop.permute.xlu1 %11816  ;;  %v11847_v55 = vpop.permute.xlu0 %11846 }
0x20ad   : > { %v11917_v28 = vrot.slane %v11817_v7, %v14722_v17  ;;  %v11965_v11 = vrot.slane %v11847_v55, %v14711_v8 }
0x20af   : > { %v11918_v58 = vsel %vm2183_vm2, %v11917_v28, %v11913_v48 }
0x20b0   : > { %v11829_v15 = vpop.permute.xlu1 %11828  ;;  %v11844_v22 = vpop.permute.xlu0 %11843 }
0x20b1   : > { %v11936_v38 = vrot.slane %v11829_v15, %v14722_v17  ;;  %v11960_v3 = vrot.slane %v11844_v22, %v14724_v18 }
0x20b3   : > { %v11937_v5 = vsel %vm2183_vm2, %v11936_v38, %v11932_v9 }
0x20b4   : > { %v11835_v37 = vpop.permute.xlu1 %11834  ;;  %v11859_v33 = vpop.permute.xlu0 %11858  ;;  %v11942_v29 = vsel %vm2190_vm3, %v11941_v51, %v11937_v5 }
0x20b5   : > { %v11946_v26 = vrot.slane %v11835_v37, %v14711_v8  ;;  %v11984_v35 = vrot.slane %v11859_v33, %v14711_v8 }
0x20b7   : > { %v11951_v31 = vsel %vm2176_vm1, %v11950_v13, %v11946_v26 }
0x20b8   : > { %v11820_v54 = vpop.permute.xlu1 %11819  ;;  %v11856_v49 = vpop.permute.xlu0 %11855 }
0x20b9   : > { %v11922_v27 = vrot.slane %v11820_v54, %v14724_v18  ;;  %v11979_v56 = vrot.slane %v11856_v49, %v14724_v18 }
0x20bb   : > { %v11923_v25 = vsel %vm2190_vm3, %v11922_v27, %v11918_v58 }
0x20bc   : > { %v11841_v21 = vpop.permute.xlu1 %11840  ;;  %v11871_v60 = vpop.permute.xlu0 %11870 }
0x20bd   : > { %v11955_v23 = vrot.slane %v11841_v21, %v14722_v17  ;;  %v12003_v41 = vrot.slane %v11871_v60, %v14711_v8 }
0x20bf   : > { %v11956_v32 = vsel %vm2183_vm2, %v11955_v23, %v11951_v31 }
0x20c0   : > { %v11850_v42 = vpop.permute.xlu1 %11849  ;;  %v11868_v24 = vpop.permute.xlu0 %11867  ;;  %v11961_v15 = vsel %vm2190_vm3, %v11960_v3, %v11956_v32 }
0x20c1   : > { %v11969_v62 = vrot.slane %v11850_v42, %v14720_v16  ;;  %v11998_v22 = vrot.slane %v11868_v24, %v14724_v18  ;;  %v12057_v42 = vsel %vm2325_vm4, %v11942_v29, %v11923_v25 }
0x20c2   : > { %v12058_v24 = vsel %vm2327_vm5, %v11961_v15, %v12057_v42 }
0x20c3   : > { %v11970_v52 = vsel %vm2176_vm1, %v11969_v62, %v11965_v11 }
0x20c4   : > { %v11853_v53 = vpop.permute.xlu1 %11852  ;;  %v11883_v61 = vpop.permute.xlu0 %11882 }
0x20c5   : > { %v11974_v4 = vrot.slane %v11853_v53, %v14722_v17  ;;  %v12022_v43 = vrot.slane %v11883_v61, %v14711_v8 }
0x20c7   : > { %v11975_v0 = vsel %vm2183_vm2, %v11974_v4, %v11970_v52 }
0x20c8   : > { %v11862_v40 = vpop.permute.xlu1 %11861  ;;  %v11880_v47 = vpop.permute.xlu0 %11879  ;;  %v11980_v54 = vsel %vm2190_vm3, %v11979_v56, %v11975_v0 }
0x20c9   : > { %v11988_v39 = vrot.slane %v11862_v40, %v14720_v16  ;;  %v12017_v21 = vrot.slane %v11880_v47, %v14724_v18  ;;  %v12059_v47 = vsel %vm2329_vm6, %v11980_v54, %v12058_v24 }
0x20cb   : > { %v11989_v10 = vsel %vm2176_vm1, %v11988_v39, %v11984_v35 }
0x20cc   : > { %v11865_v12 = vpop.permute.xlu1 %11864  ;;  %v11895_v63 = vpop.permute.xlu0 %11894 }
0x20cd   : > { %v11993_v1 = vrot.slane %v11865_v12, %v14722_v17  ;;  %v12041_v12 = vrot.slane %v11895_v63, %v14711_v8 }
0x20cf   : > { %v11994_v6 = vsel %vm2183_vm2, %v11993_v1, %v11989_v10 }
0x20d0   : > { %v11874_v20 = vpop.permute.xlu1 %11873  ;;  %v11892_v14 = vpop.permute.xlu0 %11891  ;;  %v11999_v53 = vsel %vm2190_vm3, %v11998_v22, %v11994_v6 }
0x20d1   : > { %v12007_v46 = vrot.slane %v11874_v20, %v14720_v16  ;;  %v12036_v40 = vrot.slane %v11892_v14, %v14724_v18  ;;  %v12060_v2 = vsel %vm2331_vm7, %v11999_v53, %v12059_v47 }
0x20d3   : > { %v12008_v7 = vsel %vm2176_vm1, %v12007_v46, %v12003_v41 }
0x20d4   : > { %v11877_v50 = vpop.permute.xlu1 %11876  ;;  %v11904_v61 = vpop.permute.xlu0 %11903 }
0x20d5   : > { %v12012_v30 = vrot.slane %v11877_v50, %v14722_v17  ;;  %v12055_v19 = vrot.slane %v11904_v61, %v14724_v18 }
0x20d7   : > { %v12013_v37 = vsel %vm2183_vm2, %v12012_v30, %v12008_v7 }
0x20d8   : > { %v11886_v45 = vpop.permute.xlu1 %11885  ;;  %v12018_v20 = vsel %vm2190_vm3, %v12017_v21, %v12013_v37 }
0x20d9   : > { %v12026_v44 = vrot.slane %v11886_v45, %v14720_v16  ;;  %v12061_v36 = vsel %vm2333_vm8, %v12018_v20, %v12060_v2 }
0x20db   : > { %v12027_v33 = vsel %vm2176_vm1, %v12026_v44, %v12022_v43 }
0x20dc   : > { %v11889_v59 = vpop.permute.xlu1 %11888 }
0x20dd   : > { %v12031_v57 = vrot.slane %v11889_v59, %v14722_v17 }
0x20df   : > { %v12032_v60 = vsel %vm2183_vm2, %v12031_v57, %v12027_v33 }
0x20e0   : > { %v11898_v55 = vpop.permute.xlu1 %11897  ;;  %v12037_v34 = vsel %vm2190_vm3, %v12036_v40, %v12032_v60 }
0x20e1   : > { %v12045_v49 = vrot.slane %v11898_v55, %v14720_v16  ;;  %v12062_v38 = vsel %vm2335_vm9, %v12037_v34, %v12061_v36 }
0x20e3   : > { %v12046_v28 = vsel %vm2176_vm1, %v12045_v49, %v12041_v12 }
0x20e4   : > { %v11901_v50 = vpop.permute.xlu1 %11900 }
0x20e5   : > { %v12050_v16 = vrot.slane %v11901_v50, %v14722_v17  ;;  %v12541_v17 = vld [vmem:[%s19925_s7] ss:$0 sm:$0xff]  ;;  %s14026_s7 = sshll.u32 %s14142_s1, 4  ;;  %s14027_s7 = int_to_ptr.vmem [resolvable:$false] %s14026_s7 }
0x20e6   : > { %s14028_s22 = scalar_lea.vmem %s14027_s7, 256  ;;  %p14029_p10 = scmp.lt.s32.totalorder %s19149_s3, %s14027_s7 }
0x20e7   : > { %v12051_v8 = vsel %vm2183_vm2, %v12050_v16, %v12046_v28  ;;  %p14030_p12 = scmp.lt.s32.totalorder %s14028_s22, %s14022_s26 }
0x20e8   : > { %v12056_v63 = vsel %vm2190_vm3, %v12055_v19, %v12051_v8 }
0x20e9   : > { %v12063_v45 = vsel %vm2337_vm10, %v12056_v63, %v12062_v38  ;;  %p14031_p11 = por %p14030_p12, %p14029_p10 }
0x20ea   : > { %13203 = vmatmul.mubr.msk.f32.vlgmr.msra.gmra.mrb[52].mxu0 %vm2339_vm11, %v12063_v45 }
0x20eb   : > { %p14032_p13 = pnand %p14031_p11, %p14025_p9 }
0x21bd   : > { %v12132_v18 = vpop.f32.mrb[52].mxu0 }
0x21be   : > { %v12133_v48 = vadd.f32 %v12541_v17, %v12132_v18  ;;  %v13204_v13 = vpop.f32.mrb[53].mxu0 }
0x21c0   : > { %v12543_v51 = vmul.f32 -1.442695, %v12133_v48 }
0x21c2   : > { %13624 = vpow2.f32 %v12543_v51 }
0x21cc   : > { %v13625_v26 = vpop.eup %13624 }
0x21cd   : > { %v12139_v9 = vadd.f32 1.0, %v13625_v26 }
0x21cf   : > { %13626 = vrcp.f32 %v12139_v9 }
0x21d9   : > { %v13627_v11 = vpop.eup %13626 }
0x21da   : > { %12142 = vst [vmem:[%s890_s4] sm:$0xff] %v13627_v11 }
0x21db   : > { %14035 = shalt.err (!%p14032_p13)
}
0x21dc   : > { %s14036_s25 = scalar_lea.hbm %s19147_s11, 128  ;;  %s14040_s4 = scalar_lea.hbm %s19926_s10, 256 }
0x21dd   : > { %p14037_p5 = scmp.ne.s32.totalorder %s19147_s11, %s14036_s25  ;;  %p14041_p1 = scmp.lt.u32.totalorder %s19147_s11, %s19926_s10 }
0x21de   : > { %p14042_p3 = scmp.lt.u32.totalorder %s14040_s4, %s14036_s25  ;;  %p14044_p6 = scmp.lt.u32.totalorder %s14036_s25, %s19147_s11 }
0x21df   : > { %p14038_p7 = pnand %p14037_p5, %p19927_p0 }
0x21e0   : > { %p14043_p8 = por %p14042_p3, %p14041_p1 }
0x21e1   : > { %p14039_p4 = pneg %p14038_p7 }
0x21e2   : > { %p14045_p2 = por %p14044_p6, %p14043_p8 }
0x21e4   : > { %p14046_p9 = pnand %p14045_p2, %p14039_p4 }
0x21e6   : > { %14049 = shalt.err (!%p14046_p9)
}
0x21e7   : > { %13445 = dma.vmem_to_hbm [thread:$0]  (%p19927_p0), %s19149_s3, 128, %s19147_s11, %s12144_s5  }
0x21e8 PF: > { %s19928_s26 = sld [smem:[#allocation36_spill]]  ;;  %p19929_p10 = scmp.ne.s32.totalorder %s19490_s18, 0 }
0x21e9   : > { %p19930_p12 = scmp.ge.s32.totalorder %s14116_s23, 2 }
0x21eb   : > { %p13492_p11 = pnand %p19930_p12, %p19929_p10 }
0x21ee   : > { %s12169_s7 = sand.u32 1, %s19928_s26  }
0x21ef   : > { %s12170_s22 = scalar_lea.sflag [#allocation5], %s12169_s7 }
0x21f0   : > { %14099 = dma.done.wait (!%p13492_p11), %s12170_s22, 128  }
0x21f1   : > { %14101 = vsyncadd (!%p13492_p11), %s12170_s22, 4294967168  ;;  %s19931_s30 = sld [smem:[#allocation37_spill]]  ;;  %p44_p13 = scmp.ge.s32.totalorder %s14592_s29, 4  }
0x21f2   : > { %s19932_s4 = smov %s14112_s0  ;;  %s19933_s0 = smov %s14604_s6 }
0x21f3   : > { %s19934_s23 = smov %s14592_s29  ;;  %46 = sbr.rel (!%p44_p13) target bundleno = 29 (0x1d), region = 221 }
0x21fa   :  { %12175 = vsyncpa [#allocation4], 1 }
0x21fb   :  { %12177 = vsyncpa [#allocation4 + $0x1], 1 }
0x21fc   :  { %12178 = vsyncpa [#allocation7], 1 }
0x21fd   :  { %12179 = vsyncpa [#allocation10], 1 }
0x21fe   :  { %12180 = vsyncpa [#allocation13], 1 }
0x21ff   :  { %12181 = vsyncpa [#allocation16], 1 }
0x2200   :  { %12182 = vsyncpa [#allocation19], 1 }
0x2201   :  { %12183 = vsyncpa [#allocation22], 1 }
0x2202   :  { %12184 = vsyncpa [#allocation25], 1 }
0x2203   :  { %12185 = vsyncpa [#allocation5], 1 }
0x2204   :  { %12187 = vsyncpa [#allocation5 + $0x1], 1 }

</bundles_post_ra>
